<compile_context>
chip_gen: v5e
topology: v5e:2x2
jax: 0.10.0
libtpu: 0.0.40
codegen_flags: <defaults>
</compile_context>

<pallas_src>
import functools
import math

import numpy as np

import jax
import jax.numpy as jnp
from jax.experimental import pallas as pl
from jax.experimental.pallas import tpu as pltpu


def _cdiv(a, b):
    return -(-a // b)


def _round_up(a, b):
    return _cdiv(a, b) * b


# -----------------------------------------------------------------------------
# Pallas kernels
# -----------------------------------------------------------------------------
def linear_kernel(x_ref, w_ref, b_ref, o_ref):
    """o = x @ W + b   (x: (tm, IN), W: (IN, OUT) bf16, b: (1, OUT) f32)."""
    x = x_ref[...].astype(jnp.bfloat16)
    o = jnp.dot(x, w_ref[...], preferred_element_type=jnp.float32) + b_ref[...]
    o_ref[...] = o


def prelu_linear_kernel(x_ref, a_ref, w_ref, b_ref, o_ref):
    """PReLU(x) @ W + b; PReLU slope is a scalar in SMEM."""
    x = x_ref[...].astype(jnp.float32)
    a = a_ref[0]
    x = jnp.where(x >= 0.0, x, a * x).astype(jnp.bfloat16)
    o = jnp.dot(x, w_ref[...], preferred_element_type=jnp.float32) + b_ref[...]
    o_ref[...] = o


def xfmr_block_kernel(x_ref, pe_ref,
                      wqkv_ref, bqkv_ref, wo_ref, bo_ref,
                      ln1g_ref, ln1b_ref,
                      w1_ref, b1_ref, w2_ref, b2_ref,
                      ln2g_ref, ln2b_ref,
                      o_ref, act_ref, *, nhead):
    """All num_layers post-norm encoder layers, fused.

    grid = (row_tiles, num_layers).  The layer axis is 'arbitrary' and
    innermost; the activation lives in the `act_ref` VMEM scratch across it.
    Block of activations: (Rb, A1, D) -- Rb sequences of length A1.

    All weights are resident full stacks (num_layers leading dim, constant
    index_map) in (IN, OUT) bf16 layout; the attention scale is pre-folded
    into the Q part of the fused QKV weights.
    """
    layer = pl.program_id(1)

    @pl.when(layer == 0)
    def _():
        # add absolute sinusoidal positional encoding once per row tile
        act_ref[...] = x_ref[...].astype(jnp.float32) + pe_ref[...][None]

    Rb, A1, D = act_ref.shape
    dh = D // nhead
    M = Rb * A1

    x2 = act_ref[...].reshape(M, D)            # f32 residual stream
    xb = x2.astype(jnp.bfloat16)

    # fused QKV projection: one MXU matmul with N = 3*D
    qkv = (jnp.dot(xb, wqkv_ref[layer], preferred_element_type=jnp.float32)
           + bqkv_ref[layer])                  # (M, 3D), Q already pre-scaled
    qkv = qkv.astype(jnp.bfloat16)             # single cast for all heads

    wo_l = wo_ref[layer]                       # (nhead, dh, D) bf16

    # Per-head attention; each head's context is projected through its own
    # (dh, D) slice of W_o and accumulated, so no context scratch / masked
    # lane stores are needed.
    # TODO(synk): fold heads into a single batched einsum ('bqhd,bkhd->bhqk')
    #             once sub-128 lane reshapes are guaranteed to lower cleanly;
    #             for long inter-chunk sequences also switch to a flash-style
    #             tiled online softmax instead of the full A1 x A1 scores.
    attn = None
    for h in range(nhead):
        qh = qkv[:, h * dh:(h + 1) * dh].reshape(Rb, A1, dh)
        kh = qkv[:, D + h * dh:D + (h + 1) * dh].reshape(Rb, A1, dh)
        vh = qkv[:, 2 * D + h * dh:2 * D + (h + 1) * dh].reshape(Rb, A1, dh)
        s = jnp.einsum('bqd,bkd->bqk', qh, kh,
                       preferred_element_type=jnp.float32)
        s = s - jnp.max(s, axis=-1, keepdims=True)
        p = jnp.exp(s)
        # approx reciprocal runs on the EUP slot; use approx=False for strict
        # parity against a PyTorch softmax reference.
        p = p * pl.reciprocal(jnp.sum(p, axis=-1, keepdims=True), approx=True)
        ctx = jnp.einsum('bqk,bkd->bqd', p.astype(jnp.bfloat16), vh,
                         preferred_element_type=jnp.float32)   # (Rb, A1, dh)
        part = jnp.dot(ctx.reshape(M, dh).astype(jnp.bfloat16), wo_l[h],
                       preferred_element_type=jnp.float32)     # (M, D)
        attn = part if attn is None else attn + part
    attn = attn + bo_ref[layer]

    def layer_norm(z, g, b):
        mu = jnp.mean(z, axis=-1, keepdims=True)
        var = jnp.mean((z - mu) ** 2, axis=-1, keepdims=True)
        return (z - mu) * jax.lax.rsqrt(var + 1e-5) * g + b

    y = layer_norm(x2 + attn, ln1g_ref[layer], ln1b_ref[layer])
    ff = jnp.maximum(
        jnp.dot(y.astype(jnp.bfloat16), w1_ref[layer],
                preferred_element_type=jnp.float32) + b1_ref[layer], 0.0)
    ff = (jnp.dot(ff.astype(jnp.bfloat16), w2_ref[layer],
                  preferred_element_type=jnp.float32) + b2_ref[layer])
    y = layer_norm(y + ff, ln2g_ref[layer], ln2b_ref[layer])

    y3 = y.reshape(Rb, A1, D)
    act_ref[...] = y3

    @pl.when(layer == pl.num_programs(1) - 1)
    def _():
        o_ref[...] = y3.astype(o_ref.dtype)    # bf16 inter-block carry


# -----------------------------------------------------------------------------
# Pallas call wrappers
# -----------------------------------------------------------------------------
def linear(x2d, w_t, b, tm_max=512):
    """x2d: (M, IN), w_t: (IN, OUT) bf16, b: (1, OUT) f32 -> (M, OUT) f32."""
    M, IN = x2d.shape
    OUT = w_t.shape[1]
    tm = min(tm_max, _round_up(M, 8))
    Mp = _round_up(M, tm)
    if Mp != M:
        x2d = jnp.pad(x2d, ((0, Mp - M), (0, 0)))
    out = pl.pallas_call(
        linear_kernel,
        out_shape=jax.ShapeDtypeStruct((Mp, OUT), jnp.float32),
        grid=(Mp // tm,),
        in_specs=[pl.BlockSpec((tm, IN), lambda i: (i, 0)),
                  pl.BlockSpec((IN, OUT), lambda i: (0, 0)),
                  pl.BlockSpec((1, OUT), lambda i: (0, 0))],
        out_specs=pl.BlockSpec((tm, OUT), lambda i: (i, 0)),
        compiler_params=pltpu.CompilerParams(dimension_semantics=("parallel",)),
    )(x2d, w_t, b)
    return out[:M]


def prelu_linear(x2d, alpha, w_t, b, tm_max=512):
    M, IN = x2d.shape
    OUT = w_t.shape[1]
    tm = min(tm_max, _round_up(M, 8))
    Mp = _round_up(M, tm)
    if Mp != M:
        x2d = jnp.pad(x2d, ((0, Mp - M), (0, 0)))
    out = pl.pallas_call(
        prelu_linear_kernel,
        out_shape=jax.ShapeDtypeStruct((Mp, OUT), jnp.float32),
        grid=(Mp // tm,),
        in_specs=[pl.BlockSpec((tm, IN), lambda i: (i, 0)),
                  pl.BlockSpec(memory_space=pltpu.MemorySpace.SMEM),
                  pl.BlockSpec((IN, OUT), lambda i: (0, 0)),
                  pl.BlockSpec((1, OUT), lambda i: (0, 0))],
        out_specs=pl.BlockSpec((tm, OUT), lambda i: (i, 0)),
        compiler_params=pltpu.CompilerParams(dimension_semantics=("parallel",)),
    )(x2d, alpha, w_t, b)
    return out[:M]


@functools.lru_cache(maxsize=None)
def sinusoid_pos_enc(T, D):
    """Cached absolute sinusoidal PE table; built once per (T, D) pair."""
    pos = np.arange(T, dtype=np.float32)[:, None]
    i = np.arange(0, D, 2, dtype=np.float32)[None, :]
    div = np.exp(-math.log(10000.0) * i / D)
    pe = np.zeros((T, D), np.float32)
    pe[:, 0::2] = np.sin(pos * div)
    pe[:, 1::2] = np.cos(pos * div)
    return jnp.asarray(pe)


_XFMR_WNAMES = ('wqkv', 'bqkv', 'wo', 'bo', 'ln1_g', 'ln1_b',
                'w1', 'b1', 'w2', 'b2', 'ln2_g', 'ln2_b')


def transformer_block(x, tp, nhead):
    """Matches Transformer.forward: (B, A1, A2, D) -> (B, A2, A1, D) bf16,
    self-attention along axis A1, all encoder layers fused in one pallas_call
    with VMEM-resident weight stacks."""
    B, A1, A2, D = x.shape
    R = B * A2
    # TODO(synk): fold this permutation into the in/out BlockSpecs (in-VMEM
    #             leading-dim swap) to remove one HBM pass per block.
    xr = jnp.transpose(x, (0, 2, 1, 3)).reshape(R, A1, D)

    # ~512 tokens per grid step, but keep >= 2 'parallel' row tiles so both
    # v7x TensorCores get work.
    Rb = max(1, min(R, _cdiv(512, A1)))
    Rb = min(Rb, max(1, R // 2))
    Rp = _round_up(R, Rb)
    if Rp != R:
        xr = jnp.pad(xr, ((0, Rp - R), (0, 0), (0, 0)))

    pe = sinusoid_pos_enc(A1, D)
    nl = tp['wqkv'].shape[0]
    weights = [tp[n] for n in _XFMR_WNAMES]

    def resident_spec(arr):
        nd = arr.ndim
        # full-stack block, constant index map -> DMA'd once per pallas_call
        return pl.BlockSpec(arr.shape, lambda i, l, _nd=nd: (0,) * _nd)

    in_specs = [pl.BlockSpec((Rb, A1, D), lambda i, l: (i, 0, 0)),
                pl.BlockSpec((A1, D), lambda i, l: (0, 0))]
    in_specs += [resident_spec(w) for w in weights]

    out = pl.pallas_call(
        functools.partial(xfmr_block_kernel, nhead=nhead),
        out_shape=jax.ShapeDtypeStruct((Rp, A1, D), jnp.bfloat16),
        grid=(Rp // Rb, nl),
        in_specs=in_specs,
        out_specs=pl.BlockSpec((Rb, A1, D), lambda i, l: (i, 0, 0)),
        scratch_shapes=[pltpu.VMEM((Rb, A1, D), jnp.float32)],  # residual stream
        compiler_params=pltpu.CompilerParams(
            dimension_semantics=("parallel", "arbitrary"),
            vmem_limit_bytes=64 * 1024 * 1024),
    )(xr, pe, *weights)
    return out[:R].reshape(B, A2, A1, D)


# -----------------------------------------------------------------------------
# Model glue (unfold / fold / reshapes) in plain JAX
# -----------------------------------------------------------------------------
def sepformer_forward(inp, params, *, chunk_size, num_spks, nhead):
    """inp: (B, C, T) -> masks (B, num_spks*C, T)."""
    B, C, T = inp.shape
    K = chunk_size
    stride = K // 2
    assert K == 2 * stride, "chunk_size must be even"
    L = (T - K) // stride + 1

    # unfold: one gather -> (B, C, L, K), then channels-last (B, L, K, C)
    idx = jnp.arange(L)[:, None] * stride + jnp.arange(K)[None, :]
    chunks = inp[:, :, idx]                               # (B, C, L, K)
    chunks = jnp.transpose(chunks, (0, 2, 3, 1))          # (B, L, K, C)

    # separator
    D = params['in_lin']['w'].shape[1]
    x = linear(chunks.reshape(-1, C),
               params['in_lin']['w'], params['in_lin']['b']).reshape(B, L, K, D)
    for tp in params['transformers']:
        x = transformer_block(x, tp, nhead)               # axes swap each block
    # even number of blocks -> back to (B, L, K, D), carried in bf16
    y = prelu_linear(x.reshape(-1, D), params['prelu_a'],
                     params['out_lin']['w'], params['out_lin']['b'])
    chunks = y.reshape(B, L, K, C)
    chunks = jnp.transpose(chunks, (0, 3, 1, 2))          # (B, C, L, K)

    # fold: overlap-add with hop = K/2 as two shifted half-chunk streams
    # (PyTorch fold sums overlaps without normalization; tail beyond the last
    #  chunk is zero, matching fold to output_size=T)
    first = chunks[..., :stride].reshape(B, C, L * stride)
    second = chunks[..., stride:].reshape(B, C, L * stride)
    out = (jnp.pad(first, ((0, 0), (0, 0), (0, stride))) +
           jnp.pad(second, ((0, 0), (0, 0), (stride, 0))))   # length (L+1)*stride
    if out.shape[-1] < T:
        out = jnp.pad(out, ((0, 0), (0, 0), (0, T - out.shape[-1])))

    # mask = Conv1d(C, num_spks*C, kernel=1) -> channels-last matmul
    xt = jnp.transpose(out, (0, 2, 1)).reshape(B * T, C)
    m = linear(xt, params['mask']['w'], params['mask']['b'])
    masks = jnp.transpose(m.reshape(B, T, num_spks * C), (0, 2, 1))
    return masks


# -----------------------------------------------------------------------------
# Deterministic parameter init (synthetic; matmul weights pre-transposed to
# (IN, OUT) bf16, biases / LN params f32, per-block layer weights stacked,
# QKV fused with the attention scale folded into Q, W_o pre-split per head).
# -----------------------------------------------------------------------------
def init_params(key, num_bins, att_dim, nhead, ffn_dim, num_blocks, num_layers,
                num_spks):
    keys = iter(jax.random.split(key, 1024))
    dh = att_dim // nhead
    scale = 1.0 / math.sqrt(dh)

    def w_t(in_d, out_d):
        return jax.random.normal(next(keys), (in_d, out_d),
                                 jnp.float32) / (in_d ** 0.5)

    def bias(out_d):
        return (jax.random.normal(next(keys), (out_d,), jnp.float32) * 0.02
                ).reshape(1, out_d)

    def block_params():
        wq = jnp.stack([w_t(att_dim, att_dim) * scale for _ in range(num_layers)])
        wk = jnp.stack([w_t(att_dim, att_dim) for _ in range(num_layers)])
        wv = jnp.stack([w_t(att_dim, att_dim) for _ in range(num_layers)])
        bq = jnp.stack([bias(att_dim) * scale for _ in range(num_layers)])
        bk = jnp.stack([bias(att_dim) for _ in range(num_layers)])
        bv = jnp.stack([bias(att_dim) for _ in range(num_layers)])
        wo = jnp.stack([w_t(att_dim, att_dim) for _ in range(num_layers)])
        p = {
            'wqkv': jnp.concatenate([wq, wk, wv], axis=-1).astype(jnp.bfloat16),
            'bqkv': jnp.concatenate([bq, bk, bv], axis=-1),
            'wo': wo.reshape(num_layers, nhead, dh, att_dim).astype(jnp.bfloat16),
            'bo': jnp.stack([bias(att_dim) for _ in range(num_layers)]),
            'w1': jnp.stack([w_t(att_dim, ffn_dim)
                             for _ in range(num_layers)]).astype(jnp.bfloat16),
            'b1': jnp.stack([bias(ffn_dim) for _ in range(num_layers)]),
            'w2': jnp.stack([w_t(ffn_dim, att_dim)
                             for _ in range(num_layers)]).astype(jnp.bfloat16),
            'b2': jnp.stack([bias(att_dim) for _ in range(num_layers)]),
            'ln1_g': jnp.ones((num_layers, 1, att_dim), jnp.float32),
            'ln1_b': jnp.zeros((num_layers, 1, att_dim), jnp.float32),
            'ln2_g': jnp.ones((num_layers, 1, att_dim), jnp.float32),
            'ln2_b': jnp.zeros((num_layers, 1, att_dim), jnp.float32),
        }
        return p

    params = {}
    params['in_lin'] = {'w': w_t(num_bins, att_dim).astype(jnp.bfloat16),
                        'b': bias(att_dim)}
    params['transformers'] = [block_params() for _ in range(num_blocks * 2)]
    params['prelu_a'] = jnp.full((1,), 0.25, jnp.float32)   # PyTorch PReLU default
    params['out_lin'] = {'w': w_t(att_dim, num_bins).astype(jnp.bfloat16),
                         'b': bias(num_bins)}
    params['mask'] = {'w': w_t(num_bins, num_spks * num_bins).astype(jnp.bfloat16),
                      'b': bias(num_spks * num_bins)}
    return params


# -----------------------------------------------------------------------------
if __name__ == "__main__":
    key = jax.random.PRNGKey(0)
    B, num_bins, T = 2, 16, 36            # N x C x T input
    chunk_size = 8                        # stride 4 -> L = 8 chunks, exact tiling
    att_dim, nhead, ffn_dim = 32, 4, 64
    num_blocks, num_layers, num_spks = 1, 2, 2

    pkey, xkey = jax.random.split(key)
    params = init_params(pkey, num_bins, att_dim, nhead, ffn_dim,
                         num_blocks, num_layers, num_spks)
    inp = jax.random.normal(xkey, (B, num_bins, T), jnp.float32)

    fwd = jax.jit(functools.partial(sepformer_forward, chunk_size=chunk_size,
                                    num_spks=num_spks, nhead=nhead))
    masks = jax.block_until_ready(fwd(inp, params))
    assert masks.shape == (B, num_spks * num_bins, T), masks.shape
    assert bool(jnp.all(jnp.isfinite(masks)))
    print("KERNEL_OK")
</pallas_src>

<mosaic_0001>
module attributes {stable_mosaic.version = 11 : i64} {
  func.func @linear_kernel(%arg0: i32, %arg1: memref<128x16xf32, #tpu.memory_space<vmem>>, %arg2: memref<16x32xbf16, #tpu.memory_space<vmem>>, %arg3: memref<1x32xf32, #tpu.memory_space<vmem>>, %arg4: memref<128x32xf32, #tpu.memory_space<vmem>>) attributes {dimension_semantics = [#tpu.dimension_semantics<parallel>], iteration_bounds = array<i64: 1>, scalar_prefetch = 0 : i64, scratch_operands = 0 : i64, tpu.core_type = #tpu.core_type<tc>, window_params = [{transform_indices = @transform_0, window_bounds = array<i64: 128, 16>}, {pipeline_mode = #tpu.pipeline_mode<synchronous>, transform_indices = @transform_1, window_bounds = array<i64: 16, 32>}, {pipeline_mode = #tpu.pipeline_mode<synchronous>, transform_indices = @transform_2, window_bounds = array<i64: 1, 32>}, {transform_indices = @transform_3, window_bounds = array<i64: 128, 32>}]} {
    %c0 = arith.constant 0 : index
    %c0_0 = arith.constant 0 : index
    %0 = vector.load %arg1[%c0, %c0_0] : memref<128x16xf32, #tpu.memory_space<vmem>>, vector<128x16xf32>
    %1 = arith.truncf %0 : vector<128x16xf32> to vector<128x16xbf16>
    %c0_1 = arith.constant 0 : index
    %c0_2 = arith.constant 0 : index
    %2 = vector.load %arg2[%c0_1, %c0_2] : memref<16x32xbf16, #tpu.memory_space<vmem>>, vector<16x32xbf16>
    %cst = arith.constant dense<0.000000e+00> : vector<128x32xf32>
    %3 = tpu.matmul %1, %2, %cst {dimension_numbers = #tpu.dot_dimension_numbers<[1], [0], [0], [1], [0, 0, 1, 1], [], []>} : vector<128x16xbf16>, vector<16x32xbf16>, vector<128x32xf32> -> vector<128x32xf32>
    %c0_3 = arith.constant 0 : index
    %c0_4 = arith.constant 0 : index
    %4 = vector.load %arg3[%c0_3, %c0_4] : memref<1x32xf32, #tpu.memory_space<vmem>>, vector<1x32xf32>
    %5 = vector.broadcast %4 : vector<1x32xf32> to vector<128x32xf32>
    %6 = arith.addf %3, %5 : vector<128x32xf32>
    %c0_5 = arith.constant 0 : index
    %c0_6 = arith.constant 0 : index
    %7 = vector.load %arg4[%c0_5, %c0_6] : memref<128x32xf32, #tpu.memory_space<vmem>>, vector<128x32xf32>
    tpu.vector_store %arg4[%c0_5, %c0_6], %6 {strides = array<i32>} : memref<128x32xf32, #tpu.memory_space<vmem>>, vector<128x32xf32>,
    return
  }
  func.func @transform_0(%arg0: i32) -> (i32, i32) {
    %c0_i32 = arith.constant 0 : i32
    %c0_i32_0 = arith.constant 0 : i32
    return %arg0, %c0_i32 : i32, i32
  }
  func.func @transform_1(%arg0: i32) -> (i32, i32) {
    %c0_i32 = arith.constant 0 : i32
    %c0_i32_0 = arith.constant 0 : i32
    %c0_i32_1 = arith.constant 0 : i32
    return %c0_i32, %c0_i32_0 : i32, i32
  }
  func.func @transform_2(%arg0: i32) -> (i32, i32) {
    %c0_i32 = arith.constant 0 : i32
    %c0_i32_0 = arith.constant 0 : i32
    %c0_i32_1 = arith.constant 0 : i32
    return %c0_i32, %c0_i32_0 : i32, i32
  }
  func.func @transform_3(%arg0: i32) -> (i32, i32) {
    %c0_i32 = arith.constant 0 : i32
    %c0_i32_0 = arith.constant 0 : i32
    return %arg0, %c0_i32 : i32, i32
  }
}

module attributes {stable_mosaic.version = 11 : i64} {
  func.func @xfmr_block_kernel(%arg0: i32, %arg1: i32, %arg2: memref<8x8x32xbf16, #tpu.memory_space<vmem>>, %arg3: memref<8x32xf32, #tpu.memory_space<vmem>>, %arg4: memref<2x32x96xbf16, #tpu.memory_space<vmem>>, %arg5: memref<2x1x96xf32, #tpu.memory_space<vmem>>, %arg6: memref<2x4x8x32xbf16, #tpu.memory_space<vmem>>, %arg7: memref<2x1x32xf32, #tpu.memory_space<vmem>>, %arg8: memref<2x1x32xf32, #tpu.memory_space<vmem>>, %arg9: memref<2x1x32xf32, #tpu.memory_space<vmem>>, %arg10: memref<2x32x64xbf16, #tpu.memory_space<vmem>>, %arg11: memref<2x1x64xf32, #tpu.memory_space<vmem>>, %arg12: memref<2x64x32xbf16, #tpu.memory_space<vmem>>, %arg13: memref<2x1x32xf32, #tpu.memory_space<vmem>>, %arg14: memref<2x1x32xf32, #tpu.memory_space<vmem>>, %arg15: memref<2x1x32xf32, #tpu.memory_space<vmem>>, %arg16: memref<8x8x32xbf16, #tpu.memory_space<vmem>>, %arg17: memref<8x8x32xf32, #tpu.memory_space<vmem>>) attributes {dimension_semantics = [#tpu.dimension_semantics<parallel>, #tpu.dimension_semantics<arbitrary>], iteration_bounds = array<i64: 2, 2>, scalar_prefetch = 0 : i64, scratch_operands = 1 : i64, tpu.core_type = #tpu.core_type<tc>, window_params = [{transform_indices = @transform_0, window_bounds = array<i64: 8, 8, 32>}, {pipeline_mode = #tpu.pipeline_mode<synchronous>, transform_indices = @transform_1, window_bounds = array<i64: 8, 32>}, {pipeline_mode = #tpu.pipeline_mode<synchronous>, transform_indices = @transform_2, window_bounds = array<i64: 2, 32, 96>}, {pipeline_mode = #tpu.pipeline_mode<synchronous>, transform_indices = @transform_3, window_bounds = array<i64: 2, 1, 96>}, {pipeline_mode = #tpu.pipeline_mode<synchronous>, transform_indices = @transform_4, window_bounds = array<i64: 2, 4, 8, 32>}, {pipeline_mode = #tpu.pipeline_mode<synchronous>, transform_indices = @transform_5, window_bounds = array<i64: 2, 1, 32>}, {pipeline_mode = #tpu.pipeline_mode<synchronous>, transform_indices = @transform_6, window_bounds = array<i64: 2, 1, 32>}, {pipeline_mode = #tpu.pipeline_mode<synchronous>, transform_indices = @transform_7, window_bounds = array<i64: 2, 1, 32>}, {pipeline_mode = #tpu.pipeline_mode<synchronous>, transform_indices = @transform_8, window_bounds = array<i64: 2, 32, 64>}, {pipeline_mode = #tpu.pipeline_mode<synchronous>, transform_indices = @transform_9, window_bounds = array<i64: 2, 1, 64>}, {pipeline_mode = #tpu.pipeline_mode<synchronous>, transform_indices = @transform_10, window_bounds = array<i64: 2, 64, 32>}, {pipeline_mode = #tpu.pipeline_mode<synchronous>, transform_indices = @transform_11, window_bounds = array<i64: 2, 1, 32>}, {pipeline_mode = #tpu.pipeline_mode<synchronous>, transform_indices = @transform_12, window_bounds = array<i64: 2, 1, 32>}, {pipeline_mode = #tpu.pipeline_mode<synchronous>, transform_indices = @transform_13, window_bounds = array<i64: 2, 1, 32>}, {transform_indices = @transform_14, window_bounds = array<i64: 8, 8, 32>}]} {
    %c0_i32 = arith.constant 0 : i32
    %0 = arith.cmpi eq, %arg1, %c0_i32 : i32
    %1 = arith.extui %0 : i1 to i32
    %c0_i32_0 = arith.constant 0 : i32
    %2 = arith.cmpi ne, %1, %c0_i32_0 : i32
    scf.if %2 {
      %c0_65 = arith.constant 0 : index
      %c0_66 = arith.constant 0 : index
      %c0_67 = arith.constant 0 : index
      %208 = vector.load %arg2[%c0_65, %c0_66, %c0_67] : memref<8x8x32xbf16, #tpu.memory_space<vmem>>, vector<8x8x32xbf16>
      %209 = arith.extf %208 : vector<8x8x32xbf16> to vector<8x8x32xf32>
      %c0_68 = arith.constant 0 : index
      %c0_69 = arith.constant 0 : index
      %210 = vector.load %arg3[%c0_68, %c0_69] : memref<8x32xf32, #tpu.memory_space<vmem>>, vector<8x32xf32>
      %211 = vector.shape_cast %210 : vector<8x32xf32> to vector<1x8x32xf32>
      %212 = vector.broadcast %211 : vector<1x8x32xf32> to vector<8x8x32xf32>
      %213 = arith.addf %209, %212 : vector<8x8x32xf32>
      %c0_70 = arith.constant 0 : index
      %c0_71 = arith.constant 0 : index
      %c0_72 = arith.constant 0 : index
      %214 = vector.load %arg17[%c0_70, %c0_71, %c0_72] : memref<8x8x32xf32, #tpu.memory_space<vmem>>, vector<8x8x32xf32>
      tpu.vector_store %arg17[%c0_70, %c0_71, %c0_72], %213 {strides = array<i32>} : memref<8x8x32xf32, #tpu.memory_space<vmem>>, vector<8x8x32xf32>,
    } else {
    }
    %c0 = arith.constant 0 : index
    %c0_1 = arith.constant 0 : index
    %c0_2 = arith.constant 0 : index
    %3 = vector.load %arg17[%c0, %c0_1, %c0_2] : memref<8x8x32xf32, #tpu.memory_space<vmem>>, vector<8x8x32xf32>
    %4 = vector.shape_cast %3 : vector<8x8x32xf32> to vector<64x32xf32>
    %5 = arith.truncf %4 : vector<64x32xf32> to vector<64x32xbf16>
    %6 = arith.index_cast %arg1 : i32 to index
    %c0_3 = arith.constant 0 : index
    %c0_4 = arith.constant 0 : index
    %7 = vector.load %arg4[%6, %c0_3, %c0_4] : memref<2x32x96xbf16, #tpu.memory_space<vmem>>, vector<1x32x96xbf16>
    %8 = vector.shape_cast %7 : vector<1x32x96xbf16> to vector<32x96xbf16>
    %cst = arith.constant dense<0.000000e+00> : vector<64x96xf32>
    %9 = tpu.matmul %5, %8, %cst {dimension_numbers = #tpu.dot_dimension_numbers<[1], [0], [0], [1], [0, 0, 1, 1], [], []>} : vector<64x32xbf16>, vector<32x96xbf16>, vector<64x96xf32> -> vector<64x96xf32>
    %10 = arith.index_cast %arg1 : i32 to index
    %c0_5 = arith.constant 0 : index
    %c0_6 = arith.constant 0 : index
    %11 = vector.load %arg5[%10, %c0_5, %c0_6] : memref<2x1x96xf32, #tpu.memory_space<vmem>>, vector<1x1x96xf32>
    %12 = vector.shape_cast %11 : vector<1x1x96xf32> to vector<1x96xf32>
    %13 = vector.broadcast %12 : vector<1x96xf32> to vector<64x96xf32>
    %14 = arith.addf %9, %13 : vector<64x96xf32>
    %15 = arith.truncf %14 : vector<64x96xf32> to vector<64x96xbf16>
    %16 = arith.index_cast %arg1 : i32 to index
    %c0_7 = arith.constant 0 : index
    %c0_8 = arith.constant 0 : index
    %c0_9 = arith.constant 0 : index
    %17 = vector.load %arg6[%16, %c0_7, %c0_8, %c0_9] : memref<2x4x8x32xbf16, #tpu.memory_space<vmem>>, vector<1x4x8x32xbf16>
    %18 = vector.shape_cast %17 : vector<1x4x8x32xbf16> to vector<4x8x32xbf16>
    %19 = vector.extract_strided_slice %15 {offsets = [0, 0], sizes = [64, 8], strides = [1, 1]} : vector<64x96xbf16> to vector<64x8xbf16>
    %20 = vector.shape_cast %19 : vector<64x8xbf16> to vector<8x8x8xbf16>
    %21 = vector.extract_strided_slice %15 {offsets = [0, 32], sizes = [64, 8], strides = [1, 1]} : vector<64x96xbf16> to vector<64x8xbf16>
    %22 = vector.shape_cast %21 : vector<64x8xbf16> to vector<8x8x8xbf16>
    %23 = vector.extract_strided_slice %15 {offsets = [0, 64], sizes = [64, 8], strides = [1, 1]} : vector<64x96xbf16> to vector<64x8xbf16>
    %24 = vector.shape_cast %23 : vector<64x8xbf16> to vector<8x8x8xbf16>
    "tpu.trace_start"() <{level = 10 : i32, message = "bqd,bkd->bqk"}> : () -> ()
    %cst_10 = arith.constant dense<0.000000e+00> : vector<8x8x8xf32>
    %25 = tpu.matmul %20, %22, %cst_10 {dimension_numbers = #tpu.dot_dimension_numbers<[2], [2], [1], [1], [0, 0, 0, 1, 1, 1], [0], [0]>} : vector<8x8x8xbf16>, vector<8x8x8xbf16>, vector<8x8x8xf32> -> vector<8x8x8xf32>
    "tpu.trace_stop"() : () -> ()
    %cst_11 = arith.constant dense<0xFF800000> : vector<8x8xf32>
    %26 = vector.multi_reduction <maximumf>, %25, %cst_11 [2] : vector<8x8x8xf32> to vector<8x8xf32>
    %27 = vector.shape_cast %26 : vector<8x8xf32> to vector<8x8x1xf32>
    %28 = vector.broadcast %27 : vector<8x8x1xf32> to vector<8x8x8xf32>
    %29 = arith.subf %25, %28 : vector<8x8x8xf32>
    %30 = math.exp %29 : vector<8x8x8xf32>
    %cst_12 = arith.constant dense<0.000000e+00> : vector<8x8xf32>
    %31 = vector.multi_reduction <add>, %30, %cst_12 [2] : vector<8x8x8xf32> to vector<8x8xf32>
    %32 = vector.shape_cast %31 : vector<8x8xf32> to vector<8x8x1xf32>
    %33 = tpu.reciprocal %32 {approx = true} : vector<8x8x1xf32> -> vector<8x8x1xf32>
    %34 = vector.broadcast %33 : vector<8x8x1xf32> to vector<8x8x8xf32>
    %35 = arith.mulf %30, %34 : vector<8x8x8xf32>
    %36 = arith.truncf %35 : vector<8x8x8xf32> to vector<8x8x8xbf16>
    "tpu.trace_start"() <{level = 10 : i32, message = "bqk,bkd->bqd"}> : () -> ()
    %cst_13 = arith.constant dense<0.000000e+00> : vector<8x8x8xf32>
    %37 = tpu.matmul %36, %24, %cst_13 {dimension_numbers = #tpu.dot_dimension_numbers<[2], [1], [1], [2], [0, 0, 0, 1, 1, 2], [0], [0]>} : vector<8x8x8xbf16>, vector<8x8x8xbf16>, vector<8x8x8xf32> -> vector<8x8x8xf32>
    "tpu.trace_stop"() : () -> ()
    %38 = vector.shape_cast %37 : vector<8x8x8xf32> to vector<64x8xf32>
    %39 = arith.truncf %38 : vector<64x8xf32> to vector<64x8xbf16>
    %40 = vector.extract_strided_slice %18 {offsets = [0, 0, 0], sizes = [1, 8, 32], strides = [1, 1, 1]} : vector<4x8x32xbf16> to vector<1x8x32xbf16>
    %41 = vector.shape_cast %40 : vector<1x8x32xbf16> to vector<8x32xbf16>
    %cst_14 = arith.constant dense<0.000000e+00> : vector<64x32xf32>
    %42 = tpu.matmul %39, %41, %cst_14 {dimension_numbers = #tpu.dot_dimension_numbers<[1], [0], [0], [1], [0, 0, 1, 1], [], []>} : vector<64x8xbf16>, vector<8x32xbf16>, vector<64x32xf32> -> vector<64x32xf32>
    %43 = vector.extract_strided_slice %15 {offsets = [0, 8], sizes = [64, 8], strides = [1, 1]} : vector<64x96xbf16> to vector<64x8xbf16>
    %44 = vector.shape_cast %43 : vector<64x8xbf16> to vector<8x8x8xbf16>
    %45 = vector.extract_strided_slice %15 {offsets = [0, 40], sizes = [64, 8], strides = [1, 1]} : vector<64x96xbf16> to vector<64x8xbf16>
    %46 = vector.shape_cast %45 : vector<64x8xbf16> to vector<8x8x8xbf16>
    %47 = vector.extract_strided_slice %15 {offsets = [0, 72], sizes = [64, 8], strides = [1, 1]} : vector<64x96xbf16> to vector<64x8xbf16>
    %48 = vector.shape_cast %47 : vector<64x8xbf16> to vector<8x8x8xbf16>
    "tpu.trace_start"() <{level = 10 : i32, message = "bqd,bkd->bqk"}> : () -> ()
    %cst_15 = arith.constant dense<0.000000e+00> : vector<8x8x8xf32>
    %49 = tpu.matmul %44, %46, %cst_15 {dimension_numbers = #tpu.dot_dimension_numbers<[2], [2], [1], [1], [0, 0, 0, 1, 1, 1], [0], [0]>} : vector<8x8x8xbf16>, vector<8x8x8xbf16>, vector<8x8x8xf32> -> vector<8x8x8xf32>
    "tpu.trace_stop"() : () -> ()
    %cst_16 = arith.constant dense<0xFF800000> : vector<8x8xf32>
    %50 = vector.multi_reduction <maximumf>, %49, %cst_16 [2] : vector<8x8x8xf32> to vector<8x8xf32>
    %51 = vector.shape_cast %50 : vector<8x8xf32> to vector<8x8x1xf32>
    %52 = vector.broadcast %51 : vector<8x8x1xf32> to vector<8x8x8xf32>
    %53 = arith.subf %49, %52 : vector<8x8x8xf32>
    %54 = math.exp %53 : vector<8x8x8xf32>
    %cst_17 = arith.constant dense<0.000000e+00> : vector<8x8xf32>
    %55 = vector.multi_reduction <add>, %54, %cst_17 [2] : vector<8x8x8xf32> to vector<8x8xf32>
    %56 = vector.shape_cast %55 : vector<8x8xf32> to vector<8x8x1xf32>
    %57 = tpu.reciprocal %56 {approx = true} : vector<8x8x1xf32> -> vector<8x8x1xf32>
    %58 = vector.broadcast %57 : vector<8x8x1xf32> to vector<8x8x8xf32>
    %59 = arith.mulf %54, %58 : vector<8x8x8xf32>
    %60 = arith.truncf %59 : vector<8x8x8xf32> to vector<8x8x8xbf16>
    "tpu.trace_start"() <{level = 10 : i32, message = "bqk,bkd->bqd"}> : () -> ()
    %cst_18 = arith.constant dense<0.000000e+00> : vector<8x8x8xf32>
    %61 = tpu.matmul %60, %48, %cst_18 {dimension_numbers = #tpu.dot_dimension_numbers<[2], [1], [1], [2], [0, 0, 0, 1, 1, 2], [0], [0]>} : vector<8x8x8xbf16>, vector<8x8x8xbf16>, vector<8x8x8xf32> -> vector<8x8x8xf32>
    "tpu.trace_stop"() : () -> ()
    %62 = vector.shape_cast %61 : vector<8x8x8xf32> to vector<64x8xf32>
    %63 = arith.truncf %62 : vector<64x8xf32> to vector<64x8xbf16>
    %64 = vector.extract_strided_slice %18 {offsets = [1, 0, 0], sizes = [1, 8, 32], strides = [1, 1, 1]} : vector<4x8x32xbf16> to vector<1x8x32xbf16>
    %65 = vector.shape_cast %64 : vector<1x8x32xbf16> to vector<8x32xbf16>
    %cst_19 = arith.constant dense<0.000000e+00> : vector<64x32xf32>
    %66 = tpu.matmul %63, %65, %cst_19 {dimension_numbers = #tpu.dot_dimension_numbers<[1], [0], [0], [1], [0, 0, 1, 1], [], []>} : vector<64x8xbf16>, vector<8x32xbf16>, vector<64x32xf32> -> vector<64x32xf32>
    %67 = arith.addf %42, %66 : vector<64x32xf32>
    %68 = vector.extract_strided_slice %15 {offsets = [0, 16], sizes = [64, 8], strides = [1, 1]} : vector<64x96xbf16> to vector<64x8xbf16>
    %69 = vector.shape_cast %68 : vector<64x8xbf16> to vector<8x8x8xbf16>
    %70 = vector.extract_strided_slice %15 {offsets = [0, 48], sizes = [64, 8], strides = [1, 1]} : vector<64x96xbf16> to vector<64x8xbf16>
    %71 = vector.shape_cast %70 : vector<64x8xbf16> to vector<8x8x8xbf16>
    %72 = vector.extract_strided_slice %15 {offsets = [0, 80], sizes = [64, 8], strides = [1, 1]} : vector<64x96xbf16> to vector<64x8xbf16>
    %73 = vector.shape_cast %72 : vector<64x8xbf16> to vector<8x8x8xbf16>
    "tpu.trace_start"() <{level = 10 : i32, message = "bqd,bkd->bqk"}> : () -> ()
    %cst_20 = arith.constant dense<0.000000e+00> : vector<8x8x8xf32>
    %74 = tpu.matmul %69, %71, %cst_20 {dimension_numbers = #tpu.dot_dimension_numbers<[2], [2], [1], [1], [0, 0, 0, 1, 1, 1], [0], [0]>} : vector<8x8x8xbf16>, vector<8x8x8xbf16>, vector<8x8x8xf32> -> vector<8x8x8xf32>
    "tpu.trace_stop"() : () -> ()
    %cst_21 = arith.constant dense<0xFF800000> : vector<8x8xf32>
    %75 = vector.multi_reduction <maximumf>, %74, %cst_21 [2] : vector<8x8x8xf32> to vector<8x8xf32>
    %76 = vector.shape_cast %75 : vector<8x8xf32> to vector<8x8x1xf32>
    %77 = vector.broadcast %76 : vector<8x8x1xf32> to vector<8x8x8xf32>
    %78 = arith.subf %74, %77 : vector<8x8x8xf32>
    %79 = math.exp %78 : vector<8x8x8xf32>
    %cst_22 = arith.constant dense<0.000000e+00> : vector<8x8xf32>
    %80 = vector.multi_reduction <add>, %79, %cst_22 [2] : vector<8x8x8xf32> to vector<8x8xf32>
    %81 = vector.shape_cast %80 : vector<8x8xf32> to vector<8x8x1xf32>
    %82 = tpu.reciprocal %81 {approx = true} : vector<8x8x1xf32> -> vector<8x8x1xf32>
    %83 = vector.broadcast %82 : vector<8x8x1xf32> to vector<8x8x8xf32>
    %84 = arith.mulf %79, %83 : vector<8x8x8xf32>
    %85 = arith.truncf %84 : vector<8x8x8xf32> to vector<8x8x8xbf16>
    "tpu.trace_start"() <{level = 10 : i32, message = "bqk,bkd->bqd"}> : () -> ()
    %cst_23 = arith.constant dense<0.000000e+00> : vector<8x8x8xf32>
    %86 = tpu.matmul %85, %73, %cst_23 {dimension_numbers = #tpu.dot_dimension_numbers<[2], [1], [1], [2], [0, 0, 0, 1, 1, 2], [0], [0]>} : vector<8x8x8xbf16>, vector<8x8x8xbf16>, vector<8x8x8xf32> -> vector<8x8x8xf32>
    "tpu.trace_stop"() : () -> ()
    %87 = vector.shape_cast %86 : vector<8x8x8xf32> to vector<64x8xf32>
    %88 = arith.truncf %87 : vector<64x8xf32> to vector<64x8xbf16>
    %89 = vector.extract_strided_slice %18 {offsets = [2, 0, 0], sizes = [1, 8, 32], strides = [1, 1, 1]} : vector<4x8x32xbf16> to vector<1x8x32xbf16>
    %90 = vector.shape_cast %89 : vector<1x8x32xbf16> to vector<8x32xbf16>
    %cst_24 = arith.constant dense<0.000000e+00> : vector<64x32xf32>
    %91 = tpu.matmul %88, %90, %cst_24 {dimension_numbers = #tpu.dot_dimension_numbers<[1], [0], [0], [1], [0, 0, 1, 1], [], []>} : vector<64x8xbf16>, vector<8x32xbf16>, vector<64x32xf32> -> vector<64x32xf32>
    %92 = arith.addf %67, %91 : vector<64x32xf32>
    %93 = vector.extract_strided_slice %15 {offsets = [0, 24], sizes = [64, 8], strides = [1, 1]} : vector<64x96xbf16> to vector<64x8xbf16>
    %94 = vector.shape_cast %93 : vector<64x8xbf16> to vector<8x8x8xbf16>
    %95 = vector.extract_strided_slice %15 {offsets = [0, 56], sizes = [64, 8], strides = [1, 1]} : vector<64x96xbf16> to vector<64x8xbf16>
    %96 = vector.shape_cast %95 : vector<64x8xbf16> to vector<8x8x8xbf16>
    %97 = vector.extract_strided_slice %15 {offsets = [0, 88], sizes = [64, 8], strides = [1, 1]} : vector<64x96xbf16> to vector<64x8xbf16>
    %98 = vector.shape_cast %97 : vector<64x8xbf16> to vector<8x8x8xbf16>
    "tpu.trace_start"() <{level = 10 : i32, message = "bqd,bkd->bqk"}> : () -> ()
    %cst_25 = arith.constant dense<0.000000e+00> : vector<8x8x8xf32>
    %99 = tpu.matmul %94, %96, %cst_25 {dimension_numbers = #tpu.dot_dimension_numbers<[2], [2], [1], [1], [0, 0, 0, 1, 1, 1], [0], [0]>} : vector<8x8x8xbf16>, vector<8x8x8xbf16>, vector<8x8x8xf32> -> vector<8x8x8xf32>
    "tpu.trace_stop"() : () -> ()
    %cst_26 = arith.constant dense<0xFF800000> : vector<8x8xf32>
    %100 = vector.multi_reduction <maximumf>, %99, %cst_26 [2] : vector<8x8x8xf32> to vector<8x8xf32>
    %101 = vector.shape_cast %100 : vector<8x8xf32> to vector<8x8x1xf32>
    %102 = vector.broadcast %101 : vector<8x8x1xf32> to vector<8x8x8xf32>
    %103 = arith.subf %99, %102 : vector<8x8x8xf32>
    %104 = math.exp %103 : vector<8x8x8xf32>
    %cst_27 = arith.constant dense<0.000000e+00> : vector<8x8xf32>
    %105 = vector.multi_reduction <add>, %104, %cst_27 [2] : vector<8x8x8xf32> to vector<8x8xf32>
    %106 = vector.shape_cast %105 : vector<8x8xf32> to vector<8x8x1xf32>
    %107 = tpu.reciprocal %106 {approx = true} : vector<8x8x1xf32> -> vector<8x8x1xf32>
    %108 = vector.broadcast %107 : vector<8x8x1xf32> to vector<8x8x8xf32>
    %109 = arith.mulf %104, %108 : vector<8x8x8xf32>
    %110 = arith.truncf %109 : vector<8x8x8xf32> to vector<8x8x8xbf16>
    "tpu.trace_start"() <{level = 10 : i32, message = "bqk,bkd->bqd"}> : () -> ()
    %cst_28 = arith.constant dense<0.000000e+00> : vector<8x8x8xf32>
    %111 = tpu.matmul %110, %98, %cst_28 {dimension_numbers = #tpu.dot_dimension_numbers<[2], [1], [1], [2], [0, 0, 0, 1, 1, 2], [0], [0]>} : vector<8x8x8xbf16>, vector<8x8x8xbf16>, vector<8x8x8xf32> -> vector<8x8x8xf32>
    "tpu.trace_stop"() : () -> ()
    %112 = vector.shape_cast %111 : vector<8x8x8xf32> to vector<64x8xf32>
    %113 = arith.truncf %112 : vector<64x8xf32> to vector<64x8xbf16>
    %114 = vector.extract_strided_slice %18 {offsets = [3, 0, 0], sizes = [1, 8, 32], strides = [1, 1, 1]} : vector<4x8x32xbf16> to vector<1x8x32xbf16>
    %115 = vector.shape_cast %114 : vector<1x8x32xbf16> to vector<8x32xbf16>
    %cst_29 = arith.constant dense<0.000000e+00> : vector<64x32xf32>
    %116 = tpu.matmul %113, %115, %cst_29 {dimension_numbers = #tpu.dot_dimension_numbers<[1], [0], [0], [1], [0, 0, 1, 1], [], []>} : vector<64x8xbf16>, vector<8x32xbf16>, vector<64x32xf32> -> vector<64x32xf32>
    %117 = arith.addf %92, %116 : vector<64x32xf32>
    %118 = arith.index_cast %arg1 : i32 to index
    %c0_30 = arith.constant 0 : index
    %c0_31 = arith.constant 0 : index
    %119 = vector.load %arg7[%118, %c0_30, %c0_31] : memref<2x1x32xf32, #tpu.memory_space<vmem>>, vector<1x1x32xf32>
    %120 = vector.shape_cast %119 : vector<1x1x32xf32> to vector<1x32xf32>
    %121 = vector.broadcast %120 : vector<1x32xf32> to vector<64x32xf32>
    %122 = arith.addf %117, %121 : vector<64x32xf32>
    %123 = arith.addf %4, %122 : vector<64x32xf32>
    %124 = arith.index_cast %arg1 : i32 to index
    %c0_32 = arith.constant 0 : index
    %c0_33 = arith.constant 0 : index
    %125 = vector.load %arg8[%124, %c0_32, %c0_33] : memref<2x1x32xf32, #tpu.memory_space<vmem>>, vector<1x1x32xf32>
    %126 = vector.shape_cast %125 : vector<1x1x32xf32> to vector<1x32xf32>
    %127 = arith.index_cast %arg1 : i32 to index
    %c0_34 = arith.constant 0 : index
    %c0_35 = arith.constant 0 : index
    %128 = vector.load %arg9[%127, %c0_34, %c0_35] : memref<2x1x32xf32, #tpu.memory_space<vmem>>, vector<1x1x32xf32>
    %129 = vector.shape_cast %128 : vector<1x1x32xf32> to vector<1x32xf32>
    %cst_36 = arith.constant dense<0.000000e+00> : vector<64xf32>
    %130 = vector.multi_reduction <add>, %123, %cst_36 [1] : vector<64x32xf32> to vector<64xf32>
    %131 = vector.shape_cast %130 : vector<64xf32> to vector<64x1xf32>
    %cst_37 = arith.constant 3.200000e+01 : f32
    %132 = vector.broadcast %cst_37 : f32 to vector<64x1xf32>
    %133 = arith.divf %131, %132 : vector<64x1xf32>
    %134 = vector.broadcast %133 : vector<64x1xf32> to vector<64x32xf32>
    %135 = arith.subf %123, %134 : vector<64x32xf32>
    %136 = arith.mulf %135, %135 : vector<64x32xf32>
    %cst_38 = arith.constant dense<0.000000e+00> : vector<64xf32>
    %137 = vector.multi_reduction <add>, %136, %cst_38 [1] : vector<64x32xf32> to vector<64xf32>
    %138 = vector.shape_cast %137 : vector<64xf32> to vector<64x1xf32>
    %cst_39 = arith.constant 3.200000e+01 : f32
    %139 = vector.broadcast %cst_39 : f32 to vector<64x1xf32>
    %140 = arith.divf %138, %139 : vector<64x1xf32>
    %141 = vector.broadcast %133 : vector<64x1xf32> to vector<64x32xf32>
    %142 = arith.subf %123, %141 : vector<64x32xf32>
    %cst_40 = arith.constant 9.99999974E-6 : f32
    %143 = vector.broadcast %cst_40 : f32 to vector<64x1xf32>
    %144 = arith.addf %140, %143 : vector<64x1xf32>
    %145 = math.rsqrt %144 : vector<64x1xf32>
    %146 = vector.broadcast %145 : vector<64x1xf32> to vector<64x32xf32>
    %147 = arith.mulf %142, %146 : vector<64x32xf32>
    %148 = vector.broadcast %126 : vector<1x32xf32> to vector<64x32xf32>
    %149 = arith.mulf %147, %148 : vector<64x32xf32>
    %150 = vector.broadcast %129 : vector<1x32xf32> to vector<64x32xf32>
    %151 = arith.addf %149, %150 : vector<64x32xf32>
    %152 = arith.truncf %151 : vector<64x32xf32> to vector<64x32xbf16>
    %153 = arith.index_cast %arg1 : i32 to index
    %c0_41 = arith.constant 0 : index
    %c0_42 = arith.constant 0 : index
    %154 = vector.load %arg10[%153, %c0_41, %c0_42] : memref<2x32x64xbf16, #tpu.memory_space<vmem>>, vector<1x32x64xbf16>
    %155 = vector.shape_cast %154 : vector<1x32x64xbf16> to vector<32x64xbf16>
    %cst_43 = arith.constant dense<0.000000e+00> : vector<64x64xf32>
    %156 = tpu.matmul %152, %155, %cst_43 {dimension_numbers = #tpu.dot_dimension_numbers<[1], [0], [0], [1], [0, 0, 1, 1], [], []>} : vector<64x32xbf16>, vector<32x64xbf16>, vector<64x64xf32> -> vector<64x64xf32>
    %157 = arith.index_cast %arg1 : i32 to index
    %c0_44 = arith.constant 0 : index
    %c0_45 = arith.constant 0 : index
    %158 = vector.load %arg11[%157, %c0_44, %c0_45] : memref<2x1x64xf32, #tpu.memory_space<vmem>>, vector<1x1x64xf32>
    %159 = vector.shape_cast %158 : vector<1x1x64xf32> to vector<1x64xf32>
    %160 = vector.broadcast %159 : vector<1x64xf32> to vector<64x64xf32>
    %161 = arith.addf %156, %160 : vector<64x64xf32>
    %cst_46 = arith.constant 0.000000e+00 : f32
    %162 = vector.broadcast %cst_46 : f32 to vector<64x64xf32>
    %163 = arith.maximumf %161, %162 : vector<64x64xf32>
    %164 = arith.truncf %163 : vector<64x64xf32> to vector<64x64xbf16>
    %165 = arith.index_cast %arg1 : i32 to index
    %c0_47 = arith.constant 0 : index
    %c0_48 = arith.constant 0 : index
    %166 = vector.load %arg12[%165, %c0_47, %c0_48] : memref<2x64x32xbf16, #tpu.memory_space<vmem>>, vector<1x64x32xbf16>
    %167 = vector.shape_cast %166 : vector<1x64x32xbf16> to vector<64x32xbf16>
    %cst_49 = arith.constant dense<0.000000e+00> : vector<64x32xf32>
    %168 = tpu.matmul %164, %167, %cst_49 {dimension_numbers = #tpu.dot_dimension_numbers<[1], [0], [0], [1], [0, 0, 1, 1], [], []>} : vector<64x64xbf16>, vector<64x32xbf16>, vector<64x32xf32> -> vector<64x32xf32>
    %169 = arith.index_cast %arg1 : i32 to index
    %c0_50 = arith.constant 0 : index
    %c0_51 = arith.constant 0 : index
    %170 = vector.load %arg13[%169, %c0_50, %c0_51] : memref<2x1x32xf32, #tpu.memory_space<vmem>>, vector<1x1x32xf32>
    %171 = vector.shape_cast %170 : vector<1x1x32xf32> to vector<1x32xf32>
    %172 = vector.broadcast %171 : vector<1x32xf32> to vector<64x32xf32>
    %173 = arith.addf %168, %172 : vector<64x32xf32>
    %174 = arith.addf %151, %173 : vector<64x32xf32>
    %175 = arith.index_cast %arg1 : i32 to index
    %c0_52 = arith.constant 0 : index
    %c0_53 = arith.constant 0 : index
    %176 = vector.load %arg14[%175, %c0_52, %c0_53] : memref<2x1x32xf32, #tpu.memory_space<vmem>>, vector<1x1x32xf32>
    %177 = vector.shape_cast %176 : vector<1x1x32xf32> to vector<1x32xf32>
    %178 = arith.index_cast %arg1 : i32 to index
    %c0_54 = arith.constant 0 : index
    %c0_55 = arith.constant 0 : index
    %179 = vector.load %arg15[%178, %c0_54, %c0_55] : memref<2x1x32xf32, #tpu.memory_space<vmem>>, vector<1x1x32xf32>
    %180 = vector.shape_cast %179 : vector<1x1x32xf32> to vector<1x32xf32>
    %cst_56 = arith.constant dense<0.000000e+00> : vector<64xf32>
    %181 = vector.multi_reduction <add>, %174, %cst_56 [1] : vector<64x32xf32> to vector<64xf32>
    %182 = vector.shape_cast %181 : vector<64xf32> to vector<64x1xf32>
    %cst_57 = arith.constant 3.200000e+01 : f32
    %183 = vector.broadcast %cst_57 : f32 to vector<64x1xf32>
    %184 = arith.divf %182, %183 : vector<64x1xf32>
    %185 = vector.broadcast %184 : vector<64x1xf32> to vector<64x32xf32>
    %186 = arith.subf %174, %185 : vector<64x32xf32>
    %187 = arith.mulf %186, %186 : vector<64x32xf32>
    %cst_58 = arith.constant dense<0.000000e+00> : vector<64xf32>
    %188 = vector.multi_reduction <add>, %187, %cst_58 [1] : vector<64x32xf32> to vector<64xf32>
    %189 = vector.shape_cast %188 : vector<64xf32> to vector<64x1xf32>
    %cst_59 = arith.constant 3.200000e+01 : f32
    %190 = vector.broadcast %cst_59 : f32 to vector<64x1xf32>
    %191 = arith.divf %189, %190 : vector<64x1xf32>
    %192 = vector.broadcast %184 : vector<64x1xf32> to vector<64x32xf32>
    %193 = arith.subf %174, %192 : vector<64x32xf32>
    %cst_60 = arith.constant 9.99999974E-6 : f32
    %194 = vector.broadcast %cst_60 : f32 to vector<64x1xf32>
    %195 = arith.addf %191, %194 : vector<64x1xf32>
    %196 = math.rsqrt %195 : vector<64x1xf32>
    %197 = vector.broadcast %196 : vector<64x1xf32> to vector<64x32xf32>
    %198 = arith.mulf %193, %197 : vector<64x32xf32>
    %199 = vector.broadcast %177 : vector<1x32xf32> to vector<64x32xf32>
    %200 = arith.mulf %198, %199 : vector<64x32xf32>
    %201 = vector.broadcast %180 : vector<1x32xf32> to vector<64x32xf32>
    %202 = arith.addf %200, %201 : vector<64x32xf32>
    %203 = vector.shape_cast %202 : vector<64x32xf32> to vector<8x8x32xf32>
    %c0_61 = arith.constant 0 : index
    %c0_62 = arith.constant 0 : index
    %c0_63 = arith.constant 0 : index
    %204 = vector.load %arg17[%c0_61, %c0_62, %c0_63] : memref<8x8x32xf32, #tpu.memory_space<vmem>>, vector<8x8x32xf32>
    tpu.vector_store %arg17[%c0_61, %c0_62, %c0_63], %203 {strides = array<i32>} : memref<8x8x32xf32, #tpu.memory_space<vmem>>, vector<8x8x32xf32>,
    %c1_i32 = arith.constant 1 : i32
    %205 = arith.cmpi eq, %arg1, %c1_i32 : i32
    %206 = arith.extui %205 : i1 to i32
    %c0_i32_64 = arith.constant 0 : i32
    %207 = arith.cmpi ne, %206, %c0_i32_64 : i32
    scf.if %207 {
      %208 = arith.truncf %203 : vector<8x8x32xf32> to vector<8x8x32xbf16>
      %c0_65 = arith.constant 0 : index
      %c0_66 = arith.constant 0 : index
      %c0_67 = arith.constant 0 : index
      %209 = vector.load %arg16[%c0_65, %c0_66, %c0_67] : memref<8x8x32xbf16, #tpu.memory_space<vmem>>, vector<8x8x32xbf16>
      tpu.vector_store %arg16[%c0_65, %c0_66, %c0_67], %208 {strides = array<i32>} : memref<8x8x32xbf16, #tpu.memory_space<vmem>>, vector<8x8x32xbf16>,
    } else {
    }
    return
  }
  func.func @transform_0(%arg0: i32, %arg1: i32) -> (i32, i32, i32) {
    %c0_i32 = arith.constant 0 : i32
    %c0_i32_0 = arith.constant 0 : i32
    %c0_i32_1 = arith.constant 0 : i32
    return %arg0, %c0_i32, %c0_i32_0 : i32, i32, i32
  }
  func.func @transform_1(%arg0: i32, %arg1: i32) -> (i32, i32) {
    %c0_i32 = arith.constant 0 : i32
    %c0_i32_0 = arith.constant 0 : i32
    %c0_i32_1 = arith.constant 0 : i32
    return %c0_i32, %c0_i32_0 : i32, i32
  }
  func.func @transform_2(%arg0: i32, %arg1: i32) -> (i32, i32, i32) {
    %c0_i32 = arith.constant 0 : i32
    %c0_i32_0 = arith.constant 0 : i32
    %c0_i32_1 = arith.constant 0 : i32
    %c0_i32_2 = arith.constant 0 : i32
    return %c0_i32, %c0_i32_0, %c0_i32_1 : i32, i32, i32
  }
  func.func @transform_3(%arg0: i32, %arg1: i32) -> (i32, i32, i32) {
    %c0_i32 = arith.constant 0 : i32
    %c0_i32_0 = arith.constant 0 : i32
    %c0_i32_1 = arith.constant 0 : i32
    %c0_i32_2 = arith.constant 0 : i32
    return %c0_i32, %c0_i32_0, %c0_i32_1 : i32, i32, i32
  }
  func.func @transform_4(%arg0: i32, %arg1: i32) -> (i32, i32, i32, i32) {
    %c0_i32 = arith.constant 0 : i32
    %c0_i32_0 = arith.constant 0 : i32
    %c0_i32_1 = arith.constant 0 : i32
    %c0_i32_2 = arith.constant 0 : i32
    %c0_i32_3 = arith.constant 0 : i32
    return %c0_i32, %c0_i32_0, %c0_i32_1, %c0_i32_2 : i32, i32, i32, i32
  }
  func.func @transform_5(%arg0: i32, %arg1: i32) -> (i32, i32, i32) {
    %c0_i32 = arith.constant 0 : i32
    %c0_i32_0 = arith.constant 0 : i32
    %c0_i32_1 = arith.constant 0 : i32
    %c0_i32_2 = arith.constant 0 : i32
    return %c0_i32, %c0_i32_0, %c0_i32_1 : i32, i32, i32
  }
  func.func @transform_6(%arg0: i32, %arg1: i32) -> (i32, i32, i32) {
    %c0_i32 = arith.constant 0 : i32
    %c0_i32_0 = arith.constant 0 : i32
    %c0_i32_1 = arith.constant 0 : i32
    %c0_i32_2 = arith.constant 0 : i32
    return %c0_i32, %c0_i32_0, %c0_i32_1 : i32, i32, i32
  }
  func.func @transform_7(%arg0: i32, %arg1: i32) -> (i32, i32, i32) {
    %c0_i32 = arith.constant 0 : i32
    %c0_i32_0 = arith.constant 0 : i32
    %c0_i32_1 = arith.constant 0 : i32
    %c0_i32_2 = arith.constant 0 : i32
    return %c0_i32, %c0_i32_0, %c0_i32_1 : i32, i32, i32
  }
  func.func @transform_8(%arg0: i32, %arg1: i32) -> (i32, i32, i32) {
    %c0_i32 = arith.constant 0 : i32
    %c0_i32_0 = arith.constant 0 : i32
    %c0_i32_1 = arith.constant 0 : i32
    %c0_i32_2 = arith.constant 0 : i32
    return %c0_i32, %c0_i32_0, %c0_i32_1 : i32, i32, i32
  }
  func.func @transform_9(%arg0: i32, %arg1: i32) -> (i32, i32, i32) {
    %c0_i32 = arith.constant 0 : i32
    %c0_i32_0 = arith.constant 0 : i32
    %c0_i32_1 = arith.constant 0 : i32
    %c0_i32_2 = arith.constant 0 : i32
    return %c0_i32, %c0_i32_0, %c0_i32_1 : i32, i32, i32
  }
  func.func @transform_10(%arg0: i32, %arg1: i32) -> (i32, i32, i32) {
    %c0_i32 = arith.constant 0 : i32
    %c0_i32_0 = arith.constant 0 : i32
    %c0_i32_1 = arith.constant 0 : i32
    %c0_i32_2 = arith.constant 0 : i32
    return %c0_i32, %c0_i32_0, %c0_i32_1 : i32, i32, i32
  }
  func.func @transform_11(%arg0: i32, %arg1: i32) -> (i32, i32, i32) {
    %c0_i32 = arith.constant 0 : i32
    %c0_i32_0 = arith.constant 0 : i32
    %c0_i32_1 = arith.constant 0 : i32
    %c0_i32_2 = arith.constant 0 : i32
    return %c0_i32, %c0_i32_0, %c0_i32_1 : i32, i32, i32
  }
  func.func @transform_12(%arg0: i32, %arg1: i32) -> (i32, i32, i32) {
    %c0_i32 = arith.constant 0 : i32
    %c0_i32_0 = arith.constant 0 : i32
    %c0_i32_1 = arith.constant 0 : i32
    %c0_i32_2 = arith.constant 0 : i32
    return %c0_i32, %c0_i32_0, %c0_i32_1 : i32, i32, i32
  }
  func.func @transform_13(%arg0: i32, %arg1: i32) -> (i32, i32, i32) {
    %c0_i32 = arith.constant 0 : i32
    %c0_i32_0 = arith.constant 0 : i32
    %c0_i32_1 = arith.constant 0 : i32
    %c0_i32_2 = arith.constant 0 : i32
    return %c0_i32, %c0_i32_0, %c0_i32_1 : i32, i32, i32
  }
  func.func @transform_14(%arg0: i32, %arg1: i32) -> (i32, i32, i32) {
    %c0_i32 = arith.constant 0 : i32
    %c0_i32_0 = arith.constant 0 : i32
    %c0_i32_1 = arith.constant 0 : i32
    return %arg0, %c0_i32, %c0_i32_0 : i32, i32, i32
  }
}

module attributes {stable_mosaic.version = 11 : i64} {
  func.func @xfmr_block_kernel(%arg0: i32, %arg1: i32, %arg2: memref<8x8x32xf32, #tpu.memory_space<vmem>>, %arg3: memref<8x32xf32, #tpu.memory_space<vmem>>, %arg4: memref<2x32x96xbf16, #tpu.memory_space<vmem>>, %arg5: memref<2x1x96xf32, #tpu.memory_space<vmem>>, %arg6: memref<2x4x8x32xbf16, #tpu.memory_space<vmem>>, %arg7: memref<2x1x32xf32, #tpu.memory_space<vmem>>, %arg8: memref<2x1x32xf32, #tpu.memory_space<vmem>>, %arg9: memref<2x1x32xf32, #tpu.memory_space<vmem>>, %arg10: memref<2x32x64xbf16, #tpu.memory_space<vmem>>, %arg11: memref<2x1x64xf32, #tpu.memory_space<vmem>>, %arg12: memref<2x64x32xbf16, #tpu.memory_space<vmem>>, %arg13: memref<2x1x32xf32, #tpu.memory_space<vmem>>, %arg14: memref<2x1x32xf32, #tpu.memory_space<vmem>>, %arg15: memref<2x1x32xf32, #tpu.memory_space<vmem>>, %arg16: memref<8x8x32xbf16, #tpu.memory_space<vmem>>, %arg17: memref<8x8x32xf32, #tpu.memory_space<vmem>>) attributes {dimension_semantics = [#tpu.dimension_semantics<parallel>, #tpu.dimension_semantics<arbitrary>], iteration_bounds = array<i64: 2, 2>, scalar_prefetch = 0 : i64, scratch_operands = 1 : i64, tpu.core_type = #tpu.core_type<tc>, window_params = [{transform_indices = @transform_0, window_bounds = array<i64: 8, 8, 32>}, {pipeline_mode = #tpu.pipeline_mode<synchronous>, transform_indices = @transform_1, window_bounds = array<i64: 8, 32>}, {pipeline_mode = #tpu.pipeline_mode<synchronous>, transform_indices = @transform_2, window_bounds = array<i64: 2, 32, 96>}, {pipeline_mode = #tpu.pipeline_mode<synchronous>, transform_indices = @transform_3, window_bounds = array<i64: 2, 1, 96>}, {pipeline_mode = #tpu.pipeline_mode<synchronous>, transform_indices = @transform_4, window_bounds = array<i64: 2, 4, 8, 32>}, {pipeline_mode = #tpu.pipeline_mode<synchronous>, transform_indices = @transform_5, window_bounds = array<i64: 2, 1, 32>}, {pipeline_mode = #tpu.pipeline_mode<synchronous>, transform_indices = @transform_6, window_bounds = array<i64: 2, 1, 32>}, {pipeline_mode = #tpu.pipeline_mode<synchronous>, transform_indices = @transform_7, window_bounds = array<i64: 2, 1, 32>}, {pipeline_mode = #tpu.pipeline_mode<synchronous>, transform_indices = @transform_8, window_bounds = array<i64: 2, 32, 64>}, {pipeline_mode = #tpu.pipeline_mode<synchronous>, transform_indices = @transform_9, window_bounds = array<i64: 2, 1, 64>}, {pipeline_mode = #tpu.pipeline_mode<synchronous>, transform_indices = @transform_10, window_bounds = array<i64: 2, 64, 32>}, {pipeline_mode = #tpu.pipeline_mode<synchronous>, transform_indices = @transform_11, window_bounds = array<i64: 2, 1, 32>}, {pipeline_mode = #tpu.pipeline_mode<synchronous>, transform_indices = @transform_12, window_bounds = array<i64: 2, 1, 32>}, {pipeline_mode = #tpu.pipeline_mode<synchronous>, transform_indices = @transform_13, window_bounds = array<i64: 2, 1, 32>}, {transform_indices = @transform_14, window_bounds = array<i64: 8, 8, 32>}]} {
    %c0_i32 = arith.constant 0 : i32
    %0 = arith.cmpi eq, %arg1, %c0_i32 : i32
    %1 = arith.extui %0 : i1 to i32
    %c0_i32_0 = arith.constant 0 : i32
    %2 = arith.cmpi ne, %1, %c0_i32_0 : i32
    scf.if %2 {
      %c0_65 = arith.constant 0 : index
      %c0_66 = arith.constant 0 : index
      %c0_67 = arith.constant 0 : index
      %208 = vector.load %arg2[%c0_65, %c0_66, %c0_67] : memref<8x8x32xf32, #tpu.memory_space<vmem>>, vector<8x8x32xf32>
      %c0_68 = arith.constant 0 : index
      %c0_69 = arith.constant 0 : index
      %209 = vector.load %arg3[%c0_68, %c0_69] : memref<8x32xf32, #tpu.memory_space<vmem>>, vector<8x32xf32>
      %210 = vector.shape_cast %209 : vector<8x32xf32> to vector<1x8x32xf32>
      %211 = vector.broadcast %210 : vector<1x8x32xf32> to vector<8x8x32xf32>
      %212 = arith.addf %208, %211 : vector<8x8x32xf32>
      %c0_70 = arith.constant 0 : index
      %c0_71 = arith.constant 0 : index
      %c0_72 = arith.constant 0 : index
      %213 = vector.load %arg17[%c0_70, %c0_71, %c0_72] : memref<8x8x32xf32, #tpu.memory_space<vmem>>, vector<8x8x32xf32>
      tpu.vector_store %arg17[%c0_70, %c0_71, %c0_72], %212 {strides = array<i32>} : memref<8x8x32xf32, #tpu.memory_space<vmem>>, vector<8x8x32xf32>,
    } else {
    }
    %c0 = arith.constant 0 : index
    %c0_1 = arith.constant 0 : index
    %c0_2 = arith.constant 0 : index
    %3 = vector.load %arg17[%c0, %c0_1, %c0_2] : memref<8x8x32xf32, #tpu.memory_space<vmem>>, vector<8x8x32xf32>
    %4 = vector.shape_cast %3 : vector<8x8x32xf32> to vector<64x32xf32>
    %5 = arith.truncf %4 : vector<64x32xf32> to vector<64x32xbf16>
    %6 = arith.index_cast %arg1 : i32 to index
    %c0_3 = arith.constant 0 : index
    %c0_4 = arith.constant 0 : index
    %7 = vector.load %arg4[%6, %c0_3, %c0_4] : memref<2x32x96xbf16, #tpu.memory_space<vmem>>, vector<1x32x96xbf16>
    %8 = vector.shape_cast %7 : vector<1x32x96xbf16> to vector<32x96xbf16>
    %cst = arith.constant dense<0.000000e+00> : vector<64x96xf32>
    %9 = tpu.matmul %5, %8, %cst {dimension_numbers = #tpu.dot_dimension_numbers<[1], [0], [0], [1], [0, 0, 1, 1], [], []>} : vector<64x32xbf16>, vector<32x96xbf16>, vector<64x96xf32> -> vector<64x96xf32>
    %10 = arith.index_cast %arg1 : i32 to index
    %c0_5 = arith.constant 0 : index
    %c0_6 = arith.constant 0 : index
    %11 = vector.load %arg5[%10, %c0_5, %c0_6] : memref<2x1x96xf32, #tpu.memory_space<vmem>>, vector<1x1x96xf32>
    %12 = vector.shape_cast %11 : vector<1x1x96xf32> to vector<1x96xf32>
    %13 = vector.broadcast %12 : vector<1x96xf32> to vector<64x96xf32>
    %14 = arith.addf %9, %13 : vector<64x96xf32>
    %15 = arith.truncf %14 : vector<64x96xf32> to vector<64x96xbf16>
    %16 = arith.index_cast %arg1 : i32 to index
    %c0_7 = arith.constant 0 : index
    %c0_8 = arith.constant 0 : index
    %c0_9 = arith.constant 0 : index
    %17 = vector.load %arg6[%16, %c0_7, %c0_8, %c0_9] : memref<2x4x8x32xbf16, #tpu.memory_space<vmem>>, vector<1x4x8x32xbf16>
    %18 = vector.shape_cast %17 : vector<1x4x8x32xbf16> to vector<4x8x32xbf16>
    %19 = vector.extract_strided_slice %15 {offsets = [0, 0], sizes = [64, 8], strides = [1, 1]} : vector<64x96xbf16> to vector<64x8xbf16>
    %20 = vector.shape_cast %19 : vector<64x8xbf16> to vector<8x8x8xbf16>
    %21 = vector.extract_strided_slice %15 {offsets = [0, 32], sizes = [64, 8], strides = [1, 1]} : vector<64x96xbf16> to vector<64x8xbf16>
    %22 = vector.shape_cast %21 : vector<64x8xbf16> to vector<8x8x8xbf16>
    %23 = vector.extract_strided_slice %15 {offsets = [0, 64], sizes = [64, 8], strides = [1, 1]} : vector<64x96xbf16> to vector<64x8xbf16>
    %24 = vector.shape_cast %23 : vector<64x8xbf16> to vector<8x8x8xbf16>
    "tpu.trace_start"() <{level = 10 : i32, message = "bqd,bkd->bqk"}> : () -> ()
    %cst_10 = arith.constant dense<0.000000e+00> : vector<8x8x8xf32>
    %25 = tpu.matmul %20, %22, %cst_10 {dimension_numbers = #tpu.dot_dimension_numbers<[2], [2], [1], [1], [0, 0, 0, 1, 1, 1], [0], [0]>} : vector<8x8x8xbf16>, vector<8x8x8xbf16>, vector<8x8x8xf32> -> vector<8x8x8xf32>
    "tpu.trace_stop"() : () -> ()
    %cst_11 = arith.constant dense<0xFF800000> : vector<8x8xf32>
    %26 = vector.multi_reduction <maximumf>, %25, %cst_11 [2] : vector<8x8x8xf32> to vector<8x8xf32>
    %27 = vector.shape_cast %26 : vector<8x8xf32> to vector<8x8x1xf32>
    %28 = vector.broadcast %27 : vector<8x8x1xf32> to vector<8x8x8xf32>
    %29 = arith.subf %25, %28 : vector<8x8x8xf32>
    %30 = math.exp %29 : vector<8x8x8xf32>
    %cst_12 = arith.constant dense<0.000000e+00> : vector<8x8xf32>
    %31 = vector.multi_reduction <add>, %30, %cst_12 [2] : vector<8x8x8xf32> to vector<8x8xf32>
    %32 = vector.shape_cast %31 : vector<8x8xf32> to vector<8x8x1xf32>
    %33 = tpu.reciprocal %32 {approx = true} : vector<8x8x1xf32> -> vector<8x8x1xf32>
    %34 = vector.broadcast %33 : vector<8x8x1xf32> to vector<8x8x8xf32>
    %35 = arith.mulf %30, %34 : vector<8x8x8xf32>
    %36 = arith.truncf %35 : vector<8x8x8xf32> to vector<8x8x8xbf16>
    "tpu.trace_start"() <{level = 10 : i32, message = "bqk,bkd->bqd"}> : () -> ()
    %cst_13 = arith.constant dense<0.000000e+00> : vector<8x8x8xf32>
    %37 = tpu.matmul %36, %24, %cst_13 {dimension_numbers = #tpu.dot_dimension_numbers<[2], [1], [1], [2], [0, 0, 0, 1, 1, 2], [0], [0]>} : vector<8x8x8xbf16>, vector<8x8x8xbf16>, vector<8x8x8xf32> -> vector<8x8x8xf32>
    "tpu.trace_stop"() : () -> ()
    %38 = vector.shape_cast %37 : vector<8x8x8xf32> to vector<64x8xf32>
    %39 = arith.truncf %38 : vector<64x8xf32> to vector<64x8xbf16>
    %40 = vector.extract_strided_slice %18 {offsets = [0, 0, 0], sizes = [1, 8, 32], strides = [1, 1, 1]} : vector<4x8x32xbf16> to vector<1x8x32xbf16>
    %41 = vector.shape_cast %40 : vector<1x8x32xbf16> to vector<8x32xbf16>
    %cst_14 = arith.constant dense<0.000000e+00> : vector<64x32xf32>
    %42 = tpu.matmul %39, %41, %cst_14 {dimension_numbers = #tpu.dot_dimension_numbers<[1], [0], [0], [1], [0, 0, 1, 1], [], []>} : vector<64x8xbf16>, vector<8x32xbf16>, vector<64x32xf32> -> vector<64x32xf32>
    %43 = vector.extract_strided_slice %15 {offsets = [0, 8], sizes = [64, 8], strides = [1, 1]} : vector<64x96xbf16> to vector<64x8xbf16>
    %44 = vector.shape_cast %43 : vector<64x8xbf16> to vector<8x8x8xbf16>
    %45 = vector.extract_strided_slice %15 {offsets = [0, 40], sizes = [64, 8], strides = [1, 1]} : vector<64x96xbf16> to vector<64x8xbf16>
    %46 = vector.shape_cast %45 : vector<64x8xbf16> to vector<8x8x8xbf16>
    %47 = vector.extract_strided_slice %15 {offsets = [0, 72], sizes = [64, 8], strides = [1, 1]} : vector<64x96xbf16> to vector<64x8xbf16>
    %48 = vector.shape_cast %47 : vector<64x8xbf16> to vector<8x8x8xbf16>
    "tpu.trace_start"() <{level = 10 : i32, message = "bqd,bkd->bqk"}> : () -> ()
    %cst_15 = arith.constant dense<0.000000e+00> : vector<8x8x8xf32>
    %49 = tpu.matmul %44, %46, %cst_15 {dimension_numbers = #tpu.dot_dimension_numbers<[2], [2], [1], [1], [0, 0, 0, 1, 1, 1], [0], [0]>} : vector<8x8x8xbf16>, vector<8x8x8xbf16>, vector<8x8x8xf32> -> vector<8x8x8xf32>
    "tpu.trace_stop"() : () -> ()
    %cst_16 = arith.constant dense<0xFF800000> : vector<8x8xf32>
    %50 = vector.multi_reduction <maximumf>, %49, %cst_16 [2] : vector<8x8x8xf32> to vector<8x8xf32>
    %51 = vector.shape_cast %50 : vector<8x8xf32> to vector<8x8x1xf32>
    %52 = vector.broadcast %51 : vector<8x8x1xf32> to vector<8x8x8xf32>
    %53 = arith.subf %49, %52 : vector<8x8x8xf32>
    %54 = math.exp %53 : vector<8x8x8xf32>
    %cst_17 = arith.constant dense<0.000000e+00> : vector<8x8xf32>
    %55 = vector.multi_reduction <add>, %54, %cst_17 [2] : vector<8x8x8xf32> to vector<8x8xf32>
    %56 = vector.shape_cast %55 : vector<8x8xf32> to vector<8x8x1xf32>
    %57 = tpu.reciprocal %56 {approx = true} : vector<8x8x1xf32> -> vector<8x8x1xf32>
    %58 = vector.broadcast %57 : vector<8x8x1xf32> to vector<8x8x8xf32>
    %59 = arith.mulf %54, %58 : vector<8x8x8xf32>
    %60 = arith.truncf %59 : vector<8x8x8xf32> to vector<8x8x8xbf16>
    "tpu.trace_start"() <{level = 10 : i32, message = "bqk,bkd->bqd"}> : () -> ()
    %cst_18 = arith.constant dense<0.000000e+00> : vector<8x8x8xf32>
    %61 = tpu.matmul %60, %48, %cst_18 {dimension_numbers = #tpu.dot_dimension_numbers<[2], [1], [1], [2], [0, 0, 0, 1, 1, 2], [0], [0]>} : vector<8x8x8xbf16>, vector<8x8x8xbf16>, vector<8x8x8xf32> -> vector<8x8x8xf32>
    "tpu.trace_stop"() : () -> ()
    %62 = vector.shape_cast %61 : vector<8x8x8xf32> to vector<64x8xf32>
    %63 = arith.truncf %62 : vector<64x8xf32> to vector<64x8xbf16>
    %64 = vector.extract_strided_slice %18 {offsets = [1, 0, 0], sizes = [1, 8, 32], strides = [1, 1, 1]} : vector<4x8x32xbf16> to vector<1x8x32xbf16>
    %65 = vector.shape_cast %64 : vector<1x8x32xbf16> to vector<8x32xbf16>
    %cst_19 = arith.constant dense<0.000000e+00> : vector<64x32xf32>
    %66 = tpu.matmul %63, %65, %cst_19 {dimension_numbers = #tpu.dot_dimension_numbers<[1], [0], [0], [1], [0, 0, 1, 1], [], []>} : vector<64x8xbf16>, vector<8x32xbf16>, vector<64x32xf32> -> vector<64x32xf32>
    %67 = arith.addf %42, %66 : vector<64x32xf32>
    %68 = vector.extract_strided_slice %15 {offsets = [0, 16], sizes = [64, 8], strides = [1, 1]} : vector<64x96xbf16> to vector<64x8xbf16>
    %69 = vector.shape_cast %68 : vector<64x8xbf16> to vector<8x8x8xbf16>
    %70 = vector.extract_strided_slice %15 {offsets = [0, 48], sizes = [64, 8], strides = [1, 1]} : vector<64x96xbf16> to vector<64x8xbf16>
    %71 = vector.shape_cast %70 : vector<64x8xbf16> to vector<8x8x8xbf16>
    %72 = vector.extract_strided_slice %15 {offsets = [0, 80], sizes = [64, 8], strides = [1, 1]} : vector<64x96xbf16> to vector<64x8xbf16>
    %73 = vector.shape_cast %72 : vector<64x8xbf16> to vector<8x8x8xbf16>
    "tpu.trace_start"() <{level = 10 : i32, message = "bqd,bkd->bqk"}> : () -> ()
    %cst_20 = arith.constant dense<0.000000e+00> : vector<8x8x8xf32>
    %74 = tpu.matmul %69, %71, %cst_20 {dimension_numbers = #tpu.dot_dimension_numbers<[2], [2], [1], [1], [0, 0, 0, 1, 1, 1], [0], [0]>} : vector<8x8x8xbf16>, vector<8x8x8xbf16>, vector<8x8x8xf32> -> vector<8x8x8xf32>
    "tpu.trace_stop"() : () -> ()
    %cst_21 = arith.constant dense<0xFF800000> : vector<8x8xf32>
    %75 = vector.multi_reduction <maximumf>, %74, %cst_21 [2] : vector<8x8x8xf32> to vector<8x8xf32>
    %76 = vector.shape_cast %75 : vector<8x8xf32> to vector<8x8x1xf32>
    %77 = vector.broadcast %76 : vector<8x8x1xf32> to vector<8x8x8xf32>
    %78 = arith.subf %74, %77 : vector<8x8x8xf32>
    %79 = math.exp %78 : vector<8x8x8xf32>
    %cst_22 = arith.constant dense<0.000000e+00> : vector<8x8xf32>
    %80 = vector.multi_reduction <add>, %79, %cst_22 [2] : vector<8x8x8xf32> to vector<8x8xf32>
    %81 = vector.shape_cast %80 : vector<8x8xf32> to vector<8x8x1xf32>
    %82 = tpu.reciprocal %81 {approx = true} : vector<8x8x1xf32> -> vector<8x8x1xf32>
    %83 = vector.broadcast %82 : vector<8x8x1xf32> to vector<8x8x8xf32>
    %84 = arith.mulf %79, %83 : vector<8x8x8xf32>
    %85 = arith.truncf %84 : vector<8x8x8xf32> to vector<8x8x8xbf16>
    "tpu.trace_start"() <{level = 10 : i32, message = "bqk,bkd->bqd"}> : () -> ()
    %cst_23 = arith.constant dense<0.000000e+00> : vector<8x8x8xf32>
    %86 = tpu.matmul %85, %73, %cst_23 {dimension_numbers = #tpu.dot_dimension_numbers<[2], [1], [1], [2], [0, 0, 0, 1, 1, 2], [0], [0]>} : vector<8x8x8xbf16>, vector<8x8x8xbf16>, vector<8x8x8xf32> -> vector<8x8x8xf32>
    "tpu.trace_stop"() : () -> ()
    %87 = vector.shape_cast %86 : vector<8x8x8xf32> to vector<64x8xf32>
    %88 = arith.truncf %87 : vector<64x8xf32> to vector<64x8xbf16>
    %89 = vector.extract_strided_slice %18 {offsets = [2, 0, 0], sizes = [1, 8, 32], strides = [1, 1, 1]} : vector<4x8x32xbf16> to vector<1x8x32xbf16>
    %90 = vector.shape_cast %89 : vector<1x8x32xbf16> to vector<8x32xbf16>
    %cst_24 = arith.constant dense<0.000000e+00> : vector<64x32xf32>
    %91 = tpu.matmul %88, %90, %cst_24 {dimension_numbers = #tpu.dot_dimension_numbers<[1], [0], [0], [1], [0, 0, 1, 1], [], []>} : vector<64x8xbf16>, vector<8x32xbf16>, vector<64x32xf32> -> vector<64x32xf32>
    %92 = arith.addf %67, %91 : vector<64x32xf32>
    %93 = vector.extract_strided_slice %15 {offsets = [0, 24], sizes = [64, 8], strides = [1, 1]} : vector<64x96xbf16> to vector<64x8xbf16>
    %94 = vector.shape_cast %93 : vector<64x8xbf16> to vector<8x8x8xbf16>
    %95 = vector.extract_strided_slice %15 {offsets = [0, 56], sizes = [64, 8], strides = [1, 1]} : vector<64x96xbf16> to vector<64x8xbf16>
    %96 = vector.shape_cast %95 : vector<64x8xbf16> to vector<8x8x8xbf16>
    %97 = vector.extract_strided_slice %15 {offsets = [0, 88], sizes = [64, 8], strides = [1, 1]} : vector<64x96xbf16> to vector<64x8xbf16>
    %98 = vector.shape_cast %97 : vector<64x8xbf16> to vector<8x8x8xbf16>
    "tpu.trace_start"() <{level = 10 : i32, message = "bqd,bkd->bqk"}> : () -> ()
    %cst_25 = arith.constant dense<0.000000e+00> : vector<8x8x8xf32>
    %99 = tpu.matmul %94, %96, %cst_25 {dimension_numbers = #tpu.dot_dimension_numbers<[2], [2], [1], [1], [0, 0, 0, 1, 1, 1], [0], [0]>} : vector<8x8x8xbf16>, vector<8x8x8xbf16>, vector<8x8x8xf32> -> vector<8x8x8xf32>
    "tpu.trace_stop"() : () -> ()
    %cst_26 = arith.constant dense<0xFF800000> : vector<8x8xf32>
    %100 = vector.multi_reduction <maximumf>, %99, %cst_26 [2] : vector<8x8x8xf32> to vector<8x8xf32>
    %101 = vector.shape_cast %100 : vector<8x8xf32> to vector<8x8x1xf32>
    %102 = vector.broadcast %101 : vector<8x8x1xf32> to vector<8x8x8xf32>
    %103 = arith.subf %99, %102 : vector<8x8x8xf32>
    %104 = math.exp %103 : vector<8x8x8xf32>
    %cst_27 = arith.constant dense<0.000000e+00> : vector<8x8xf32>
    %105 = vector.multi_reduction <add>, %104, %cst_27 [2] : vector<8x8x8xf32> to vector<8x8xf32>
    %106 = vector.shape_cast %105 : vector<8x8xf32> to vector<8x8x1xf32>
    %107 = tpu.reciprocal %106 {approx = true} : vector<8x8x1xf32> -> vector<8x8x1xf32>
    %108 = vector.broadcast %107 : vector<8x8x1xf32> to vector<8x8x8xf32>
    %109 = arith.mulf %104, %108 : vector<8x8x8xf32>
    %110 = arith.truncf %109 : vector<8x8x8xf32> to vector<8x8x8xbf16>
    "tpu.trace_start"() <{level = 10 : i32, message = "bqk,bkd->bqd"}> : () -> ()
    %cst_28 = arith.constant dense<0.000000e+00> : vector<8x8x8xf32>
    %111 = tpu.matmul %110, %98, %cst_28 {dimension_numbers = #tpu.dot_dimension_numbers<[2], [1], [1], [2], [0, 0, 0, 1, 1, 2], [0], [0]>} : vector<8x8x8xbf16>, vector<8x8x8xbf16>, vector<8x8x8xf32> -> vector<8x8x8xf32>
    "tpu.trace_stop"() : () -> ()
    %112 = vector.shape_cast %111 : vector<8x8x8xf32> to vector<64x8xf32>
    %113 = arith.truncf %112 : vector<64x8xf32> to vector<64x8xbf16>
    %114 = vector.extract_strided_slice %18 {offsets = [3, 0, 0], sizes = [1, 8, 32], strides = [1, 1, 1]} : vector<4x8x32xbf16> to vector<1x8x32xbf16>
    %115 = vector.shape_cast %114 : vector<1x8x32xbf16> to vector<8x32xbf16>
    %cst_29 = arith.constant dense<0.000000e+00> : vector<64x32xf32>
    %116 = tpu.matmul %113, %115, %cst_29 {dimension_numbers = #tpu.dot_dimension_numbers<[1], [0], [0], [1], [0, 0, 1, 1], [], []>} : vector<64x8xbf16>, vector<8x32xbf16>, vector<64x32xf32> -> vector<64x32xf32>
    %117 = arith.addf %92, %116 : vector<64x32xf32>
    %118 = arith.index_cast %arg1 : i32 to index
    %c0_30 = arith.constant 0 : index
    %c0_31 = arith.constant 0 : index
    %119 = vector.load %arg7[%118, %c0_30, %c0_31] : memref<2x1x32xf32, #tpu.memory_space<vmem>>, vector<1x1x32xf32>
    %120 = vector.shape_cast %119 : vector<1x1x32xf32> to vector<1x32xf32>
    %121 = vector.broadcast %120 : vector<1x32xf32> to vector<64x32xf32>
    %122 = arith.addf %117, %121 : vector<64x32xf32>
    %123 = arith.addf %4, %122 : vector<64x32xf32>
    %124 = arith.index_cast %arg1 : i32 to index
    %c0_32 = arith.constant 0 : index
    %c0_33 = arith.constant 0 : index
    %125 = vector.load %arg8[%124, %c0_32, %c0_33] : memref<2x1x32xf32, #tpu.memory_space<vmem>>, vector<1x1x32xf32>
    %126 = vector.shape_cast %125 : vector<1x1x32xf32> to vector<1x32xf32>
    %127 = arith.index_cast %arg1 : i32 to index
    %c0_34 = arith.constant 0 : index
    %c0_35 = arith.constant 0 : index
    %128 = vector.load %arg9[%127, %c0_34, %c0_35] : memref<2x1x32xf32, #tpu.memory_space<vmem>>, vector<1x1x32xf32>
    %129 = vector.shape_cast %128 : vector<1x1x32xf32> to vector<1x32xf32>
    %cst_36 = arith.constant dense<0.000000e+00> : vector<64xf32>
    %130 = vector.multi_reduction <add>, %123, %cst_36 [1] : vector<64x32xf32> to vector<64xf32>
    %131 = vector.shape_cast %130 : vector<64xf32> to vector<64x1xf32>
    %cst_37 = arith.constant 3.200000e+01 : f32
    %132 = vector.broadcast %cst_37 : f32 to vector<64x1xf32>
    %133 = arith.divf %131, %132 : vector<64x1xf32>
    %134 = vector.broadcast %133 : vector<64x1xf32> to vector<64x32xf32>
    %135 = arith.subf %123, %134 : vector<64x32xf32>
    %136 = arith.mulf %135, %135 : vector<64x32xf32>
    %cst_38 = arith.constant dense<0.000000e+00> : vector<64xf32>
    %137 = vector.multi_reduction <add>, %136, %cst_38 [1] : vector<64x32xf32> to vector<64xf32>
    %138 = vector.shape_cast %137 : vector<64xf32> to vector<64x1xf32>
    %cst_39 = arith.constant 3.200000e+01 : f32
    %139 = vector.broadcast %cst_39 : f32 to vector<64x1xf32>
    %140 = arith.divf %138, %139 : vector<64x1xf32>
    %141 = vector.broadcast %133 : vector<64x1xf32> to vector<64x32xf32>
    %142 = arith.subf %123, %141 : vector<64x32xf32>
    %cst_40 = arith.constant 9.99999974E-6 : f32
    %143 = vector.broadcast %cst_40 : f32 to vector<64x1xf32>
    %144 = arith.addf %140, %143 : vector<64x1xf32>
    %145 = math.rsqrt %144 : vector<64x1xf32>
    %146 = vector.broadcast %145 : vector<64x1xf32> to vector<64x32xf32>
    %147 = arith.mulf %142, %146 : vector<64x32xf32>
    %148 = vector.broadcast %126 : vector<1x32xf32> to vector<64x32xf32>
    %149 = arith.mulf %147, %148 : vector<64x32xf32>
    %150 = vector.broadcast %129 : vector<1x32xf32> to vector<64x32xf32>
    %151 = arith.addf %149, %150 : vector<64x32xf32>
    %152 = arith.truncf %151 : vector<64x32xf32> to vector<64x32xbf16>
    %153 = arith.index_cast %arg1 : i32 to index
    %c0_41 = arith.constant 0 : index
    %c0_42 = arith.constant 0 : index
    %154 = vector.load %arg10[%153, %c0_41, %c0_42] : memref<2x32x64xbf16, #tpu.memory_space<vmem>>, vector<1x32x64xbf16>
    %155 = vector.shape_cast %154 : vector<1x32x64xbf16> to vector<32x64xbf16>
    %cst_43 = arith.constant dense<0.000000e+00> : vector<64x64xf32>
    %156 = tpu.matmul %152, %155, %cst_43 {dimension_numbers = #tpu.dot_dimension_numbers<[1], [0], [0], [1], [0, 0, 1, 1], [], []>} : vector<64x32xbf16>, vector<32x64xbf16>, vector<64x64xf32> -> vector<64x64xf32>
    %157 = arith.index_cast %arg1 : i32 to index
    %c0_44 = arith.constant 0 : index
    %c0_45 = arith.constant 0 : index
    %158 = vector.load %arg11[%157, %c0_44, %c0_45] : memref<2x1x64xf32, #tpu.memory_space<vmem>>, vector<1x1x64xf32>
    %159 = vector.shape_cast %158 : vector<1x1x64xf32> to vector<1x64xf32>
    %160 = vector.broadcast %159 : vector<1x64xf32> to vector<64x64xf32>
    %161 = arith.addf %156, %160 : vector<64x64xf32>
    %cst_46 = arith.constant 0.000000e+00 : f32
    %162 = vector.broadcast %cst_46 : f32 to vector<64x64xf32>
    %163 = arith.maximumf %161, %162 : vector<64x64xf32>
    %164 = arith.truncf %163 : vector<64x64xf32> to vector<64x64xbf16>
    %165 = arith.index_cast %arg1 : i32 to index
    %c0_47 = arith.constant 0 : index
    %c0_48 = arith.constant 0 : index
    %166 = vector.load %arg12[%165, %c0_47, %c0_48] : memref<2x64x32xbf16, #tpu.memory_space<vmem>>, vector<1x64x32xbf16>
    %167 = vector.shape_cast %166 : vector<1x64x32xbf16> to vector<64x32xbf16>
    %cst_49 = arith.constant dense<0.000000e+00> : vector<64x32xf32>
    %168 = tpu.matmul %164, %167, %cst_49 {dimension_numbers = #tpu.dot_dimension_numbers<[1], [0], [0], [1], [0, 0, 1, 1], [], []>} : vector<64x64xbf16>, vector<64x32xbf16>, vector<64x32xf32> -> vector<64x32xf32>
    %169 = arith.index_cast %arg1 : i32 to index
    %c0_50 = arith.constant 0 : index
    %c0_51 = arith.constant 0 : index
    %170 = vector.load %arg13[%169, %c0_50, %c0_51] : memref<2x1x32xf32, #tpu.memory_space<vmem>>, vector<1x1x32xf32>
    %171 = vector.shape_cast %170 : vector<1x1x32xf32> to vector<1x32xf32>
    %172 = vector.broadcast %171 : vector<1x32xf32> to vector<64x32xf32>
    %173 = arith.addf %168, %172 : vector<64x32xf32>
    %174 = arith.addf %151, %173 : vector<64x32xf32>
    %175 = arith.index_cast %arg1 : i32 to index
    %c0_52 = arith.constant 0 : index
    %c0_53 = arith.constant 0 : index
    %176 = vector.load %arg14[%175, %c0_52, %c0_53] : memref<2x1x32xf32, #tpu.memory_space<vmem>>, vector<1x1x32xf32>
    %177 = vector.shape_cast %176 : vector<1x1x32xf32> to vector<1x32xf32>
    %178 = arith.index_cast %arg1 : i32 to index
    %c0_54 = arith.constant 0 : index
    %c0_55 = arith.constant 0 : index
    %179 = vector.load %arg15[%178, %c0_54, %c0_55] : memref<2x1x32xf32, #tpu.memory_space<vmem>>, vector<1x1x32xf32>
    %180 = vector.shape_cast %179 : vector<1x1x32xf32> to vector<1x32xf32>
    %cst_56 = arith.constant dense<0.000000e+00> : vector<64xf32>
    %181 = vector.multi_reduction <add>, %174, %cst_56 [1] : vector<64x32xf32> to vector<64xf32>
    %182 = vector.shape_cast %181 : vector<64xf32> to vector<64x1xf32>
    %cst_57 = arith.constant 3.200000e+01 : f32
    %183 = vector.broadcast %cst_57 : f32 to vector<64x1xf32>
    %184 = arith.divf %182, %183 : vector<64x1xf32>
    %185 = vector.broadcast %184 : vector<64x1xf32> to vector<64x32xf32>
    %186 = arith.subf %174, %185 : vector<64x32xf32>
    %187 = arith.mulf %186, %186 : vector<64x32xf32>
    %cst_58 = arith.constant dense<0.000000e+00> : vector<64xf32>
    %188 = vector.multi_reduction <add>, %187, %cst_58 [1] : vector<64x32xf32> to vector<64xf32>
    %189 = vector.shape_cast %188 : vector<64xf32> to vector<64x1xf32>
    %cst_59 = arith.constant 3.200000e+01 : f32
    %190 = vector.broadcast %cst_59 : f32 to vector<64x1xf32>
    %191 = arith.divf %189, %190 : vector<64x1xf32>
    %192 = vector.broadcast %184 : vector<64x1xf32> to vector<64x32xf32>
    %193 = arith.subf %174, %192 : vector<64x32xf32>
    %cst_60 = arith.constant 9.99999974E-6 : f32
    %194 = vector.broadcast %cst_60 : f32 to vector<64x1xf32>
    %195 = arith.addf %191, %194 : vector<64x1xf32>
    %196 = math.rsqrt %195 : vector<64x1xf32>
    %197 = vector.broadcast %196 : vector<64x1xf32> to vector<64x32xf32>
    %198 = arith.mulf %193, %197 : vector<64x32xf32>
    %199 = vector.broadcast %177 : vector<1x32xf32> to vector<64x32xf32>
    %200 = arith.mulf %198, %199 : vector<64x32xf32>
    %201 = vector.broadcast %180 : vector<1x32xf32> to vector<64x32xf32>
    %202 = arith.addf %200, %201 : vector<64x32xf32>
    %203 = vector.shape_cast %202 : vector<64x32xf32> to vector<8x8x32xf32>
    %c0_61 = arith.constant 0 : index
    %c0_62 = arith.constant 0 : index
    %c0_63 = arith.constant 0 : index
    %204 = vector.load %arg17[%c0_61, %c0_62, %c0_63] : memref<8x8x32xf32, #tpu.memory_space<vmem>>, vector<8x8x32xf32>
    tpu.vector_store %arg17[%c0_61, %c0_62, %c0_63], %203 {strides = array<i32>} : memref<8x8x32xf32, #tpu.memory_space<vmem>>, vector<8x8x32xf32>,
    %c1_i32 = arith.constant 1 : i32
    %205 = arith.cmpi eq, %arg1, %c1_i32 : i32
    %206 = arith.extui %205 : i1 to i32
    %c0_i32_64 = arith.constant 0 : i32
    %207 = arith.cmpi ne, %206, %c0_i32_64 : i32
    scf.if %207 {
      %208 = arith.truncf %203 : vector<8x8x32xf32> to vector<8x8x32xbf16>
      %c0_65 = arith.constant 0 : index
      %c0_66 = arith.constant 0 : index
      %c0_67 = arith.constant 0 : index
      %209 = vector.load %arg16[%c0_65, %c0_66, %c0_67] : memref<8x8x32xbf16, #tpu.memory_space<vmem>>, vector<8x8x32xbf16>
      tpu.vector_store %arg16[%c0_65, %c0_66, %c0_67], %208 {strides = array<i32>} : memref<8x8x32xbf16, #tpu.memory_space<vmem>>, vector<8x8x32xbf16>,
    } else {
    }
    return
  }
  func.func @transform_0(%arg0: i32, %arg1: i32) -> (i32, i32, i32) {
    %c0_i32 = arith.constant 0 : i32
    %c0_i32_0 = arith.constant 0 : i32
    %c0_i32_1 = arith.constant 0 : i32
    return %arg0, %c0_i32, %c0_i32_0 : i32, i32, i32
  }
  func.func @transform_1(%arg0: i32, %arg1: i32) -> (i32, i32) {
    %c0_i32 = arith.constant 0 : i32
    %c0_i32_0 = arith.constant 0 : i32
    %c0_i32_1 = arith.constant 0 : i32
    return %c0_i32, %c0_i32_0 : i32, i32
  }
  func.func @transform_2(%arg0: i32, %arg1: i32) -> (i32, i32, i32) {
    %c0_i32 = arith.constant 0 : i32
    %c0_i32_0 = arith.constant 0 : i32
    %c0_i32_1 = arith.constant 0 : i32
    %c0_i32_2 = arith.constant 0 : i32
    return %c0_i32, %c0_i32_0, %c0_i32_1 : i32, i32, i32
  }
  func.func @transform_3(%arg0: i32, %arg1: i32) -> (i32, i32, i32) {
    %c0_i32 = arith.constant 0 : i32
    %c0_i32_0 = arith.constant 0 : i32
    %c0_i32_1 = arith.constant 0 : i32
    %c0_i32_2 = arith.constant 0 : i32
    return %c0_i32, %c0_i32_0, %c0_i32_1 : i32, i32, i32
  }
  func.func @transform_4(%arg0: i32, %arg1: i32) -> (i32, i32, i32, i32) {
    %c0_i32 = arith.constant 0 : i32
    %c0_i32_0 = arith.constant 0 : i32
    %c0_i32_1 = arith.constant 0 : i32
    %c0_i32_2 = arith.constant 0 : i32
    %c0_i32_3 = arith.constant 0 : i32
    return %c0_i32, %c0_i32_0, %c0_i32_1, %c0_i32_2 : i32, i32, i32, i32
  }
  func.func @transform_5(%arg0: i32, %arg1: i32) -> (i32, i32, i32) {
    %c0_i32 = arith.constant 0 : i32
    %c0_i32_0 = arith.constant 0 : i32
    %c0_i32_1 = arith.constant 0 : i32
    %c0_i32_2 = arith.constant 0 : i32
    return %c0_i32, %c0_i32_0, %c0_i32_1 : i32, i32, i32
  }
  func.func @transform_6(%arg0: i32, %arg1: i32) -> (i32, i32, i32) {
    %c0_i32 = arith.constant 0 : i32
    %c0_i32_0 = arith.constant 0 : i32
    %c0_i32_1 = arith.constant 0 : i32
    %c0_i32_2 = arith.constant 0 : i32
    return %c0_i32, %c0_i32_0, %c0_i32_1 : i32, i32, i32
  }
  func.func @transform_7(%arg0: i32, %arg1: i32) -> (i32, i32, i32) {
    %c0_i32 = arith.constant 0 : i32
    %c0_i32_0 = arith.constant 0 : i32
    %c0_i32_1 = arith.constant 0 : i32
    %c0_i32_2 = arith.constant 0 : i32
    return %c0_i32, %c0_i32_0, %c0_i32_1 : i32, i32, i32
  }
  func.func @transform_8(%arg0: i32, %arg1: i32) -> (i32, i32, i32) {
    %c0_i32 = arith.constant 0 : i32
    %c0_i32_0 = arith.constant 0 : i32
    %c0_i32_1 = arith.constant 0 : i32
    %c0_i32_2 = arith.constant 0 : i32
    return %c0_i32, %c0_i32_0, %c0_i32_1 : i32, i32, i32
  }
  func.func @transform_9(%arg0: i32, %arg1: i32) -> (i32, i32, i32) {
    %c0_i32 = arith.constant 0 : i32
    %c0_i32_0 = arith.constant 0 : i32
    %c0_i32_1 = arith.constant 0 : i32
    %c0_i32_2 = arith.constant 0 : i32
    return %c0_i32, %c0_i32_0, %c0_i32_1 : i32, i32, i32
  }
  func.func @transform_10(%arg0: i32, %arg1: i32) -> (i32, i32, i32) {
    %c0_i32 = arith.constant 0 : i32
    %c0_i32_0 = arith.constant 0 : i32
    %c0_i32_1 = arith.constant 0 : i32
    %c0_i32_2 = arith.constant 0 : i32
    return %c0_i32, %c0_i32_0, %c0_i32_1 : i32, i32, i32
  }
  func.func @transform_11(%arg0: i32, %arg1: i32) -> (i32, i32, i32) {
    %c0_i32 = arith.constant 0 : i32
    %c0_i32_0 = arith.constant 0 : i32
    %c0_i32_1 = arith.constant 0 : i32
    %c0_i32_2 = arith.constant 0 : i32
    return %c0_i32, %c0_i32_0, %c0_i32_1 : i32, i32, i32
  }
  func.func @transform_12(%arg0: i32, %arg1: i32) -> (i32, i32, i32) {
    %c0_i32 = arith.constant 0 : i32
    %c0_i32_0 = arith.constant 0 : i32
    %c0_i32_1 = arith.constant 0 : i32
    %c0_i32_2 = arith.constant 0 : i32
    return %c0_i32, %c0_i32_0, %c0_i32_1 : i32, i32, i32
  }
  func.func @transform_13(%arg0: i32, %arg1: i32) -> (i32, i32, i32) {
    %c0_i32 = arith.constant 0 : i32
    %c0_i32_0 = arith.constant 0 : i32
    %c0_i32_1 = arith.constant 0 : i32
    %c0_i32_2 = arith.constant 0 : i32
    return %c0_i32, %c0_i32_0, %c0_i32_1 : i32, i32, i32
  }
  func.func @transform_14(%arg0: i32, %arg1: i32) -> (i32, i32, i32) {
    %c0_i32 = arith.constant 0 : i32
    %c0_i32_0 = arith.constant 0 : i32
    %c0_i32_1 = arith.constant 0 : i32
    return %arg0, %c0_i32, %c0_i32_0 : i32, i32, i32
  }
}

module attributes {stable_mosaic.version = 11 : i64} {
  func.func @prelu_linear_kernel(%arg0: i32, %arg1: memref<128x32xbf16, #tpu.memory_space<vmem>>, %arg2: memref<1xf32, #tpu.memory_space<smem>>, %arg3: memref<32x16xbf16, #tpu.memory_space<vmem>>, %arg4: memref<1x16xf32, #tpu.memory_space<vmem>>, %arg5: memref<128x16xf32, #tpu.memory_space<vmem>>) attributes {dimension_semantics = [#tpu.dimension_semantics<parallel>], iteration_bounds = array<i64: 1>, scalar_prefetch = 0 : i64, scratch_operands = 0 : i64, tpu.core_type = #tpu.core_type<tc>, window_params = [{transform_indices = @transform_0, window_bounds = array<i64: 128, 32>}, {transform_indices = @transform_1, window_bounds = array<i64: 1>}, {pipeline_mode = #tpu.pipeline_mode<synchronous>, transform_indices = @transform_2, window_bounds = array<i64: 32, 16>}, {pipeline_mode = #tpu.pipeline_mode<synchronous>, transform_indices = @transform_3, window_bounds = array<i64: 1, 16>}, {transform_indices = @transform_4, window_bounds = array<i64: 128, 16>}]} {
    %c0 = arith.constant 0 : index
    %c0_0 = arith.constant 0 : index
    %0 = vector.load %arg1[%c0, %c0_0] : memref<128x32xbf16, #tpu.memory_space<vmem>>, vector<128x32xbf16>
    %1 = arith.extf %0 : vector<128x32xbf16> to vector<128x32xf32>
    %c0_1 = arith.constant 0 : index
    %2 = memref.load %arg2[%c0_1] : memref<1xf32, #tpu.memory_space<smem>>
    %cst = arith.constant 0.000000e+00 : f32
    %3 = vector.broadcast %cst : f32 to vector<128x32xf32>
    %4 = arith.cmpf oge, %1, %3 : vector<128x32xf32>
    %5 = vector.broadcast %2 : f32 to vector<128x32xf32>
    %6 = arith.mulf %5, %1 : vector<128x32xf32>
    %7 = arith.select %4, %1, %6 : vector<128x32xi1>, vector<128x32xf32>
    %8 = arith.truncf %7 : vector<128x32xf32> to vector<128x32xbf16>
    %c0_2 = arith.constant 0 : index
    %c0_3 = arith.constant 0 : index
    %9 = vector.load %arg3[%c0_2, %c0_3] : memref<32x16xbf16, #tpu.memory_space<vmem>>, vector<32x16xbf16>
    %cst_4 = arith.constant dense<0.000000e+00> : vector<128x16xf32>
    %10 = tpu.matmul %8, %9, %cst_4 {dimension_numbers = #tpu.dot_dimension_numbers<[1], [0], [0], [1], [0, 0, 1, 1], [], []>} : vector<128x32xbf16>, vector<32x16xbf16>, vector<128x16xf32> -> vector<128x16xf32>
    %c0_5 = arith.constant 0 : index
    %c0_6 = arith.constant 0 : index
    %11 = vector.load %arg4[%c0_5, %c0_6] : memref<1x16xf32, #tpu.memory_space<vmem>>, vector<1x16xf32>
    %12 = vector.broadcast %11 : vector<1x16xf32> to vector<128x16xf32>
    %13 = arith.addf %10, %12 : vector<128x16xf32>
    %c0_7 = arith.constant 0 : index
    %c0_8 = arith.constant 0 : index
    %14 = vector.load %arg5[%c0_7, %c0_8] : memref<128x16xf32, #tpu.memory_space<vmem>>, vector<128x16xf32>
    tpu.vector_store %arg5[%c0_7, %c0_8], %13 {strides = array<i32>} : memref<128x16xf32, #tpu.memory_space<vmem>>, vector<128x16xf32>,
    return
  }
  func.func @transform_0(%arg0: i32) -> (i32, i32) {
    %c0_i32 = arith.constant 0 : i32
    %c0_i32_0 = arith.constant 0 : i32
    return %arg0, %c0_i32 : i32, i32
  }
  func.func @transform_1(%arg0: i32) -> i32 {
    %c0_i32 = arith.constant 0 : i32
    %c0_i32_0 = arith.constant 0 : i32
    return %c0_i32 : i32
  }
  func.func @transform_2(%arg0: i32) -> (i32, i32) {
    %c0_i32 = arith.constant 0 : i32
    %c0_i32_0 = arith.constant 0 : i32
    %c0_i32_1 = arith.constant 0 : i32
    return %c0_i32, %c0_i32_0 : i32, i32
  }
  func.func @transform_3(%arg0: i32) -> (i32, i32) {
    %c0_i32 = arith.constant 0 : i32
    %c0_i32_0 = arith.constant 0 : i32
    %c0_i32_1 = arith.constant 0 : i32
    return %c0_i32, %c0_i32_0 : i32, i32
  }
  func.func @transform_4(%arg0: i32) -> (i32, i32) {
    %c0_i32 = arith.constant 0 : i32
    %c0_i32_0 = arith.constant 0 : i32
    return %arg0, %c0_i32 : i32, i32
  }
}

module attributes {stable_mosaic.version = 11 : i64} {
  func.func @linear_kernel(%arg0: i32, %arg1: memref<72x16xf32, #tpu.memory_space<vmem>>, %arg2: memref<16x32xbf16, #tpu.memory_space<vmem>>, %arg3: memref<1x32xf32, #tpu.memory_space<vmem>>, %arg4: memref<72x32xf32, #tpu.memory_space<vmem>>) attributes {dimension_semantics = [#tpu.dimension_semantics<parallel>], iteration_bounds = array<i64: 1>, scalar_prefetch = 0 : i64, scratch_operands = 0 : i64, tpu.core_type = #tpu.core_type<tc>, window_params = [{transform_indices = @transform_0, window_bounds = array<i64: 72, 16>}, {pipeline_mode = #tpu.pipeline_mode<synchronous>, transform_indices = @transform_1, window_bounds = array<i64: 16, 32>}, {pipeline_mode = #tpu.pipeline_mode<synchronous>, transform_indices = @transform_2, window_bounds = array<i64: 1, 32>}, {transform_indices = @transform_3, window_bounds = array<i64: 72, 32>}]} {
    %c0 = arith.constant 0 : index
    %c0_0 = arith.constant 0 : index
    %0 = vector.load %arg1[%c0, %c0_0] : memref<72x16xf32, #tpu.memory_space<vmem>>, vector<72x16xf32>
    %1 = arith.truncf %0 : vector<72x16xf32> to vector<72x16xbf16>
    %c0_1 = arith.constant 0 : index
    %c0_2 = arith.constant 0 : index
    %2 = vector.load %arg2[%c0_1, %c0_2] : memref<16x32xbf16, #tpu.memory_space<vmem>>, vector<16x32xbf16>
    %cst = arith.constant dense<0.000000e+00> : vector<72x32xf32>
    %3 = tpu.matmul %1, %2, %cst {dimension_numbers = #tpu.dot_dimension_numbers<[1], [0], [0], [1], [0, 0, 1, 1], [], []>} : vector<72x16xbf16>, vector<16x32xbf16>, vector<72x32xf32> -> vector<72x32xf32>
    %c0_3 = arith.constant 0 : index
    %c0_4 = arith.constant 0 : index
    %4 = vector.load %arg3[%c0_3, %c0_4] : memref<1x32xf32, #tpu.memory_space<vmem>>, vector<1x32xf32>
    %5 = vector.broadcast %4 : vector<1x32xf32> to vector<72x32xf32>
    %6 = arith.addf %3, %5 : vector<72x32xf32>
    %c0_5 = arith.constant 0 : index
    %c0_6 = arith.constant 0 : index
    %7 = vector.load %arg4[%c0_5, %c0_6] : memref<72x32xf32, #tpu.memory_space<vmem>>, vector<72x32xf32>
    tpu.vector_store %arg4[%c0_5, %c0_6], %6 {strides = array<i32>} : memref<72x32xf32, #tpu.memory_space<vmem>>, vector<72x32xf32>,
    return
  }
  func.func @transform_0(%arg0: i32) -> (i32, i32) {
    %c0_i32 = arith.constant 0 : i32
    %c0_i32_0 = arith.constant 0 : i32
    return %arg0, %c0_i32 : i32, i32
  }
  func.func @transform_1(%arg0: i32) -> (i32, i32) {
    %c0_i32 = arith.constant 0 : i32
    %c0_i32_0 = arith.constant 0 : i32
    %c0_i32_1 = arith.constant 0 : i32
    return %c0_i32, %c0_i32_0 : i32, i32
  }
  func.func @transform_2(%arg0: i32) -> (i32, i32) {
    %c0_i32 = arith.constant 0 : i32
    %c0_i32_0 = arith.constant 0 : i32
    %c0_i32_1 = arith.constant 0 : i32
    return %c0_i32, %c0_i32_0 : i32, i32
  }
  func.func @transform_3(%arg0: i32) -> (i32, i32) {
    %c0_i32 = arith.constant 0 : i32
    %c0_i32_0 = arith.constant 0 : i32
    return %arg0, %c0_i32 : i32, i32
  }
}

</mosaic_0001>

<bundles_post_ra>
// kernel: sepformer_forward.5
= control target key start
LH: loop header
LB: loop body
LE: loop exit
PB: predicated region body
PF: predicated region fallthrough
CT: control target
= control target key end

     0   :  { %vm51_vm0 = vcmask 130048   ;;  %vm125_vm1 = vcmask 261120   ;;  %s309_s1 = inlined_call_operand.vmem [shape: bf16[16,32], index: 1, kind: input, shape index: {}]   ;;  %s310_s0 = inlined_call_operand.vmem [shape: f32[128,16], index: 0, kind: input, shape index: {}]   ;;  %s311_s2 = inlined_call_operand.vmem [shape: f32[1,32], index: 2, kind: input, shape index: {}]   ;;  %s312_s3 = inlined_call_operand.vmem [shape: f32[128,32], index: 3, kind: output, shape index: {}]  }
   0x1   :  { %v158_v0 = vld [vmem:[%s309_s1] sm:$0xff]  ;;  %v16_v2 = vld [vmem:[%s310_s0 + $0x8] sm:$0xff]  ;;  %v17_v13 = vld [vmem:[%s310_s0 + $0x10] sm:$0xff] }
   0x2   :  { %v15_v1 = vld [vmem:[%s310_s0] sm:$0xff]  ;;  %v20_v5 = vld [vmem:[%s310_s0 + $0x28] sm:$0xff]  ;;  %83 = vmatpush.bf16.msra.mxu0 %v158_v0  ;;  %159 = vmatpush.bf16.msra.mxu1 %v158_v0  ;;  %v18_v14 = vld [vmem:[%s310_s0 + $0x18] sm:$0xff] }
   0x3   :  { %v31_v3 = vpack.c.bf16 %v16_v2, %v15_v1  ;;  %v19_v4 = vld [vmem:[%s310_s0 + $0x20] sm:$0xff]  ;;  %v24_v8 = vld [vmem:[%s310_s0 + $0x48] sm:$0xff]  ;;  %160 = vmatpush.bf16.msra.mxu2 %v158_v0  ;;  %161 = vmatpush.bf16.msra.mxu3 %v158_v0  ;;  %v21_v15 = vld [vmem:[%s310_s0 + $0x30] sm:$0xff]  ;;  %v32_v21 = vpack.c.bf16 %v18_v14, %v17_v13 }
   0x4   :  { %v23_v6 = vld [vmem:[%s310_s0 + $0x40] sm:$0xff]  ;;  %v33_v7 = vpack.c.bf16 %v20_v5, %v19_v4  ;;  %v28_v10 = vld [vmem:[%s310_s0 + $0x68] sm:$0xff]  ;;  %v22_v16 = vld [vmem:[%s310_s0 + $0x38] sm:$0xff] }
   0x5   :  { %v27_v9 = vld [vmem:[%s310_s0 + $0x60] sm:$0xff]  ;;  %v35_v11 = vpack.c.bf16 %v24_v8, %v23_v6  ;;  %150 = vmatmul.msk.bf16.vlgmr.msra.gmra.mxu0 %vm51_vm0, %v31_v3  ;;  %v25_v17 = vld [vmem:[%s310_s0 + $0x50] sm:$0xff]  ;;  %v26_v18 = vld [vmem:[%s310_s0 + $0x58] sm:$0xff]  ;;  %v34_v22 = vpack.c.bf16 %v22_v16, %v21_v15 }
   0x6   :  { %v37_v12 = vpack.c.bf16 %v28_v10, %v27_v9  ;;  %152 = vmatmul.msk.bf16.vlgmr.msra.gmra.mxu1 %vm51_vm0, %v33_v7  ;;  %v29_v19 = vld [vmem:[%s310_s0 + $0x70] sm:$0xff]  ;;  %v30_v20 = vld [vmem:[%s310_s0 + $0x78] sm:$0xff]  ;;  %v36_v23 = vpack.c.bf16 %v26_v18, %v25_v17  ;;  %v162_v25 = vld [vmem:[%s311_s2] ss:$0 sm:$0xff] }
   0x7   :  { %154 = vmatmul.msk.bf16.vlgmr.msra.gmra.mxu2 %vm51_vm0, %v35_v11  ;;  %v38_v24 = vpack.c.bf16 %v30_v20, %v29_v19 }
   0x8   :  { %156 = vmatmul.msk.bf16.vlgmr.msra.gmra.mxu3 %vm51_vm0, %v37_v12 }
  0x15   :  { %151 = vmatmul.msk.bf16.gmra.mxu0 %vm51_vm0, %v32_v21 }
  0x16   :  { %153 = vmatmul.msk.bf16.gmra.mxu1 %vm51_vm0, %v34_v22 }
  0x17   :  { %155 = vmatmul.msk.bf16.gmra.mxu2 %vm51_vm0, %v36_v23 }
  0x18   :  { %157 = vmatmul.msk.bf16.gmra.mxu3 %vm51_vm0, %v38_v24 }
  0x82   :  { %v85_v26 = vpop.f32.mrf.mxu0 }
  0x83   :  { %v95_v27 = vpop.f32.mrf.mxu1  ;;  %v86_v28 = vadd.f32 %v162_v25, %v85_v26 }
  0x84   :  { %v96_v29 = vadd.f32 %v162_v25, %v95_v27 }
  0x85   :  { %126 = vst.msk [vmem:[%s312_s3] sm:$0xff] %vm125_vm1, %v86_v28 }
  0x86   :  { %130 = vst.msk [vmem:[%s312_s3 + $0x20] sm:$0xff] %vm125_vm1, %v96_v29 }
  0x8a   :  { %v105_v30 = vpop.f32.mrf.mxu2  ;;  %v87_v34 = vpop.f32.mrf.mxu0 }
  0x8b   :  { %v115_v31 = vpop.f32.mrf.mxu3  ;;  %v106_v32 = vadd.f32 %v162_v25, %v105_v30  ;;  %v97_v35 = vpop.f32.mrf.mxu1  ;;  %v88_v36 = vadd.f32 %v162_v25, %v87_v34 }
  0x8c   :  { %v116_v33 = vadd.f32 %v162_v25, %v115_v31  ;;  %v98_v37 = vadd.f32 %v162_v25, %v97_v35 }
  0x8d   :  { %134 = vst.msk [vmem:[%s312_s3 + $0x40] sm:$0xff] %vm125_vm1, %v106_v32 }
  0x8e   :  { %138 = vst.msk [vmem:[%s312_s3 + $0x60] sm:$0xff] %vm125_vm1, %v116_v33 }
  0x8f   :  { %127 = vst.msk [vmem:[%s312_s3 + $0x8] sm:$0xff] %vm125_vm1, %v88_v36 }
  0x90   :  { %131 = vst.msk [vmem:[%s312_s3 + $0x28] sm:$0xff] %vm125_vm1, %v98_v37 }
  0x92   :  { %v107_v38 = vpop.f32.mrf.mxu2  ;;  %v90_v42 = vpop.f32.mrf.mxu0 }
  0x93   :  { %v117_v39 = vpop.f32.mrf.mxu3  ;;  %v108_v40 = vadd.f32 %v162_v25, %v107_v38  ;;  %v100_v43 = vpop.f32.mrf.mxu1  ;;  %v91_v44 = vadd.f32 %v162_v25, %v90_v42 }
  0x94   :  { %v118_v41 = vadd.f32 %v162_v25, %v117_v39  ;;  %v101_v45 = vadd.f32 %v162_v25, %v100_v43 }
  0x95   :  { %135 = vst.msk [vmem:[%s312_s3 + $0x48] sm:$0xff] %vm125_vm1, %v108_v40 }
  0x96   :  { %139 = vst.msk [vmem:[%s312_s3 + $0x68] sm:$0xff] %vm125_vm1, %v118_v41 }
  0x97   :  { %128 = vst.msk [vmem:[%s312_s3 + $0x10] sm:$0xff] %vm125_vm1, %v91_v44 }
  0x98   :  { %132 = vst.msk [vmem:[%s312_s3 + $0x30] sm:$0xff] %vm125_vm1, %v101_v45 }
  0x9a   :  { %v110_v46 = vpop.f32.mrf.mxu2  ;;  %v92_v50 = vpop.f32.mrf.mxu0 }
  0x9b   :  { %v120_v47 = vpop.f32.mrf.mxu3  ;;  %v111_v48 = vadd.f32 %v162_v25, %v110_v46  ;;  %v102_v51 = vpop.f32.mrf.mxu1  ;;  %v93_v52 = vadd.f32 %v162_v25, %v92_v50 }
  0x9c   :  { %v121_v49 = vadd.f32 %v162_v25, %v120_v47  ;;  %v103_v53 = vadd.f32 %v162_v25, %v102_v51 }
  0x9d   :  { %136 = vst.msk [vmem:[%s312_s3 + $0x50] sm:$0xff] %vm125_vm1, %v111_v48 }
  0x9e   :  { %140 = vst.msk [vmem:[%s312_s3 + $0x70] sm:$0xff] %vm125_vm1, %v121_v49 }
  0x9f   :  { %129 = vst.msk [vmem:[%s312_s3 + $0x18] sm:$0xff] %vm125_vm1, %v93_v52 }
  0xa0   :  { %133 = vst.msk [vmem:[%s312_s3 + $0x38] sm:$0xff] %vm125_vm1, %v103_v53 }
  0xa2   :  { %v112_v54 = vpop.f32.mrf.mxu2 }
  0xa3   :  { %v122_v55 = vpop.f32.mrf.mxu3  ;;  %v113_v56 = vadd.f32 %v162_v25, %v112_v54 }
  0xa4   :  { %v123_v57 = vadd.f32 %v162_v25, %v122_v55 }
  0xa5   :  { %137 = vst.msk [vmem:[%s312_s3 + $0x58] sm:$0xff] %vm125_vm1, %v113_v56 }
  0xa6   :  { %141 = vst.msk [vmem:[%s312_s3 + $0x78] sm:$0xff] %vm125_vm1, %v123_v57 }

// kernel: sepformer_forward.8
= control target key start
LH: loop header
LB: loop body
LE: loop exit
PB: predicated region body
PF: predicated region fallthrough
CT: control target
= control target key end

     0   :  { %vm129_vm0 = vcmask 261120   ;;  %s441_s2 = inlined_call_operand.vmem [shape: bf16[32,16], index: 2, kind: input, shape index: {}]   ;;  %s442_s0 = inlined_call_operand.vmem [shape: bf16[128,32], index: 0, kind: input, shape index: {}]   ;;  %s443_s1 = inlined_call_operand.<no memory space> [shape: f32[1], index: 1, kind: input, shape index: {}]   ;;  %s444_s3 = inlined_call_operand.vmem [shape: f32[1,16], index: 3, kind: input, shape index: {}]   ;;  %s445_s4 = inlined_call_operand.vmem [shape: f32[128,16], index: 4, kind: output, shape index: {}]  }
   0x1   :  { %v241_v0 = vld [vmem:[%s441_s2 + $0x8] sm:$0xff]  ;;  %v243_v1 = vld [vmem:[%s442_s0] sm:$0xff]   ;;  %v322_v2 = vstv %s443_s1  ;;  %v275_v5 = vld [vmem:[%s442_s0 + $0x10] sm:$0xff]  }
   0x2   :  { %v244_v3 = vunpack.c.l.bf16 %v243_v1  ;;  %v245_v4 = vunpack.c.h.bf16 %v243_v1  ;;  %v277_v6 = vld [vmem:[%s442_s0 + $0x20] sm:$0xff]   ;;  %160 = vmatpush.bf16.msra.mxu0 %v241_v0  ;;  %281 = vmatpush.bf16.msra.mxu1 %v241_v0  ;;  %v252_v8 = vunpack.c.l.bf16 %v275_v5  ;;  %v253_v9 = vunpack.c.h.bf16 %v275_v5  ;;  %v279_v14 = vld [vmem:[%s442_s0 + $0x30] sm:$0xff]   ;;  %v274_v19 = vld [vmem:[%s442_s0 + $0x8] sm:$0xff]  }
   0x3   :  { %v240_v7 = vld [vmem:[%s441_s2] sm:$0xff]  ;;  %v260_v10 = vunpack.c.l.bf16 %v277_v6  ;;  %v261_v11 = vunpack.c.h.bf16 %v277_v6  ;;  %282 = vmatpush.bf16.msra.mxu2 %v241_v0  ;;  %283 = vmatpush.bf16.msra.mxu3 %v241_v0  ;;  %v268_v23 = vunpack.c.l.bf16 %v279_v14  ;;  %v269_v27 = vunpack.c.h.bf16 %v279_v14  ;;  %v276_v31 = vld [vmem:[%s442_s0 + $0x18] sm:$0xff]   ;;  %v278_v37 = vld [vmem:[%s442_s0 + $0x28] sm:$0xff]  }
   0x4   :  { %vm52_vm1 = vcmp.ge.f32.partialorder %v244_v3, 0.0  ;;  %vm53_vm2 = vcmp.ge.f32.partialorder %v245_v4, 0.0  ;;  %v69_v12 = vmul.f32 %v244_v3, %v322_v2  ;;  %v70_v13 = vmul.f32 %v245_v4, %v322_v2  ;;  %v280_v46 = vld [vmem:[%s442_s0 + $0x38] sm:$0xff]  }
   0x5   :  { %vm56_vm3 = vcmp.ge.f32.partialorder %v252_v8, 0.0  ;;  %vm57_vm4 = vcmp.ge.f32.partialorder %v253_v9, 0.0  ;;  %v73_v15 = vmul.f32 %v252_v8, %v322_v2  ;;  %v74_v16 = vmul.f32 %v253_v9, %v322_v2 }
   0x6   :  { %v85_v17 = vsel %vm52_vm1, %v244_v3, %v69_v12  ;;  %v86_v18 = vsel %vm53_vm2, %v245_v4, %v70_v13  ;;  %vm60_vm5 = vcmp.ge.f32.partialorder %v260_v10, 0.0  ;;  %vm61_vm6 = vcmp.ge.f32.partialorder %v261_v11, 0.0  ;;  %161 = vmatpush.bf16.msra.mxu0 %v240_v7  ;;  %284 = vmatpush.bf16.msra.mxu1 %v240_v7 }
   0x7   :  { %v101_v20 = vpack.c.bf16 %v86_v18, %v85_v17  ;;  %v89_v21 = vsel %vm56_vm3, %v252_v8, %v73_v15  ;;  %v90_v22 = vsel %vm57_vm4, %v253_v9, %v74_v16  ;;  %285 = vmatpush.bf16.msra.mxu2 %v240_v7  ;;  %286 = vmatpush.bf16.msra.mxu3 %v240_v7  ;;  %vm64_vm7 = vcmp.ge.f32.partialorder %v268_v23, 0.0 }
   0x8   :  { %v103_v24 = vpack.c.bf16 %v90_v22, %v89_v21  ;;  %v77_v25 = vmul.f32 %v260_v10, %v322_v2  ;;  %v78_v26 = vmul.f32 %v261_v11, %v322_v2  ;;  %v81_v28 = vmul.f32 %v268_v23, %v322_v2 }
   0x9   :  { %v248_v29 = vunpack.c.l.bf16 %v274_v19  ;;  %v249_v30 = vunpack.c.h.bf16 %v274_v19  ;;  %232 = vmatmul.msk.bf16.vlgmr.msra.gmra.mxu0 %vm129_vm0, %v101_v20  ;;  %vm65_vm8 = vcmp.ge.f32.partialorder %v269_v27, 0.0  ;;  %v82_v34 = vmul.f32 %v269_v27, %v322_v2 }
   0xa   :  { %234 = vmatmul.msk.bf16.vlgmr.msra.gmra.mxu1 %vm129_vm0, %v103_v24  ;;  %v93_v32 = vsel %vm60_vm5, %v260_v10, %v77_v25  ;;  %v94_v33 = vsel %vm61_vm6, %v261_v11, %v78_v26  ;;  %v97_v36 = vsel %vm64_vm7, %v268_v23, %v81_v28  ;;  %v256_v39 = vunpack.c.l.bf16 %v276_v31 }
   0xb   :  { %v105_v35 = vpack.c.bf16 %v94_v33, %v93_v32  ;;  %v98_v38 = vsel %vm65_vm8, %v269_v27, %v82_v34  ;;  %v257_v41 = vunpack.c.h.bf16 %v276_v31  ;;  %v71_v42 = vmul.f32 %v248_v29, %v322_v2 }
   0xc   :  { %v107_v40 = vpack.c.bf16 %v98_v38, %v97_v36  ;;  %v72_v43 = vmul.f32 %v249_v30, %v322_v2  ;;  %v264_v44 = vunpack.c.l.bf16 %v278_v37  ;;  %v265_v45 = vunpack.c.h.bf16 %v278_v37 }
   0xd   :  { %236 = vmatmul.msk.bf16.vlgmr.msra.gmra.mxu2 %vm129_vm0, %v105_v35  ;;  %vm54_vm9 = vcmp.ge.f32.partialorder %v248_v29, 0.0  ;;  %vm55_vm10 = vcmp.ge.f32.partialorder %v249_v30, 0.0  ;;  %v75_v47 = vmul.f32 %v256_v39, %v322_v2  ;;  %v76_v48 = vmul.f32 %v257_v41, %v322_v2 }
   0xe   :  { %238 = vmatmul.msk.bf16.vlgmr.msra.gmra.mxu3 %vm129_vm0, %v107_v40  ;;  %vm58_vm11 = vcmp.ge.f32.partialorder %v256_v39, 0.0  ;;  %vm59_vm12 = vcmp.ge.f32.partialorder %v257_v41, 0.0  ;;  %v272_v49 = vunpack.c.l.bf16 %v280_v46  ;;  %v273_v50 = vunpack.c.h.bf16 %v280_v46 }
   0xf   :  { %v87_v51 = vsel %vm54_vm9, %v248_v29, %v71_v42  ;;  %v88_v52 = vsel %vm55_vm10, %v249_v30, %v72_v43  ;;  %v79_v53 = vmul.f32 %v264_v44, %v322_v2  ;;  %v80_v54 = vmul.f32 %v265_v45, %v322_v2 }
  0x10   :  { %v91_v55 = vsel %vm58_vm11, %v256_v39, %v75_v47  ;;  %v92_v56 = vsel %vm59_vm12, %v257_v41, %v76_v48  ;;  %vm62_vm13 = vcmp.ge.f32.partialorder %v264_v44, 0.0  ;;  %vm63_vm14 = vcmp.ge.f32.partialorder %v265_v45, 0.0 }
  0x11   :  { %v83_v57 = vmul.f32 %v272_v49, %v322_v2  ;;  %v84_v58 = vmul.f32 %v273_v50, %v322_v2  ;;  %vm66_vm15 = vcmp.ge.f32.partialorder %v272_v49, 0.0  ;;  %vm67_vm1 = vcmp.ge.f32.partialorder %v273_v50, 0.0  ;;  %v287_v2 = vld [vmem:[%s444_s3] ss:$0 sm:$0xff] }
  0x12   :  { %v102_v59 = vpack.c.bf16 %v88_v52, %v87_v51  ;;  %v104_v60 = vpack.c.bf16 %v92_v56, %v91_v55  ;;  %v95_v61 = vsel %vm62_vm13, %v264_v44, %v79_v53  ;;  %v96_v62 = vsel %vm63_vm14, %v265_v45, %v80_v54 }
  0x13   :  { %v99_v63 = vsel %vm66_vm15, %v272_v49, %v83_v57  ;;  %v100_v0 = vsel %vm67_vm1, %v273_v50, %v84_v58  ;;  %v106_v1 = vpack.c.bf16 %v96_v62, %v95_v61  ;;  %vm203_vm2 = vcmask 130048  }
  0x14   :  { %v108_v3 = vpack.c.bf16 %v100_v0, %v99_v63 }
  0x19   :  { %233 = vmatmul.msk.bf16.gmra.mxu0 %vm129_vm0, %v102_v59 }
  0x1a   :  { %235 = vmatmul.msk.bf16.gmra.mxu1 %vm129_vm0, %v104_v60 }
  0x1d   :  { %237 = vmatmul.msk.bf16.gmra.mxu2 %vm129_vm0, %v106_v1 }
  0x1e   :  { %239 = vmatmul.msk.bf16.gmra.mxu3 %vm129_vm0, %v108_v3 }
  0x86   :  { %v163_v4 = vpop.f32.mrf.mxu0 }
  0x87   :  { %v173_v5 = vpop.f32.mrf.mxu1  ;;  %v164_v6 = vadd.f32 %v287_v2, %v163_v4 }
  0x88   :  { %v174_v7 = vadd.f32 %v287_v2, %v173_v5 }
  0x89   :  { %204 = vst.msk [vmem:[%s445_s4] sm:$0xff] %vm203_vm2, %v164_v6 }
  0x8a   :  { %208 = vst.msk [vmem:[%s445_s4 + $0x20] sm:$0xff] %vm203_vm2, %v174_v7 }
  0x8e   :  { %v165_v8 = vpop.f32.mrf.mxu0 }
  0x8f   :  { %v175_v9 = vpop.f32.mrf.mxu1  ;;  %v166_v11 = vadd.f32 %v287_v2, %v165_v8 }
  0x90   :  { %v183_v10 = vpop.f32.mrf.mxu2  ;;  %v176_v12 = vadd.f32 %v287_v2, %v175_v9 }
  0x91   :  { %v184_v13 = vadd.f32 %v287_v2, %v183_v10  ;;  %v193_v14 = vpop.f32.mrf.mxu3  ;;  %205 = vst.msk [vmem:[%s445_s4 + $0x8] sm:$0xff] %vm203_vm2, %v166_v11 }
  0x92   :  { %v194_v15 = vadd.f32 %v287_v2, %v193_v14  ;;  %209 = vst.msk [vmem:[%s445_s4 + $0x28] sm:$0xff] %vm203_vm2, %v176_v12 }
  0x93   :  { %212 = vst.msk [vmem:[%s445_s4 + $0x40] sm:$0xff] %vm203_vm2, %v184_v13 }
  0x94   :  { %216 = vst.msk [vmem:[%s445_s4 + $0x60] sm:$0xff] %vm203_vm2, %v194_v15 }
  0x96   :  { %v168_v16 = vpop.f32.mrf.mxu0 }
  0x97   :  { %v178_v17 = vpop.f32.mrf.mxu1  ;;  %v169_v19 = vadd.f32 %v287_v2, %v168_v16 }
  0x98   :  { %v185_v18 = vpop.f32.mrf.mxu2  ;;  %v179_v20 = vadd.f32 %v287_v2, %v178_v17 }
  0x99   :  { %v186_v21 = vadd.f32 %v287_v2, %v185_v18  ;;  %v195_v22 = vpop.f32.mrf.mxu3  ;;  %206 = vst.msk [vmem:[%s445_s4 + $0x10] sm:$0xff] %vm203_vm2, %v169_v19 }
  0x9a   :  { %v196_v23 = vadd.f32 %v287_v2, %v195_v22  ;;  %210 = vst.msk [vmem:[%s445_s4 + $0x30] sm:$0xff] %vm203_vm2, %v179_v20 }
  0x9b   :  { %213 = vst.msk [vmem:[%s445_s4 + $0x48] sm:$0xff] %vm203_vm2, %v186_v21 }
  0x9c   :  { %217 = vst.msk [vmem:[%s445_s4 + $0x68] sm:$0xff] %vm203_vm2, %v196_v23 }
  0x9e   :  { %v170_v24 = vpop.f32.mrf.mxu0 }
  0x9f   :  { %v180_v25 = vpop.f32.mrf.mxu1  ;;  %v171_v27 = vadd.f32 %v287_v2, %v170_v24 }
  0xa0   :  { %v188_v26 = vpop.f32.mrf.mxu2  ;;  %v181_v28 = vadd.f32 %v287_v2, %v180_v25 }
  0xa1   :  { %v189_v29 = vadd.f32 %v287_v2, %v188_v26  ;;  %v198_v30 = vpop.f32.mrf.mxu3  ;;  %207 = vst.msk [vmem:[%s445_s4 + $0x18] sm:$0xff] %vm203_vm2, %v171_v27 }
  0xa2   :  { %v199_v31 = vadd.f32 %v287_v2, %v198_v30  ;;  %211 = vst.msk [vmem:[%s445_s4 + $0x38] sm:$0xff] %vm203_vm2, %v181_v28 }
  0xa3   :  { %214 = vst.msk [vmem:[%s445_s4 + $0x50] sm:$0xff] %vm203_vm2, %v189_v29 }
  0xa4   :  { %218 = vst.msk [vmem:[%s445_s4 + $0x70] sm:$0xff] %vm203_vm2, %v199_v31 }
  0xa8   :  { %v190_v32 = vpop.f32.mrf.mxu2 }
  0xa9   :  { %v191_v33 = vadd.f32 %v287_v2, %v190_v32  ;;  %v200_v34 = vpop.f32.mrf.mxu3 }
  0xaa   :  { %v201_v35 = vadd.f32 %v287_v2, %v200_v34 }
  0xab   :  { %215 = vst.msk [vmem:[%s445_s4 + $0x58] sm:$0xff] %vm203_vm2, %v191_v33 }
  0xac   :  { %219 = vst.msk [vmem:[%s445_s4 + $0x78] sm:$0xff] %vm203_vm2, %v201_v35 }

// kernel: sepformer_forward.9
= control target key start
LH: loop header
LB: loop body
LE: loop exit
PB: predicated region body
PF: predicated region fallthrough
CT: control target
= control target key end

     0   :  { %vm41_vm0 = vcmask 130048   ;;  %vm90_vm1 = vcmask 261120   ;;  %s212_s1 = inlined_call_operand.vmem [shape: bf16[16,32], index: 1, kind: input, shape index: {}]   ;;  %s213_s0 = inlined_call_operand.vmem [shape: f32[72,16], index: 0, kind: input, shape index: {}]   ;;  %s214_s2 = inlined_call_operand.vmem [shape: f32[1,32], index: 2, kind: input, shape index: {}]   ;;  %s215_s3 = inlined_call_operand.vmem [shape: f32[72,32], index: 3, kind: output, shape index: {}]  }
   0x1   :  { %v113_v0 = vld [vmem:[%s212_s1] sm:$0xff]  ;;  %v20_v2 = vld [vmem:[%s213_s0 + $0x28] sm:$0xff]  ;;  %v17_v9 = vld [vmem:[%s213_s0 + $0x10] sm:$0xff] }
   0x2   :  { %v19_v1 = vld [vmem:[%s213_s0 + $0x20] sm:$0xff]  ;;  %v16_v6 = vld [vmem:[%s213_s0 + $0x8] sm:$0xff]  ;;  %115 = vmatpush.bf16.msra.mxu2 %v113_v0  ;;  %116 = vmatpush.bf16.msra.mxu3 %v113_v0  ;;  %v18_v10 = vld [vmem:[%s213_s0 + $0x18] sm:$0xff] }
   0x3   :  { %v26_v3 = vpack.c.bf16 %v20_v2, %v19_v1  ;;  %v23_v4 = vld [vmem:[%s213_s0 + $0x40] sm:$0xff]  ;;  %64 = vmatpush.bf16.msra.mxu0 %v113_v0  ;;  %114 = vmatpush.bf16.msra.mxu1 %v113_v0  ;;  %v25_v11 = vpack.c.bf16 %v18_v10, %v17_v9  ;;  %v21_v12 = vld [vmem:[%s213_s0 + $0x30] sm:$0xff]  ;;  %v22_v13 = vld [vmem:[%s213_s0 + $0x38] sm:$0xff] }
   0x4   :  { %v15_v5 = vld [vmem:[%s213_s0] sm:$0xff]  ;;  %v28_v7 = vpack.c.bf16 %v23_v4, %v23_v4  ;;  %v27_v14 = vpack.c.bf16 %v22_v13, %v21_v12 }
   0x5   :  { %v24_v8 = vpack.c.bf16 %v16_v6, %v15_v5  ;;  %110 = vmatmul.msk.bf16.vlgmr.msra.gmra.mxu2 %vm41_vm0, %v26_v3  ;;  %v117_v15 = vld [vmem:[%s214_s2] ss:$0 sm:$0xff] }
   0x6   :  { %112 = vmatmul.msk.bf16.vlgmr.msra.gmra.mxu3 %vm41_vm0, %v28_v7  ;;  %109 = vmatmul.msk.bf16.vlgmr.msra.gmra.mxu1 %vm41_vm0, %v25_v11 }
   0x7   :  { %108 = vmatmul.msk.bf16.vlgmr.msra.gmra.mxu0 %vm41_vm0, %v24_v8 }
  0x15   :  { %111 = vmatmul.msk.bf16.gmra.mxu2 %vm41_vm0, %v27_v14 }
  0x83   :  { %v71_v17 = vpop.f32.mrf.mxu1 }
  0x84   :  { %v66_v16 = vpop.f32.mrf.mxu0  ;;  %v72_v19 = vadd.f32 %v117_v15, %v71_v17 }
  0x85   :  { %v67_v18 = vadd.f32 %v117_v15, %v66_v16 }
  0x86   :  { %93 = vst.msk [vmem:[%s215_s3 + $0x10] sm:$0xff] %vm90_vm1, %v72_v19 }
  0x87   :  { %91 = vst.msk [vmem:[%s215_s3] sm:$0xff] %vm90_vm1, %v67_v18 }
  0x88   :  { %v76_v20 = vpop.f32.mrf.mxu2 }
  0x89   :  { %v86_v21 = vpop.f32.mrf.mxu3  ;;  %v77_v22 = vadd.f32 %v117_v15, %v76_v20 }
  0x8a   :  { %v87_v23 = vadd.f32 %v117_v15, %v86_v21 }
  0x8b   :  { %95 = vst.msk [vmem:[%s215_s3 + $0x20] sm:$0xff] %vm90_vm1, %v77_v22  ;;  %v73_v25 = vpop.f32.mrf.mxu1 }
  0x8c   :  { %v68_v24 = vpop.f32.mrf.mxu0  ;;  %99 = vst.msk [vmem:[%s215_s3 + $0x40] sm:$0xff] %vm90_vm1, %v87_v23  ;;  %v74_v27 = vadd.f32 %v117_v15, %v73_v25 }
  0x8d   :  { %v69_v26 = vadd.f32 %v117_v15, %v68_v24 }
  0x8e   :  { %94 = vst.msk [vmem:[%s215_s3 + $0x18] sm:$0xff] %vm90_vm1, %v74_v27 }
  0x8f   :  { %92 = vst.msk [vmem:[%s215_s3 + $0x8] sm:$0xff] %vm90_vm1, %v69_v26 }
  0x90   :  { %v78_v28 = vpop.f32.mrf.mxu2 }
  0x91   :  { %v88_v29 = vpop.f32.mrf.mxu3  ;;  %v79_v30 = vadd.f32 %v117_v15, %v78_v28 }
  0x93   :  { %96 = vst.msk [vmem:[%s215_s3 + $0x28] sm:$0xff] %vm90_vm1, %v79_v30 }
  0x98   :  { %v81_v31 = vpop.f32.mrf.mxu2 }
  0x99   :  { %v82_v32 = vadd.f32 %v117_v15, %v81_v31 }
  0x9b   :  { %97 = vst.msk [vmem:[%s215_s3 + $0x30] sm:$0xff] %vm90_vm1, %v82_v32 }
  0xa0   :  { %v83_v33 = vpop.f32.mrf.mxu2 }
  0xa1   :  { %v84_v34 = vadd.f32 %v117_v15, %v83_v33 }
  0xa3   :  { %98 = vst.msk [vmem:[%s215_s3 + $0x38] sm:$0xff] %vm90_vm1, %v84_v34 }

// kernel: sepformer_forward.7
= control target key start
LH: loop header
LB: loop body
LE: loop exit
PB: predicated region body
PF: predicated region fallthrough
CT: control target
= control target key end

     0   :  { %s3872_s29 = smov 0   ;;  %s3874_s30 = smov 0   ;;  %s5069_s0 = inlined_call_operand.vmem [shape: bf16[16,8,32], index: 0, kind: input, shape index: {}]   ;;  %s5070_s1 = inlined_call_operand.vmem [shape: f32[8,32], index: 1, kind: input, shape index: {}]   ;;  %s5071_s2 = inlined_call_operand.vmem [shape: bf16[2,32,96], index: 2, kind: input, shape index: {}]   ;;  %s5072_s3 = inlined_call_operand.vmem [shape: f32[2,1,96], index: 3, kind: input, shape index: {}]   ;;  %s5073_s4 = inlined_call_operand.vmem [shape: bf16[2,4,8,32], index: 4, kind: input, shape index: {}]   ;;  %s5074_s5 = inlined_call_operand.vmem [shape: f32[2,1,32], index: 5, kind: input, shape index: {}]   ;;  %s5075_s6 = inlined_call_operand.vmem [shape: f32[2,1,32], index: 6, kind: input, shape index: {}]   ;;  %s5076_s7 = inlined_call_operand.vmem [shape: f32[2,1,32], index: 7, kind: input, shape index: {}]   ;;  %s5077_s8 = inlined_call_operand.vmem [shape: bf16[2,32,64], index: 8, kind: input, shape index: {}]   ;;  %s5078_s9 = inlined_call_operand.vmem [shape: f32[2,1,64], index: 9, kind: input, shape index: {}]   ;;  %s5079_s10 = inlined_call_operand.vmem [shape: bf16[2,64,32], index: 10, kind: input, shape index: {}]   ;;  %s5080_s11 = inlined_call_operand.vmem [shape: f32[2,1,32], index: 11, kind: input, shape index: {}]   ;;  %s5081_s12 = inlined_call_operand.vmem [shape: f32[2,1,32], index: 12, kind: input, shape index: {}]   ;;  %s5082_s13 = inlined_call_operand.vmem [shape: f32[2,1,32], index: 13, kind: input, shape index: {}]   ;;  %s5083_s14 = inlined_call_operand.vmem [shape: bf16[16,8,32], index: 14, kind: output, shape index: {}]  }
   0x1   :  { %s3876_s15 = smov 0   ;;  %s3878_s16 = smov 0  }
   0x2   :  { %s3880_s17 = smov 0  }
   0x3 LB: > { %s33_s18 = sadd.s32 1, %s3775_s15  ;;  %s36_s19 = sadd.s32 1, %s3779_s16  ;;  %s3783_s17 = sphi %s3880_s17, %s24_s17   ;;  %s3779_s16 = sphi %s3878_s16, %s5089_s16   ;;  %s3775_s15 = sphi %s3876_s15, %s5088_s15   ;;  %s3771_s30 = sphi %s3874_s30, %s5087_s30   ;;  %s3767_s29 = sphi %s3872_s29, %s5086_s29  }
   0x4   : > { %p34_p0 = scmp.ge.s32.totalorder %s33_s18, 2  ;;  %p3343_p1 = scmp.ge.s32.totalorder %s3783_s17, 1 }
   0x5   : > { %p425_p2 = scmp.lt.s32.totalorder %s3783_s17, 5 }
   0x6   : > { %s5091_s18 = smov (%p34_p0, %s33_s18), 0  ;;  %s5093_s19 = smov (!%p34_p0, %s36_s19), %s3779_s16 }
   0x7   : > { %p426_p3 = pnand %p3343_p1, %p425_p2  ;;  %p38_p4 = scmp.ge.s32.totalorder %s5093_s19, 2 }
   0x8   : > { %s3344_s20 = sshll.u32 (!%p426_p3), %s3771_s30, 3  ;;  %p3348_p6 = scmp.ne.s32.totalorder (!%p426_p3), %s3767_s29, 0 }
   0x9   : > { %s5095_s19 = smov (%p38_p4, %s5093_s19), 0  ;;  %429 = sbr.rel (%p426_p3) target bundleno = 3272 (0xcc8), region = 76 }
   0xa   : > { %5084 = sst [smem:[#allocation3_spill]] %s5095_s19  ;;  %p472_p5 = scmp.lt.s32.totalorder (!%p426_p3), %s3344_s20, 15 }
   0xe   : > { %s5097_s20 = smov (!%p472_p5, %s3344_s20), 15  ;;  %487 = sbr.rel (%p3348_p6) target bundleno = 32 (0x20), region = 80 }
   0xf   : > { %s3345_s21 = sshll.u32 %s5097_s20, 2 }
  0x10   : > { %s475_s24 = scalar_lea.vmem %s5069_s0, %s3345_s21  ;;  %s3910_s27 = scalar_lea.vmem %s5083_s14, %s3345_s21 }
  0x13   : > { %v3495_v0 = vld [vmem:[%s475_s24] sm:$0xff]   ;;  %v3510_v2 = vld [vmem:[%s475_s24 + $0x8] sm:$0xff]   ;;  %v3511_v7 = vld [vmem:[%s475_s24 + $0x10] sm:$0xff]   ;;  %vm513_vm0 = vcmask 261120  }
  0x14   : > { %v504_v1 = vld [vmem:[%s5070_s1] sm:$0xff]  ;;  %v3496_v3 = vunpack.c.l.bf16 %v3495_v0  ;;  %v3497_v4 = vunpack.c.h.bf16 %v3495_v0  ;;  %v3500_v5 = vunpack.c.l.bf16 %v3510_v2  ;;  %v3501_v6 = vunpack.c.h.bf16 %v3510_v2  ;;  %v3512_v8 = vld [vmem:[%s475_s24 + $0x18] sm:$0xff]  }
  0x15   : > { %v3504_v9 = vunpack.c.l.bf16 %v3511_v7  ;;  %v3505_v10 = vunpack.c.h.bf16 %v3511_v7  ;;  %v3508_v14 = vunpack.c.l.bf16 %v3512_v8  ;;  %v3509_v16 = vunpack.c.h.bf16 %v3512_v8 }
  0x16   : > { %v505_v11 = vadd.f32 %v3496_v3, %v504_v1  ;;  %v506_v12 = vadd.f32 %v3497_v4, %v504_v1  ;;  %v507_v13 = vadd.f32 %v3500_v5, %v504_v1  ;;  %v508_v15 = vadd.f32 %v3501_v6, %v504_v1 }
  0x17   : > { %v509_v17 = vadd.f32 %v3504_v9, %v504_v1  ;;  %v510_v18 = vadd.f32 %v3505_v10, %v504_v1  ;;  %v511_v19 = vadd.f32 %v3508_v14, %v504_v1  ;;  %v512_v20 = vadd.f32 %v3509_v16, %v504_v1 }
  0x18   : > { %514 = vst.msk [vmem:[#allocation2] sm:$0xff] %vm513_vm0, %v505_v11 }
  0x19   : > { %515 = vst.msk [vmem:[#allocation2 + $0x8] sm:$0xff] %vm513_vm0, %v506_v12 }
  0x1a   : > { %516 = vst.msk [vmem:[#allocation2 + $0x10] sm:$0xff] %vm513_vm0, %v507_v13 }
  0x1b   : > { %517 = vst.msk [vmem:[#allocation2 + $0x18] sm:$0xff] %vm513_vm0, %v508_v15 }
  0x1c   : > { %518 = vst.msk [vmem:[#allocation2 + $0x20] sm:$0xff] %vm513_vm0, %v509_v17 }
  0x1d   : > { %519 = vst.msk [vmem:[#allocation2 + $0x28] sm:$0xff] %vm513_vm0, %v510_v18 }
  0x1e   : > { %520 = vst.msk [vmem:[#allocation2 + $0x30] sm:$0xff] %vm513_vm0, %v511_v19 }
  0x1f   : > { %521 = vst.msk [vmem:[#allocation2 + $0x38] sm:$0xff] %vm513_vm0, %v512_v20 }
  0x20 PF: > { %s3925_s30 = sshll.u32 %s3767_s29, 4  ;;  %s541_s24 = scalar_lea.vmem %s5072_s3, %s3767_s29  ;;  %v522_v22 = vld [vmem:[#allocation2] sm:$0xff]  ;;  %v523_v23 = vld [vmem:[#allocation2 + $0x8] sm:$0xff]  ;;  %vm558_vm1 = vcmask 261120   ;;  %vm619_vm2 = vcmask 64512   ;;  %vm908_vm3 = vcmask 1043456  }
  0x21   : > { %s536_s21 = scalar_lea.vmem %s5071_s2, %s3925_s30  ;;  %v524_v25 = vld [vmem:[#allocation2 + $0x10] sm:$0xff]  ;;  %v530_v27 = vpack.c.bf16 %v523_v23, %v522_v22  ;;  %v3567_v35 = vld [vmem:[%s541_s24] ss:$0 sm:$0xff]  ;;  %s3785_s25 = smov 96  }
  0x22   : > { %v3484_v21 = vld [vmem:[%s536_s21 + $0x8] sm:$0xff]  ;;  %v3483_v24 = vld [vmem:[%s536_s21] sm:$0xff]  ;;  %v525_v26 = vld [vmem:[#allocation2 + $0x18] sm:$0xff]  ;;  %s3786_s26 = smov 64   ;;  %s3787_s28 = smov 88  }
  0x23   : > { %577 = vmatpush.bf16.msra.mxu0 %v3484_v21  ;;  %3513 = vmatpush.bf16.msra.mxu3 %v3484_v21  ;;  %v531_v28 = vpack.c.bf16 %v525_v26, %v524_v25  ;;  %v526_v29 = vld [vmem:[#allocation2 + $0x20] sm:$0xff]  ;;  %s3788_s19 = smov 120   ;;  %s3789_s20 = smov 56  }
  0x24   : > { %v527_v30 = vld [vmem:[#allocation2 + $0x28] sm:$0xff]  ;;  %s3790_s21 = smov 80   ;;  %s3791_s22 = smov 112  }
  0x25   : > { %v532_v31 = vpack.c.bf16 %v527_v30, %v526_v29  ;;  %v528_v32 = vld [vmem:[#allocation2 + $0x30] sm:$0xff]  ;;  %s3792_s23 = smov 48   ;;  %s3793_s24 = smov 72  }
  0x26   : > { %v529_v33 = vld [vmem:[#allocation2 + $0x38] sm:$0xff]  ;;  %p3479_p7 = scmp.ne.s32.totalorder %s3767_s29, 1 }
  0x27   : > { %578 = vmatpush.bf16.msra.mxu0 %v3483_v24  ;;  %3514 = vmatpush.bf16.msra.mxu3 %v3483_v24  ;;  %v533_v34 = vpack.c.bf16 %v529_v33, %v528_v32 }
  0x2a   : > { %3359 = vmatmul.msk.bf16.vlgmr.msra.gmra.mxu0 %vm558_vm1, %v530_v27  ;;  %3360 = vmatmul.msk.bf16.vlgmr.msra.gmra.mxu3 %vm558_vm1, %v531_v28 }
  0x3a   : > { %3361 = vmatmul.msk.bf16.gmra.mxu3 %vm558_vm1, %v532_v31 }
  0x4a   : > { %3362 = vmatmul.msk.bf16.gmra.mxu3 %vm558_vm1, %v533_v34 }
  0xa7   : > { %v580_v36 = vpop.f32.mrf.mxu0 }
  0xa8   : > { %v581_v37 = vadd.f32 %v3567_v35, %v580_v36 }
  0xaa   : > { %v600_v38 = vpack.c.bf16 %v581_v37, %v581_v37 }
  0xac   : > { %v615_v39 = vunpack.c.l.b16 %v600_v38 }
  0xad   : > { %v585_v40 = vpop.f32.mrf.mxu3 }
  0xae   : > { %v3939_v41 = vpack.c.b16 %v615_v39, %v615_v39  ;;  %v586_v42 = vadd.f32 %v3567_v35, %v585_v40 }
  0xaf   : > { %v582_v2 = vpop.f32.mrf.mxu0 }
  0xb0   : > { %v602_v43 = vpack.c.bf16 %v586_v42, %v586_v42  ;;  %617 = vrot.lane.b32.xlu0 %v3939_v41, %s3785_s25  ;;  %v583_v5 = vadd.f32 %v3567_v35, %v582_v2 }
  0xb2   : > { %v664_v44 = vunpack.c.l.b16 %v602_v43  ;;  %v601_v8 = vpack.c.bf16 %v583_v5, %v583_v5 }
  0xb4   : > { %v3943_v45 = vpack.c.b16 %v664_v44, %v664_v44  ;;  %v640_v10 = vunpack.c.l.b16 %v601_v8 }
  0xb5   : > { %v587_v46 = vpop.f32.mrf.mxu3 }
  0xb6   : > { %v588_v47 = vadd.f32 %v3567_v35, %v587_v46  ;;  %v3973_v11 = vpack.c.b16 %v640_v10, %v640_v10 }
  0xb8   : > { %v603_v48 = vpack.c.bf16 %v588_v47, %v588_v47  ;;  %666 = vrot.lane.b32.xlu0 %v3943_v45, %s3785_s25 }
  0xba   : > { %v688_v49 = vunpack.c.l.b16 %v603_v48 }
  0xbc   : > { %v3947_v50 = vpack.c.b16 %v688_v49, %v688_v49 }
  0xbd   : > { %v590_v51 = vpop.f32.mrf.mxu3 }
  0xbe   : > { %v591_v52 = vadd.f32 %v3567_v35, %v590_v51  ;;  %690 = vrot.lane.b32.xlu1 %v3947_v50, %s3785_s25 }
  0xc0   : > { %v604_v53 = vpack.c.bf16 %v591_v52, %v591_v52  ;;  %903 = vrot.lane.b32.xlu0 %v3939_v41, %s3786_s26 }
  0xc2   : > { %v712_v54 = vunpack.c.l.b16 %v604_v53 }
  0xc4   : > { %v3953_v55 = vpack.c.b16 %v712_v54, %v712_v54 }
  0xc5   : > { %v592_v56 = vpop.f32.mrf.mxu3 }
  0xc6   : > { %v593_v57 = vadd.f32 %v3567_v35, %v592_v56  ;;  %714 = vrot.lane.b32.xlu1 %v3953_v55, %s3785_s25 }
  0xc8   : > { %v605_v58 = vpack.c.bf16 %v593_v57, %v593_v57  ;;  %967 = vrot.lane.b32.xlu0 %v3947_v50, %s3786_s26 }
  0xca   : > { %v736_v59 = vunpack.c.l.b16 %v605_v58 }
  0xcc   : > { %v3959_v60 = vpack.c.b16 %v736_v59, %v736_v59 }
  0xcd   : > { %v595_v61 = vpop.f32.mrf.mxu3 }
  0xce   : > { %v596_v62 = vadd.f32 %v3567_v35, %v595_v61  ;;  %738 = vrot.lane.b32.xlu1 %v3959_v60, %s3785_s25 }
  0xd0   : > { %v606_v63 = vpack.c.bf16 %v596_v62, %v596_v62 }
  0xd2   : > { %v760_v0 = vunpack.c.l.b16 %v606_v63 }
  0xd4   : > { %v3963_v1 = vpack.c.b16 %v760_v0, %v760_v0 }
  0xd5   : > { %v597_v3 = vpop.f32.mrf.mxu3 }
  0xd6   : > { %v598_v4 = vadd.f32 %v3567_v35, %v597_v3  ;;  %762 = vrot.lane.b32.xlu2 %v3963_v1, %s3785_s25  ;;  %946 = vrot.lane.b32.xlu1 %v3943_v45, %s3786_s26 }
  0xd8   : > { %v607_v6 = vpack.c.bf16 %v598_v4, %v598_v4 }
  0xda   : > { %v784_v7 = vunpack.c.l.b16 %v607_v6 }
  0xdc   : > { %v3969_v9 = vpack.c.b16 %v784_v7, %v784_v7 }
  0xde   : > { %786 = vrot.lane.b32.xlu2 %v3969_v9, %s3785_s25 }
  0xe6   : > { %642 = vrot.lane.b32.xlu2 %v3973_v11, %s3785_s25 }
 0x122   : > { %v618_v12 = vpop.permute.xlu0 %617 }
 0x123   : > { %v624_v13 = vsel %vm619_vm2, %v618_v12, 0 }
 0x124   : > { %633 = vmatpush.bf16.xpose.msrb.mxu0 %v624_v13 }
 0x12a   : > { %v667_v14 = vpop.permute.xlu0 %666 }
 0x12b   : > { %3364 = vmatmul.msk.bf16.vlgmr.msrb.gmra.mxu0 %vm619_vm2, %v600_v38  ;;  %v672_v15 = vsel %vm619_vm2, %v667_v14, 0 }
 0x12c   : > { %681 = vmatpush.bf16.xpose.msrb.mxu3 %v672_v15 }
 0x130   : > { %v763_v16 = vpop.permute.xlu2 %762  ;;  %v691_v17 = vpop.permute.xlu1 %690 }
 0x131   : > { %v696_v18 = vsel %vm619_vm2, %v691_v17, 0  ;;  %v768_v19 = vsel %vm619_vm2, %v763_v16, 0 }
 0x132   : > { %705 = vmatpush.bf16.xpose.msra.mxu1 %v696_v18  ;;  %v904_v24 = vpop.permute.xlu0 %903 }
 0x133   : > { %3366 = vmatmul.msk.bf16.vlgmr.msrb.gmra.mxu3 %vm619_vm2, %v602_v43  ;;  %v910_v29 = vsel %vm908_vm3, %v904_v24, 0 }
 0x138   : > { %v787_v20 = vpop.permute.xlu2 %786  ;;  %v715_v21 = vpop.permute.xlu1 %714 }
 0x139   : > { %3367 = vmatmul.msk.bf16.vlgmr.msra.gmra.mxu1 %vm619_vm2, %v603_v48  ;;  %v720_v22 = vsel %vm619_vm2, %v715_v21, 0  ;;  %v792_v23 = vsel %vm619_vm2, %v787_v20, 0 }
 0x13a   : > { %777 = vmatpush.bf16.xpose.msrb.mxu1 %v768_v19  ;;  %729 = vmatpush.bf16.xpose.msra.mxu2 %v720_v22  ;;  %v968_v30 = vpop.permute.xlu0 %967 }
 0x13b   : > { %v973_v33 = vsel %vm908_vm3, %v968_v30, 0 }
 0x140   : > { %v739_v25 = vpop.permute.xlu1 %738  ;;  %v643_v26 = vpop.permute.xlu2 %642 }
 0x141   : > { %v744_v27 = vsel %vm619_vm2, %v739_v25, 0  ;;  %v648_v28 = vsel %vm619_vm2, %v643_v26, 0  ;;  %3368 = vmatmul.msk.bf16.vlgmr.msra.gmra.mxu2 %vm619_vm2, %v604_v53 }
 0x142   : > { %801 = vmatpush.bf16.xpose.msrb.mxu2 %v792_v23  ;;  %657 = vmatpush.bf16.xpose.msra.mxu0 %v648_v28 }
 0x143   : > { %753 = vmatpush.bf16.xpose.msra.mxu3 %v744_v27 }
 0x148   : > { %v947_v31 = vpop.permute.xlu1 %946 }
 0x149   : > { %v952_v32 = vsel %vm908_vm3, %v947_v31, 0  ;;  %3365 = vmatmul.msk.bf16.vlgmr.msra.gmra.mxu0 %vm619_vm2, %v601_v8  ;;  %3370 = vmatmul.msk.bf16.vlgmr.msrb.gmra.mxu1 %vm619_vm2, %v606_v63 }
 0x14a   : > { %3369 = vmatmul.msk.bf16.vlgmr.msra.gmra.mxu3 %vm619_vm2, %v605_v58  ;;  %961 = vmatpush.bf16.msra.mxu2 %v952_v32 }
 0x14b   : > { %919 = vmatpush.bf16.msrb.mxu3 %v910_v29 }
 0x14f   : > { %982 = vmatpush.bf16.msra.mxu3 %v973_v33 }
 0x151   : > { %3371 = vmatmul.msk.bf16.vlgmr.msrb.gmra.mxu2 %vm619_vm2, %v607_v6 }
 0x1a8   : > { %v635_v34 = vpop.f32.mrf.mxu0 }
 0x1a9   : > { %v807_v35 = vsel %vm619_vm2, %v635_v34, -inf }
 0x1aa   : > { %808 = vmax.xlane.f32.xlu0 %v807_v35 }
 0x1b0   : > { %v637_v36 = vpop.f32.mrf.mxu0 }
 0x1b6   : > { %v683_v37 = vpop.f32.mrf.mxu3  ;;  %v707_v38 = vpop.f32.mrf.mxu1 }
 0x1b7   : > { %v816_v39 = vsel %vm619_vm2, %v707_v38, -inf  ;;  %v813_v40 = vsel %vm619_vm2, %v683_v37, -inf }
 0x1b8   : > { %817 = vmax.xlane.f32.xlu2 %v816_v39  ;;  %814 = vmax.xlane.f32.xlu1 %v813_v40 }
 0x1be   : > { %v709_v42 = vpop.f32.mrf.mxu1  ;;  %1030 = vrot.lane.b32.xlu0 %v3963_v1, %s3786_s26  ;;  %v685_v43 = vpop.f32.mrf.mxu3 }
 0x1c4   : > { %v4001_v44 = vpop.f32.mrf.mxu2 }
 0x1c5   : > { %v819_v27 = vsel %vm619_vm2, %v4001_v44, -inf }
 0x1c6   : > { %v4003_v46 = vpop.f32.mrf.mxu0  ;;  %v779_v47 = vpop.f32.mrf.mxu1 }
 0x1c7   : > { %v825_v48 = vsel %vm619_vm2, %v779_v47, -inf  ;;  %v810_v26 = vsel %vm619_vm2, %v4003_v46, -inf }
 0x1c8   : > { %826 = vmax.xlane.f32.xlu2 %v825_v48 }
 0x1cc   : > { %v733_v49 = vpop.f32.mrf.mxu2 }
 0x1cd   : > { %v4006_v51 = vpop.f32.mrf.mxu3 }
 0x1ce   : > { %v661_v52 = vpop.f32.mrf.mxu0  ;;  %v781_v53 = vpop.f32.mrf.mxu1  ;;  %v822_v32 = vsel %vm619_vm2, %v4006_v51, -inf }
 0x1d1   : > { %1124 = vrot.lane.b32.xlu1 %v3943_v45, %s3787_s28 }
 0x1d4   : > { %v803_v56 = vpop.f32.mrf.mxu2 }
 0x1d5   : > { %v757_v54 = vpop.f32.mrf.mxu3  ;;  %v828_v58 = vsel %vm619_vm2, %v803_v56, -inf }
 0x1dc   : > { %v805_v57 = vpop.f32.mrf.mxu2 }
 0x1e0   : > { %1051 = vrot.lane.b32.xlu2 %v3969_v9, %s3786_s26 }
 0x1e8   : > { %829 = vmax.xlane.f32.xlu0 %v828_v58 }
 0x21d   : > { %v809_v59 = vpop.xlane.xlu0 %808 }
 0x21e   : > { %v831_v61 = vsub.f32 %v635_v34, %v809_v59 }
 0x220   : > { %v839_v62 = vmul.f32 1.442695, %v831_v61 }
 0x222   : > { %3575 = vpow2.f32 %v839_v62 }
 0x228   : > { %v3576_v63 = vpop.eup %3575 }
 0x229   : > { %v855_v0 = vsel %vm619_vm2, %v3576_v63, 0.0 }
 0x22a   : > { %856 = vadd.xlane.f32.xlu0 %v855_v0 }
 0x22b   : > { %v818_v2 = vpop.xlane.xlu2 %817  ;;  %v815_v3 = vpop.xlane.xlu1 %814 }
 0x22c   : > { %v834_v4 = vsub.f32 %v707_v38, %v818_v2  ;;  %v833_v5 = vsub.f32 %v683_v37, %v815_v3 }
 0x22e   : > { %v845_v6 = vmul.f32 1.442695, %v834_v4  ;;  %v843_v7 = vmul.f32 1.442695, %v833_v5 }
 0x230   : > { %3577 = vpow2.f32 %v845_v6  ;;  %v1031_v8 = vpop.permute.xlu0 %1030 }
 0x231   : > { %3579 = vpow2.f32 %v843_v7  ;;  %v1036_v10 = vsel %vm908_vm3, %v1031_v8, 0 }
 0x232   : > { %1045 = vmatpush.bf16.msrb.mxu2 %v1036_v10 }
 0x236   : > { %v3578_v12 = vpop.eup %3577 }
 0x237   : > { %v3580_v13 = vpop.eup %3579  ;;  %v864_v14 = vsel %vm619_vm2, %v3578_v12, 0.0 }
 0x238   : > { %865 = vadd.xlane.f32.xlu2 %v864_v14  ;;  %v861_v15 = vsel %vm619_vm2, %v3580_v13, 0.0 }
 0x239   : > { %862 = vadd.xlane.f32.xlu0 %v861_v15 }
 0x23b   : > { %v827_v16 = vpop.xlane.xlu2 %826 }
 0x23c   : > { %v837_v17 = vsub.f32 %v779_v47, %v827_v16 }
 0x23e   : > { %v851_v18 = vmul.f32 1.442695, %v837_v17 }
 0x240   : > { %3581 = vpow2.f32 %v851_v18 }
 0x243   : > { %v1052_v29 = vpop.permute.xlu2 %1051  ;;  %v1125_v40 = vpop.permute.xlu1 %1124 }
 0x244   : > { %v1057_v34 = vsel %vm908_vm3, %v1052_v29, 0  ;;  %v1130_v48 = vsel %vm619_vm2, %v1125_v40, 0 }
 0x246   : > { %v3582_v19 = vpop.eup %3581 }
 0x247   : > { %v873_v20 = vsel %vm619_vm2, %v3582_v19, 0.0 }
 0x248   : > { %874 = vadd.xlane.f32.xlu1 %v873_v20 }
 0x250   : > { %1122 = vrot.lane.b32.xlu2 %v3943_v45, %s3788_s19 }
 0x258   : > { %1145 = vrot.lane.b32.xlu2 %v3947_v50, %s3788_s19 }
 0x25b   : > { %v830_v21 = vpop.xlane.xlu0 %829 }
 0x25c   : > { %v838_v22 = vsub.f32 %v803_v56, %v830_v21 }
 0x25e   : > { %v853_v23 = vmul.f32 1.442695, %v838_v22 }
 0x260   : > { %3583 = vpow2.f32 %v853_v23  ;;  %1239 = vrot.lane.b32.xlu2 %v3969_v9, %s3787_s28 }
 0x261   : > { %1147 = vrot.lane.b32.xlu1 %v3947_v50, %s3787_s28 }
 0x266   : > { %v3584_v24 = vpop.eup %3583 }
 0x267   : > { %v876_v25 = vsel %vm619_vm2, %v3584_v24, 0.0 }
 0x268   : > { %877 = vadd.xlane.f32.xlu0 %v876_v25 }
 0x269   : > { %1214 = vrot.lane.b32.xlu1 %v3963_v1, %s3788_s19 }
 0x271   : > { %1237 = vrot.lane.b32.xlu1 %v3969_v9, %s3788_s19 }
 0x27c   : > { %1216 = vrot.lane.b32.xlu0 %v3963_v1, %s3787_s28 }
 0x289   : > { %811 = vmax.xlane.f32.xlu2 %v810_v26 }
 0x29b   : > { %820 = vmax.xlane.f32.xlu1 %v819_v27 }
 0x29d   : > { %v857_v28 = vpop.xlane.xlu0 %856 }
 0x29e   : > { %3585 = vrcp.f32 %v857_v28 }
 0x2a4   : > { %v3586_v30 = vpop.eup %3585 }
 0x2a5   : > { %v887_v31 = vmul.f32 %v3586_v30, %v3576_v63 }
 0x2a6   : > { %823 = vmax.xlane.f32.xlu0 %v822_v32 }
 0x2a7   : > { %v895_v33 = vpack.c.bf16 %v887_v31, %v887_v31 }
 0x2a9   : > { %3372 = vmatmul.msk.bf16.vlgmr.msrb.gmra.mxu3 %vm619_vm2, %v895_v33 }
 0x2aa   : > { %1066 = vmatpush.bf16.msrb.mxu3 %v1057_v34 }
 0x2ab   : > { %v866_v35 = vpop.xlane.xlu2 %865 }
 0x2ac   : > { %3587 = vrcp.f32 %v866_v35  ;;  %v863_v36 = vpop.xlane.xlu0 %862 }
 0x2ad   : > { %3589 = vrcp.f32 %v863_v36 }
 0x2b2   : > { %v3588_v37 = vpop.eup %3587 }
 0x2b3   : > { %v3590_v38 = vpop.eup %3589  ;;  %v890_v39 = vmul.f32 %v3588_v37, %v3578_v12  ;;  %v1123_v56 = vpop.permute.xlu2 %1122 }
 0x2b4   : > { %v889_v42 = vmul.f32 %v3590_v38, %v3580_v13  ;;  %925 = vrot.lane.b32.xlu1 %v3973_v11, %s3786_s26 }
 0x2b5   : > { %v898_v47 = vpack.c.bf16 %v890_v39, %v890_v39 }
 0x2b6   : > { %v897_v43 = vpack.c.bf16 %v889_v42, %v889_v42 }
 0x2b8   : > { %3374 = vmatmul.msk.bf16.vlgmr.msra.gmra.mxu2 %vm619_vm2, %v897_v43 }
 0x2b9   : > { %1139 = vmatpush.bf16.xpose.msra.mxu2 %v1130_v48  ;;  %3375 = vmatmul.msk.bf16.vlgmr.msra.gmra.mxu3 %vm619_vm2, %v898_v47 }
 0x2ba   : > { %1009 = vrot.lane.b32.xlu0 %v3959_v60, %s3786_s26 }
 0x2bb   : > { %v875_v49 = vpop.xlane.xlu1 %874  ;;  %v1146_v59 = vpop.permute.xlu2 %1145 }
 0x2bc   : > { %3591 = vrcp.f32 %v875_v49  ;;  %1398 = vrot.lane.b32.xlu1 %v3943_v45, %s3789_s20 }
 0x2c2   : > { %1101 = vrot.lane.b32.xlu0 %v3973_v11, %s3787_s28  ;;  %v3592_v52 = vpop.eup %3591 }
 0x2c3   : > { %v893_v53 = vmul.f32 %v3592_v52, %v3582_v19  ;;  %v1240_v0 = vpop.permute.xlu2 %1239 }
 0x2c4   : > { %v1245_v3 = vsel %vm619_vm2, %v1240_v0, 0 }
 0x2c5   : > { %v901_v54 = vpack.c.bf16 %v893_v53, %v893_v53 }
 0x2c8   : > { %3378 = vmatmul.msk.bf16.vlgmr.msrb.gmra.mxu2 %vm619_vm2, %v901_v54 }
 0x2ca   : > { %1099 = vrot.lane.b32.xlu0 %v3973_v11, %s3788_s19 }
 0x2d2   : > { %1078 = vrot.lane.b32.xlu0 %v3939_v41, %s3787_s28 }
 0x2d3   : > { %v1148_v57 = vpop.permute.xlu1 %1147 }
 0x2d4   : > { %v1153_v58 = vsel %vm619_vm2, %v1148_v57, 0 }
 0x2d5   : > { %1162 = vmatpush.bf16.xpose.msra.mxu3 %v1153_v58 }
 0x2d8   : > { %3382 = vmatmul.msk.bf16.vlgmr.msra.gmra.mxu2 %vm619_vm2, %v1123_v56 }
 0x2da   : > { %1076 = vrot.lane.b32.xlu0 %v3939_v41, %s3788_s19 }
 0x2db   : > { %v878_v61 = vpop.xlane.xlu0 %877  ;;  %v1215_v6 = vpop.permute.xlu1 %1214 }
 0x2dc   : > { %3593 = vrcp.f32 %v878_v61 }
 0x2e2   : > { %v3594_v62 = vpop.eup %3593  ;;  %1191 = vrot.lane.b32.xlu0 %v3959_v60, %s3788_s19 }
 0x2e3   : > { %v894_v63 = vmul.f32 %v3594_v62, %v3584_v24  ;;  %v1238_v12 = vpop.permute.xlu1 %1237 }
 0x2e5   : > { %v902_v2 = vpack.c.bf16 %v894_v63, %v894_v63 }
 0x2e7   : > { %3379 = vmatmul.msk.bf16.vlgmr.msrb.gmra.mxu3 %vm619_vm2, %v902_v2 }
 0x2e8   : > { %1254 = vmatpush.bf16.xpose.msrb.mxu3 %v1245_v3 }
 0x2ea   : > { %1170 = vrot.lane.b32.xlu0 %v3953_v55, %s3787_s28 }
 0x2ee   : > { %v1217_v4 = vpop.permute.xlu0 %1216 }
 0x2ef   : > { %v1222_v5 = vsel %vm619_vm2, %v1217_v4, 0 }
 0x2f0   : > { %1231 = vmatpush.bf16.xpose.msrb.mxu2 %v1222_v5 }
 0x2f7   : > { %3383 = vmatmul.msk.bf16.vlgmr.msra.gmra.mxu3 %vm619_vm2, %v1146_v59  ;;  %3386 = vmatmul.msk.bf16.vlgmr.msrb.gmra.mxu2 %vm619_vm2, %v1215_v6 }
 0x2fc   : > { %v812_v7 = vpop.xlane.xlu2 %811 }
 0x2fd   : > { %v832_v8 = vsub.f32 %v4003_v46, %v812_v7 }
 0x2ff   : > { %v841_v10 = vmul.f32 1.442695, %v832_v8 }
 0x301   : > { %3595 = vpow2.f32 %v841_v10 }
 0x307   : > { %v3596_v13 = vpop.eup %3595  ;;  %3387 = vmatmul.msk.bf16.vlgmr.msrb.gmra.mxu3 %vm619_vm2, %v1238_v12 }
 0x308   : > { %v858_v14 = vsel %vm619_vm2, %v3596_v13, 0.0 }
 0x309   : > { %859 = vadd.xlane.f32.xlu2 %v858_v14 }
 0x30e   : > { %v821_v15 = vpop.xlane.xlu1 %820 }
 0x30f   : > { %v835_v18 = vsub.f32 %v4001_v44, %v821_v15 }
 0x311   : > { %v847_v20 = vmul.f32 1.442695, %v835_v18 }
 0x319   : > { %v824_v16 = vpop.xlane.xlu0 %823 }
 0x31a   : > { %v836_v17 = vsub.f32 %v4006_v51, %v824_v16 }
 0x31c   : > { %v849_v19 = vmul.f32 1.442695, %v836_v17 }
 0x31e   : > { %3597 = vpow2.f32 %v849_v19 }
 0x31f   : > { %3599 = vpow2.f32 %v847_v20 }
 0x324   : > { %v4075_v21 = vpop.eup %3597 }
 0x325   : > { %v870_v46 = vsel %vm619_vm2, %v4075_v21, 0.0  ;;  %v4080_v24 = vpop.eup %3599 }
 0x326   : > { %871 = vadd.xlane.f32.xlu2 %v870_v46  ;;  %v926_v22 = vpop.permute.xlu1 %925  ;;  %v867_v26 = vsel %vm619_vm2, %v4080_v24, 0.0 }
 0x327   : > { %v931_v23 = vsel %vm908_vm3, %v926_v22, 0 }
 0x328   : > { %940 = vmatpush.bf16.msra.mxu1 %v931_v23 }
 0x32c   : > { %v4082_v25 = vpop.f32.mrf.mxu3  ;;  %v1010_v51 = vpop.permute.xlu0 %1009 }
 0x32d   : > { %v1015_v44 = vsel %vm908_vm3, %v1010_v51, 0 }
 0x32e   : > { %868 = vadd.xlane.f32.xlu2 %v867_v26  ;;  %1024 = vmatpush.bf16.msrb.mxu1 %v1015_v44  ;;  %v1399_v27 = vpop.permute.xlu1 %1398 }
 0x32f   : > { %v1404_v28 = vsel %vm908_vm3, %v1399_v27, 0 }
 0x330   : > { %1413 = vmatpush.bf16.msra.mxu2 %v1404_v28 }
 0x334   : > { %v923_v29 = vpop.f32.mrf.mxu3  ;;  %v1102_v47 = vpop.permute.xlu0 %1101 }
 0x335   : > { %v1107_v63 = vsel %vm619_vm2, %v1102_v47, 0 }
 0x33b   : > { %v4088_v30 = vpop.f32.mrf.mxu2 }
 0x33c   : > { %v4090_v31 = vpop.f32.mrf.mxu3  ;;  %v1100_v59 = vpop.permute.xlu0 %1099 }
 0x33d   : > { %v1073_v32 = vpack.c.bf16 %v4090_v31, %v4088_v30 }
 0x343   : > { %v965_v33 = vpop.f32.mrf.mxu2 }
 0x344   : > { %v986_v34 = vpop.f32.mrf.mxu3  ;;  %v1079_v3 = vpop.permute.xlu0 %1078 }
 0x345   : > { %v1084_v18 = vsel %vm619_vm2, %v1079_v3, 0 }
 0x346   : > { %988 = vrot.lane.b32.xlu2 %v3953_v55, %s3786_s26  ;;  %s2645_s26 = scalar_lea.vmem %s5075_s6, %s3767_s29 }
 0x34b   : > { %v4096_v35 = vpop.f32.mrf.mxu2 }
 0x34c   : > { %v1077_v5 = vpop.permute.xlu0 %1076 }
 0x34e   : > { %1193 = vrot.lane.b32.xlu2 %v3959_v60, %s3787_s28  ;;  %s4332_s28 = scalar_lea.vmem %s5073_s4, %s3925_s30 }
 0x353   : > { %v1049_v36 = vpop.f32.mrf.mxu2 }
 0x354   : > { %v1192_v8 = vpop.permute.xlu0 %1191 }
 0x356   : > { %1419 = vrot.lane.b32.xlu2 %v3947_v50, %s3789_s20 }
 0x35b   : > { %v4102_v37 = vpop.f32.mrf.mxu2 }
 0x35c   : > { %v1266_v38 = vsel %vm619_vm2, %v4102_v37, -inf  ;;  %v1171_v19 = vpop.permute.xlu0 %1170 }
 0x35d   : > { %1267 = vmax.xlane.f32.xlu0 %v1266_v38 }
 0x363   : > { %v1143_v39 = vpop.f32.mrf.mxu2 }
 0x36a   : > { %v4106_v40 = vpop.f32.mrf.mxu3 }
 0x36b   : > { %v1075_v42 = vpack.c.bf16 %v4106_v40, %v4096_v35 }
 0x372   : > { %v1070_v43 = vpop.f32.mrf.mxu3 }
 0x37a   : > { %v4110_v48 = vpop.f32.mrf.mxu3  ;;  %v4112_v49 = vpop.f32.mrf.mxu2 }
 0x37b   : > { %v1269_v52 = vsel %vm619_vm2, %v4110_v48, -inf  ;;  %v1278_v54 = vsel %vm619_vm2, %v4112_v49, -inf }
 0x37c   : > { %v860_v53 = vpop.xlane.xlu2 %859  ;;  %1270 = vmax.xlane.f32.xlu0 %v1269_v52 }
 0x37d   : > { %3601 = vrcp.f32 %v860_v53 }
 0x37f   : > { %1279 = vmax.xlane.f32.xlu2 %v1278_v54 }
 0x382   : > { %v1166_v56 = vpop.f32.mrf.mxu3  ;;  %v1235_v57 = vpop.f32.mrf.mxu2 }
 0x383   : > { %v3602_v58 = vpop.eup %3601 }
 0x384   : > { %v888_v61 = vmul.f32 %v3602_v58, %v3596_v13 }
 0x386   : > { %v896_v62 = vpack.c.bf16 %v888_v61, %v888_v61 }
 0x388   : > { %3373 = vmatmul.msk.bf16.vlgmr.msra.gmra.mxu1 %vm619_vm2, %v896_v62 }
 0x389   : > { %1116 = vmatpush.bf16.xpose.msra.mxu1 %v1107_v63 }
 0x38a   : > { %v4120_v0 = vpop.f32.mrf.mxu3 }
 0x38b   : > { %v1281_v2 = vsel %vm619_vm2, %v4120_v0, -inf }
 0x38c   : > { %1282 = vmax.xlane.f32.xlu1 %v1281_v2 }
 0x390   : > { %1503 = vrot.lane.b32.xlu0 %v3969_v9, %s3789_s20 }
 0x392   : > { %v1258_v4 = vpop.f32.mrf.mxu3 }
 0x398   : > { %1618 = vrot.lane.b32.xlu0 %v3939_v41, %s3790_s21 }
 0x399   : > { %v872_v6 = vpop.xlane.xlu2 %871 }
 0x39a   : > { %3603 = vrcp.f32 %v872_v6 }
 0x3a0   : > { %v3604_v7 = vpop.eup %3603  ;;  %1616 = vrot.lane.b32.xlu0 %v3939_v41, %s3791_s22 }
 0x3a1   : > { %v892_v10 = vmul.f32 %v3604_v7, %v4075_v21  ;;  %v869_v12 = vpop.xlane.xlu2 %868  ;;  %v1176_v21 = vsel %vm619_vm2, %v1171_v19, 0 }
 0x3a2   : > { %3605 = vrcp.f32 %v869_v12 }
 0x3a3   : > { %v900_v13 = vpack.c.bf16 %v892_v10, %v892_v10 }
 0x3a5   : > { %1168 = vrot.lane.b32.xlu1 %v3953_v55, %s3788_s19  ;;  %3377 = vmatmul.msk.bf16.vlgmr.msrb.gmra.mxu1 %vm619_vm2, %v900_v13  ;;  %s3794_s19 = smov 104  }
 0x3a8   : > { %v3606_v14 = vpop.eup %3605  ;;  %1664 = vrot.lane.b32.xlu0 %v3943_v45, %s3790_s21 }
 0x3a9   : > { %v891_v15 = vmul.f32 %v3606_v14, %v4080_v24  ;;  %v989_v16 = vpop.permute.xlu2 %988 }
 0x3aa   : > { %v994_v17 = vsel %vm908_vm3, %v989_v16, 0 }
 0x3ab   : > { %v899_v20 = vpack.c.bf16 %v891_v15, %v891_v15  ;;  %1003 = vmatpush.bf16.msrb.mxu0 %v994_v17 }
 0x3ad   : > { %1641 = vrot.lane.b32.xlu1 %v3973_v11, %s3790_s21 }
 0x3ae   : > { %3376 = vmatmul.msk.bf16.vlgmr.msrb.gmra.mxu0 %vm619_vm2, %v899_v20 }
 0x3af   : > { %1093 = vmatpush.bf16.xpose.msra.mxu0 %v1084_v18 }
 0x3b0   : > { %1662 = vrot.lane.b32.xlu0 %v3943_v45, %s3791_s22 }
 0x3b1   : > { %v1194_v46 = vpop.permute.xlu2 %1193 }
 0x3b2   : > { %v1199_v22 = vsel %vm619_vm2, %v1194_v46, 0 }
 0x3b3   : > { %1208 = vmatpush.bf16.xpose.msrb.mxu1 %v1199_v22 }
 0x3b5   : > { %1639 = vrot.lane.b32.xlu1 %v3973_v11, %s3791_s22  ;;  %3381 = vmatmul.msk.bf16.vlgmr.msra.gmra.mxu1 %vm619_vm2, %v1100_v59 }
 0x3b7   : > { %1185 = vmatpush.bf16.xpose.msrb.mxu0 %v1176_v21 }
 0x3b9   : > { %v1420_v23 = vpop.permute.xlu2 %1419 }
 0x3ba   : > { %v1425_v24 = vsel %vm908_vm3, %v1420_v23, 0 }
 0x3bb   : > { %1434 = vmatpush.bf16.msra.mxu3 %v1425_v24 }
 0x3be   : > { %3380 = vmatmul.msk.bf16.vlgmr.msra.gmra.mxu0 %vm619_vm2, %v1077_v5 }
 0x3c5   : > { %3385 = vmatmul.msk.bf16.vlgmr.msrb.gmra.mxu1 %vm619_vm2, %v1192_v8 }
 0x3d0   : > { %v1268_v51 = vpop.xlane.xlu0 %1267 }
 0x3d1   : > { %v1286_v44 = vsub.f32 %v4102_v37, %v1268_v51 }
 0x3d3   : > { %v1296_v26 = vmul.f32 1.442695, %v1286_v44 }
 0x3d5   : > { %3607 = vpow2.f32 %v1296_v26 }
 0x3db   : > { %v3608_v27 = vpop.eup %3607 }
 0x3dc   : > { %v1314_v28 = vsel %vm619_vm2, %v3608_v27, 0.0 }
 0x3dd   : > { %1315 = vadd.xlane.f32.xlu2 %v1314_v28 }
 0x3ef   : > { %v1271_v29 = vpop.xlane.xlu0 %1270 }
 0x3f0   : > { %v1287_v33 = vsub.f32 %v4110_v48, %v1271_v29 }
 0x3f2   : > { %v1298_v34 = vmul.f32 1.442695, %v1287_v33  ;;  %v1280_v36 = vpop.xlane.xlu2 %1279 }
 0x3f3   : > { %v1290_v38 = vsub.f32 %v4112_v49, %v1280_v36 }
 0x3f4   : > { %3609 = vpow2.f32 %v1298_v34 }
 0x3f5   : > { %v1304_v39 = vmul.f32 1.442695, %v1290_v38  ;;  %1482 = vrot.lane.b32.xlu2 %v3963_v1, %s3789_s20 }
 0x3f7   : > { %3611 = vpow2.f32 %v1304_v39 }
 0x3fa   : > { %v4158_v37 = vpop.eup %3609 }
 0x3fb   : > { %v1317_v43 = vsel %vm619_vm2, %v4158_v37, 0.0 }
 0x3fc   : > { %1318 = vadd.xlane.f32.xlu0 %v1317_v43 }
 0x3fd   : > { %v4162_v47 = vpop.eup %3611 }
 0x3fe   : > { %v1326_v48 = vsel %vm619_vm2, %v4162_v47, 0.0 }
 0x3ff   : > { %1327 = vadd.xlane.f32.xlu1 %v1326_v48  ;;  %v1283_v54 = vpop.xlane.xlu1 %1282 }
 0x400   : > { %v1291_v56 = vsub.f32 %v4120_v0, %v1283_v54 }
 0x402   : > { %v1504_v52 = vpop.permute.xlu0 %1503  ;;  %v1306_v58 = vmul.f32 1.442695, %v1291_v56 }
 0x403   : > { %v1509_v49 = vsel %vm908_vm3, %v1504_v52, 0 }
 0x404   : > { %1518 = vmatpush.bf16.msrb.mxu3 %v1509_v49  ;;  %3613 = vpow2.f32 %v1306_v58 }
 0x405   : > { %v4167_v53 = vpop.f32.mrf.mxu1 }
 0x40a   : > { %v4177_v61 = vpop.eup %3613  ;;  %v1619_v12 = vpop.permute.xlu0 %1618 }
 0x40b   : > { %v1329_v62 = vsel %vm619_vm2, %v4177_v61, 0.0  ;;  %v1624_v22 = vsel %vm619_vm2, %v1619_v12, 0 }
 0x40d   : > { %v944_v57 = vpop.f32.mrf.mxu1 }
 0x410   : > { %1685 = vrot.lane.b32.xlu0 %v3947_v50, %s3791_s22 }
 0x412   : > { %v1617_v16 = vpop.permute.xlu0 %1616 }
 0x417   : > { %v1169_v59 = vpop.permute.xlu1 %1168 }
 0x418   : > { %1710 = vrot.lane.b32.xlu1 %v3953_v55, %s3790_s21  ;;  %3384 = vmatmul.msk.bf16.vlgmr.msrb.gmra.mxu0 %vm619_vm2, %v1169_v59 }
 0x419   : > { %1733 = vrot.lane.b32.xlu0 %v3959_v60, %s3790_s21 }
 0x41a   : > { %v1665_v23 = vpop.permute.xlu0 %1664 }
 0x41b   : > { %v1670_v48 = vsel %vm619_vm2, %v1665_v23, 0 }
 0x41e   : > { %1330 = vadd.xlane.f32.xlu2 %v1329_v62 }
 0x41f   : > { %v1642_v24 = vpop.permute.xlu1 %1641 }
 0x420   : > { %1708 = vrot.lane.b32.xlu1 %v3953_v55, %s3791_s22  ;;  %v1647_v39 = vsel %vm619_vm2, %v1642_v24, 0 }
 0x421   : > { %1731 = vrot.lane.b32.xlu0 %v3959_v60, %s3791_s22 }
 0x422   : > { %v4185_v63 = vpop.f32.mrf.mxu1  ;;  %v1663_v44 = vpop.permute.xlu0 %1662 }
 0x427   : > { %v1640_v26 = vpop.permute.xlu1 %1639 }
 0x428   : > { %1756 = vrot.lane.b32.xlu1 %v3963_v1, %s3790_s21 }
 0x429   : > { %1777 = vrot.lane.b32.xlu0 %v3969_v9, %s3791_s22 }
 0x42a   : > { %v1028_v0 = vpop.f32.mrf.mxu1 }
 0x42b   : > { %v4191_v2 = vpop.f32.mrf.mxu0 }
 0x42c   : > { %v1074_v3 = vpack.c.bf16 %v4185_v63, %v4191_v2 }
 0x430   : > { %1779 = vrot.lane.b32.xlu1 %v3969_v9, %s3790_s21 }
 0x432   : > { %v4197_v4 = vpop.f32.mrf.mxu1 }
 0x433   : > { %v1007_v5 = vpop.f32.mrf.mxu0  ;;  %v1263_v51 = vsel %vm619_vm2, %v4197_v4, -inf }
 0x436   : > { %1687 = vrot.lane.b32.xlu2 %v3947_v50, %s3790_s21  ;;  %s2864_s21 = scalar_lea.vmem %s5078_s9, %s3767_s29 }
 0x43a   : > { %v1120_v6 = vpop.f32.mrf.mxu1 }
 0x43b   : > { %v4201_v7 = vpop.f32.mrf.mxu0 }
 0x43c   : > { %v1260_v21 = vsel %vm619_vm2, %v4201_v7, -inf }
 0x43e   : > { %1754 = vrot.lane.b32.xlu2 %v3963_v1, %s3791_s22  ;;  %s3024_s22 = scalar_lea.vmem %s5081_s12, %s3767_s29 }
 0x442   : > { %v4205_v8 = vpop.f32.mrf.mxu1 }
 0x443   : > { %v1097_v10 = vpop.f32.mrf.mxu0  ;;  %v1275_v15 = vsel %vm619_vm2, %v4205_v8, -inf }
 0x44a   : > { %v1212_v13 = vpop.f32.mrf.mxu1 }
 0x450   : > { %v1316_v14 = vpop.xlane.xlu2 %1315 }
 0x451   : > { %3615 = vrcp.f32 %v1316_v14 }
 0x453   : > { %1276 = vmax.xlane.f32.xlu0 %v1275_v15 }
 0x457   : > { %v3616_v17 = vpop.eup %3615 }
 0x458   : > { %v1342_v18 = vmul.f32 %v3616_v17, %v3608_v27  ;;  %v1483_v19 = vpop.permute.xlu2 %1482 }
 0x459   : > { %v1488_v20 = vsel %vm908_vm3, %v1483_v19, 0 }
 0x45a   : > { %v1350_v46 = vpack.c.bf16 %v1342_v18, %v1342_v18  ;;  %1497 = vmatpush.bf16.msrb.mxu2 %v1488_v20  ;;  %1261 = vmax.xlane.f32.xlu1 %v1260_v21 }
 0x45c   : > { %3390 = vmatmul.msk.bf16.vlgmr.msra.gmra.mxu2 %vm619_vm2, %v1350_v46 }
 0x45e   : > { %1633 = vmatpush.bf16.xpose.msra.mxu2 %v1624_v22 }
 0x467   : > { %1264 = vmax.xlane.f32.xlu2 %v1263_v51  ;;  %1377 = vrot.lane.b32.xlu0 %v3973_v11, %s3789_s20 }
 0x46f   : > { %v1319_v27 = vpop.xlane.xlu0 %1318 }
 0x470   : > { %3617 = vrcp.f32 %v1319_v27 }
 0x472   : > { %v1328_v28 = vpop.xlane.xlu1 %1327 }
 0x473   : > { %3619 = vrcp.f32 %v1328_v28 }
 0x476   : > { %v3618_v29 = vpop.eup %3617 }
 0x477   : > { %v1343_v33 = vmul.f32 %v3618_v29, %v4158_v37 }
 0x479   : > { %v3620_v34 = vpop.eup %3619  ;;  %v1351_v36 = vpack.c.bf16 %v1343_v33, %v1343_v33 }
 0x47a   : > { %v1346_v38 = vmul.f32 %v3620_v34, %v4162_v47 }
 0x47b   : > { %3391 = vmatmul.msk.bf16.vlgmr.msra.gmra.mxu3 %vm619_vm2, %v1351_v36 }
 0x47c   : > { %v1354_v43 = vpack.c.bf16 %v1346_v38, %v1346_v38  ;;  %1656 = vmatpush.bf16.xpose.msra.mxu3 %v1647_v39 }
 0x47e   : > { %3394 = vmatmul.msk.bf16.vlgmr.msrb.gmra.mxu2 %vm619_vm2, %v1354_v43 }
 0x47f   : > { %1679 = vmatpush.bf16.xpose.msrb.mxu2 %v1670_v48 }
 0x482   : > { %v1686_v12 = vpop.permute.xlu0 %1685 }
 0x48a   : > { %v1711_v52 = vpop.permute.xlu1 %1710 }
 0x48b   : > { %v1716_v49 = vsel %vm619_vm2, %v1711_v52, 0  ;;  %v1734_v13 = vpop.permute.xlu0 %1733 }
 0x48c   : > { %v1739_v14 = vsel %vm619_vm2, %v1734_v13, 0 }
 0x48e   : > { %3404 = vmatmul.msk.bf16.vlgmr.msra.gmra.mxu2 %vm619_vm2, %v1617_v16 }
 0x48f   : > { %1725 = vmatpush.bf16.xpose.msra.mxu2 %v1716_v49 }
 0x491   : > { %v1331_v37 = vpop.xlane.xlu2 %1330 }
 0x492   : > { %3621 = vrcp.f32 %v1331_v37  ;;  %v1709_v47 = vpop.permute.xlu1 %1708 }
 0x493   : > { %v1732_v17 = vpop.permute.xlu0 %1731 }
 0x495   : > { %v4226_v54 = vpop.f32.mrf.mxu0 }
 0x496   : > { %v1272_v56 = vsel %vm619_vm2, %v4226_v54, -inf }
 0x497   : > { %1273 = vmax.xlane.f32.xlu2 %v1272_v56 }
 0x498   : > { %v3622_v57 = vpop.eup %3621 }
 0x499   : > { %v1347_v58 = vmul.f32 %v3622_v57, %v4177_v61  ;;  %v1688_v59 = vpop.permute.xlu2 %1687 }
 0x49a   : > { %v1757_v0 = vpop.permute.xlu1 %1756  ;;  %v1693_v5 = vsel %vm619_vm2, %v1688_v59, 0 }
 0x49b   : > { %v1355_v62 = vpack.c.bf16 %v1347_v58, %v1347_v58  ;;  %v1762_v10 = vsel %vm619_vm2, %v1757_v0, 0  ;;  %v1778_v18 = vpop.permute.xlu0 %1777 }
 0x49d   : > { %3395 = vmatmul.msk.bf16.vlgmr.msrb.gmra.mxu3 %vm619_vm2, %v1355_v62  ;;  %v1189_v6 = vpop.f32.mrf.mxu0 }
 0x49e   : > { %1702 = vmatpush.bf16.xpose.msrb.mxu3 %v1693_v5  ;;  %3406 = vmatmul.msk.bf16.vlgmr.msrb.gmra.mxu2 %vm619_vm2, %v1663_v44 }
 0x49f   : > { %1771 = vmatpush.bf16.xpose.msrb.mxu2 %v1762_v10 }
 0x4a1   : > { %v1755_v15 = vpop.permute.xlu2 %1754 }
 0x4a2   : > { %v1780_v61 = vpop.permute.xlu1 %1779 }
 0x4a3   : > { %v1785_v16 = vsel %vm619_vm2, %v1780_v61, 0 }
 0x4ad   : > { %3405 = vmatmul.msk.bf16.vlgmr.msra.gmra.mxu3 %vm619_vm2, %v1640_v26 }
 0x4ae   : > { %1748 = vmatpush.bf16.xpose.msra.mxu3 %v1739_v14  ;;  %3408 = vmatmul.msk.bf16.vlgmr.msra.gmra.mxu2 %vm619_vm2, %v1709_v47 }
 0x4bd   : > { %3407 = vmatmul.msk.bf16.vlgmr.msrb.gmra.mxu3 %vm619_vm2, %v1686_v12 }
 0x4be   : > { %1794 = vmatpush.bf16.xpose.msrb.mxu3 %v1785_v16  ;;  %3410 = vmatmul.msk.bf16.vlgmr.msrb.gmra.mxu2 %vm619_vm2, %v1755_v15 }
 0x4c6   : > { %v1277_v46 = vpop.xlane.xlu0 %1276 }
 0x4c7   : > { %v1289_v27 = vsub.f32 %v4205_v8, %v1277_v46 }
 0x4c9   : > { %v1302_v29 = vmul.f32 1.442695, %v1289_v27 }
 0x4cd   : > { %3409 = vmatmul.msk.bf16.vlgmr.msra.gmra.mxu3 %vm619_vm2, %v1732_v17  ;;  %v1262_v19 = vpop.xlane.xlu1 %1261 }
 0x4ce   : > { %v1284_v20 = vsub.f32 %v4201_v7, %v1262_v19 }
 0x4d0   : > { %v1292_v21 = vmul.f32 1.442695, %v1284_v20 }
 0x4d2   : > { %3623 = vpow2.f32 %v1292_v21 }
 0x4d8   : > { %v4243_v22 = vpop.eup %3623 }
 0x4d9   : > { %v1378_v23 = vpop.permute.xlu0 %1377  ;;  %v1308_v24 = vsel %vm619_vm2, %v4243_v22, 0.0 }
 0x4da   : > { %v1383_v51 = vsel %vm908_vm3, %v1378_v23, 0  ;;  %v1265_v44 = vpop.xlane.xlu2 %1264  ;;  %1309 = vadd.xlane.f32.xlu2 %v1308_v24 }
 0x4db   : > { %v1285_v26 = vsub.f32 %v4197_v4, %v1265_v44  ;;  %1392 = vmatpush.bf16.msra.mxu1 %v1383_v51 }
 0x4dd   : > { %v1294_v28 = vmul.f32 1.442695, %v1285_v26  ;;  %3411 = vmatmul.msk.bf16.vlgmr.msrb.gmra.mxu3 %vm619_vm2, %v1778_v18 }
 0x4df   : > { %3625 = vpow2.f32 %v1294_v28  ;;  %v4251_v7 = vpop.f32.mrf.mxu2 }
 0x4e0   : > { %3627 = vpow2.f32 %v1302_v29 }
 0x4e5   : > { %v4253_v33 = vpop.eup %3625 }
 0x4e6   : > { %v1311_v34 = vsel %vm619_vm2, %v4253_v33, 0.0  ;;  %v4257_v38 = vpop.eup %3627 }
 0x4e7   : > { %v1417_v36 = vpop.f32.mrf.mxu2  ;;  %1312 = vadd.xlane.f32.xlu1 %v1311_v34  ;;  %v1323_v4 = vsel %vm619_vm2, %v4257_v38, 0.0 }
 0x4ef   : > { %1324 = vadd.xlane.f32.xlu1 %v1323_v4 }
 0x4f2   : > { %1356 = vrot.lane.b32.xlu2 %v3939_v41, %s3789_s20 }
 0x4fa   : > { %1938 = vrot.lane.b32.xlu2 %v3943_v45, %s3792_s23 }
 0x4fe   : > { %v4265_v8 = vpop.f32.mrf.mxu3 }
 0x4ff   : > { %v1525_v39 = vpack.c.bf16 %v4265_v8, %v4251_v7 }
 0x501   : > { %v4269_v43 = vpop.f32.mrf.mxu2 }
 0x506   : > { %v1438_v48 = vpop.f32.mrf.mxu3 }
 0x508   : > { %1461 = vrot.lane.b32.xlu1 %v3959_v60, %s3789_s20 }
 0x509   : > { %v1501_v52 = vpop.f32.mrf.mxu2 }
 0x50a   : > { %v1274_v49 = vpop.xlane.xlu2 %1273 }
 0x50b   : > { %v1288_v37 = vsub.f32 %v4226_v54, %v1274_v49 }
 0x50d   : > { %v1300_v47 = vmul.f32 1.442695, %v1288_v37 }
 0x50f   : > { %3629 = vpow2.f32 %v1300_v47 }
 0x510   : > { %1917 = vrot.lane.b32.xlu1 %v3973_v11, %s3792_s23 }
 0x511   : > { %v4276_v56 = vpop.f32.mrf.mxu2 }
 0x515   : > { %v4278_v57 = vpop.eup %3629 }
 0x516   : > { %v1320_v58 = vsel %vm619_vm2, %v4278_v57, 0.0 }
 0x517   : > { %1321 = vadd.xlane.f32.xlu0 %v1320_v58 }
 0x519   : > { %v1637_v59 = vpop.f32.mrf.mxu2 }
 0x520   : > { %v4282_v62 = vpop.f32.mrf.mxu3 }
 0x521   : > { %v1527_v0 = vpack.c.bf16 %v4282_v62, %v4269_v43  ;;  %v4286_v54 = vpop.f32.mrf.mxu2 }
 0x522   : > { %v1806_v15 = vsel %vm619_vm2, %v4286_v54, -inf }
 0x528   : > { %v1522_v5 = vpop.f32.mrf.mxu3 }
 0x529   : > { %v1683_v6 = vpop.f32.mrf.mxu2  ;;  %v610_v5 = vld [vmem:[%s4332_s28] sm:$0xf] }
 0x52b   : > { %1440 = vrot.lane.b32.xlu0 %v3953_v55, %s3789_s20  ;;  %s3795_s20 = smov 40  }
 0x530   : > { %v4290_v10 = vpop.f32.mrf.mxu3 }
 0x531   : > { %v4292_v12 = vpop.f32.mrf.mxu2  ;;  %v1803_v13 = vsel %vm619_vm2, %v4290_v10, -inf }
 0x532   : > { %1804 = vmax.xlane.f32.xlu2 %v1803_v13  ;;  %v1585_v13 = vsel %vm908_vm3, %v610_v5, 0 }
 0x533   : > { %1959 = vrot.lane.b32.xlu0 %v3947_v50, %s3792_s23 }
 0x538   : > { %v1660_v14 = vpop.f32.mrf.mxu3 }
 0x539   : > { %v1729_v61 = vpop.f32.mrf.mxu2 }
 0x53a   : > { %1807 = vmax.xlane.f32.xlu1 %v1806_v15 }
 0x53b   : > { %2001 = vrot.lane.b32.xlu0 %v3959_v60, %s3792_s23 }
 0x540   : > { %v4302_v16 = vpop.f32.mrf.mxu3 }
 0x541   : > { %v4304_v17 = vpop.f32.mrf.mxu2  ;;  %v1809_v18 = vsel %vm619_vm2, %v4302_v16, -inf }
 0x542   : > { %1810 = vmax.xlane.f32.xlu2 %v1809_v18  ;;  %v1818_v19 = vsel %vm619_vm2, %v4304_v17, -inf }
 0x543   : > { %2022 = vrot.lane.b32.xlu0 %v3963_v1, %s3792_s23  ;;  %1819 = vmax.xlane.f32.xlu1 %v1818_v19 }
 0x548   : > { %v1706_v20 = vpop.f32.mrf.mxu3 }
 0x549   : > { %v1775_v21 = vpop.f32.mrf.mxu2 }
 0x54d   : > { %v1310_v46 = vpop.xlane.xlu2 %1309 }
 0x54e   : > { %3631 = vrcp.f32 %v1310_v46 }
 0x550   : > { %v4312_v23 = vpop.f32.mrf.mxu3 }
 0x551   : > { %v1815_v47 = vsel %vm619_vm2, %v4312_v23, -inf }
 0x554   : > { %v3632_v24 = vpop.eup %3631 }
 0x555   : > { %v1340_v51 = vmul.f32 %v3632_v24, %v4243_v22  ;;  %v1357_v44 = vpop.permute.xlu2 %1356 }
 0x556   : > { %v1362_v26 = vsel %vm908_vm3, %v1357_v44, 0 }
 0x557   : > { %v1348_v27 = vpack.c.bf16 %v1340_v51, %v1340_v51  ;;  %1371 = vmatpush.bf16.msra.mxu0 %v1362_v26 }
 0x558   : > { %v1752_v28 = vpop.f32.mrf.mxu3 }
 0x55a   : > { %v1313_v29 = vpop.xlane.xlu1 %1312  ;;  %3388 = vmatmul.msk.bf16.vlgmr.msra.gmra.mxu0 %vm619_vm2, %v1348_v27 }
 0x55b   : > { %3633 = vrcp.f32 %v1313_v29 }
 0x55c   : > { %2145 = vrot.lane.b32.xlu1 %v3973_v11, %s3793_s24 }
 0x55d   : > { %v1939_v34 = vpop.permute.xlu2 %1938 }
 0x55e   : > { %v1944_v36 = vsel %vm908_vm3, %v1939_v34, 0 }
 0x55f   : > { %1953 = vmatpush.bf16.msra.mxu2 %v1944_v36 }
 0x560   : > { %v4320_v22 = vpop.f32.mrf.mxu3 }
 0x561   : > { %v3634_v4 = vpop.eup %3633  ;;  %v1821_v48 = vsel %vm619_vm2, %v4320_v22, -inf }
 0x562   : > { %v1341_v52 = vmul.f32 %v3634_v4, %v4253_v33  ;;  %1822 = vmax.xlane.f32.xlu2 %v1821_v48  ;;  %v1325_v58 = vpop.xlane.xlu1 %1324 }
 0x563   : > { %3635 = vrcp.f32 %v1325_v58  ;;  %v611_v58 = vld [vmem:[%s4332_s28 + $0x4] sm:$0xf] }
 0x564   : > { %v1349_v49 = vpack.c.bf16 %v1341_v52, %v1341_v52 }
 0x566   : > { %3389 = vmatmul.msk.bf16.vlgmr.msra.gmra.mxu1 %vm619_vm2, %v1349_v49 }
 0x568   : > { %v1798_v37 = vpop.f32.mrf.mxu3 }
 0x569   : > { %v3636_v59 = vpop.eup %3635 }
 0x56a   : > { %v1345_v33 = vmul.f32 %v3636_v59, %v4257_v38  ;;  %v1072_v38 = vpack.c.bf16 %v4167_v53, %v4082_v25  ;;  %v1541_v59 = vsel %vm908_vm3, %v611_v58, 0 }
 0x56c   : > { %v1353_v61 = vpack.c.bf16 %v1345_v33, %v1345_v33 }
 0x56d   : > { %1816 = vmax.xlane.f32.xlu0 %v1815_v47 }
 0x57a   : > { %2043 = vrot.lane.b32.xlu2 %v3969_v9, %s3792_s23  ;;  %v1462_v6 = vpop.permute.xlu1 %1461 }
 0x57b   : > { %v1467_v14 = vsel %vm908_vm3, %v1462_v6, 0 }
 0x57c   : > { %1476 = vmatpush.bf16.msrb.mxu1 %v1467_v14 }
 0x57f   : > { %3393 = vmatmul.msk.bf16.vlgmr.msrb.gmra.mxu1 %vm619_vm2, %v1353_v61 }
 0x580   : > { %1594 = vmatpush.bf16.msra.mxu1 %v1585_v13 }
 0x581   : > { %2122 = vrot.lane.b32.xlu0 %v3939_v41, %s3793_s24 }
 0x582   : > { %v1918_v15 = vpop.permute.xlu1 %1917 }
 0x583   : > { %v1923_v18 = vsel %vm908_vm3, %v1918_v15, 0 }
 0x584   : > { %1932 = vmatpush.bf16.msrb.mxu1 %v1923_v18 }
 0x589   : > { %2120 = vrot.lane.b32.xlu0 %v3939_v41, %s3794_s19 }
 0x58a   : > { %v1322_v19 = vpop.xlane.xlu0 %1321 }
 0x58b   : > { %3637 = vrcp.f32 %v1322_v19 }
 0x58f   : > { %3400 = vmatmul.msk.bf16.vlgmr.msra.gmra.mxu1 %vm619_vm2, %v1072_v38 }
 0x591   : > { %2143 = vrot.lane.b32.xlu0 %v3973_v11, %s3794_s19  ;;  %v3638_v20 = vpop.eup %3637 }
 0x592   : > { %v1344_v21 = vmul.f32 %v3638_v20, %v4278_v57 }
 0x594   : > { %v1352_v25 = vpack.c.bf16 %v1344_v21, %v1344_v21 }
 0x59d   : > { %v1441_v46 = vpop.permute.xlu0 %1440 }
 0x59e   : > { %v1446_v24 = vsel %vm908_vm3, %v1441_v46, 0  ;;  %v1800_v46 = vsel %vm619_vm2, %v4276_v56, -inf }
 0x59f   : > { %3401 = vmatmul.msk.bf16.gmra.mxu1 %vm619_vm2, %v1073_v32  ;;  %1455 = vmatpush.bf16.msrb.mxu0 %v1446_v24 }
 0x5a2   : > { %3392 = vmatmul.msk.bf16.vlgmr.msrb.gmra.mxu0 %vm619_vm2, %v1352_v25 }
 0x5a3   : > { %1550 = vmatpush.bf16.msra.mxu0 %v1541_v59 }
 0x5a5   : > { %v1805_v53 = vpop.xlane.xlu2 %1804  ;;  %v1960_v51 = vpop.permute.xlu0 %1959 }
 0x5a6   : > { %v1825_v44 = vsub.f32 %v4290_v10, %v1805_v53  ;;  %v1965_v26 = vsel %vm908_vm3, %v1960_v51, 0 }
 0x5a7   : > { %1974 = vmatpush.bf16.msra.mxu3 %v1965_v26 }
 0x5a8   : > { %v1834_v57 = vmul.f32 1.442695, %v1825_v44 }
 0x5aa   : > { %3639 = vpow2.f32 %v1834_v57 }
 0x5ad   : > { %v1808_v27 = vpop.xlane.xlu1 %1807  ;;  %v2002_v28 = vpop.permute.xlu0 %2001 }
 0x5ae   : > { %v1826_v29 = vsub.f32 %v4286_v54, %v1808_v27  ;;  %v2007_v30 = vsel %vm908_vm3, %v2002_v28, 0 }
 0x5af   : > { %3402 = vmatmul.msk.bf16.gmra.mxu1 %vm619_vm2, %v1074_v3 }
 0x5b0   : > { %v4366_v31 = vpop.eup %3639  ;;  %v1836_v32 = vmul.f32 1.442695, %v1826_v29  ;;  %2016 = vmatpush.bf16.msra.mxu1 %v2007_v30 }
 0x5b1   : > { %v1851_v10 = vsel %vm619_vm2, %v4366_v31, 0.0 }
 0x5b2   : > { %3641 = vpow2.f32 %v1836_v32  ;;  %1852 = vadd.xlane.f32.xlu1 %v1851_v10 }
 0x5b5   : > { %v1811_v34 = vpop.xlane.xlu2 %1810  ;;  %v2023_v36 = vpop.permute.xlu0 %2022 }
 0x5b6   : > { %v1827_v54 = vsub.f32 %v4302_v16, %v1811_v34  ;;  %v2028_v4 = vsel %vm908_vm3, %v2023_v36, 0  ;;  %v1820_v48 = vpop.xlane.xlu1 %1819 }
 0x5b7   : > { %v1830_v63 = vsub.f32 %v4304_v17, %v1820_v48  ;;  %2037 = vmatpush.bf16.msrb.mxu2 %v2028_v4 }
 0x5b8   : > { %v4373_v2 = vpop.eup %3641  ;;  %v1838_v3 = vmul.f32 1.442695, %v1827_v54 }
 0x5b9   : > { %v1844_v52 = vmul.f32 1.442695, %v1830_v63  ;;  %v1854_v49 = vsel %vm619_vm2, %v4373_v2, 0.0 }
 0x5ba   : > { %3643 = vpow2.f32 %v1838_v3  ;;  %1855 = vadd.xlane.f32.xlu2 %v1854_v49  ;;  %v1812_v3 = vsel %vm619_vm2, %v4292_v12, -inf }
 0x5bb   : > { %3645 = vpow2.f32 %v1844_v52 }
 0x5bf   : > { %3403 = vmatmul.msk.bf16.gmra.mxu1 %vm619_vm2, %v1075_v42 }
 0x5c0   : > { %v4381_v16 = vpop.eup %3643 }
 0x5c1   : > { %v4383_v37 = vpop.eup %3645  ;;  %v1857_v17 = vsel %vm619_vm2, %v4381_v16, 0.0 }
 0x5c2   : > { %1858 = vadd.xlane.f32.xlu1 %v1857_v17  ;;  %v1866_v47 = vsel %vm619_vm2, %v4383_v37, 0.0 }
 0x5c3   : > { %1867 = vadd.xlane.f32.xlu2 %v1866_v47 }
 0x5ce   : > { %v2146_v8 = vpop.permute.xlu1 %2145 }
 0x5cf   : > { %v2151_v36 = vsel %vm619_vm2, %v2146_v8, 0 }
 0x5d5   : > { %v1823_v5 = vpop.xlane.xlu2 %1822 }
 0x5d7   : > { %v1373_v35 = vpop.f32.mrf.mxu0 }
 0x5db   : > { %2166 = vrot.lane.b32.xlu1 %v3943_v45, %s3794_s19  ;;  %2168 = vrot.lane.b32.xlu2 %v3943_v45, %s3793_s24 }
 0x5dd   : > { %v2044_v40 = vpop.permute.xlu2 %2043 }
 0x5de   : > { %v2049_v42 = vsel %vm908_vm3, %v2044_v40, 0 }
 0x5df   : > { %2058 = vmatpush.bf16.msrb.mxu3 %v2049_v42  ;;  %v1375_v33 = vpop.f32.mrf.mxu0 }
 0x5e0   : > { %v1817_v6 = vpop.xlane.xlu0 %1816 }
 0x5e1   : > { %v1829_v13 = vsub.f32 %v4312_v23, %v1817_v6  ;;  %v1831_v23 = vsub.f32 %v4320_v22, %v1823_v5 }
 0x5e3   : > { %v1842_v14 = vmul.f32 1.442695, %v1829_v13  ;;  %2214 = vrot.lane.b32.xlu1 %v3953_v55, %s3793_s24  ;;  %v1394_v61 = vpop.f32.mrf.mxu1  ;;  %v1846_v21 = vmul.f32 1.442695, %v1831_v23 }
 0x5e4   : > { %v1524_v15 = vpack.c.bf16 %v1394_v61, %v1373_v35 }
 0x5e5   : > { %3647 = vpow2.f32 %v1842_v14 }
 0x5e6   : > { %3396 = vmatmul.msk.bf16.vlgmr.msra.gmra.mxu0 %vm619_vm2, %v1524_v15  ;;  %3649 = vpow2.f32 %v1846_v21 }
 0x5eb   : > { %v4400_v18 = vpop.eup %3647  ;;  %v1396_v38 = vpop.f32.mrf.mxu1 }
 0x5ec   : > { %v1863_v19 = vsel %vm619_vm2, %v4400_v18, 0.0  ;;  %v4413_v25 = vpop.eup %3649 }
 0x5ed   : > { %1864 = vadd.xlane.f32.xlu0 %v1863_v19  ;;  %v1869_v7 = vsel %vm619_vm2, %v4413_v25, 0.0 }
 0x5f3   : > { %v2123_v27 = vpop.permute.xlu0 %2122 }
 0x5f4   : > { %v2128_v29 = vsel %vm619_vm2, %v2123_v27, 0 }
 0x5f6   : > { %3397 = vmatmul.msk.bf16.gmra.mxu0 %vm619_vm2, %v1525_v39 }
 0x5fb   : > { %v2121_v49 = vpop.permute.xlu0 %2120 }
 0x5fc   : > { %v1478_v20 = vpop.f32.mrf.mxu1 }
 0x601   : > { %2191 = vrot.lane.b32.xlu0 %v3947_v50, %s3793_s24 }
 0x604   : > { %v1480_v24 = vpop.f32.mrf.mxu1  ;;  %1801 = vmax.xlane.f32.xlu2 %v1800_v46 }
 0x609   : > { %2189 = vrot.lane.b32.xlu0 %v3947_v50, %s3794_s19 }
 0x60c   : > { %v4459_v47 = vpop.f32.mrf.mxu1 }
 0x60d   : > { %1870 = vadd.xlane.f32.xlu1 %v1869_v7 }
 0x611   : > { %2237 = vrot.lane.b32.xlu0 %v3959_v60, %s3793_s24 }
 0x614   : > { %v4462_v35 = vpop.f32.mrf.mxu1 }
 0x619   : > { %2235 = vrot.lane.b32.xlu0 %v3959_v60, %s3794_s19 }
 0x61c   : > { %v4465_v33 = vpop.f32.mrf.mxu1 }
 0x61f   : > { %v1457_v39 = vpop.f32.mrf.mxu0 }
 0x620   : > { %v1526_v22 = vpack.c.bf16 %v1478_v20, %v1457_v39 }
 0x621   : > { %2260 = vrot.lane.b32.xlu0 %v3963_v1, %s3793_s24 }
 0x622   : > { %3398 = vmatmul.msk.bf16.gmra.mxu0 %vm619_vm2, %v1526_v22 }
 0x624   : > { %v4470_v15 = vpop.f32.mrf.mxu1 }
 0x625   : > { %v1853_v53 = vpop.xlane.xlu1 %1852 }
 0x626   : > { %3651 = vrcp.f32 %v1853_v53  ;;  %2212 = vrot.lane.b32.xlu1 %v3953_v55, %s3794_s19 }
 0x627   : > { %v1459_v51 = vpop.f32.mrf.mxu0 }
 0x62c   : > { %v3652_v44 = vpop.eup %3651  ;;  %v4476_v21 = vpop.f32.mrf.mxu1 }
 0x62d   : > { %v1881_v26 = vmul.f32 %v3652_v44, %v4366_v31  ;;  %v1856_v57 = vpop.xlane.xlu2 %1855 }
 0x62e   : > { %3653 = vrcp.f32 %v1856_v57  ;;  %2283 = vrot.lane.b32.xlu1 %v3969_v9, %s3793_s24  ;;  %s3026_s24 = scalar_lea.vmem %s5082_s13, %s3767_s29 }
 0x62f   : > { %v1889_v28 = vpack.c.bf16 %v1881_v26, %v1881_v26 }
 0x631   : > { %3413 = vmatmul.msk.bf16.vlgmr.msrb.gmra.mxu1 %vm619_vm2, %v1889_v28 }
 0x632   : > { %2137 = vmatpush.bf16.xpose.msrb.mxu1 %v2128_v29  ;;  %3399 = vmatmul.msk.bf16.gmra.mxu0 %vm619_vm2, %v1527_v0 }
 0x634   : > { %v3654_v30 = vpop.eup %3653  ;;  %v4482_v8 = vpop.f32.mrf.mxu1 }
 0x635   : > { %v1882_v31 = vmul.f32 %v3654_v30, %v4373_v2  ;;  %v1859_v32 = vpop.xlane.xlu1 %1858 }
 0x636   : > { %3655 = vrcp.f32 %v1859_v32  ;;  %2281 = vrot.lane.b32.xlu1 %v3969_v9, %s3794_s19  ;;  %v1868_v10 = vpop.xlane.xlu2 %1867 }
 0x637   : > { %v1890_v34 = vpack.c.bf16 %v1882_v31, %v1882_v31  ;;  %3657 = vrcp.f32 %v1868_v10 }
 0x639   : > { %3414 = vmatmul.msk.bf16.vlgmr.msra.gmra.mxu2 %vm619_vm2, %v1890_v34 }
 0x63a   : > { %2160 = vmatpush.bf16.xpose.msra.mxu2 %v2151_v36 }
 0x63c   : > { %v3656_v54 = vpop.eup %3655  ;;  %v4486_v51 = vpop.f32.mrf.mxu1 }
 0x63d   : > { %v1883_v43 = vmul.f32 %v3656_v54, %v4381_v16  ;;  %v3658_v48 = vpop.eup %3657 }
 0x63e   : > { %2258 = vrot.lane.b32.xlu1 %v3963_v1, %s3794_s19  ;;  %v2169_v62 = vpop.permute.xlu2 %2168  ;;  %v1886_v63 = vmul.f32 %v3658_v48, %v4383_v37  ;;  %v2144_v37 = vpop.permute.xlu0 %2143  ;;  %s2945_s19 = scalar_lea.vmem %s5080_s11, %s3767_s29 }
 0x63f   : > { %v1891_v0 = vpack.c.bf16 %v1883_v43, %v1883_v43  ;;  %v2174_v4 = vsel %vm619_vm2, %v2169_v62, 0 }
 0x640   : > { %v1894_v2 = vpack.c.bf16 %v1886_v63, %v1886_v63 }
 0x641   : > { %3415 = vmatmul.msk.bf16.vlgmr.msra.gmra.mxu3 %vm619_vm2, %v1891_v0 }
 0x642   : > { %2183 = vmatpush.bf16.xpose.msra.mxu3 %v2174_v4 }
 0x644   : > { %v4490_v26 = vpop.f32.mrf.mxu1 }
 0x646   : > { %1896 = vrot.lane.b32.xlu1 %v3939_v41, %s3792_s23 }
 0x649   : > { %3418 = vmatmul.msk.bf16.vlgmr.msrb.gmra.mxu2 %vm619_vm2, %v1894_v2 }
 0x64b   : > { %1813 = vmax.xlane.f32.xlu0 %v1812_v3 }
 0x64d   : > { %v2167_v52 = vpop.permute.xlu1 %2166 }
 0x64e   : > { %1980 = vrot.lane.b32.xlu1 %v3953_v55, %s3792_s23  ;;  %s2624_s23 = scalar_lea.vmem %s5074_s5, %s3767_s29 }
 0x655   : > { %v2215_v16 = vpop.permute.xlu1 %2214 }
 0x656   : > { %v2220_v17 = vsel %vm619_vm2, %v2215_v16, 0 }
 0x657   : > { %2229 = vmatpush.bf16.xpose.msrb.mxu2 %v2220_v17 }
 0x659   : > { %3425 = vmatmul.msk.bf16.vlgmr.msra.gmra.mxu2 %vm619_vm2, %v2144_v37 }
 0x65f   : > { %2400 = vrot.lane.b32.xlu0 %v3939_v41, %s3795_s20 }
 0x660   : > { %v1865_v58 = vpop.xlane.xlu0 %1864 }
 0x661   : > { %3659 = vrcp.f32 %v1865_v58 }
 0x667   : > { %v3660_v59 = vpop.eup %3659 }
 0x668   : > { %v1885_v5 = vmul.f32 %v3660_v59, %v4400_v18 }
 0x66a   : > { %v1893_v40 = vpack.c.bf16 %v1885_v5, %v1885_v5 }
 0x66c   : > { %3417 = vmatmul.msk.bf16.vlgmr.msra.gmra.mxu1 %vm619_vm2, %v1893_v40 }
 0x673   : > { %v2192_v42 = vpop.permute.xlu0 %2191 }
 0x674   : > { %v2197_v6 = vsel %vm619_vm2, %v2192_v42, 0 }
 0x675   : > { %2206 = vmatpush.bf16.xpose.msra.mxu1 %v2197_v6 }
 0x677   : > { %v1802_v13 = vpop.xlane.xlu2 %1801 }
 0x678   : > { %v1824_v41 = vsub.f32 %v4276_v56, %v1802_v13 }
 0x67a   : > { %v1832_v14 = vmul.f32 1.442695, %v1824_v41 }
 0x67b   : > { %v2190_v61 = vpop.permute.xlu0 %2189 }
 0x67c   : > { %3661 = vpow2.f32 %v1832_v14  ;;  %3424 = vmatmul.msk.bf16.vlgmr.msrb.gmra.mxu1 %vm619_vm2, %v2121_v49 }
 0x680   : > { %v1871_v18 = vpop.xlane.xlu1 %1870 }
 0x681   : > { %3663 = vrcp.f32 %v1871_v18 }
 0x682   : > { %v4472_v38 = vpop.eup %3661 }
 0x683   : > { %v2238_v19 = vpop.permute.xlu0 %2237  ;;  %v1848_v23 = vsel %vm619_vm2, %v4472_v38, 0.0 }
 0x684   : > { %1849 = vadd.xlane.f32.xlu2 %v1848_v23  ;;  %v2243_v7 = vsel %vm619_vm2, %v2238_v19, 0 }
 0x687   : > { %v3664_v20 = vpop.eup %3663 }
 0x688   : > { %v1887_v56 = vmul.f32 %v3664_v20, %v4413_v25 }
 0x68a   : > { %v1895_v46 = vpack.c.bf16 %v1887_v56, %v1887_v56 }
 0x68b   : > { %v2236_v24 = vpop.permute.xlu0 %2235 }
 0x68c   : > { %3419 = vmatmul.msk.bf16.vlgmr.msrb.gmra.mxu3 %vm619_vm2, %v1895_v46  ;;  %3427 = vmatmul.msk.bf16.vlgmr.msra.gmra.mxu1 %vm619_vm2, %v2190_v61 }
 0x68d   : > { %2252 = vmatpush.bf16.xpose.msrb.mxu3 %v2243_v7 }
 0x693   : > { %v2261_v39 = vpop.permute.xlu0 %2260 }
 0x694   : > { %v2266_v22 = vsel %vm619_vm2, %v2261_v39, 0 }
 0x695   : > { %2275 = vmatpush.bf16.xpose.msrb.mxu1 %v2266_v22 }
 0x698   : > { %v2213_v53 = vpop.permute.xlu1 %2212 }
 0x699   : > { %3428 = vmatmul.msk.bf16.vlgmr.msrb.gmra.mxu2 %vm619_vm2, %v2213_v53 }
 0x69c   : > { %3426 = vmatmul.msk.bf16.vlgmr.msra.gmra.mxu3 %vm619_vm2, %v2167_v52 }
 0x6a0   : > { %v2284_v25 = vpop.permute.xlu1 %2283 }
 0x6a1   : > { %v2289_v44 = vsel %vm619_vm2, %v2284_v25, 0 }
 0x6a2   : > { %2298 = vmatpush.bf16.xpose.msra.mxu2 %v2289_v44 }
 0x6a8   : > { %v2282_v57 = vpop.permute.xlu1 %2281 }
 0x6a9   : > { %3431 = vmatmul.msk.bf16.vlgmr.msra.gmra.mxu2 %vm619_vm2, %v2282_v57  ;;  %v4549_v57 = vpop.f32.mrf.mxu0 }
 0x6ac   : > { %3429 = vmatmul.msk.bf16.vlgmr.msrb.gmra.mxu3 %vm619_vm2, %v2236_v24 }
 0x6ae   : > { %v4494_v27 = vpop.f32.mrf.mxu1 }
 0x6b0   : > { %v2259_v28 = vpop.permute.xlu1 %2258 }
 0x6b1   : > { %3430 = vmatmul.msk.bf16.vlgmr.msrb.gmra.mxu1 %vm619_vm2, %v2259_v28 }
 0x6b6   : > { %v1936_v29 = vpop.f32.mrf.mxu1 }
 0x6b8   : > { %v1897_v30 = vpop.permute.xlu1 %1896 }
 0x6b9   : > { %v1902_v31 = vsel %vm908_vm3, %v1897_v30, 0 }
 0x6ba   : > { %1911 = vmatpush.bf16.msrb.mxu0 %v1902_v31 }
 0x6bc   : > { %v4498_v32 = vpop.f32.mrf.mxu2 }
 0x6be   : > { %v1814_v10 = vpop.xlane.xlu0 %1813 }
 0x6bf   : > { %v1828_v34 = vsub.f32 %v4292_v12, %v1814_v10  ;;  %v4553_v10 = vpop.f32.mrf.mxu0 }
 0x6c0   : > { %v1981_v36 = vpop.permute.xlu1 %1980 }
 0x6c1   : > { %v1840_v54 = vmul.f32 1.442695, %v1828_v34  ;;  %v1986_v43 = vsel %vm908_vm3, %v1981_v36, 0 }
 0x6c2   : > { %1995 = vmatpush.bf16.msra.mxu0 %v1986_v43 }
 0x6c3   : > { %3665 = vpow2.f32 %v1840_v54 }
 0x6c4   : > { %v1957_v62 = vpop.f32.mrf.mxu2  ;;  %v4502_v0 = vpop.f32.mrf.mxu3 }
 0x6c5   : > { %v2065_v4 = vpack.c.bf16 %v4502_v0, %v4498_v32 }
 0x6c7   : > { %v4555_v43 = vpop.f32.mrf.mxu0 }
 0x6c9   : > { %v3666_v48 = vpop.eup %3665 }
 0x6ca   : > { %v1860_v63 = vsel %vm619_vm2, %v3666_v48, 0.0 }
 0x6cb   : > { %1861 = vadd.xlane.f32.xlu2 %v1860_v63 }
 0x6cc   : > { %v1978_v2 = vpop.f32.mrf.mxu3  ;;  %v4507_v3 = vpop.f32.mrf.mxu2 }
 0x6cd   : > { %v612_v2 = vld [vmem:[%s4332_s28 + $0x8] sm:$0xf] }
 0x6d1   : > { %v2401_v12 = vpop.permute.xlu0 %2400 }
 0x6d2   : > { %v2406_v52 = vsel %vm908_vm3, %v2401_v12, 0  ;;  %v4559_v12 = vpop.f32.mrf.mxu0 }
 0x6d3   : > { %2415 = vmatpush.bf16.msra.mxu3 %v2406_v52 }
 0x6d4   : > { %v2041_v49 = vpop.f32.mrf.mxu2 }
 0x6d5   : > { %v2081_v49 = vsel %vm908_vm3, %v612_v2, 0 }
 0x6dc   : > { %v2162_v16 = vpop.f32.mrf.mxu2 }
 0x6dd   : > { %v2307_v17 = vsel %vm619_vm2, %v2162_v16, -inf }
 0x6de   : > { %2308 = vmax.xlane.f32.xlu1 %v2307_v17 }
 0x6e4   : > { %v2164_v37 = vpop.f32.mrf.mxu2 }
 0x6e5   : > { %v4562_v37 = vpop.f32.mrf.mxu0 }
 0x6e9   : > { %v4511_v58 = vpop.f32.mrf.mxu1 }
 0x6f1   : > { %v2020_v59 = vpop.f32.mrf.mxu1 }
 0x6f7   : > { %2463 = vrot.lane.b32.xlu1 %v3947_v50, %s3795_s20  ;;  %v1850_v5 = vpop.xlane.xlu2 %1849 }
 0x6f8   : > { %3667 = vrcp.f32 %v1850_v5  ;;  %v4568_v5 = vpop.f32.mrf.mxu0 }
 0x6f9   : > { %v4515_v40 = vpop.f32.mrf.mxu1 }
 0x6fa   : > { %v2304_v42 = vsel %vm619_vm2, %v4515_v40, -inf }
 0x6fb   : > { %2305 = vmax.xlane.f32.xlu2 %v2304_v42 }
 0x6fe   : > { %v3668_v6 = vpop.eup %3667 }
 0x6ff   : > { %v1880_v13 = vmul.f32 %v3668_v6, %v4472_v38  ;;  %2484 = vrot.lane.b32.xlu1 %v3953_v55, %s3795_s20 }
 0x701   : > { %v1888_v41 = vpack.c.bf16 %v1880_v13, %v1880_v13  ;;  %v2141_v14 = vpop.f32.mrf.mxu1 }
 0x703   : > { %3412 = vmatmul.msk.bf16.vlgmr.msrb.gmra.mxu0 %vm619_vm2, %v1888_v41 }
 0x704   : > { %2090 = vmatpush.bf16.msrb.mxu0 %v2081_v49 }
 0x709   : > { %v4523_v61 = vpop.f32.mrf.mxu1 }
 0x70a   : > { %v2313_v50 = vsel %vm619_vm2, %v4523_v61, -inf }
 0x70b   : > { %2314 = vmax.xlane.f32.xlu2 %v2313_v50 }
 0x70f   : > { %v4527_v18 = vpop.f32.mrf.mxu3 }
 0x710   : > { %v2067_v19 = vpack.c.bf16 %v4527_v18, %v4507_v3  ;;  %v1597_v18 = vadd.f32 %v4459_v47, %v4549_v57 }
 0x711   : > { %v2210_v23 = vpop.f32.mrf.mxu1 }
 0x717   : > { %v2062_v38 = vpop.f32.mrf.mxu3 }
 0x71c   : > { %v4531_v20 = vpop.f32.mrf.mxu2 }
 0x71d   : > { %v2316_v55 = vsel %vm619_vm2, %v4531_v20, -inf }
 0x71e   : > { %2317 = vmax.xlane.f32.xlu0 %v2316_v55 }
 0x71f   : > { %v4535_v56 = vpop.f32.mrf.mxu3 }
 0x720   : > { %v2310_v46 = vsel %vm619_vm2, %v4535_v56, -inf }
 0x721   : > { %2311 = vmax.xlane.f32.xlu2 %v2310_v46 }
 0x724   : > { %v2233_v24 = vpop.f32.mrf.mxu2 }
 0x727   : > { %v2187_v7 = vpop.f32.mrf.mxu3 }
 0x72c   : > { %v4539_v39 = vpop.f32.mrf.mxu2 }
 0x72d   : > { %v2325_v31 = vsel %vm619_vm2, %v4539_v39, -inf }
 0x72e   : > { %v4541_v22 = vpop.f32.mrf.mxu1 }
 0x72f   : > { %v4543_v53 = vpop.f32.mrf.mxu3  ;;  %v2322_v25 = vsel %vm619_vm2, %v4541_v22, -inf }
 0x730   : > { %2323 = vmax.xlane.f32.xlu0 %v2322_v25  ;;  %v2319_v44 = vsel %vm619_vm2, %v4543_v53, -inf }
 0x731   : > { %2320 = vmax.xlane.f32.xlu2 %v2319_v44 }
 0x734   : > { %v2302_v28 = vpop.f32.mrf.mxu2 }
 0x736   : > { %v2279_v29 = vpop.f32.mrf.mxu1 }
 0x737   : > { %v2256_v30 = vpop.f32.mrf.mxu3 }
 0x739   : > { %2326 = vmax.xlane.f32.xlu2 %v2325_v31 }
 0x73e   : > { %v1862_v34 = vpop.xlane.xlu2 %1861 }
 0x73f   : > { %3669 = vrcp.f32 %v1862_v34 }
 0x745   : > { %v3670_v36 = vpop.eup %3669 }
 0x746   : > { %v1884_v54 = vmul.f32 %v3670_v36, %v3666_v48 }
 0x748   : > { %v1892_v62 = vpack.c.bf16 %v1884_v54, %v1884_v54 }
 0x74a   : > { %3416 = vmatmul.msk.bf16.vlgmr.msra.gmra.mxu0 %vm619_vm2, %v1892_v62 }
 0x751   : > { %v2309_v63 = vpop.xlane.xlu1 %2308 }
 0x752   : > { %v2329_v52 = vsub.f32 %v2162_v16, %v2309_v63  ;;  %v4571_v16 = vpop.f32.mrf.mxu0 }
 0x754   : > { %v2338_v17 = vmul.f32 1.442695, %v2329_v52 }
 0x756   : > { %3671 = vpow2.f32 %v2338_v17 }
 0x75a   : > { %v4577_v38 = vpop.f32.mrf.mxu0 }
 0x75c   : > { %v4564_v59 = vpop.eup %3671 }
 0x75d   : > { %v2355_v48 = vsel %vm619_vm2, %v4564_v59, 0.0 }
 0x75e   : > { %2356 = vadd.xlane.f32.xlu2 %v2355_v48 }
 0x769   : > { %v2464_v42 = vpop.permute.xlu1 %2463 }
 0x76a   : > { %v2469_v6 = vsel %vm908_vm3, %v2464_v42, 0 }
 0x76b   : > { %2478 = vmatpush.bf16.msrb.mxu3 %v2469_v6 }
 0x76e   : > { %v2306_v13 = vpop.xlane.xlu2 %2305 }
 0x76f   : > { %v2328_v41 = vsub.f32 %v4515_v40, %v2306_v13 }
 0x771   : > { %v2336_v14 = vmul.f32 1.442695, %v2328_v41  ;;  %v2485_v50 = vpop.permute.xlu1 %2484 }
 0x772   : > { %v2490_v23 = vsel %vm908_vm3, %v2485_v50, 0 }
 0x773   : > { %3673 = vpow2.f32 %v2336_v14  ;;  %2499 = vmatpush.bf16.msra.mxu0 %v2490_v23 }
 0x776   : > { %2421 = vrot.lane.b32.xlu2 %v3973_v11, %s3795_s20 }
 0x779   : > { %v4579_v55 = vpop.eup %3673 }
 0x77a   : > { %v2352_v46 = vsel %vm619_vm2, %v4579_v55, 0.0 }
 0x77b   : > { %2353 = vadd.xlane.f32.xlu0 %v2352_v46 }
 0x77e   : > { %v2315_v24 = vpop.xlane.xlu2 %2314 }
 0x77f   : > { %v2331_v40 = vsub.f32 %v4523_v61, %v2315_v24 }
 0x780   : > { %v1913_v7 = vpop.f32.mrf.mxu0 }
 0x781   : > { %v2342_v25 = vmul.f32 1.442695, %v2331_v40  ;;  %v2064_v44 = vpack.c.bf16 %v4494_v27, %v1913_v7 }
 0x783   : > { %3675 = vpow2.f32 %v2342_v25  ;;  %3420 = vmatmul.msk.bf16.vlgmr.msrb.gmra.mxu0 %vm619_vm2, %v2064_v44 }
 0x788   : > { %v1915_v28 = vpop.f32.mrf.mxu0 }
 0x789   : > { %v4586_v11 = vpop.eup %3675 }
 0x78a   : > { %v2361_v29 = vsel %vm619_vm2, %v4586_v11, 0.0 }
 0x78b   : > { %2362 = vadd.xlane.f32.xlu1 %v2361_v29 }
 0x78f   : > { %2442 = vrot.lane.b32.xlu0 %v3943_v45, %s3795_s20 }
 0x791   : > { %v2318_v36 = vpop.xlane.xlu0 %2317 }
 0x792   : > { %v2332_v62 = vsub.f32 %v4531_v20, %v2318_v36 }
 0x793   : > { %3421 = vmatmul.msk.bf16.gmra.mxu0 %vm619_vm2, %v2065_v4 }
 0x794   : > { %v2312_v61 = vpop.xlane.xlu2 %2311  ;;  %v2344_v0 = vmul.f32 1.442695, %v2332_v62 }
 0x795   : > { %v2330_v27 = vsub.f32 %v4535_v56, %v2312_v61 }
 0x797   : > { %v2340_v30 = vmul.f32 1.442695, %v2330_v27  ;;  %v1602_v27 = vadd.f32 %v4465_v33, %v4555_v43 }
 0x799   : > { %3677 = vpow2.f32 %v2340_v30 }
 0x79f   : > { %v4597_v31 = vpop.eup %3677 }
 0x7a0   : > { %v2358_v34 = vsel %vm619_vm2, %v4597_v31, 0.0 }
 0x7a1   : > { %2359 = vadd.xlane.f32.xlu1 %v2358_v34 }
 0x7a3   : > { %v2324_v42 = vpop.xlane.xlu0 %2323 }
 0x7a4   : > { %v2321_v54 = vpop.xlane.xlu2 %2320  ;;  %v2334_v41 = vsub.f32 %v4541_v22, %v2324_v42 }
 0x7a5   : > { %v2333_v45 = vsub.f32 %v4543_v53, %v2321_v54 }
 0x7a7   : > { %v2346_v32 = vmul.f32 1.442695, %v2333_v45 }
 0x7a9   : > { %3679 = vpow2.f32 %v2346_v32 }
 0x7aa   : > { %3681 = vpow2.f32 %v2344_v0 }
 0x7ac   : > { %v2327_v4 = vpop.xlane.xlu2 %2326 }
 0x7ad   : > { %v2335_v56 = vsub.f32 %v4539_v39, %v2327_v4 }
 0x7af   : > { %v4603_v63 = vpop.eup %3679  ;;  %v2350_v52 = vmul.f32 1.442695, %v2335_v56 }
 0x7b0   : > { %v2367_v2 = vsel %vm619_vm2, %v4603_v63, 0.0  ;;  %v4608_v49 = vpop.eup %3681 }
 0x7b1   : > { %2368 = vadd.xlane.f32.xlu2 %v2367_v2  ;;  %3683 = vpow2.f32 %v2350_v52  ;;  %v2364_v20 = vsel %vm619_vm2, %v4608_v49, 0.0 }
 0x7b7   : > { %v4614_v53 = vpop.eup %3683 }
 0x7b8   : > { %v2373_v39 = vsel %vm619_vm2, %v4614_v53, 0.0 }
 0x7b9   : > { %2365 = vadd.xlane.f32.xlu0 %v2364_v20 }
 0x7ba   : > { %2505 = vrot.lane.b32.xlu1 %v3959_v60, %s3795_s20  ;;  %v2348_v60 = vmul.f32 1.442695, %v2334_v41 }
 0x7c1   : > { %2374 = vadd.xlane.f32.xlu0 %v2373_v39 }
 0x7c7   : > { %v1997_v17 = vpop.f32.mrf.mxu0 }
 0x7c8   : > { %v2066_v48 = vpack.c.bf16 %v4511_v58, %v1997_v17  ;;  %v1607_v17 = vadd.f32 %v4476_v21, %v4562_v37 }
 0x7c9   : > { %2526 = vrot.lane.b32.xlu2 %v3963_v1, %s3795_s20 }
 0x7ca   : > { %3422 = vmatmul.msk.bf16.gmra.mxu0 %vm619_vm2, %v2066_v48 }
 0x7cf   : > { %v1999_v6 = vpop.f32.mrf.mxu0 }
 0x7d1   : > { %v2357_v13 = vpop.xlane.xlu2 %2356 }
 0x7d2   : > { %3685 = vrcp.f32 %v2357_v13 }
 0x7d3   : > { %3687 = vpow2.f32 %v2348_v60 }
 0x7d5   : > { %2547 = vrot.lane.b32.xlu0 %v3969_v9, %s3795_s20  ;;  %s2647_s20 = scalar_lea.vmem %s5076_s7, %s3767_s29 }
 0x7d8   : > { %v3686_v14 = vpop.eup %3685 }
 0x7d9   : > { %v2385_v50 = vmul.f32 %v3686_v14, %v4564_v59  ;;  %v2422_v23 = vpop.permute.xlu2 %2421  ;;  %v4632_v22 = vpop.eup %3687  ;;  %v1612_v14 = vadd.f32 %v4486_v51, %v4571_v16 }
 0x7da   : > { %v2427_v58 = vsel %vm908_vm3, %v2422_v23, 0  ;;  %3423 = vmatmul.msk.bf16.gmra.mxu0 %vm619_vm2, %v2067_v19  ;;  %v2370_v9 = vsel %vm619_vm2, %v4632_v22, 0.0  ;;  %v613_v23 = vld [vmem:[%s4332_s28 + $0xc] sm:$0xf] }
 0x7db   : > { %v2393_v1 = vpack.c.bf16 %v2385_v50, %v2385_v50  ;;  %2436 = vmatpush.bf16.msra.mxu1 %v2427_v58 }
 0x7de   : > { %3433 = vmatmul.msk.bf16.vlgmr.msra.gmra.mxu1 %vm619_vm2, %v2393_v1  ;;  %v2585_v1 = vsel %vm908_vm3, %v613_v23, 0  ;;  %v1609_v23 = vadd.f32 %v4482_v8, %v4568_v5  ;;  %v3796_v8 = vmov 32.0  }
 0x7df   : > { %2594 = vmatpush.bf16.msrb.mxu0 %v2585_v1 }
 0x7e4   : > { %2371 = vadd.xlane.f32.xlu1 %v2370_v9 }
 0x7ee   : > { %v2354_v59 = vpop.xlane.xlu0 %2353 }
 0x7ef   : > { %3689 = vrcp.f32 %v2354_v59 }
 0x7f5   : > { %v3690_v46 = vpop.eup %3689 }
 0x7f6   : > { %v2384_v24 = vmul.f32 %v3690_v46, %v4579_v55 }
 0x7f8   : > { %v2392_v40 = vpack.c.bf16 %v2384_v24, %v2384_v24 }
 0x7fa   : > { %3432 = vmatmul.msk.bf16.vlgmr.msra.gmra.mxu3 %vm619_vm2, %v2392_v40 }
 0x7fe   : > { %v2363_v3 = vpop.xlane.xlu1 %2362 }
 0x7ff   : > { %3691 = vrcp.f32 %v2363_v3 }
 0x800   : > { %v2092_v19 = vpop.f32.mrf.mxu0 }
 0x801   : > { %v4640_v7 = vadd.f32 %v2092_v19, %v1597_v18  ;;  %v2443_v25 = vpop.permute.xlu0 %2442 }
 0x802   : > { %v2448_v44 = vsel %vm908_vm3, %v2443_v25, 0 }
 0x803   : > { %2457 = vmatpush.bf16.msrb.mxu2 %v2448_v44 }
 0x805   : > { %v3692_v28 = vpop.eup %3691 }
 0x806   : > { %v2387_v29 = vmul.f32 %v3692_v28, %v4586_v11 }
 0x808   : > { %v2395_v61 = vpack.c.bf16 %v2387_v29, %v2387_v29  ;;  %v4644_v55 = vpop.f32.mrf.mxu0 }
 0x80a   : > { %3435 = vmatmul.msk.bf16.vlgmr.msrb.gmra.mxu3 %vm619_vm2, %v2395_v61 }
 0x810   : > { %v2097_v47 = vpop.f32.mrf.mxu0 }
 0x811   : > { %v4649_v57 = vadd.f32 %v2097_v47, %v1602_v27 }
 0x814   : > { %v2360_v30 = vpop.xlane.xlu1 %2359 }
 0x815   : > { %3693 = vrcp.f32 %v2360_v30 }
 0x818   : > { %v4659_v20 = vpop.f32.mrf.mxu0 }
 0x81b   : > { %v3694_v34 = vpop.eup %3693 }
 0x81c   : > { %v2386_v36 = vmul.f32 %v3694_v34, %v4597_v31 }
 0x81e   : > { %v2394_v54 = vpack.c.bf16 %v2386_v36, %v2386_v36 }
 0x820   : > { %3434 = vmatmul.msk.bf16.vlgmr.msrb.gmra.mxu2 %vm619_vm2, %v2394_v54 }
 0x824   : > { %v2369_v11 = vpop.xlane.xlu2 %2368 }
 0x825   : > { %3695 = vrcp.f32 %v2369_v11  ;;  %v4688_v11 = vld [vmem:[%s2624_s23] ss:$0 sm:$0xff]  ;;  %s2859_s23 = scalar_lea.vmem %s5077_s8, %s3925_s30 }
 0x82b   : > { %v3696_v45 = vpop.eup %3695 }
 0x82c   : > { %v2389_v62 = vmul.f32 %v3696_v45, %v4603_v63  ;;  %v2506_v32 = vpop.permute.xlu1 %2505  ;;  %v2527_v0 = vpop.permute.xlu2 %2526 }
 0x82d   : > { %v2511_v33 = vsel %vm908_vm3, %v2506_v32, 0  ;;  %v2532_v43 = vsel %vm908_vm3, %v2527_v0, 0  ;;  %v2366_v4 = vpop.xlane.xlu0 %2365  ;;  %v1599_v0 = vadd.f32 %v4462_v35, %v4553_v10 }
 0x82e   : > { %v2397_v56 = vpack.c.bf16 %v2389_v62, %v2389_v62  ;;  %3697 = vrcp.f32 %v2366_v4  ;;  %2520 = vmatpush.bf16.msrb.mxu1 %v2511_v33  ;;  %2541 = vmatpush.bf16.msra.mxu2 %v2532_v43  ;;  %v3737_v33 = vld [vmem:[#allocation2] sm:$0xff] }
 0x82f   : > { %v2113_v4 = vadd.f32 %v4644_v55, %v1599_v0 }
 0x831   : > { %3437 = vmatmul.msk.bf16.vlgmr.msrb.gmra.mxu1 %vm619_vm2, %v2397_v56 }
 0x834   : > { %v3698_v31 = vpop.eup %3697 }
 0x835   : > { %v2388_v2 = vmul.f32 %v3698_v31, %v4608_v49  ;;  %v2375_v63 = vpop.xlane.xlu0 %2374 }
 0x836   : > { %3699 = vrcp.f32 %v2375_v63  ;;  %v3738_v63 = vld [vmem:[#allocation2 + $0x8] sm:$0xff] }
 0x837   : > { %v2396_v52 = vpack.c.bf16 %v2388_v2, %v2388_v2 }
 0x839   : > { %3436 = vmatmul.msk.bf16.vlgmr.msra.gmra.mxu0 %vm619_vm2, %v2396_v52 }
 0x83c   : > { %v3700_v39 = vpop.eup %3699 }
 0x83d   : > { %v2391_v48 = vmul.f32 %v3700_v39, %v4614_v53 }
 0x83f   : > { %v2399_v41 = vpack.c.bf16 %v2391_v48, %v2391_v48  ;;  %v3739_v48 = vld [vmem:[#allocation2 + $0x10] sm:$0xff] }
 0x847   : > { %v2102_v42 = vpop.f32.mrf.mxu0  ;;  %v2548_v6 = vpop.permute.xlu0 %2547 }
 0x848   : > { %v4664_v13 = vadd.f32 %v2102_v42, %v1607_v17  ;;  %v2553_v49 = vsel %vm908_vm3, %v2548_v6, 0  ;;  %v1604_v17 = vadd.f32 %v4470_v15, %v4559_v12 }
 0x849   : > { %2562 = vmatpush.bf16.msra.mxu3 %v2553_v49 }
 0x84a   : > { %v2115_v6 = vadd.f32 %v4659_v20, %v1604_v17 }
 0x84c   : > { %3439 = vmatmul.msk.bf16.vlgmr.msra.gmra.mxu3 %vm619_vm2, %v2399_v41 }
 0x84f   : > { %v4668_v60 = vpop.f32.mrf.mxu0 }
 0x857   : > { %v2372_v21 = vpop.xlane.xlu1 %2371  ;;  %v2107_v37 = vpop.f32.mrf.mxu0 }
 0x858   : > { %3701 = vrcp.f32 %v2372_v21  ;;  %v4672_v53 = vadd.f32 %v2107_v37, %v1612_v14  ;;  %v3740_v37 = vld [vmem:[#allocation2 + $0x18] sm:$0xff] }
 0x859   : > { %3703 = vrcp.f32 %v3796_v8 }
 0x85b   : > { %v2438_v50 = vpop.f32.mrf.mxu1 }
 0x85e   : > { %v3702_v58 = vpop.eup %3701 }
 0x85f   : > { %v2390_v9 = vmul.f32 %v3702_v58, %v4632_v22  ;;  %v4684_v25 = vpop.f32.mrf.mxu0  ;;  %v3741_v58 = vld [vmem:[#allocation2 + $0x20] sm:$0xff]  ;;  %v3704_v5 = vpop.eup %3703 }
 0x860   : > { %vm2678_vm4 = vweird.f32 %v3704_v5 }
 0x861   : > { %v2398_v59 = vpack.c.bf16 %v2390_v9, %v2390_v9  ;;  %v2117_v9 = vadd.f32 %v4668_v60, %v1609_v23  ;;  %v2674_v60 = vmul.f32 32.0, %v3704_v5 }
 0x863   : > { %v2440_v46 = vpop.f32.mrf.mxu1  ;;  %3438 = vmatmul.msk.bf16.vlgmr.msra.gmra.mxu2 %vm619_vm2, %v2398_v59 }
 0x87d   : > { %v2417_v24 = vpop.f32.mrf.mxu3 }
 0x87e   : > { %v2568_v51 = vpack.c.bf16 %v2438_v50, %v2417_v24 }
 0x880   : > { %3440 = vmatmul.msk.bf16.vlgmr.msrb.gmra.mxu0 %vm619_vm2, %v2568_v51  ;;  %v3742_v51 = vld [vmem:[#allocation2 + $0x28] sm:$0xff] }
 0x885   : > { %v2419_v16 = vpop.f32.mrf.mxu3 }
 0x88d   : > { %v2480_v40 = vpop.f32.mrf.mxu3 }
 0x895   : > { %v2482_v3 = vpop.f32.mrf.mxu3 }
 0x8a3   : > { %v2459_v18 = vpop.f32.mrf.mxu2 }
 0x8a4   : > { %v2569_v19 = vpack.c.bf16 %v2480_v40, %v2459_v18 }
 0x8a6   : > { %3441 = vmatmul.msk.bf16.gmra.mxu0 %vm619_vm2, %v2569_v19 }
 0x8ab   : > { %v2461_v22 = vpop.f32.mrf.mxu2 }
 0x8ac   : > { %v2675_v22 = vsub.f32 1.0, %v2674_v60 }
 0x8ae   : > { %v2522_v44 = vpop.f32.mrf.mxu1 }
 0x8b6   : > { %v2501_v28 = vpop.f32.mrf.mxu0  ;;  %v2524_v29 = vpop.f32.mrf.mxu1 }
 0x8b7   : > { %v2570_v61 = vpack.c.bf16 %v2522_v44, %v2501_v28  ;;  %v3743_v44 = vld [vmem:[#allocation2 + $0x30] sm:$0xff] }
 0x8b9   : > { %3442 = vmatmul.msk.bf16.gmra.mxu0 %vm619_vm2, %v2570_v61  ;;  %v2676_v61 = vmul.f32 %v3704_v5, %v2675_v22 }
 0x8be   : > { %v2503_v27 = vpop.f32.mrf.mxu0 }
 0x8bf   : > { %v2677_v27 = vadd.f32 %v3704_v5, %v2676_v61 }
 0x8cf   : > { %v2564_v47 = vpop.f32.mrf.mxu3 }
 0x8d7   : > { %v2566_v30 = vpop.f32.mrf.mxu3 }
 0x8e6   : > { %v2543_v34 = vpop.f32.mrf.mxu2 }
 0x8e7   : > { %v2571_v36 = vpack.c.bf16 %v2564_v47, %v2543_v34  ;;  %v1614_v47 = vadd.f32 %v4490_v26, %v4577_v38 }
 0x8e9   : > { %3443 = vmatmul.msk.bf16.gmra.mxu0 %vm619_vm2, %v2571_v36  ;;  %v2119_v36 = vadd.f32 %v4684_v25, %v1614_v47  ;;  %v3744_v25 = vld [vmem:[#allocation2 + $0x38] sm:$0xff] }
 0x8ee   : > { %v2545_v54 = vpop.f32.mrf.mxu2 }
 0x8fd   : > { %v2596_v45 = vpop.f32.mrf.mxu0 }
 0x8fe   : > { %v2616_v62 = vadd.f32 %v2596_v45, %v4640_v7 }
 0x900   : > { %v2629_v32 = vadd.f32 %v4688_v11, %v2616_v62 }
 0x902   : > { %v4694_v43 = vadd.f32 %v3737_v33, %v2629_v32 }
 0x904   : > { %v2649_v56 = vsel %vm558_vm1, %v4694_v43, 0.0 }
 0x905   : > { %2650 = vadd.xlane.f32.xlu2 %v2649_v56  ;;  %v2598_v31 = vpop.f32.mrf.mxu0 }
 0x906   : > { %v2617_v2 = vadd.f32 %v2598_v31, %v2113_v4 }
 0x908   : > { %v2630_v52 = vadd.f32 %v4688_v11, %v2617_v2 }
 0x90a   : > { %v4700_v7 = vadd.f32 %v3738_v63, %v2630_v52 }
 0x90c   : > { %v2652_v39 = vsel %vm558_vm1, %v4700_v7, 0.0 }
 0x90d   : > { %2653 = vadd.xlane.f32.xlu0 %v2652_v39 }
 0x923   : > { %v2601_v35 = vpop.f32.mrf.mxu0 }
 0x924   : > { %v2618_v10 = vadd.f32 %v2601_v35, %v4649_v57 }
 0x926   : > { %v2631_v55 = vadd.f32 %v4688_v11, %v2618_v10 }
 0x928   : > { %v4708_v42 = vadd.f32 %v3739_v48, %v2631_v55 }
 0x92a   : > { %v2655_v49 = vsel %vm558_vm1, %v4708_v42, 0.0 }
 0x92b   : > { %2656 = vadd.xlane.f32.xlu1 %v2655_v49  ;;  %v2603_v41 = vpop.f32.mrf.mxu0 }
 0x92c   : > { %v2619_v14 = vadd.f32 %v2603_v41, %v2115_v6 }
 0x92e   : > { %v2632_v21 = vadd.f32 %v4688_v11, %v2619_v14 }
 0x930   : > { %v4714_v57 = vadd.f32 %v3740_v37, %v2632_v21 }
 0x932   : > { %v2658_v50 = vsel %vm558_vm1, %v4714_v57, 0.0 }
 0x933   : > { %2659 = vadd.xlane.f32.xlu1 %v2658_v50 }
 0x936   : > { %v2606_v15 = vpop.f32.mrf.mxu0 }
 0x937   : > { %v2620_v12 = vadd.f32 %v2606_v15, %v4664_v13 }
 0x939   : > { %v2633_v20 = vadd.f32 %v4688_v11, %v2620_v12 }
 0x93b   : > { %v4722_v1 = vadd.f32 %v3741_v58, %v2633_v20 }
 0x93d   : > { %v2661_v59 = vsel %vm558_vm1, %v4722_v1, 0.0 }
 0x93e   : > { %2662 = vadd.xlane.f32.xlu1 %v2661_v59  ;;  %v2608_v46 = vpop.f32.mrf.mxu0  ;;  %v3488_v59 = vld [vmem:[%s2859_s23 + $0x8] sm:$0xff] }
 0x93f   : > { %v2621_v24 = vadd.f32 %v2608_v46, %v2117_v9  ;;  %2899 = vmatpush.bf16.msra.mxu1 %v3488_v59 }
 0x941   : > { %v2634_v13 = vadd.f32 %v4688_v11, %v2621_v24 }
 0x943   : > { %v2642_v16 = vadd.f32 %v3742_v51, %v2634_v13  ;;  %v3487_v13 = vld [vmem:[%s2859_s23] sm:$0xff] }
 0x944   : > { %2900 = vmatpush.bf16.msra.mxu1 %v3487_v13 }
 0x945   : > { %v2664_v40 = vsel %vm558_vm1, %v2642_v16, 0.0 }
 0x946   : > { %2665 = vadd.xlane.f32.xlu1 %v2664_v40 }
 0x966   : > { %v2611_v3 = vpop.f32.mrf.mxu0 }
 0x967   : > { %v2622_v18 = vadd.f32 %v2611_v3, %v4672_v53  ;;  %v4740_v53 = vsel %vm2678_vm4, %v3704_v5, %v2677_v27 }
 0x969   : > { %v2635_v19 = vadd.f32 %v4688_v11, %v2622_v18 }
 0x96b   : > { %v2643_v28 = vadd.f32 %v3743_v44, %v2635_v19 }
 0x96d   : > { %v2667_v29 = vsel %vm558_vm1, %v2643_v28, 0.0 }
 0x96e   : > { %2668 = vadd.xlane.f32.xlu0 %v2667_v29  ;;  %v2613_v30 = vpop.f32.mrf.mxu0 }
 0x96f   : > { %v2623_v45 = vadd.f32 %v2613_v30, %v2119_v36 }
 0x971   : > { %v2636_v0 = vadd.f32 %v4688_v11, %v2623_v45  ;;  %v4811_v45 = vld [vmem:[%s2645_s26] ss:$0 sm:$0xff] }
 0x973   : > { %v2644_v56 = vadd.f32 %v3744_v25, %v2636_v0 }
 0x975   : > { %v2670_v31 = vsel %vm558_vm1, %v2644_v56, 0.0 }
 0x978   : > { %v2651_v34 = vpop.xlane.xlu2 %2650 }
 0x979   : > { %v2680_v54 = vmul.f32 %v4740_v53, %v2651_v34 }
 0x97b   : > { %v4747_v62 = vsub.f32 %v4694_v43, %v2680_v54 }
 0x97d   : > { %v2696_v32 = vmul.f32 %v4747_v62, %v4747_v62 }
 0x97f   : > { %v2704_v33 = vsel %vm558_vm1, %v2696_v32, 0.0 }
 0x980   : > { %2705 = vadd.xlane.f32.xlu2 %v2704_v33  ;;  %v2654_v4 = vpop.xlane.xlu0 %2653 }
 0x981   : > { %v2681_v26 = vmul.f32 %v4740_v53, %v2654_v4  ;;  %v4819_v4 = vld [vmem:[%s2647_s20] ss:$0 sm:$0xff]  ;;  %s3489_s20 = sshll.u32 %s3767_s29, 5 }
 0x982   : > { %s2936_s30 = scalar_lea.vmem %s5079_s10, %s3489_s20 }
 0x983   : > { %v4755_v38 = vsub.f32 %v4700_v7, %v2681_v26 }
 0x985   : > { %v2697_v43 = vmul.f32 %v4755_v38, %v4755_v38 }
 0x987   : > { %v2707_v2 = vsel %vm558_vm1, %v2697_v43, 0.0 }
 0x988   : > { %2671 = vadd.xlane.f32.xlu2 %v2670_v31  ;;  %2708 = vadd.xlane.f32.xlu1 %v2707_v2 }
 0x99e   : > { %v2657_v11 = vpop.xlane.xlu1 %2656 }
 0x99f   : > { %v2682_v52 = vmul.f32 %v4740_v53, %v2657_v11 }
 0x9a1   : > { %v4763_v63 = vsub.f32 %v4708_v42, %v2682_v52 }
 0x9a3   : > { %v2698_v7 = vmul.f32 %v4763_v63, %v4763_v63 }
 0x9a5   : > { %v2710_v39 = vsel %vm558_vm1, %v2698_v7, 0.0 }
 0x9a6   : > { %v2660_v35 = vpop.xlane.xlu1 %2659  ;;  %2711 = vadd.xlane.f32.xlu1 %v2710_v39 }
 0x9a7   : > { %v2683_v10 = vmul.f32 %v4740_v53, %v2660_v35 }
 0x9a9   : > { %v4770_v55 = vsub.f32 %v4714_v57, %v2683_v10 }
 0x9ab   : > { %v2699_v17 = vmul.f32 %v4770_v55, %v4770_v55 }
 0x9ad   : > { %v2713_v48 = vsel %vm558_vm1, %v2699_v17, 0.0 }
 0x9ae   : > { %2714 = vadd.xlane.f32.xlu0 %v2713_v48 }
 0x9b1   : > { %v2663_v42 = vpop.xlane.xlu1 %2662 }
 0x9b2   : > { %v2684_v6 = vmul.f32 %v4740_v53, %v2663_v42 }
 0x9b4   : > { %v4777_v49 = vsub.f32 %v4722_v1, %v2684_v6 }
 0x9b6   : > { %v2700_v41 = vmul.f32 %v4777_v49, %v4777_v49 }
 0x9b8   : > { %v2716_v14 = vsel %vm558_vm1, %v2700_v41, 0.0 }
 0x9b9   : > { %v2666_v21 = vpop.xlane.xlu1 %2665  ;;  %2717 = vadd.xlane.f32.xlu2 %v2716_v14 }
 0x9ba   : > { %v2685_v37 = vmul.f32 %v4740_v53, %v2666_v21 }
 0x9bc   : > { %v4783_v57 = vsub.f32 %v2642_v16, %v2685_v37 }
 0x9be   : > { %v2701_v50 = vmul.f32 %v4783_v57, %v4783_v57 }
 0x9c0   : > { %v2719_v15 = vsel %vm558_vm1, %v2701_v50, 0.0 }
 0x9c1   : > { %2720 = vadd.xlane.f32.xlu1 %v2719_v15 }
 0x9e1   : > { %v2669_v12 = vpop.xlane.xlu0 %2668 }
 0x9e2   : > { %v2686_v20 = vmul.f32 %v4740_v53, %v2669_v12 }
 0x9e4   : > { %v4789_v23 = vsub.f32 %v2643_v28, %v2686_v20 }
 0x9e6   : > { %v2702_v58 = vmul.f32 %v4789_v23, %v4789_v23 }
 0x9e8   : > { %v2722_v1 = vsel %vm558_vm1, %v2702_v58, 0.0 }
 0x9e9   : > { %2723 = vadd.xlane.f32.xlu0 %v2722_v1 }
 0x9f3   : > { %v2706_v9 = vpop.xlane.xlu2 %2705 }
 0x9f4   : > { %v2728_v46 = vmul.f32 %v2706_v9, %v4740_v53 }
 0x9f6   : > { %v2736_v24 = vadd.f32 1e-05, %v2728_v46 }
 0x9f8   : > { %3705 = vrsqrt.f32 %v2736_v24  ;;  %vm2750_vm6 = vweird.f32 %v2736_v24 }
 0x9fb   : > { %v2672_v51 = vpop.xlane.xlu2 %2671  ;;  %v2709_v16 = vpop.xlane.xlu1 %2708 }
 0x9fc   : > { %v2687_v40 = vmul.f32 %v4740_v53, %v2672_v51  ;;  %v2729_v8 = vmul.f32 %v2709_v16, %v4740_v53 }
 0x9fe   : > { %v3706_v5 = vpop.eup %3705  ;;  %v4801_v3 = vsub.f32 %v2644_v56, %v2687_v40  ;;  %v2737_v60 = vadd.f32 1e-05, %v2729_v8 }
 0x9ff   : > { %v2745_v18 = vmul.f32 %v3706_v5, %v2736_v24  ;;  %vm2751_vm5 = vweird.f32 %v3706_v5 }
 0xa00   : > { %3707 = vrsqrt.f32 %v2737_v60  ;;  %v2703_v19 = vmul.f32 %v4801_v3, %v4801_v3  ;;  %vm2752_vm7 = vmor %vm2750_vm6, %vm2751_vm5  ;;  %vm2760_vm9 = vweird.f32 %v2737_v60 }
 0xa01   : > { %v2746_v22 = vmul.f32 %v3706_v5, %v2745_v18 }
 0xa02   : > { %v2725_v44 = vsel %vm558_vm1, %v2703_v19, 0.0 }
 0xa03   : > { %v2747_v28 = vmul.f32 0.5, %v2746_v22  ;;  %2726 = vadd.xlane.f32.xlu2 %v2725_v44 }
 0xa05   : > { %v2748_v29 = vsub.f32 1.5, %v2747_v28 }
 0xa06   : > { %v3708_v61 = vpop.eup %3707 }
 0xa07   : > { %v2749_v27 = vmul.f32 %v3706_v5, %v2748_v29  ;;  %v2755_v47 = vmul.f32 %v3708_v61, %v2737_v60  ;;  %vm2761_vm8 = vweird.f32 %v3708_v61 }
 0xa08   : > { %vm2762_vm10 = vmor %vm2760_vm9, %vm2761_vm8 }
 0xa09   : > { %v2756_v30 = vmul.f32 %v3708_v61, %v2755_v47  ;;  %v2753_v34 = vsel %vm2752_vm7, %v3706_v5, %v2749_v27 }
 0xa0a   : > { %v2824_v32 = vmul.f32 %v2753_v34, %v4747_v62 }
 0xa0b   : > { %v2757_v36 = vmul.f32 0.5, %v2756_v30 }
 0xa0c   : > { %v2835_v26 = vmul.f32 %v4811_v45, %v2824_v32 }
 0xa0d   : > { %v2758_v54 = vsub.f32 1.5, %v2757_v36 }
 0xa0e   : > { %v4829_v62 = vadd.f32 %v4819_v4, %v2835_v26 }
 0xa0f   : > { %v2759_v0 = vmul.f32 %v3708_v61, %v2758_v54 }
 0xa11   : > { %v2763_v33 = vsel %vm2762_vm10, %v3708_v61, %v2759_v0 }
 0xa12   : > { %v2825_v25 = vmul.f32 %v2763_v33, %v4755_v38 }
 0xa14   : > { %v2836_v56 = vmul.f32 %v4811_v45, %v2825_v25 }
 0xa16   : > { %v4832_v43 = vadd.f32 %v4819_v4, %v2836_v56 }
 0xa18   : > { %v2854_v31 = vpack.c.bf16 %v4832_v43, %v4829_v62 }
 0xa19   : > { %v2712_v2 = vpop.xlane.xlu1 %2711 }
 0xa1a   : > { %v2730_v11 = vmul.f32 %v2712_v2, %v4740_v53  ;;  %3453 = vmatmul.msk.bf16.vlgmr.msra.gmra.mxu1 %vm558_vm1, %v2854_v31 }
 0xa1c   : > { %v2738_v38 = vadd.f32 1e-05, %v2730_v11 }
 0xa1e   : > { %3709 = vrsqrt.f32 %v2738_v38  ;;  %vm2770_vm12 = vweird.f32 %v2738_v38 }
 0xa21   : > { %v2715_v52 = vpop.xlane.xlu0 %2714 }
 0xa22   : > { %v2731_v7 = vmul.f32 %v2715_v52, %v4740_v53 }
 0xa24   : > { %v3710_v39 = vpop.eup %3709  ;;  %v2739_v35 = vadd.f32 1e-05, %v2731_v7 }
 0xa25   : > { %v2765_v10 = vmul.f32 %v3710_v39, %v2738_v38  ;;  %vm2771_vm11 = vweird.f32 %v3710_v39 }
 0xa26   : > { %3711 = vrsqrt.f32 %v2739_v35  ;;  %vm2772_vm13 = vmor %vm2770_vm12, %vm2771_vm11  ;;  %vm2780_vm15 = vweird.f32 %v2739_v35 }
 0xa27   : > { %v2766_v17 = vmul.f32 %v3710_v39, %v2765_v10 }
 0xa29   : > { %v2767_v48 = vmul.f32 0.5, %v2766_v17  ;;  %v3492_v17 = vld [vmem:[%s2936_s30 + $0x10] sm:$0xff] }
 0xa2b   : > { %v2768_v42 = vsub.f32 1.5, %v2767_v48 }
 0xa2c   : > { %v3712_v6 = vpop.eup %3711  ;;  %v2718_v41 = vpop.xlane.xlu2 %2717 }
 0xa2d   : > { %v2769_v14 = vmul.f32 %v3710_v39, %v2768_v42  ;;  %v2775_v21 = vmul.f32 %v3712_v6, %v2739_v35  ;;  %v2732_v37 = vmul.f32 %v2718_v41, %v4740_v53  ;;  %vm2781_vm14 = vweird.f32 %v3712_v6  ;;  %v3491_v42 = vld [vmem:[%s2936_s30 + $0x8] sm:$0xff] }
 0xa2e   : > { %vm2782_vm0 = vmor %vm2780_vm15, %vm2781_vm14  ;;  %vm2974_vm14 = vcmask 523264  }
 0xa2f   : > { %v2776_v50 = vmul.f32 %v3712_v6, %v2775_v21  ;;  %v2740_v15 = vadd.f32 1e-05, %v2732_v37  ;;  %v2773_v12 = vsel %vm2772_vm13, %v3710_v39, %v2769_v14  ;;  %v3493_v39 = vld [vmem:[%s2936_s30 + $0x18] sm:$0xff]  ;;  %v3490_v21 = vld [vmem:[%s2936_s30] sm:$0xff] }
 0xa30   : > { %v2826_v1 = vmul.f32 %v2773_v12, %v4763_v63  ;;  %2991 = vmatpush.bf16.msrb.mxu2 %v3493_v39 }
 0xa31   : > { %v2777_v20 = vmul.f32 0.5, %v2776_v50  ;;  %3713 = vrsqrt.f32 %v2740_v15  ;;  %vm2790_vm3 = vweird.f32 %v2740_v15 }
 0xa32   : > { %v2837_v8 = vmul.f32 %v4811_v45, %v2826_v1 }
 0xa33   : > { %v2778_v58 = vsub.f32 1.5, %v2777_v20 }
 0xa34   : > { %v2721_v9 = vpop.xlane.xlu1 %2720  ;;  %v4846_v63 = vadd.f32 %v4819_v4, %v2837_v8  ;;  %2992 = vmatpush.bf16.msrb.mxu2 %v3492_v17 }
 0xa35   : > { %v2779_v59 = vmul.f32 %v3712_v6, %v2778_v58  ;;  %v2733_v46 = vmul.f32 %v2721_v9, %v4740_v53 }
 0xa37   : > { %v3714_v24 = vpop.eup %3713  ;;  %v2783_v13 = vsel %vm2782_vm0, %v3712_v6, %v2779_v59  ;;  %v2741_v51 = vadd.f32 1e-05, %v2733_v46 }
 0xa38   : > { %v2827_v16 = vmul.f32 %v2783_v13, %v4770_v55  ;;  %v2785_v40 = vmul.f32 %v3714_v24, %v2740_v15  ;;  %vm2791_vm2 = vweird.f32 %v3714_v24  ;;  %2993 = vmatpush.bf16.msrb.mxu2 %v3491_v42 }
 0xa39   : > { %3715 = vrsqrt.f32 %v2741_v51  ;;  %vm2792_vm4 = vmor %vm2790_vm3, %vm2791_vm2  ;;  %vm2800_vm6 = vweird.f32 %v2741_v51 }
 0xa3a   : > { %v2786_v5 = vmul.f32 %v3714_v24, %v2785_v40  ;;  %v2838_v60 = vmul.f32 %v4811_v45, %v2827_v16 }
 0xa3c   : > { %v2787_v18 = vmul.f32 0.5, %v2786_v5  ;;  %v4849_v19 = vadd.f32 %v4819_v4, %v2838_v60  ;;  %2994 = vmatpush.bf16.msrb.mxu2 %v3490_v21 }
 0xa3e   : > { %v2788_v22 = vsub.f32 1.5, %v2787_v18  ;;  %v2855_v44 = vpack.c.bf16 %v4849_v19, %v4846_v63 }
 0xa3f   : > { %v3716_v28 = vpop.eup %3715 }
 0xa40   : > { %v2789_v55 = vmul.f32 %v3714_v24, %v2788_v22  ;;  %v2795_v29 = vmul.f32 %v3716_v28, %v2741_v51  ;;  %3454 = vmatmul.msk.bf16.gmra.mxu1 %vm558_vm1, %v2855_v44  ;;  %vm2801_vm5 = vweird.f32 %v3716_v28 }
 0xa41   : > { %vm2802_vm7 = vmor %vm2800_vm6, %vm2801_vm5 }
 0xa42   : > { %v2796_v61 = vmul.f32 %v3716_v28, %v2795_v29  ;;  %v2793_v27 = vsel %vm2792_vm4, %v3714_v24, %v2789_v55 }
 0xa43   : > { %v2828_v34 = vmul.f32 %v2793_v27, %v4777_v49 }
 0xa44   : > { %v2797_v47 = vmul.f32 0.5, %v2796_v61 }
 0xa45   : > { %v2839_v0 = vmul.f32 %v4811_v45, %v2828_v34 }
 0xa46   : > { %v2798_v30 = vsub.f32 1.5, %v2797_v47 }
 0xa47   : > { %v4859_v26 = vadd.f32 %v4819_v4, %v2839_v0 }
 0xa48   : > { %v2799_v36 = vmul.f32 %v3716_v28, %v2798_v30 }
 0xa4a   : > { %v2803_v54 = vsel %vm2802_vm7, %v3716_v28, %v2799_v36 }
 0xa4b   : > { %v2829_v32 = vmul.f32 %v2803_v54, %v4783_v57 }
 0xa4d   : > { %v2840_v33 = vmul.f32 %v4811_v45, %v2829_v32 }
 0xa4f   : > { %v4862_v25 = vadd.f32 %v4819_v4, %v2840_v33 }
 0xa51   : > { %v2856_v49 = vpack.c.bf16 %v4862_v25, %v4859_v26 }
 0xa53   : > { %3455 = vmatmul.msk.bf16.gmra.mxu1 %vm558_vm1, %v2856_v49 }
 0xa5c   : > { %v2724_v56 = vpop.xlane.xlu0 %2723 }
 0xa5d   : > { %v2734_v31 = vmul.f32 %v2724_v56, %v4740_v53 }
 0xa5f   : > { %v2742_v2 = vadd.f32 1e-05, %v2734_v31 }
 0xa61   : > { %3717 = vrsqrt.f32 %v2742_v2  ;;  %vm2810_vm9 = vweird.f32 %v2742_v2 }
 0xa67   : > { %v3718_v57 = vpop.eup %3717 }
 0xa68   : > { %v2805_v11 = vmul.f32 %v3718_v57, %v2742_v2  ;;  %vm2811_vm8 = vweird.f32 %v3718_v57 }
 0xa69   : > { %vm2812_vm10 = vmor %vm2810_vm9, %vm2811_vm8 }
 0xa6a   : > { %v2806_v38 = vmul.f32 %v3718_v57, %v2805_v11 }
 0xa6c   : > { %v2807_v10 = vmul.f32 0.5, %v2806_v38 }
 0xa6e   : > { %v2808_v48 = vsub.f32 1.5, %v2807_v10 }
 0xa70   : > { %v2809_v41 = vmul.f32 %v3718_v57, %v2808_v48 }
 0xa72   : > { %v2813_v50 = vsel %vm2812_vm10, %v3718_v57, %v2809_v41  ;;  %v3572_v57 = vld [vmem:[%s2945_s19] ss:$0 sm:$0xff] }
 0xa73   : > { %v2830_v20 = vmul.f32 %v2813_v50, %v4789_v23 }
 0xa75   : > { %v2841_v59 = vmul.f32 %v4811_v45, %v2830_v20 }
 0xa76   : > { %v2727_v52 = vpop.xlane.xlu2 %2726 }
 0xa77   : > { %v2735_v7 = vmul.f32 %v2727_v52, %v4740_v53  ;;  %v4878_v24 = vadd.f32 %v4819_v4, %v2841_v59 }
 0xa79   : > { %v2743_v35 = vadd.f32 1e-05, %v2735_v7 }
 0xa7b   : > { %3719 = vrsqrt.f32 %v2743_v35  ;;  %vm2820_vm12 = vweird.f32 %v2743_v35 }
 0xa81   : > { %v3720_v6 = vpop.eup %3719 }
 0xa82   : > { %v2815_v14 = vmul.f32 %v3720_v6, %v2743_v35  ;;  %vm2821_vm11 = vweird.f32 %v3720_v6 }
 0xa83   : > { %vm2822_vm13 = vmor %vm2820_vm12, %vm2821_vm11 }
 0xa84   : > { %v2816_v37 = vmul.f32 %v3720_v6, %v2815_v14 }
 0xa86   : > { %v2817_v15 = vmul.f32 0.5, %v2816_v37 }
 0xa88   : > { %v2818_v12 = vsub.f32 1.5, %v2817_v15 }
 0xa8a   : > { %v2819_v58 = vmul.f32 %v3720_v6, %v2818_v12 }
 0xa8c   : > { %v2823_v1 = vsel %vm2822_vm13, %v3720_v6, %v2819_v58 }
 0xa8d   : > { %v2831_v9 = vmul.f32 %v2823_v1, %v4801_v3  ;;  %v3571_v3 = vld [vmem:[%s2864_s21] ss:$0 sm:$0xff] }
 0xa8f   : > { %v2842_v46 = vmul.f32 %v4811_v45, %v2831_v9 }
 0xa91   : > { %v4881_v13 = vadd.f32 %v4819_v4, %v2842_v46 }
 0xa93   : > { %v2857_v23 = vpack.c.bf16 %v4881_v13, %v4878_v24 }
 0xa95   : > { %3456 = vmatmul.msk.bf16.gmra.mxu1 %vm558_vm1, %v2857_v23 }
 0xa97   : > { %v2902_v51 = vpop.f32.mrf.mxu1 }
 0xa98   : > { %v2903_v16 = vadd.f32 %v3571_v3, %v2902_v51 }
 0xa9a   : > { %v2922_v4 = vmax.f32 %v2903_v16, 0.0 }
 0xa9f   : > { %v2904_v40 = vpop.f32.mrf.mxu1 }
 0xaa0   : > { %v2905_v45 = vadd.f32 %v3571_v3, %v2904_v40 }
 0xaa2   : > { %v2923_v8 = vmax.f32 %v2905_v45, 0.0 }
 0xaa4   : > { %v2930_v5 = vpack.c.bf16 %v2923_v8, %v2922_v4 }
 0xaa6   : > { %3475 = vmatmul.msk.bf16.vlgmr.msrb.gmra.mxu2 %vm2974_vm14, %v2930_v5 }
 0xabd   : > { %v2907_v60 = vpop.f32.mrf.mxu1 }
 0xabe   : > { %v2908_v18 = vadd.f32 %v3571_v3, %v2907_v60 }
 0xac0   : > { %v2924_v28 = vmax.f32 %v2908_v18, 0.0 }
 0xac5   : > { %v2909_v22 = vpop.f32.mrf.mxu1 }
 0xac6   : > { %v2910_v44 = vadd.f32 %v3571_v3, %v2909_v22 }
 0xac8   : > { %v2925_v55 = vmax.f32 %v2910_v44, 0.0 }
 0xaca   : > { %v2931_v29 = vpack.c.bf16 %v2925_v55, %v2924_v28 }
 0xacc   : > { %3476 = vmatmul.msk.bf16.gmra.mxu2 %vm2974_vm14, %v2931_v29 }
 0xad0   : > { %v2912_v61 = vpop.f32.mrf.mxu1 }
 0xad1   : > { %v2913_v27 = vadd.f32 %v3571_v3, %v2912_v61 }
 0xad3   : > { %v2926_v34 = vmax.f32 %v2913_v27, 0.0 }
 0xad8   : > { %v2914_v47 = vpop.f32.mrf.mxu1 }
 0xad9   : > { %v2915_v30 = vadd.f32 %v3571_v3, %v2914_v47 }
 0xadb   : > { %v2927_v36 = vmax.f32 %v2915_v30, 0.0 }
 0xadd   : > { %v2932_v54 = vpack.c.bf16 %v2927_v36, %v2926_v34 }
 0xadf   : > { %3477 = vmatmul.msk.bf16.gmra.mxu2 %vm2974_vm14, %v2932_v54 }
 0xb12   : > { %v2917_v32 = vpop.f32.mrf.mxu1 }
 0xb13   : > { %v2918_v0 = vadd.f32 %v3571_v3, %v2917_v32 }
 0xb15   : > { %v2928_v56 = vmax.f32 %v2918_v0, 0.0 }
 0xb1a   : > { %v2919_v33 = vpop.f32.mrf.mxu1 }
 0xb1b   : > { %v2920_v49 = vadd.f32 %v3571_v3, %v2919_v33 }
 0xb1d   : > { %v2929_v31 = vmax.f32 %v2920_v49, 0.0 }
 0xb1f   : > { %v2933_v2 = vpack.c.bf16 %v2929_v31, %v2928_v56 }
 0xb21   : > { %3478 = vmatmul.msk.bf16.gmra.mxu2 %vm2974_vm14, %v2933_v2 }
 0xb29   : > { %v2996_v11 = vpop.f32.mrf.mxu2 }
 0xb2a   : > { %v2997_v38 = vadd.f32 %v3572_v57, %v2996_v11 }
 0xb2c   : > { %v3016_v52 = vadd.f32 %v2997_v38, %v4829_v62 }
 0xb2e   : > { %v3028_v7 = vsel %vm558_vm1, %v3016_v52, 0.0 }
 0xb2f   : > { %3029 = vadd.xlane.f32.xlu1 %v3028_v7 }
 0xb31   : > { %v2998_v39 = vpop.f32.mrf.mxu2 }
 0xb32   : > { %v2999_v35 = vadd.f32 %v3572_v57, %v2998_v39 }
 0xb34   : > { %v3017_v10 = vadd.f32 %v2999_v35, %v4832_v43 }
 0xb36   : > { %v3031_v17 = vsel %vm558_vm1, %v3017_v10, 0.0 }
 0xb37   : > { %3032 = vadd.xlane.f32.xlu0 %v3031_v17 }
 0xb4f   : > { %v3001_v48 = vpop.f32.mrf.mxu2 }
 0xb50   : > { %v3002_v42 = vadd.f32 %v3572_v57, %v3001_v48 }
 0xb52   : > { %v3018_v6 = vadd.f32 %v3002_v42, %v4846_v63 }
 0xb54   : > { %v3034_v41 = vsel %vm558_vm1, %v3018_v6, 0.0 }
 0xb55   : > { %3035 = vadd.xlane.f32.xlu2 %v3034_v41 }
 0xb57   : > { %v3003_v62 = vpop.f32.mrf.mxu2 }
 0xb58   : > { %v3004_v14 = vadd.f32 %v3572_v57, %v3003_v62 }
 0xb5a   : > { %v3019_v21 = vadd.f32 %v3004_v14, %v4849_v19 }
 0xb5c   : > { %v3037_v37 = vsel %vm558_vm1, %v3019_v21, 0.0 }
 0xb5d   : > { %3038 = vadd.xlane.f32.xlu1 %v3037_v37 }
 0xb62   : > { %v3006_v43 = vpop.f32.mrf.mxu2 }
 0xb63   : > { %v3007_v50 = vadd.f32 %v3572_v57, %v3006_v43 }
 0xb65   : > { %v3020_v15 = vadd.f32 %v3007_v50, %v4859_v26 }
 0xb67   : > { %v3040_v12 = vsel %vm558_vm1, %v3020_v15, 0.0 }
 0xb68   : > { %3041 = vadd.xlane.f32.xlu0 %v3040_v12 }
 0xb6a   : > { %v3008_v20 = vpop.f32.mrf.mxu2 }
 0xb6b   : > { %v3009_v63 = vadd.f32 %v3572_v57, %v3008_v20 }
 0xb6d   : > { %v3021_v19 = vadd.f32 %v3009_v63, %v4862_v25 }
 0xb6f   : > { %v3043_v58 = vsel %vm558_vm1, %v3021_v19, 0.0 }
 0xb70   : > { %3044 = vadd.xlane.f32.xlu2 %v3043_v58  ;;  %v4978_v58 = vld [vmem:[%s3024_s22] ss:$0 sm:$0xff] }
 0xba2   : > { %v3030_v1 = vpop.xlane.xlu1 %3029 }
 0xba3   : > { %v3052_v26 = vmul.f32 %v3030_v1, %v4740_v53 }
 0xba4   : > { %v3011_v9 = vpop.f32.mrf.mxu2 }
 0xba5   : > { %v4920_v59 = vsub.f32 %v3016_v52, %v3052_v26  ;;  %v3012_v46 = vadd.f32 %v3572_v57, %v3011_v9  ;;  %v4985_v9 = vld [vmem:[%s3026_s24] ss:$0 sm:$0xff] }
 0xba7   : > { %v3022_v23 = vadd.f32 %v3012_v46, %v4878_v24  ;;  %v3068_v51 = vmul.f32 %v4920_v59, %v4920_v59 }
 0xba9   : > { %v3076_v3 = vsel %vm558_vm1, %v3068_v51, 0.0  ;;  %v3046_v16 = vsel %vm558_vm1, %v3022_v23, 0.0 }
 0xbaa   : > { %3077 = vadd.xlane.f32.xlu2 %v3076_v3  ;;  %3047 = vadd.xlane.f32.xlu1 %v3046_v16  ;;  %v3033_v25 = vpop.xlane.xlu0 %3032 }
 0xbab   : > { %v3053_v40 = vmul.f32 %v3033_v25, %v4740_v53 }
 0xbac   : > { %v3013_v45 = vpop.f32.mrf.mxu2 }
 0xbad   : > { %v4928_v4 = vsub.f32 %v3017_v10, %v3053_v40  ;;  %v3014_v8 = vadd.f32 %v3572_v57, %v3013_v45 }
 0xbaf   : > { %v3023_v5 = vadd.f32 %v3014_v8, %v4881_v13  ;;  %v3069_v24 = vmul.f32 %v4928_v4, %v4928_v4 }
 0xbb1   : > { %v3049_v60 = vsel %vm558_vm1, %v3023_v5, 0.0  ;;  %v3079_v18 = vsel %vm558_vm1, %v3069_v24, 0.0 }
 0xbb2   : > { %3050 = vadd.xlane.f32.xlu0 %v3049_v60  ;;  %3080 = vadd.xlane.f32.xlu1 %v3079_v18 }
 0xbc8   : > { %v3036_v22 = vpop.xlane.xlu2 %3035 }
 0xbc9   : > { %v3054_v44 = vmul.f32 %v3036_v22, %v4740_v53 }
 0xbcb   : > { %v4936_v28 = vsub.f32 %v3018_v6, %v3054_v44 }
 0xbcd   : > { %v3070_v55 = vmul.f32 %v4936_v28, %v4936_v28 }
 0xbcf   : > { %v3082_v29 = vsel %vm558_vm1, %v3070_v55, 0.0 }
 0xbd0   : > { %v3039_v13 = vpop.xlane.xlu1 %3038  ;;  %3083 = vadd.xlane.f32.xlu0 %v3082_v29 }
 0xbd1   : > { %v3055_v61 = vmul.f32 %v3039_v13, %v4740_v53 }
 0xbd3   : > { %v4942_v27 = vsub.f32 %v3019_v21, %v3055_v61 }
 0xbd5   : > { %v3071_v47 = vmul.f32 %v4942_v27, %v4942_v27 }
 0xbd7   : > { %v3085_v30 = vsel %vm558_vm1, %v3071_v47, 0.0 }
 0xbd8   : > { %3086 = vadd.xlane.f32.xlu2 %v3085_v30 }
 0xbdb   : > { %v3042_v34 = vpop.xlane.xlu0 %3041 }
 0xbdc   : > { %v3056_v36 = vmul.f32 %v3042_v34, %v4740_v53 }
 0xbde   : > { %v4948_v54 = vsub.f32 %v3020_v15, %v3056_v36 }
 0xbe0   : > { %v3072_v32 = vmul.f32 %v4948_v54, %v4948_v54 }
 0xbe2   : > { %v3088_v0 = vsel %vm558_vm1, %v3072_v32, 0.0 }
 0xbe3   : > { %v3045_v33 = vpop.xlane.xlu2 %3044  ;;  %3089 = vadd.xlane.f32.xlu1 %v3088_v0 }
 0xbe4   : > { %v3057_v49 = vmul.f32 %v3045_v33, %v4740_v53 }
 0xbe6   : > { %v4954_v56 = vsub.f32 %v3021_v19, %v3057_v49 }
 0xbe8   : > { %v3073_v31 = vmul.f32 %v4954_v56, %v4954_v56 }
 0xbea   : > { %v3091_v2 = vsel %vm558_vm1, %v3073_v31, 0.0 }
 0xbeb   : > { %3092 = vadd.xlane.f32.xlu0 %v3091_v2 }
 0xc1d   : > { %v3078_v57 = vpop.xlane.xlu2 %3077  ;;  %v3048_v11 = vpop.xlane.xlu1 %3047 }
 0xc1e   : > { %v3100_v38 = vmul.f32 %v3078_v57, %v4740_v53  ;;  %v3058_v52 = vmul.f32 %v3048_v11, %v4740_v53 }
 0xc20   : > { %v3108_v7 = vadd.f32 1e-05, %v3100_v38  ;;  %v4961_v39 = vsub.f32 %v3022_v23, %v3058_v52 }
 0xc22   : > { %3721 = vrsqrt.f32 %v3108_v7  ;;  %v3074_v35 = vmul.f32 %v4961_v39, %v4961_v39  ;;  %vm3122_vm0 = vweird.f32 %v3108_v7 }
 0xc24   : > { %v3094_v10 = vsel %vm558_vm1, %v3074_v35, 0.0 }
 0xc25   : > { %3095 = vadd.xlane.f32.xlu2 %v3094_v10  ;;  %v3081_v17 = vpop.xlane.xlu1 %3080  ;;  %v3051_v48 = vpop.xlane.xlu0 %3050 }
 0xc26   : > { %v3101_v42 = vmul.f32 %v3081_v17, %v4740_v53  ;;  %v3059_v6 = vmul.f32 %v3051_v48, %v4740_v53 }
 0xc28   : > { %v3722_v41 = vpop.eup %3721  ;;  %v3109_v62 = vadd.f32 1e-05, %v3101_v42  ;;  %v4968_v14 = vsub.f32 %v3023_v5, %v3059_v6 }
 0xc29   : > { %v3117_v21 = vmul.f32 %v3722_v41, %v3108_v7  ;;  %vm3123_vm15 = vweird.f32 %v3722_v41 }
 0xc2a   : > { %3723 = vrsqrt.f32 %v3109_v62  ;;  %v3075_v37 = vmul.f32 %v4968_v14, %v4968_v14  ;;  %vm3124_vm2 = vmor %vm3122_vm0, %vm3123_vm15  ;;  %vm3132_vm4 = vweird.f32 %v3109_v62 }
 0xc2b   : > { %v3118_v43 = vmul.f32 %v3722_v41, %v3117_v21 }
 0xc2c   : > { %v3097_v50 = vsel %vm558_vm1, %v3075_v37, 0.0 }
 0xc2d   : > { %v3119_v15 = vmul.f32 0.5, %v3118_v43  ;;  %3098 = vadd.xlane.f32.xlu1 %v3097_v50 }
 0xc2f   : > { %v3120_v12 = vsub.f32 1.5, %v3119_v15 }
 0xc30   : > { %v3724_v20 = vpop.eup %3723 }
 0xc31   : > { %v3121_v63 = vmul.f32 %v3722_v41, %v3120_v12  ;;  %v3127_v19 = vmul.f32 %v3724_v20, %v3109_v62  ;;  %vm3133_vm3 = vweird.f32 %v3724_v20 }
 0xc32   : > { %vm3134_vm5 = vmor %vm3132_vm4, %vm3133_vm3 }
 0xc33   : > { %v3125_v1 = vsel %vm3124_vm2, %v3722_v41, %v3121_v63  ;;  %v3128_v26 = vmul.f32 %v3724_v20, %v3127_v19 }
 0xc34   : > { %v3196_v46 = vmul.f32 %v3125_v1, %v4920_v59 }
 0xc35   : > { %v3129_v23 = vmul.f32 0.5, %v3128_v26 }
 0xc36   : > { %v3207_v51 = vmul.f32 %v4978_v58, %v3196_v46 }
 0xc37   : > { %v3130_v3 = vsub.f32 1.5, %v3129_v23 }
 0xc38   : > { %v4990_v16 = vadd.f32 %v4985_v9, %v3207_v51 }
 0xc39   : > { %v3131_v25 = vmul.f32 %v3724_v20, %v3130_v3 }
 0xc3a   : > { %3226 = vst.msk [vmem:[#allocation2] sm:$0xff] %vm558_vm1, %v4990_v16 }
 0xc3b   : > { %v3135_v40 = vsel %vm3134_vm5, %v3724_v20, %v3131_v25 }
 0xc3c   : > { %v3197_v45 = vmul.f32 %v3135_v40, %v4928_v4 }
 0xc3e   : > { %v3208_v8 = vmul.f32 %v4978_v58, %v3197_v45 }
 0xc40   : > { %v4997_v59 = vadd.f32 %v4985_v9, %v3208_v8 }
 0xc42   : > { %3227 = vst.msk [vmem:[#allocation2 + $0x8] sm:$0xff] %vm558_vm1, %v4997_v59 }
 0xc43   : > { %v3084_v5 = vpop.xlane.xlu0 %3083 }
 0xc44   : > { %v3102_v24 = vmul.f32 %v3084_v5, %v4740_v53 }
 0xc46   : > { %v3110_v60 = vadd.f32 1e-05, %v3102_v24 }
 0xc48   : > { %3725 = vrsqrt.f32 %v3110_v60  ;;  %vm3142_vm7 = vweird.f32 %v3110_v60 }
 0xc4b   : > { %v3087_v18 = vpop.xlane.xlu2 %3086 }
 0xc4c   : > { %v3103_v22 = vmul.f32 %v3087_v18, %v4740_v53 }
 0xc4e   : > { %v3726_v44 = vpop.eup %3725  ;;  %v3111_v55 = vadd.f32 1e-05, %v3103_v22 }
 0xc4f   : > { %v3137_v29 = vmul.f32 %v3726_v44, %v3110_v60  ;;  %vm3143_vm6 = vweird.f32 %v3726_v44 }
 0xc50   : > { %3727 = vrsqrt.f32 %v3111_v55  ;;  %vm3144_vm8 = vmor %vm3142_vm7, %vm3143_vm6  ;;  %vm3152_vm10 = vweird.f32 %v3111_v55 }
 0xc51   : > { %v3138_v4 = vmul.f32 %v3726_v44, %v3137_v29 }
 0xc53   : > { %v3139_v13 = vmul.f32 0.5, %v3138_v4 }
 0xc55   : > { %v3140_v61 = vsub.f32 1.5, %v3139_v13 }
 0xc56   : > { %v3728_v47 = vpop.eup %3727  ;;  %v3090_v30 = vpop.xlane.xlu1 %3089 }
 0xc57   : > { %v3141_v34 = vmul.f32 %v3726_v44, %v3140_v61  ;;  %v3147_v36 = vmul.f32 %v3728_v47, %v3111_v55  ;;  %v3104_v32 = vmul.f32 %v3090_v30, %v4740_v53  ;;  %vm3153_vm9 = vweird.f32 %v3728_v47 }
 0xc58   : > { %vm3154_vm11 = vmor %vm3152_vm10, %vm3153_vm9 }
 0xc59   : > { %v3145_v0 = vsel %vm3144_vm8, %v3726_v44, %v3141_v34  ;;  %v3148_v33 = vmul.f32 %v3728_v47, %v3147_v36  ;;  %v3112_v49 = vadd.f32 1e-05, %v3104_v32 }
 0xc5a   : > { %v3198_v31 = vmul.f32 %v3145_v0, %v4936_v28 }
 0xc5b   : > { %v3149_v2 = vmul.f32 0.5, %v3148_v33  ;;  %3729 = vrsqrt.f32 %v3112_v49  ;;  %vm3162_vm13 = vweird.f32 %v3112_v49 }
 0xc5c   : > { %v3209_v57 = vmul.f32 %v4978_v58, %v3198_v31 }
 0xc5d   : > { %v3150_v11 = vsub.f32 1.5, %v3149_v2 }
 0xc5e   : > { %v5007_v38 = vadd.f32 %v4985_v9, %v3209_v57  ;;  %v3093_v52 = vpop.xlane.xlu0 %3092 }
 0xc5f   : > { %v3151_v7 = vmul.f32 %v3728_v47, %v3150_v11  ;;  %v3105_v35 = vmul.f32 %v3093_v52, %v4740_v53 }
 0xc60   : > { %3228 = vst.msk [vmem:[#allocation2 + $0x10] sm:$0xff] %vm558_vm1, %v5007_v38 }
 0xc61   : > { %v3730_v10 = vpop.eup %3729  ;;  %v3155_v28 = vsel %vm3154_vm11, %v3728_v47, %v3151_v7  ;;  %v3113_v17 = vadd.f32 1e-05, %v3105_v35 }
 0xc62   : > { %v3199_v48 = vmul.f32 %v3155_v28, %v4942_v27  ;;  %v3157_v42 = vmul.f32 %v3730_v10, %v3112_v49  ;;  %vm3163_vm12 = vweird.f32 %v3730_v10 }
 0xc63   : > { %3731 = vrsqrt.f32 %v3113_v17  ;;  %vm3164_vm14 = vmor %vm3162_vm13, %vm3163_vm12  ;;  %vm3172_vm0 = vweird.f32 %v3113_v17 }
 0xc64   : > { %v3210_v6 = vmul.f32 %v4978_v58, %v3199_v48  ;;  %v3158_v41 = vmul.f32 %v3730_v10, %v3157_v42 }
 0xc66   : > { %v5015_v62 = vadd.f32 %v4985_v9, %v3210_v6  ;;  %v3159_v21 = vmul.f32 0.5, %v3158_v41 }
 0xc68   : > { %3229 = vst.msk [vmem:[#allocation2 + $0x18] sm:$0xff] %vm558_vm1, %v5015_v62  ;;  %v3160_v37 = vsub.f32 1.5, %v3159_v21 }
 0xc69   : > { %v3732_v43 = vpop.eup %3731 }
 0xc6a   : > { %v3161_v50 = vmul.f32 %v3730_v10, %v3160_v37  ;;  %v3167_v15 = vmul.f32 %v3732_v43, %v3113_v17  ;;  %vm3173_vm15 = vweird.f32 %v3732_v43 }
 0xc6b   : > { %vm3174_vm2 = vmor %vm3172_vm0, %vm3173_vm15 }
 0xc6c   : > { %v3165_v27 = vsel %vm3164_vm14, %v3730_v10, %v3161_v50  ;;  %v3168_v12 = vmul.f32 %v3732_v43, %v3167_v15 }
 0xc6d   : > { %v3200_v20 = vmul.f32 %v3165_v27, %v4948_v54 }
 0xc6e   : > { %v3169_v63 = vmul.f32 0.5, %v3168_v12 }
 0xc6f   : > { %v3211_v19 = vmul.f32 %v4978_v58, %v3200_v20 }
 0xc70   : > { %v3170_v1 = vsub.f32 1.5, %v3169_v63 }
 0xc71   : > { %v3222_v26 = vadd.f32 %v4985_v9, %v3211_v19 }
 0xc72   : > { %v3171_v46 = vmul.f32 %v3732_v43, %v3170_v1 }
 0xc73   : > { %3230 = vst.msk [vmem:[#allocation2 + $0x20] sm:$0xff] %vm558_vm1, %v3222_v26 }
 0xc74   : > { %v3175_v23 = vsel %vm3174_vm2, %v3732_v43, %v3171_v46 }
 0xc75   : > { %v3201_v51 = vmul.f32 %v3175_v23, %v4954_v56 }
 0xc77   : > { %v3212_v3 = vmul.f32 %v4978_v58, %v3201_v51 }
 0xc79   : > { %v3223_v25 = vadd.f32 %v4985_v9, %v3212_v3 }
 0xc7b   : > { %3231 = vst.msk [vmem:[#allocation2 + $0x28] sm:$0xff] %vm558_vm1, %v3223_v25 }
 0xc98   : > { %v3096_v54 = vpop.xlane.xlu2 %3095 }
 0xc99   : > { %v3106_v40 = vmul.f32 %v3096_v54, %v4740_v53 }
 0xc9b   : > { %v3114_v45 = vadd.f32 1e-05, %v3106_v40 }
 0xc9d   : > { %3733 = vrsqrt.f32 %v3114_v45  ;;  %vm3182_vm4 = vweird.f32 %v3114_v45 }
 0xca0   : > { %v3099_v8 = vpop.xlane.xlu1 %3098 }
 0xca1   : > { %v3107_v5 = vmul.f32 %v3099_v8, %v4740_v53 }
 0xca3   : > { %v3734_v24 = vpop.eup %3733  ;;  %v3115_v60 = vadd.f32 1e-05, %v3107_v5 }
 0xca4   : > { %v3177_v18 = vmul.f32 %v3734_v24, %v3114_v45  ;;  %vm3183_vm3 = vweird.f32 %v3734_v24 }
 0xca5   : > { %3735 = vrsqrt.f32 %v3115_v60  ;;  %vm3184_vm5 = vmor %vm3182_vm4, %vm3183_vm3  ;;  %vm3192_vm7 = vweird.f32 %v3115_v60 }
 0xca6   : > { %v3178_v22 = vmul.f32 %v3734_v24, %v3177_v18 }
 0xca8   : > { %v3179_v56 = vmul.f32 0.5, %v3178_v22 }
 0xcaa   : > { %v3180_v44 = vsub.f32 1.5, %v3179_v56 }
 0xcab   : > { %v3736_v55 = vpop.eup %3735 }
 0xcac   : > { %v3181_v29 = vmul.f32 %v3734_v24, %v3180_v44  ;;  %v3187_v4 = vmul.f32 %v3736_v55, %v3115_v60  ;;  %vm3193_vm6 = vweird.f32 %v3736_v55 }
 0xcad   : > { %vm3194_vm8 = vmor %vm3192_vm7, %vm3193_vm6 }
 0xcae   : > { %v3185_v13 = vsel %vm3184_vm5, %v3734_v24, %v3181_v29  ;;  %v3188_v61 = vmul.f32 %v3736_v55, %v3187_v4 }
 0xcaf   : > { %v3202_v47 = vmul.f32 %v3185_v13, %v4961_v39 }
 0xcb0   : > { %v3189_v30 = vmul.f32 0.5, %v3188_v61 }
 0xcb1   : > { %v3213_v53 = vmul.f32 %v4978_v58, %v3202_v47 }
 0xcb2   : > { %v3190_v34 = vsub.f32 1.5, %v3189_v30 }
 0xcb3   : > { %v3224_v36 = vadd.f32 %v4985_v9, %v3213_v53 }
 0xcb4   : > { %v3191_v32 = vmul.f32 %v3736_v55, %v3190_v34 }
 0xcb5   : > { %3232 = vst.msk [vmem:[#allocation2 + $0x30] sm:$0xff] %vm558_vm1, %v3224_v36 }
 0xcb6   : > { %v3195_v0 = vsel %vm3194_vm8, %v3736_v55, %v3191_v32 }
 0xcb7   : > { %v3203_v33 = vmul.f32 %v3195_v0, %v4968_v14 }
 0xcb9   : > { %v3214_v49 = vmul.f32 %v4978_v58, %v3203_v33  ;;  %3237 = sbr.rel (%p3479_p7) target bundleno = 3272 (0xcc8), region = 84 }
 0xcbb   : > { %v3225_v31 = vadd.f32 %v4985_v9, %v3214_v49 }
 0xcbd   : > { %3233 = vst.msk [vmem:[#allocation2 + $0x38] sm:$0xff] %vm558_vm1, %v3225_v31 }
 0xcbe   : > { %v3238_v39 = vpack.c.bf16 %v4990_v16, %v4990_v16  ;;  %vm3246_vm9 = vcmask 257024   ;;  %v3239_v14 = vpack.c.bf16 %v4997_v59, %v4997_v59  ;;  %v3240_v58 = vpack.c.bf16 %v5007_v38, %v5007_v38 }
 0xcbf   : > { %v3241_v9 = vpack.c.bf16 %v5015_v62, %v5015_v62  ;;  %v3242_v2 = vpack.c.bf16 %v3222_v26, %v3222_v26  ;;  %v3243_v57 = vpack.c.bf16 %v3223_v25, %v3223_v25  ;;  %v3244_v11 = vpack.c.bf16 %v3224_v36, %v3224_v36 }
 0xcc0   : > { %3247 = vst.msk [vmem:[%s3910_s27] sm:$0xf] %vm3246_vm9, %v3238_v39  ;;  %v3245_v52 = vpack.c.bf16 %v3225_v31, %v3225_v31 }
 0xcc1   : > { %3248 = vst.msk [vmem:[%s3910_s27 + $0x4] sm:$0xf] %vm3246_vm9, %v3239_v14 }
 0xcc2   : > { %3249 = vst.msk [vmem:[%s3910_s27 + $0x8] sm:$0xf] %vm3246_vm9, %v3240_v58 }
 0xcc3   : > { %3250 = vst.msk [vmem:[%s3910_s27 + $0xc] sm:$0xf] %vm3246_vm9, %v3241_v9 }
 0xcc4   : > { %3251 = vst.msk [vmem:[%s3910_s27 + $0x10] sm:$0xf] %vm3246_vm9, %v3242_v2 }
 0xcc5   : > { %3252 = vst.msk [vmem:[%s3910_s27 + $0x14] sm:$0xf] %vm3246_vm9, %v3243_v57 }
 0xcc6   : > { %3253 = vst.msk [vmem:[%s3910_s27 + $0x18] sm:$0xf] %vm3246_vm9, %v3244_v11 }
 0xcc7   : > { %3254 = vst.msk [vmem:[%s3910_s27 + $0x1c] sm:$0xf] %vm3246_vm9, %v3245_v52 }
 0xcc8 PF: > { %s24_s17 = sadd.s32 1, %s3783_s17   ;;  %s5085_s21 = sld [smem:[#allocation3_spill]] }
 0xcc9   : > { %p21_p8 = scmp.ge.s32.totalorder %s24_s17, 6   ;;  %s5086_s29 = smov %s3775_s15 }
 0xcca   : > { %s5087_s30 = smov %s3779_s16  ;;  %s5088_s15 = smov %s5091_s18 }
 0xccb   :  { %23 = sbr.rel (!%p21_p8) target bundleno = 3 (0x3), region = 126 }
 0xcce   : > { %s5089_s16 = smov %s5085_s21 }

// kernel: sepformer_forward.6
= control target key start
LH: loop header
LB: loop body
LE: loop exit
PB: predicated region body
PF: predicated region fallthrough
CT: control target
= control target key end

     0   :  { %s3845_s29 = smov 0   ;;  %s3847_s30 = smov 0   ;;  %s5042_s0 = inlined_call_operand.vmem [shape: f32[16,8,32], index: 0, kind: input, shape index: {}]   ;;  %s5043_s1 = inlined_call_operand.vmem [shape: f32[8,32], index: 1, kind: input, shape index: {}]   ;;  %s5044_s2 = inlined_call_operand.vmem [shape: bf16[2,32,96], index: 2, kind: input, shape index: {}]   ;;  %s5045_s3 = inlined_call_operand.vmem [shape: f32[2,1,96], index: 3, kind: input, shape index: {}]   ;;  %s5046_s4 = inlined_call_operand.vmem [shape: bf16[2,4,8,32], index: 4, kind: input, shape index: {}]   ;;  %s5047_s5 = inlined_call_operand.vmem [shape: f32[2,1,32], index: 5, kind: input, shape index: {}]   ;;  %s5048_s6 = inlined_call_operand.vmem [shape: f32[2,1,32], index: 6, kind: input, shape index: {}]   ;;  %s5049_s7 = inlined_call_operand.vmem [shape: f32[2,1,32], index: 7, kind: input, shape index: {}]   ;;  %s5050_s8 = inlined_call_operand.vmem [shape: bf16[2,32,64], index: 8, kind: input, shape index: {}]   ;;  %s5051_s9 = inlined_call_operand.vmem [shape: f32[2,1,64], index: 9, kind: input, shape index: {}]   ;;  %s5052_s10 = inlined_call_operand.vmem [shape: bf16[2,64,32], index: 10, kind: input, shape index: {}]   ;;  %s5053_s11 = inlined_call_operand.vmem [shape: f32[2,1,32], index: 11, kind: input, shape index: {}]   ;;  %s5054_s12 = inlined_call_operand.vmem [shape: f32[2,1,32], index: 12, kind: input, shape index: {}]   ;;  %s5055_s13 = inlined_call_operand.vmem [shape: f32[2,1,32], index: 13, kind: input, shape index: {}]   ;;  %s5056_s14 = inlined_call_operand.vmem [shape: bf16[16,8,32], index: 14, kind: output, shape index: {}]  }
   0x1   :  { %s3849_s15 = smov 0   ;;  %s3851_s16 = smov 0  }
   0x2   :  { %s3853_s17 = smov 0  }
   0x3 LB: > { %s33_s18 = sadd.s32 1, %s3748_s15  ;;  %s36_s19 = sadd.s32 1, %s3752_s16  ;;  %s3756_s17 = sphi %s3853_s17, %s24_s17   ;;  %s3752_s16 = sphi %s3851_s16, %s5064_s16   ;;  %s3748_s15 = sphi %s3849_s15, %s5063_s15   ;;  %s3744_s30 = sphi %s3847_s30, %s5062_s30   ;;  %s3740_s29 = sphi %s3845_s29, %s5061_s29  }
   0x4   : > { %p34_p0 = scmp.ge.s32.totalorder %s33_s18, 2  ;;  %p3335_p1 = scmp.ge.s32.totalorder %s3756_s17, 1 }
   0x5   : > { %p425_p2 = scmp.lt.s32.totalorder %s3756_s17, 5 }
   0x6   : > { %s5066_s18 = smov (%p34_p0, %s33_s18), 0  ;;  %s5068_s19 = smov (!%p34_p0, %s36_s19), %s3752_s16 }
   0x7   : > { %5057 = sst [smem:[#allocation3_spill]] %s5066_s18  ;;  %p426_p3 = pnand %p3335_p1, %p425_p2 }
   0x8   : > { %p38_p4 = scmp.ge.s32.totalorder %s5068_s19, 2  ;;  %s3336_s20 = sshll.u32 (!%p426_p3), %s3744_s30, 3 }
   0x9   : > { %429 = sbr.rel (%p426_p3) target bundleno = 3271 (0xcc7), region = 76  ;;  %p472_p5 = scmp.lt.s32.totalorder (!%p426_p3), %s3336_s20, 15 }
   0xa   : > { %s5070_s19 = smov (%p38_p4, %s5068_s19), 0  ;;  %p3340_p6 = scmp.ne.s32.totalorder (!%p426_p3), %s3740_s29, 0 }
   0xb   : > { %5058 = sst [smem:[#allocation4_spill]] %s5070_s19 }
   0xe   : > { %s5072_s20 = smov (!%p472_p5, %s3336_s20), 15  ;;  %487 = sbr.rel (%p3340_p6) target bundleno = 31 (0x1f), region = 80 }
   0xf   : > { %s3337_s21 = sshll.u32 %s5072_s20, 3  ;;  %s3339_s22 = sshll.u32 %s5072_s20, 2 }
  0x10   : > { %s475_s25 = scalar_lea.vmem %s5042_s0, %s3337_s21  ;;  %s3883_s28 = scalar_lea.vmem %s5056_s14, %s3339_s22 }
  0x13   : > { %v488_v0 = vld [vmem:[%s475_s25] sm:$0xff]  ;;  %vm505_vm0 = vcmask 261120   ;;  %v489_v2 = vld [vmem:[%s475_s25 + $0x8] sm:$0xff]  ;;  %v490_v5 = vld [vmem:[%s475_s25 + $0x10] sm:$0xff] }
  0x14   : > { %v496_v1 = vld [vmem:[%s5043_s1] sm:$0xff]  ;;  %v491_v6 = vld [vmem:[%s475_s25 + $0x18] sm:$0xff]  ;;  %v493_v10 = vld [vmem:[%s475_s25 + $0x28] sm:$0xff] }
  0x15   : > { %v497_v3 = vadd.f32 %v496_v1, %v488_v0  ;;  %v498_v4 = vadd.f32 %v496_v1, %v489_v2  ;;  %v492_v7 = vld [vmem:[%s475_s25 + $0x20] sm:$0xff]  ;;  %v499_v8 = vadd.f32 %v496_v1, %v490_v5  ;;  %v500_v9 = vadd.f32 %v496_v1, %v491_v6  ;;  %v494_v11 = vld [vmem:[%s475_s25 + $0x30] sm:$0xff]  ;;  %v495_v13 = vld [vmem:[%s475_s25 + $0x38] sm:$0xff] }
  0x16   : > { %v501_v12 = vadd.f32 %v496_v1, %v492_v7  ;;  %v502_v14 = vadd.f32 %v496_v1, %v493_v10  ;;  %v503_v15 = vadd.f32 %v496_v1, %v494_v11  ;;  %v504_v16 = vadd.f32 %v496_v1, %v495_v13 }
  0x17   : > { %506 = vst.msk [vmem:[#allocation2] sm:$0xff] %vm505_vm0, %v497_v3 }
  0x18   : > { %507 = vst.msk [vmem:[#allocation2 + $0x8] sm:$0xff] %vm505_vm0, %v498_v4 }
  0x19   : > { %508 = vst.msk [vmem:[#allocation2 + $0x10] sm:$0xff] %vm505_vm0, %v499_v8 }
  0x1a   : > { %509 = vst.msk [vmem:[#allocation2 + $0x18] sm:$0xff] %vm505_vm0, %v500_v9 }
  0x1b   : > { %510 = vst.msk [vmem:[#allocation2 + $0x20] sm:$0xff] %vm505_vm0, %v501_v12 }
  0x1c   : > { %511 = vst.msk [vmem:[#allocation2 + $0x28] sm:$0xff] %vm505_vm0, %v502_v14 }
  0x1d   : > { %512 = vst.msk [vmem:[#allocation2 + $0x30] sm:$0xff] %vm505_vm0, %v503_v15 }
  0x1e   : > { %513 = vst.msk [vmem:[#allocation2 + $0x38] sm:$0xff] %vm505_vm0, %v504_v16 }
  0x1f PF: > { %s3898_s30 = sshll.u32 %s3740_s29, 4  ;;  %s533_s23 = scalar_lea.vmem %s5045_s3, %s3740_s29  ;;  %v514_v18 = vld [vmem:[#allocation2] sm:$0xff]  ;;  %v515_v19 = vld [vmem:[#allocation2 + $0x8] sm:$0xff]  ;;  %vm550_vm1 = vcmask 261120   ;;  %vm611_vm2 = vcmask 64512   ;;  %vm900_vm3 = vcmask 1043456  }
  0x20   : > { %s528_s20 = scalar_lea.vmem %s5044_s2, %s3898_s30  ;;  %v516_v21 = vld [vmem:[#allocation2 + $0x10] sm:$0xff]  ;;  %v522_v23 = vpack.c.bf16 %v515_v19, %v514_v18  ;;  %v3540_v31 = vld [vmem:[%s533_s23] ss:$0 sm:$0xff]  ;;  %s3758_s24 = smov 96  }
  0x21   : > { %v3476_v17 = vld [vmem:[%s528_s20 + $0x8] sm:$0xff]  ;;  %v3475_v20 = vld [vmem:[%s528_s20] sm:$0xff]  ;;  %v517_v22 = vld [vmem:[#allocation2 + $0x18] sm:$0xff]  ;;  %s3759_s25 = smov 64   ;;  %s3760_s26 = smov 88  }
  0x22   : > { %569 = vmatpush.bf16.msra.mxu0 %v3476_v17  ;;  %3486 = vmatpush.bf16.msra.mxu3 %v3476_v17  ;;  %v523_v24 = vpack.c.bf16 %v517_v22, %v516_v21  ;;  %v518_v25 = vld [vmem:[#allocation2 + $0x20] sm:$0xff]  ;;  %s3761_s27 = smov 120   ;;  %s3762_s18 = smov 56  }
  0x23   : > { %v519_v26 = vld [vmem:[#allocation2 + $0x28] sm:$0xff]  ;;  %s3763_s19 = smov 80   ;;  %s3764_s20 = smov 112  }
  0x24   : > { %v524_v27 = vpack.c.bf16 %v519_v26, %v518_v25  ;;  %v520_v28 = vld [vmem:[#allocation2 + $0x30] sm:$0xff]  ;;  %s3765_s21 = smov 48   ;;  %s3766_s22 = smov 72  }
  0x25   : > { %v521_v29 = vld [vmem:[#allocation2 + $0x38] sm:$0xff]  ;;  %s2637_s23 = scalar_lea.vmem %s5048_s6, %s3740_s29  ;;  %p3471_p7 = scmp.ne.s32.totalorder %s3740_s29, 1 }
  0x26   : > { %570 = vmatpush.bf16.msra.mxu0 %v3475_v20  ;;  %3487 = vmatpush.bf16.msra.mxu3 %v3475_v20  ;;  %v525_v30 = vpack.c.bf16 %v521_v29, %v520_v28 }
  0x29   : > { %3351 = vmatmul.msk.bf16.vlgmr.msra.gmra.mxu0 %vm550_vm1, %v522_v23  ;;  %3352 = vmatmul.msk.bf16.vlgmr.msra.gmra.mxu3 %vm550_vm1, %v523_v24 }
  0x39   : > { %3353 = vmatmul.msk.bf16.gmra.mxu3 %vm550_vm1, %v524_v27 }
  0x49   : > { %3354 = vmatmul.msk.bf16.gmra.mxu3 %vm550_vm1, %v525_v30 }
  0xa6   : > { %v572_v32 = vpop.f32.mrf.mxu0 }
  0xa7   : > { %v573_v33 = vadd.f32 %v3540_v31, %v572_v32 }
  0xa9   : > { %v592_v34 = vpack.c.bf16 %v573_v33, %v573_v33 }
  0xab   : > { %v607_v35 = vunpack.c.l.b16 %v592_v34 }
  0xac   : > { %v577_v36 = vpop.f32.mrf.mxu3 }
  0xad   : > { %v3912_v37 = vpack.c.b16 %v607_v35, %v607_v35  ;;  %v578_v38 = vadd.f32 %v3540_v31, %v577_v36 }
  0xae   : > { %v574_v62 = vpop.f32.mrf.mxu0 }
  0xaf   : > { %v594_v39 = vpack.c.bf16 %v578_v38, %v578_v38  ;;  %609 = vrot.lane.b32.xlu0 %v3912_v37, %s3758_s24  ;;  %v575_v1 = vadd.f32 %v3540_v31, %v574_v62 }
  0xb1   : > { %v656_v40 = vunpack.c.l.b16 %v594_v39  ;;  %v593_v4 = vpack.c.bf16 %v575_v1, %v575_v1 }
  0xb3   : > { %v3916_v41 = vpack.c.b16 %v656_v40, %v656_v40  ;;  %v632_v6 = vunpack.c.l.b16 %v593_v4 }
  0xb4   : > { %v579_v42 = vpop.f32.mrf.mxu3 }
  0xb5   : > { %v580_v43 = vadd.f32 %v3540_v31, %v579_v42  ;;  %v3946_v7 = vpack.c.b16 %v632_v6, %v632_v6 }
  0xb7   : > { %v595_v44 = vpack.c.bf16 %v580_v43, %v580_v43  ;;  %658 = vrot.lane.b32.xlu0 %v3916_v41, %s3758_s24 }
  0xb9   : > { %v680_v45 = vunpack.c.l.b16 %v595_v44 }
  0xbb   : > { %v3920_v46 = vpack.c.b16 %v680_v45, %v680_v45 }
  0xbc   : > { %v582_v47 = vpop.f32.mrf.mxu3 }
  0xbd   : > { %v583_v48 = vadd.f32 %v3540_v31, %v582_v47  ;;  %682 = vrot.lane.b32.xlu1 %v3920_v46, %s3758_s24 }
  0xbf   : > { %v596_v49 = vpack.c.bf16 %v583_v48, %v583_v48  ;;  %895 = vrot.lane.b32.xlu0 %v3912_v37, %s3759_s25 }
  0xc1   : > { %v704_v50 = vunpack.c.l.b16 %v596_v49 }
  0xc3   : > { %v3926_v51 = vpack.c.b16 %v704_v50, %v704_v50 }
  0xc4   : > { %v584_v52 = vpop.f32.mrf.mxu3 }
  0xc5   : > { %v585_v53 = vadd.f32 %v3540_v31, %v584_v52  ;;  %706 = vrot.lane.b32.xlu1 %v3926_v51, %s3758_s24 }
  0xc7   : > { %v597_v54 = vpack.c.bf16 %v585_v53, %v585_v53  ;;  %959 = vrot.lane.b32.xlu0 %v3920_v46, %s3759_s25 }
  0xc9   : > { %v728_v55 = vunpack.c.l.b16 %v597_v54 }
  0xcb   : > { %v3932_v56 = vpack.c.b16 %v728_v55, %v728_v55 }
  0xcc   : > { %v587_v57 = vpop.f32.mrf.mxu3 }
  0xcd   : > { %v588_v58 = vadd.f32 %v3540_v31, %v587_v57  ;;  %730 = vrot.lane.b32.xlu1 %v3932_v56, %s3758_s24 }
  0xcf   : > { %v598_v59 = vpack.c.bf16 %v588_v58, %v588_v58 }
  0xd1   : > { %v752_v60 = vunpack.c.l.b16 %v598_v59 }
  0xd3   : > { %v3936_v61 = vpack.c.b16 %v752_v60, %v752_v60 }
  0xd4   : > { %v589_v63 = vpop.f32.mrf.mxu3 }
  0xd5   : > { %v590_v0 = vadd.f32 %v3540_v31, %v589_v63  ;;  %754 = vrot.lane.b32.xlu2 %v3936_v61, %s3758_s24  ;;  %938 = vrot.lane.b32.xlu1 %v3916_v41, %s3759_s25 }
  0xd7   : > { %v599_v2 = vpack.c.bf16 %v590_v0, %v590_v0 }
  0xd9   : > { %v776_v3 = vunpack.c.l.b16 %v599_v2 }
  0xdb   : > { %v3942_v5 = vpack.c.b16 %v776_v3, %v776_v3 }
  0xdd   : > { %778 = vrot.lane.b32.xlu2 %v3942_v5, %s3758_s24 }
  0xe5   : > { %634 = vrot.lane.b32.xlu2 %v3946_v7, %s3758_s24 }
 0x121   : > { %v610_v8 = vpop.permute.xlu0 %609 }
 0x122   : > { %v616_v9 = vsel %vm611_vm2, %v610_v8, 0 }
 0x123   : > { %625 = vmatpush.bf16.xpose.msrb.mxu0 %v616_v9 }
 0x129   : > { %v659_v10 = vpop.permute.xlu0 %658 }
 0x12a   : > { %3356 = vmatmul.msk.bf16.vlgmr.msrb.gmra.mxu0 %vm611_vm2, %v592_v34  ;;  %v664_v11 = vsel %vm611_vm2, %v659_v10, 0 }
 0x12b   : > { %673 = vmatpush.bf16.xpose.msrb.mxu3 %v664_v11 }
 0x12f   : > { %v755_v12 = vpop.permute.xlu2 %754  ;;  %v683_v13 = vpop.permute.xlu1 %682 }
 0x130   : > { %v688_v14 = vsel %vm611_vm2, %v683_v13, 0  ;;  %v760_v15 = vsel %vm611_vm2, %v755_v12, 0 }
 0x131   : > { %697 = vmatpush.bf16.xpose.msra.mxu1 %v688_v14  ;;  %v896_v20 = vpop.permute.xlu0 %895 }
 0x132   : > { %3358 = vmatmul.msk.bf16.vlgmr.msrb.gmra.mxu3 %vm611_vm2, %v594_v39  ;;  %v902_v25 = vsel %vm900_vm3, %v896_v20, 0 }
 0x137   : > { %v779_v16 = vpop.permute.xlu2 %778  ;;  %v707_v17 = vpop.permute.xlu1 %706 }
 0x138   : > { %3359 = vmatmul.msk.bf16.vlgmr.msra.gmra.mxu1 %vm611_vm2, %v595_v44  ;;  %v712_v18 = vsel %vm611_vm2, %v707_v17, 0  ;;  %v784_v19 = vsel %vm611_vm2, %v779_v16, 0 }
 0x139   : > { %769 = vmatpush.bf16.xpose.msrb.mxu1 %v760_v15  ;;  %721 = vmatpush.bf16.xpose.msra.mxu2 %v712_v18  ;;  %v960_v26 = vpop.permute.xlu0 %959 }
 0x13a   : > { %v965_v29 = vsel %vm900_vm3, %v960_v26, 0 }
 0x13f   : > { %v731_v21 = vpop.permute.xlu1 %730  ;;  %v635_v22 = vpop.permute.xlu2 %634 }
 0x140   : > { %v736_v23 = vsel %vm611_vm2, %v731_v21, 0  ;;  %v640_v24 = vsel %vm611_vm2, %v635_v22, 0  ;;  %3360 = vmatmul.msk.bf16.vlgmr.msra.gmra.mxu2 %vm611_vm2, %v596_v49 }
 0x141   : > { %793 = vmatpush.bf16.xpose.msrb.mxu2 %v784_v19  ;;  %649 = vmatpush.bf16.xpose.msra.mxu0 %v640_v24 }
 0x142   : > { %745 = vmatpush.bf16.xpose.msra.mxu3 %v736_v23 }
 0x147   : > { %v939_v27 = vpop.permute.xlu1 %938 }
 0x148   : > { %v944_v28 = vsel %vm900_vm3, %v939_v27, 0  ;;  %3357 = vmatmul.msk.bf16.vlgmr.msra.gmra.mxu0 %vm611_vm2, %v593_v4  ;;  %3362 = vmatmul.msk.bf16.vlgmr.msrb.gmra.mxu1 %vm611_vm2, %v598_v59 }
 0x149   : > { %3361 = vmatmul.msk.bf16.vlgmr.msra.gmra.mxu3 %vm611_vm2, %v597_v54  ;;  %953 = vmatpush.bf16.msra.mxu2 %v944_v28 }
 0x14a   : > { %911 = vmatpush.bf16.msrb.mxu3 %v902_v25 }
 0x14e   : > { %974 = vmatpush.bf16.msra.mxu3 %v965_v29 }
 0x150   : > { %3363 = vmatmul.msk.bf16.vlgmr.msrb.gmra.mxu2 %vm611_vm2, %v599_v2 }
 0x1a7   : > { %v627_v30 = vpop.f32.mrf.mxu0 }
 0x1a8   : > { %v799_v31 = vsel %vm611_vm2, %v627_v30, -inf }
 0x1a9   : > { %800 = vmax.xlane.f32.xlu0 %v799_v31 }
 0x1af   : > { %v629_v32 = vpop.f32.mrf.mxu0 }
 0x1b5   : > { %v675_v33 = vpop.f32.mrf.mxu3  ;;  %v699_v34 = vpop.f32.mrf.mxu1 }
 0x1b6   : > { %v808_v35 = vsel %vm611_vm2, %v699_v34, -inf  ;;  %v805_v36 = vsel %vm611_vm2, %v675_v33, -inf }
 0x1b7   : > { %809 = vmax.xlane.f32.xlu2 %v808_v35  ;;  %806 = vmax.xlane.f32.xlu1 %v805_v36 }
 0x1bd   : > { %v701_v38 = vpop.f32.mrf.mxu1  ;;  %1022 = vrot.lane.b32.xlu0 %v3936_v61, %s3759_s25  ;;  %v677_v39 = vpop.f32.mrf.mxu3 }
 0x1c3   : > { %v3974_v40 = vpop.f32.mrf.mxu2 }
 0x1c4   : > { %v811_v23 = vsel %vm611_vm2, %v3974_v40, -inf }
 0x1c5   : > { %v3976_v42 = vpop.f32.mrf.mxu0  ;;  %v771_v43 = vpop.f32.mrf.mxu1 }
 0x1c6   : > { %v817_v44 = vsel %vm611_vm2, %v771_v43, -inf  ;;  %v802_v22 = vsel %vm611_vm2, %v3976_v42, -inf }
 0x1c7   : > { %818 = vmax.xlane.f32.xlu2 %v817_v44 }
 0x1cb   : > { %v725_v45 = vpop.f32.mrf.mxu2 }
 0x1cc   : > { %v3979_v47 = vpop.f32.mrf.mxu3 }
 0x1cd   : > { %v653_v48 = vpop.f32.mrf.mxu0  ;;  %v773_v49 = vpop.f32.mrf.mxu1  ;;  %v814_v28 = vsel %vm611_vm2, %v3979_v47, -inf }
 0x1d0   : > { %1116 = vrot.lane.b32.xlu1 %v3916_v41, %s3760_s26 }
 0x1d3   : > { %v795_v52 = vpop.f32.mrf.mxu2 }
 0x1d4   : > { %v749_v50 = vpop.f32.mrf.mxu3  ;;  %v820_v54 = vsel %vm611_vm2, %v795_v52, -inf }
 0x1db   : > { %v797_v53 = vpop.f32.mrf.mxu2 }
 0x1df   : > { %1043 = vrot.lane.b32.xlu2 %v3942_v5, %s3759_s25 }
 0x1e7   : > { %821 = vmax.xlane.f32.xlu0 %v820_v54 }
 0x21c   : > { %v801_v55 = vpop.xlane.xlu0 %800 }
 0x21d   : > { %v823_v57 = vsub.f32 %v627_v30, %v801_v55 }
 0x21f   : > { %v831_v58 = vmul.f32 1.442695, %v823_v57 }
 0x221   : > { %3548 = vpow2.f32 %v831_v58 }
 0x227   : > { %v3549_v59 = vpop.eup %3548 }
 0x228   : > { %v847_v60 = vsel %vm611_vm2, %v3549_v59, 0.0 }
 0x229   : > { %848 = vadd.xlane.f32.xlu0 %v847_v60 }
 0x22a   : > { %v810_v62 = vpop.xlane.xlu2 %809  ;;  %v807_v63 = vpop.xlane.xlu1 %806 }
 0x22b   : > { %v826_v0 = vsub.f32 %v699_v34, %v810_v62  ;;  %v825_v1 = vsub.f32 %v675_v33, %v807_v63 }
 0x22d   : > { %v837_v2 = vmul.f32 1.442695, %v826_v0  ;;  %v835_v3 = vmul.f32 1.442695, %v825_v1 }
 0x22f   : > { %3550 = vpow2.f32 %v837_v2  ;;  %v1023_v4 = vpop.permute.xlu0 %1022 }
 0x230   : > { %3552 = vpow2.f32 %v835_v3  ;;  %v1028_v6 = vsel %vm900_vm3, %v1023_v4, 0 }
 0x231   : > { %1037 = vmatpush.bf16.msrb.mxu2 %v1028_v6 }
 0x235   : > { %v3551_v8 = vpop.eup %3550 }
 0x236   : > { %v3553_v9 = vpop.eup %3552  ;;  %v856_v10 = vsel %vm611_vm2, %v3551_v8, 0.0 }
 0x237   : > { %857 = vadd.xlane.f32.xlu2 %v856_v10  ;;  %v853_v11 = vsel %vm611_vm2, %v3553_v9, 0.0 }
 0x238   : > { %854 = vadd.xlane.f32.xlu0 %v853_v11 }
 0x23a   : > { %v819_v12 = vpop.xlane.xlu2 %818 }
 0x23b   : > { %v829_v13 = vsub.f32 %v771_v43, %v819_v12 }
 0x23d   : > { %v843_v14 = vmul.f32 1.442695, %v829_v13 }
 0x23f   : > { %3554 = vpow2.f32 %v843_v14 }
 0x242   : > { %v1044_v25 = vpop.permute.xlu2 %1043  ;;  %v1117_v36 = vpop.permute.xlu1 %1116 }
 0x243   : > { %v1049_v30 = vsel %vm900_vm3, %v1044_v25, 0  ;;  %v1122_v44 = vsel %vm611_vm2, %v1117_v36, 0 }
 0x245   : > { %v3555_v15 = vpop.eup %3554 }
 0x246   : > { %v865_v16 = vsel %vm611_vm2, %v3555_v15, 0.0 }
 0x247   : > { %866 = vadd.xlane.f32.xlu1 %v865_v16 }
 0x24f   : > { %1114 = vrot.lane.b32.xlu2 %v3916_v41, %s3761_s27 }
 0x257   : > { %1137 = vrot.lane.b32.xlu2 %v3920_v46, %s3761_s27 }
 0x25a   : > { %v822_v17 = vpop.xlane.xlu0 %821 }
 0x25b   : > { %v830_v18 = vsub.f32 %v795_v52, %v822_v17 }
 0x25d   : > { %v845_v19 = vmul.f32 1.442695, %v830_v18 }
 0x25f   : > { %3556 = vpow2.f32 %v845_v19  ;;  %1231 = vrot.lane.b32.xlu2 %v3942_v5, %s3760_s26 }
 0x260   : > { %1139 = vrot.lane.b32.xlu1 %v3920_v46, %s3760_s26 }
 0x265   : > { %v3557_v20 = vpop.eup %3556 }
 0x266   : > { %v868_v21 = vsel %vm611_vm2, %v3557_v20, 0.0 }
 0x267   : > { %869 = vadd.xlane.f32.xlu0 %v868_v21 }
 0x268   : > { %1206 = vrot.lane.b32.xlu1 %v3936_v61, %s3761_s27 }
 0x270   : > { %1229 = vrot.lane.b32.xlu1 %v3942_v5, %s3761_s27 }
 0x27b   : > { %1208 = vrot.lane.b32.xlu0 %v3936_v61, %s3760_s26 }
 0x288   : > { %803 = vmax.xlane.f32.xlu2 %v802_v22 }
 0x29a   : > { %812 = vmax.xlane.f32.xlu1 %v811_v23 }
 0x29c   : > { %v849_v24 = vpop.xlane.xlu0 %848 }
 0x29d   : > { %3558 = vrcp.f32 %v849_v24 }
 0x2a3   : > { %v3559_v26 = vpop.eup %3558 }
 0x2a4   : > { %v879_v27 = vmul.f32 %v3559_v26, %v3549_v59 }
 0x2a5   : > { %815 = vmax.xlane.f32.xlu0 %v814_v28 }
 0x2a6   : > { %v887_v29 = vpack.c.bf16 %v879_v27, %v879_v27 }
 0x2a8   : > { %3364 = vmatmul.msk.bf16.vlgmr.msrb.gmra.mxu3 %vm611_vm2, %v887_v29 }
 0x2a9   : > { %1058 = vmatpush.bf16.msrb.mxu3 %v1049_v30 }
 0x2aa   : > { %v858_v31 = vpop.xlane.xlu2 %857 }
 0x2ab   : > { %3560 = vrcp.f32 %v858_v31  ;;  %v855_v32 = vpop.xlane.xlu0 %854 }
 0x2ac   : > { %3562 = vrcp.f32 %v855_v32 }
 0x2b1   : > { %v3561_v33 = vpop.eup %3560 }
 0x2b2   : > { %v3563_v34 = vpop.eup %3562  ;;  %v882_v35 = vmul.f32 %v3561_v33, %v3551_v8  ;;  %v1115_v52 = vpop.permute.xlu2 %1114 }
 0x2b3   : > { %v881_v38 = vmul.f32 %v3563_v34, %v3553_v9  ;;  %917 = vrot.lane.b32.xlu1 %v3946_v7, %s3759_s25 }
 0x2b4   : > { %v890_v43 = vpack.c.bf16 %v882_v35, %v882_v35 }
 0x2b5   : > { %v889_v39 = vpack.c.bf16 %v881_v38, %v881_v38 }
 0x2b7   : > { %3366 = vmatmul.msk.bf16.vlgmr.msra.gmra.mxu2 %vm611_vm2, %v889_v39 }
 0x2b8   : > { %1131 = vmatpush.bf16.xpose.msra.mxu2 %v1122_v44  ;;  %3367 = vmatmul.msk.bf16.vlgmr.msra.gmra.mxu3 %vm611_vm2, %v890_v43 }
 0x2b9   : > { %1001 = vrot.lane.b32.xlu0 %v3932_v56, %s3759_s25 }
 0x2ba   : > { %v867_v45 = vpop.xlane.xlu1 %866  ;;  %v1138_v55 = vpop.permute.xlu2 %1137 }
 0x2bb   : > { %3564 = vrcp.f32 %v867_v45  ;;  %1390 = vrot.lane.b32.xlu1 %v3916_v41, %s3762_s18 }
 0x2c1   : > { %1093 = vrot.lane.b32.xlu0 %v3946_v7, %s3760_s26  ;;  %v3565_v48 = vpop.eup %3564 }
 0x2c2   : > { %v885_v49 = vmul.f32 %v3565_v48, %v3555_v15  ;;  %v1232_v60 = vpop.permute.xlu2 %1231 }
 0x2c3   : > { %v1237_v63 = vsel %vm611_vm2, %v1232_v60, 0 }
 0x2c4   : > { %v893_v50 = vpack.c.bf16 %v885_v49, %v885_v49 }
 0x2c7   : > { %3370 = vmatmul.msk.bf16.vlgmr.msrb.gmra.mxu2 %vm611_vm2, %v893_v50 }
 0x2c9   : > { %1091 = vrot.lane.b32.xlu0 %v3946_v7, %s3761_s27 }
 0x2d1   : > { %1070 = vrot.lane.b32.xlu0 %v3912_v37, %s3760_s26 }
 0x2d2   : > { %v1140_v53 = vpop.permute.xlu1 %1139 }
 0x2d3   : > { %v1145_v54 = vsel %vm611_vm2, %v1140_v53, 0 }
 0x2d4   : > { %1154 = vmatpush.bf16.xpose.msra.mxu3 %v1145_v54 }
 0x2d7   : > { %3374 = vmatmul.msk.bf16.vlgmr.msra.gmra.mxu2 %vm611_vm2, %v1115_v52 }
 0x2d9   : > { %1068 = vrot.lane.b32.xlu0 %v3912_v37, %s3761_s27 }
 0x2da   : > { %v870_v57 = vpop.xlane.xlu0 %869  ;;  %v1207_v2 = vpop.permute.xlu1 %1206 }
 0x2db   : > { %3566 = vrcp.f32 %v870_v57 }
 0x2e1   : > { %v3567_v58 = vpop.eup %3566  ;;  %1183 = vrot.lane.b32.xlu0 %v3932_v56, %s3761_s27 }
 0x2e2   : > { %v886_v59 = vmul.f32 %v3567_v58, %v3557_v20  ;;  %v1230_v8 = vpop.permute.xlu1 %1229 }
 0x2e4   : > { %v894_v62 = vpack.c.bf16 %v886_v59, %v886_v59 }
 0x2e6   : > { %3371 = vmatmul.msk.bf16.vlgmr.msrb.gmra.mxu3 %vm611_vm2, %v894_v62 }
 0x2e7   : > { %1246 = vmatpush.bf16.xpose.msrb.mxu3 %v1237_v63 }
 0x2e9   : > { %1162 = vrot.lane.b32.xlu0 %v3926_v51, %s3760_s26 }
 0x2ed   : > { %v1209_v0 = vpop.permute.xlu0 %1208 }
 0x2ee   : > { %v1214_v1 = vsel %vm611_vm2, %v1209_v0, 0 }
 0x2ef   : > { %1223 = vmatpush.bf16.xpose.msrb.mxu2 %v1214_v1 }
 0x2f6   : > { %3375 = vmatmul.msk.bf16.vlgmr.msra.gmra.mxu3 %vm611_vm2, %v1138_v55  ;;  %3378 = vmatmul.msk.bf16.vlgmr.msrb.gmra.mxu2 %vm611_vm2, %v1207_v2 }
 0x2fb   : > { %v804_v3 = vpop.xlane.xlu2 %803 }
 0x2fc   : > { %v824_v4 = vsub.f32 %v3976_v42, %v804_v3 }
 0x2fe   : > { %v833_v6 = vmul.f32 1.442695, %v824_v4 }
 0x300   : > { %3568 = vpow2.f32 %v833_v6 }
 0x306   : > { %v3569_v9 = vpop.eup %3568  ;;  %3379 = vmatmul.msk.bf16.vlgmr.msrb.gmra.mxu3 %vm611_vm2, %v1230_v8 }
 0x307   : > { %v850_v10 = vsel %vm611_vm2, %v3569_v9, 0.0 }
 0x308   : > { %851 = vadd.xlane.f32.xlu2 %v850_v10 }
 0x30d   : > { %v813_v11 = vpop.xlane.xlu1 %812 }
 0x30e   : > { %v827_v14 = vsub.f32 %v3974_v40, %v813_v11 }
 0x310   : > { %v839_v16 = vmul.f32 1.442695, %v827_v14 }
 0x318   : > { %v816_v12 = vpop.xlane.xlu0 %815 }
 0x319   : > { %v828_v13 = vsub.f32 %v3979_v47, %v816_v12 }
 0x31b   : > { %v841_v15 = vmul.f32 1.442695, %v828_v13 }
 0x31d   : > { %3570 = vpow2.f32 %v841_v15 }
 0x31e   : > { %3572 = vpow2.f32 %v839_v16 }
 0x323   : > { %v4048_v17 = vpop.eup %3570 }
 0x324   : > { %v862_v42 = vsel %vm611_vm2, %v4048_v17, 0.0  ;;  %v4053_v20 = vpop.eup %3572 }
 0x325   : > { %863 = vadd.xlane.f32.xlu2 %v862_v42  ;;  %v918_v18 = vpop.permute.xlu1 %917  ;;  %v859_v22 = vsel %vm611_vm2, %v4053_v20, 0.0 }
 0x326   : > { %v923_v19 = vsel %vm900_vm3, %v918_v18, 0 }
 0x327   : > { %932 = vmatpush.bf16.msra.mxu1 %v923_v19 }
 0x32b   : > { %v4055_v21 = vpop.f32.mrf.mxu3  ;;  %v1002_v47 = vpop.permute.xlu0 %1001 }
 0x32c   : > { %v1007_v40 = vsel %vm900_vm3, %v1002_v47, 0 }
 0x32d   : > { %860 = vadd.xlane.f32.xlu2 %v859_v22  ;;  %1016 = vmatpush.bf16.msrb.mxu1 %v1007_v40  ;;  %v1391_v23 = vpop.permute.xlu1 %1390 }
 0x32e   : > { %v1396_v24 = vsel %vm900_vm3, %v1391_v23, 0 }
 0x32f   : > { %1405 = vmatpush.bf16.msra.mxu2 %v1396_v24 }
 0x333   : > { %v915_v25 = vpop.f32.mrf.mxu3  ;;  %v1094_v43 = vpop.permute.xlu0 %1093 }
 0x334   : > { %v1099_v59 = vsel %vm611_vm2, %v1094_v43, 0 }
 0x33a   : > { %v4061_v26 = vpop.f32.mrf.mxu2 }
 0x33b   : > { %v4063_v27 = vpop.f32.mrf.mxu3  ;;  %v1092_v55 = vpop.permute.xlu0 %1091 }
 0x33c   : > { %v1065_v28 = vpack.c.bf16 %v4063_v27, %v4061_v26 }
 0x342   : > { %v957_v29 = vpop.f32.mrf.mxu2 }
 0x343   : > { %v978_v30 = vpop.f32.mrf.mxu3  ;;  %v1071_v63 = vpop.permute.xlu0 %1070 }
 0x344   : > { %v1076_v14 = vsel %vm611_vm2, %v1071_v63, 0 }
 0x345   : > { %980 = vrot.lane.b32.xlu2 %v3926_v51, %s3759_s25  ;;  %s4305_s25 = scalar_lea.vmem %s5046_s4, %s3898_s30 }
 0x34a   : > { %v4069_v31 = vpop.f32.mrf.mxu2 }
 0x34b   : > { %v1069_v1 = vpop.permute.xlu0 %1068 }
 0x34d   : > { %1185 = vrot.lane.b32.xlu2 %v3932_v56, %s3760_s26  ;;  %s3767_s26 = smov 104  }
 0x352   : > { %v1041_v32 = vpop.f32.mrf.mxu2 }
 0x353   : > { %v1184_v4 = vpop.permute.xlu0 %1183 }
 0x355   : > { %1411 = vrot.lane.b32.xlu2 %v3920_v46, %s3762_s18 }
 0x35a   : > { %v4075_v33 = vpop.f32.mrf.mxu2 }
 0x35b   : > { %v1258_v34 = vsel %vm611_vm2, %v4075_v33, -inf  ;;  %v1163_v15 = vpop.permute.xlu0 %1162 }
 0x35c   : > { %1259 = vmax.xlane.f32.xlu0 %v1258_v34 }
 0x362   : > { %v1135_v35 = vpop.f32.mrf.mxu2 }
 0x369   : > { %v4079_v36 = vpop.f32.mrf.mxu3 }
 0x36a   : > { %v1067_v38 = vpack.c.bf16 %v4079_v36, %v4069_v31 }
 0x371   : > { %v1062_v39 = vpop.f32.mrf.mxu3 }
 0x379   : > { %v4083_v44 = vpop.f32.mrf.mxu3  ;;  %v4085_v45 = vpop.f32.mrf.mxu2 }
 0x37a   : > { %v1261_v48 = vsel %vm611_vm2, %v4083_v44, -inf  ;;  %v1270_v50 = vsel %vm611_vm2, %v4085_v45, -inf }
 0x37b   : > { %v852_v49 = vpop.xlane.xlu2 %851  ;;  %1262 = vmax.xlane.f32.xlu0 %v1261_v48 }
 0x37c   : > { %3574 = vrcp.f32 %v852_v49 }
 0x37e   : > { %1271 = vmax.xlane.f32.xlu2 %v1270_v50 }
 0x381   : > { %v1158_v52 = vpop.f32.mrf.mxu3  ;;  %v1227_v53 = vpop.f32.mrf.mxu2 }
 0x382   : > { %v3575_v54 = vpop.eup %3574 }
 0x383   : > { %v880_v57 = vmul.f32 %v3575_v54, %v3569_v9 }
 0x385   : > { %v888_v58 = vpack.c.bf16 %v880_v57, %v880_v57 }
 0x387   : > { %3365 = vmatmul.msk.bf16.vlgmr.msra.gmra.mxu1 %vm611_vm2, %v888_v58 }
 0x388   : > { %1108 = vmatpush.bf16.xpose.msra.mxu1 %v1099_v59 }
 0x389   : > { %v4093_v60 = vpop.f32.mrf.mxu3 }
 0x38a   : > { %v1273_v62 = vsel %vm611_vm2, %v4093_v60, -inf }
 0x38b   : > { %1274 = vmax.xlane.f32.xlu1 %v1273_v62 }
 0x38f   : > { %1495 = vrot.lane.b32.xlu0 %v3942_v5, %s3762_s18 }
 0x391   : > { %v1250_v0 = vpop.f32.mrf.mxu3 }
 0x397   : > { %1610 = vrot.lane.b32.xlu0 %v3912_v37, %s3763_s19 }
 0x398   : > { %v864_v2 = vpop.xlane.xlu2 %863 }
 0x399   : > { %3576 = vrcp.f32 %v864_v2 }
 0x39f   : > { %v3577_v3 = vpop.eup %3576  ;;  %1608 = vrot.lane.b32.xlu0 %v3912_v37, %s3764_s20 }
 0x3a0   : > { %v884_v6 = vmul.f32 %v3577_v3, %v4048_v17  ;;  %v861_v8 = vpop.xlane.xlu2 %860  ;;  %v1168_v17 = vsel %vm611_vm2, %v1163_v15, 0 }
 0x3a1   : > { %3578 = vrcp.f32 %v861_v8 }
 0x3a2   : > { %v892_v9 = vpack.c.bf16 %v884_v6, %v884_v6 }
 0x3a4   : > { %1160 = vrot.lane.b32.xlu1 %v3926_v51, %s3761_s27  ;;  %3369 = vmatmul.msk.bf16.vlgmr.msrb.gmra.mxu1 %vm611_vm2, %v892_v9  ;;  %s3768_s27 = smov 40  }
 0x3a7   : > { %v3579_v10 = vpop.eup %3578  ;;  %1656 = vrot.lane.b32.xlu0 %v3916_v41, %s3763_s19 }
 0x3a8   : > { %v883_v11 = vmul.f32 %v3579_v10, %v4053_v20  ;;  %v981_v12 = vpop.permute.xlu2 %980 }
 0x3a9   : > { %v986_v13 = vsel %vm900_vm3, %v981_v12, 0 }
 0x3aa   : > { %v891_v16 = vpack.c.bf16 %v883_v11, %v883_v11  ;;  %995 = vmatpush.bf16.msrb.mxu0 %v986_v13 }
 0x3ac   : > { %1633 = vrot.lane.b32.xlu1 %v3946_v7, %s3763_s19 }
 0x3ad   : > { %3368 = vmatmul.msk.bf16.vlgmr.msrb.gmra.mxu0 %vm611_vm2, %v891_v16 }
 0x3ae   : > { %1085 = vmatpush.bf16.xpose.msra.mxu0 %v1076_v14 }
 0x3af   : > { %1654 = vrot.lane.b32.xlu0 %v3916_v41, %s3764_s20 }
 0x3b0   : > { %v1186_v42 = vpop.permute.xlu2 %1185 }
 0x3b1   : > { %v1191_v18 = vsel %vm611_vm2, %v1186_v42, 0 }
 0x3b2   : > { %1200 = vmatpush.bf16.xpose.msrb.mxu1 %v1191_v18 }
 0x3b4   : > { %1631 = vrot.lane.b32.xlu1 %v3946_v7, %s3764_s20  ;;  %3373 = vmatmul.msk.bf16.vlgmr.msra.gmra.mxu1 %vm611_vm2, %v1092_v55 }
 0x3b6   : > { %1177 = vmatpush.bf16.xpose.msrb.mxu0 %v1168_v17 }
 0x3b8   : > { %v1412_v19 = vpop.permute.xlu2 %1411 }
 0x3b9   : > { %v1417_v20 = vsel %vm900_vm3, %v1412_v19, 0 }
 0x3ba   : > { %1426 = vmatpush.bf16.msra.mxu3 %v1417_v20 }
 0x3bd   : > { %3372 = vmatmul.msk.bf16.vlgmr.msra.gmra.mxu0 %vm611_vm2, %v1069_v1 }
 0x3c4   : > { %3377 = vmatmul.msk.bf16.vlgmr.msrb.gmra.mxu1 %vm611_vm2, %v1184_v4 }
 0x3cf   : > { %v1260_v47 = vpop.xlane.xlu0 %1259 }
 0x3d0   : > { %v1278_v40 = vsub.f32 %v4075_v33, %v1260_v47 }
 0x3d2   : > { %v1288_v22 = vmul.f32 1.442695, %v1278_v40 }
 0x3d4   : > { %3580 = vpow2.f32 %v1288_v22 }
 0x3da   : > { %v3581_v23 = vpop.eup %3580 }
 0x3db   : > { %v1306_v24 = vsel %vm611_vm2, %v3581_v23, 0.0 }
 0x3dc   : > { %1307 = vadd.xlane.f32.xlu2 %v1306_v24 }
 0x3ee   : > { %v1263_v25 = vpop.xlane.xlu0 %1262 }
 0x3ef   : > { %v1279_v29 = vsub.f32 %v4083_v44, %v1263_v25 }
 0x3f1   : > { %v1290_v30 = vmul.f32 1.442695, %v1279_v29  ;;  %v1272_v32 = vpop.xlane.xlu2 %1271 }
 0x3f2   : > { %v1282_v34 = vsub.f32 %v4085_v45, %v1272_v32 }
 0x3f3   : > { %3582 = vpow2.f32 %v1290_v30 }
 0x3f4   : > { %v1296_v35 = vmul.f32 1.442695, %v1282_v34  ;;  %1474 = vrot.lane.b32.xlu2 %v3936_v61, %s3762_s18 }
 0x3f6   : > { %3584 = vpow2.f32 %v1296_v35 }
 0x3f9   : > { %v4131_v33 = vpop.eup %3582 }
 0x3fa   : > { %v1309_v39 = vsel %vm611_vm2, %v4131_v33, 0.0 }
 0x3fb   : > { %1310 = vadd.xlane.f32.xlu0 %v1309_v39 }
 0x3fc   : > { %v4135_v43 = vpop.eup %3584 }
 0x3fd   : > { %v1318_v44 = vsel %vm611_vm2, %v4135_v43, 0.0 }
 0x3fe   : > { %1319 = vadd.xlane.f32.xlu1 %v1318_v44  ;;  %v1275_v50 = vpop.xlane.xlu1 %1274 }
 0x3ff   : > { %v1283_v52 = vsub.f32 %v4093_v60, %v1275_v50 }
 0x401   : > { %v1496_v48 = vpop.permute.xlu0 %1495  ;;  %v1298_v54 = vmul.f32 1.442695, %v1283_v52 }
 0x402   : > { %v1501_v45 = vsel %vm900_vm3, %v1496_v48, 0 }
 0x403   : > { %1510 = vmatpush.bf16.msrb.mxu3 %v1501_v45  ;;  %3586 = vpow2.f32 %v1298_v54 }
 0x404   : > { %v4140_v49 = vpop.f32.mrf.mxu1 }
 0x409   : > { %v4150_v57 = vpop.eup %3586  ;;  %v1611_v8 = vpop.permute.xlu0 %1610 }
 0x40a   : > { %v1321_v58 = vsel %vm611_vm2, %v4150_v57, 0.0  ;;  %v1616_v18 = vsel %vm611_vm2, %v1611_v8, 0 }
 0x40c   : > { %v936_v53 = vpop.f32.mrf.mxu1 }
 0x40f   : > { %1677 = vrot.lane.b32.xlu0 %v3920_v46, %s3764_s20 }
 0x411   : > { %v1609_v12 = vpop.permute.xlu0 %1608 }
 0x416   : > { %v1161_v55 = vpop.permute.xlu1 %1160 }
 0x417   : > { %1702 = vrot.lane.b32.xlu1 %v3926_v51, %s3763_s19  ;;  %3376 = vmatmul.msk.bf16.vlgmr.msrb.gmra.mxu0 %vm611_vm2, %v1161_v55 }
 0x418   : > { %1725 = vrot.lane.b32.xlu0 %v3932_v56, %s3763_s19 }
 0x419   : > { %v1657_v19 = vpop.permute.xlu0 %1656 }
 0x41a   : > { %v1662_v44 = vsel %vm611_vm2, %v1657_v19, 0 }
 0x41d   : > { %1322 = vadd.xlane.f32.xlu2 %v1321_v58 }
 0x41e   : > { %v1634_v20 = vpop.permute.xlu1 %1633 }
 0x41f   : > { %1700 = vrot.lane.b32.xlu1 %v3926_v51, %s3764_s20  ;;  %v1639_v35 = vsel %vm611_vm2, %v1634_v20, 0 }
 0x420   : > { %1723 = vrot.lane.b32.xlu0 %v3932_v56, %s3764_s20 }
 0x421   : > { %v4158_v59 = vpop.f32.mrf.mxu1  ;;  %v1655_v40 = vpop.permute.xlu0 %1654 }
 0x426   : > { %v1632_v22 = vpop.permute.xlu1 %1631 }
 0x427   : > { %1748 = vrot.lane.b32.xlu1 %v3936_v61, %s3763_s19 }
 0x428   : > { %1769 = vrot.lane.b32.xlu0 %v3942_v5, %s3764_s20 }
 0x429   : > { %v1020_v60 = vpop.f32.mrf.mxu1 }
 0x42a   : > { %v4164_v62 = vpop.f32.mrf.mxu0 }
 0x42b   : > { %v1066_v63 = vpack.c.bf16 %v4158_v59, %v4164_v62 }
 0x42f   : > { %1771 = vrot.lane.b32.xlu1 %v3942_v5, %s3763_s19 }
 0x431   : > { %v4170_v0 = vpop.f32.mrf.mxu1 }
 0x432   : > { %v999_v1 = vpop.f32.mrf.mxu0  ;;  %v1255_v47 = vsel %vm611_vm2, %v4170_v0, -inf }
 0x435   : > { %1679 = vrot.lane.b32.xlu2 %v3920_v46, %s3763_s19  ;;  %s2851_s19 = scalar_lea.vmem %s5050_s8, %s3898_s30 }
 0x439   : > { %v1112_v2 = vpop.f32.mrf.mxu1 }
 0x43a   : > { %v4174_v3 = vpop.f32.mrf.mxu0 }
 0x43b   : > { %v1252_v17 = vsel %vm611_vm2, %v4174_v3, -inf }
 0x43d   : > { %1746 = vrot.lane.b32.xlu2 %v3936_v61, %s3764_s20  ;;  %s2616_s20 = scalar_lea.vmem %s5047_s5, %s3740_s29 }
 0x441   : > { %v4178_v4 = vpop.f32.mrf.mxu1 }
 0x442   : > { %v1089_v6 = vpop.f32.mrf.mxu0  ;;  %v1267_v11 = vsel %vm611_vm2, %v4178_v4, -inf }
 0x449   : > { %v1204_v9 = vpop.f32.mrf.mxu1 }
 0x44f   : > { %v1308_v10 = vpop.xlane.xlu2 %1307 }
 0x450   : > { %3588 = vrcp.f32 %v1308_v10 }
 0x452   : > { %1268 = vmax.xlane.f32.xlu0 %v1267_v11 }
 0x456   : > { %v3589_v13 = vpop.eup %3588 }
 0x457   : > { %v1334_v14 = vmul.f32 %v3589_v13, %v3581_v23  ;;  %v1475_v15 = vpop.permute.xlu2 %1474 }
 0x458   : > { %v1480_v16 = vsel %vm900_vm3, %v1475_v15, 0 }
 0x459   : > { %v1342_v42 = vpack.c.bf16 %v1334_v14, %v1334_v14  ;;  %1489 = vmatpush.bf16.msrb.mxu2 %v1480_v16  ;;  %1253 = vmax.xlane.f32.xlu1 %v1252_v17 }
 0x45b   : > { %3382 = vmatmul.msk.bf16.vlgmr.msra.gmra.mxu2 %vm611_vm2, %v1342_v42 }
 0x45d   : > { %1625 = vmatpush.bf16.xpose.msra.mxu2 %v1616_v18 }
 0x466   : > { %1256 = vmax.xlane.f32.xlu2 %v1255_v47  ;;  %1369 = vrot.lane.b32.xlu0 %v3946_v7, %s3762_s18 }
 0x46e   : > { %v1311_v23 = vpop.xlane.xlu0 %1310 }
 0x46f   : > { %3590 = vrcp.f32 %v1311_v23 }
 0x471   : > { %v1320_v24 = vpop.xlane.xlu1 %1319 }
 0x472   : > { %3592 = vrcp.f32 %v1320_v24 }
 0x475   : > { %v3591_v25 = vpop.eup %3590 }
 0x476   : > { %v1335_v29 = vmul.f32 %v3591_v25, %v4131_v33 }
 0x478   : > { %v3593_v30 = vpop.eup %3592  ;;  %v1343_v32 = vpack.c.bf16 %v1335_v29, %v1335_v29 }
 0x479   : > { %v1338_v34 = vmul.f32 %v3593_v30, %v4135_v43 }
 0x47a   : > { %3383 = vmatmul.msk.bf16.vlgmr.msra.gmra.mxu3 %vm611_vm2, %v1343_v32 }
 0x47b   : > { %v1346_v39 = vpack.c.bf16 %v1338_v34, %v1338_v34  ;;  %1648 = vmatpush.bf16.xpose.msra.mxu3 %v1639_v35 }
 0x47d   : > { %3386 = vmatmul.msk.bf16.vlgmr.msrb.gmra.mxu2 %vm611_vm2, %v1346_v39 }
 0x47e   : > { %1671 = vmatpush.bf16.xpose.msrb.mxu2 %v1662_v44 }
 0x481   : > { %v1678_v8 = vpop.permute.xlu0 %1677 }
 0x489   : > { %v1703_v48 = vpop.permute.xlu1 %1702 }
 0x48a   : > { %v1708_v45 = vsel %vm611_vm2, %v1703_v48, 0  ;;  %v1726_v9 = vpop.permute.xlu0 %1725 }
 0x48b   : > { %v1731_v10 = vsel %vm611_vm2, %v1726_v9, 0 }
 0x48d   : > { %3396 = vmatmul.msk.bf16.vlgmr.msra.gmra.mxu2 %vm611_vm2, %v1609_v12 }
 0x48e   : > { %1717 = vmatpush.bf16.xpose.msra.mxu2 %v1708_v45 }
 0x490   : > { %v1323_v33 = vpop.xlane.xlu2 %1322 }
 0x491   : > { %3594 = vrcp.f32 %v1323_v33  ;;  %v1701_v43 = vpop.permute.xlu1 %1700 }
 0x492   : > { %v1724_v13 = vpop.permute.xlu0 %1723 }
 0x494   : > { %v4199_v50 = vpop.f32.mrf.mxu0 }
 0x495   : > { %v1264_v52 = vsel %vm611_vm2, %v4199_v50, -inf }
 0x496   : > { %1265 = vmax.xlane.f32.xlu2 %v1264_v52 }
 0x497   : > { %v3595_v53 = vpop.eup %3594 }
 0x498   : > { %v1339_v54 = vmul.f32 %v3595_v53, %v4150_v57  ;;  %v1680_v55 = vpop.permute.xlu2 %1679 }
 0x499   : > { %v1749_v60 = vpop.permute.xlu1 %1748  ;;  %v1685_v1 = vsel %vm611_vm2, %v1680_v55, 0 }
 0x49a   : > { %v1347_v58 = vpack.c.bf16 %v1339_v54, %v1339_v54  ;;  %v1754_v6 = vsel %vm611_vm2, %v1749_v60, 0  ;;  %v1770_v14 = vpop.permute.xlu0 %1769 }
 0x49c   : > { %3387 = vmatmul.msk.bf16.vlgmr.msrb.gmra.mxu3 %vm611_vm2, %v1347_v58  ;;  %v1181_v2 = vpop.f32.mrf.mxu0 }
 0x49d   : > { %1694 = vmatpush.bf16.xpose.msrb.mxu3 %v1685_v1  ;;  %3398 = vmatmul.msk.bf16.vlgmr.msrb.gmra.mxu2 %vm611_vm2, %v1655_v40 }
 0x49e   : > { %1763 = vmatpush.bf16.xpose.msrb.mxu2 %v1754_v6 }
 0x4a0   : > { %v1747_v11 = vpop.permute.xlu2 %1746 }
 0x4a1   : > { %v1772_v57 = vpop.permute.xlu1 %1771 }
 0x4a2   : > { %v1777_v12 = vsel %vm611_vm2, %v1772_v57, 0 }
 0x4ac   : > { %3397 = vmatmul.msk.bf16.vlgmr.msra.gmra.mxu3 %vm611_vm2, %v1632_v22 }
 0x4ad   : > { %1740 = vmatpush.bf16.xpose.msra.mxu3 %v1731_v10  ;;  %3400 = vmatmul.msk.bf16.vlgmr.msra.gmra.mxu2 %vm611_vm2, %v1701_v43 }
 0x4bc   : > { %3399 = vmatmul.msk.bf16.vlgmr.msrb.gmra.mxu3 %vm611_vm2, %v1678_v8 }
 0x4bd   : > { %1786 = vmatpush.bf16.xpose.msrb.mxu3 %v1777_v12  ;;  %3402 = vmatmul.msk.bf16.vlgmr.msrb.gmra.mxu2 %vm611_vm2, %v1747_v11 }
 0x4c5   : > { %v1269_v42 = vpop.xlane.xlu0 %1268 }
 0x4c6   : > { %v1281_v23 = vsub.f32 %v4178_v4, %v1269_v42 }
 0x4c8   : > { %v1294_v25 = vmul.f32 1.442695, %v1281_v23 }
 0x4cc   : > { %3401 = vmatmul.msk.bf16.vlgmr.msra.gmra.mxu3 %vm611_vm2, %v1724_v13  ;;  %v1254_v15 = vpop.xlane.xlu1 %1253 }
 0x4cd   : > { %v1276_v16 = vsub.f32 %v4174_v3, %v1254_v15 }
 0x4cf   : > { %v1284_v17 = vmul.f32 1.442695, %v1276_v16 }
 0x4d1   : > { %3596 = vpow2.f32 %v1284_v17 }
 0x4d7   : > { %v4216_v18 = vpop.eup %3596 }
 0x4d8   : > { %v1370_v19 = vpop.permute.xlu0 %1369  ;;  %v1300_v20 = vsel %vm611_vm2, %v4216_v18, 0.0 }
 0x4d9   : > { %v1375_v47 = vsel %vm900_vm3, %v1370_v19, 0  ;;  %v1257_v40 = vpop.xlane.xlu2 %1256  ;;  %1301 = vadd.xlane.f32.xlu2 %v1300_v20 }
 0x4da   : > { %v1277_v22 = vsub.f32 %v4170_v0, %v1257_v40  ;;  %1384 = vmatpush.bf16.msra.mxu1 %v1375_v47 }
 0x4dc   : > { %v1286_v24 = vmul.f32 1.442695, %v1277_v22  ;;  %3403 = vmatmul.msk.bf16.vlgmr.msrb.gmra.mxu3 %vm611_vm2, %v1770_v14 }
 0x4de   : > { %3598 = vpow2.f32 %v1286_v24  ;;  %v4224_v3 = vpop.f32.mrf.mxu2 }
 0x4df   : > { %3600 = vpow2.f32 %v1294_v25 }
 0x4e4   : > { %v4226_v29 = vpop.eup %3598 }
 0x4e5   : > { %v1303_v30 = vsel %vm611_vm2, %v4226_v29, 0.0  ;;  %v4230_v34 = vpop.eup %3600 }
 0x4e6   : > { %v1409_v32 = vpop.f32.mrf.mxu2  ;;  %1304 = vadd.xlane.f32.xlu1 %v1303_v30  ;;  %v1315_v0 = vsel %vm611_vm2, %v4230_v34, 0.0 }
 0x4ee   : > { %1316 = vadd.xlane.f32.xlu1 %v1315_v0 }
 0x4f1   : > { %1348 = vrot.lane.b32.xlu2 %v3912_v37, %s3762_s18 }
 0x4f9   : > { %1930 = vrot.lane.b32.xlu2 %v3916_v41, %s3765_s21 }
 0x4fd   : > { %v4238_v4 = vpop.f32.mrf.mxu3 }
 0x4fe   : > { %v1517_v35 = vpack.c.bf16 %v4238_v4, %v4224_v3 }
 0x500   : > { %v4242_v39 = vpop.f32.mrf.mxu2 }
 0x505   : > { %v1430_v44 = vpop.f32.mrf.mxu3 }
 0x507   : > { %1453 = vrot.lane.b32.xlu1 %v3932_v56, %s3762_s18 }
 0x508   : > { %v1493_v48 = vpop.f32.mrf.mxu2 }
 0x509   : > { %v1266_v45 = vpop.xlane.xlu2 %1265 }
 0x50a   : > { %v1280_v33 = vsub.f32 %v4199_v50, %v1266_v45 }
 0x50c   : > { %v1292_v43 = vmul.f32 1.442695, %v1280_v33 }
 0x50e   : > { %3602 = vpow2.f32 %v1292_v43 }
 0x50f   : > { %1909 = vrot.lane.b32.xlu1 %v3946_v7, %s3765_s21 }
 0x510   : > { %v4249_v52 = vpop.f32.mrf.mxu2 }
 0x514   : > { %v4251_v53 = vpop.eup %3602 }
 0x515   : > { %v1312_v54 = vsel %vm611_vm2, %v4251_v53, 0.0 }
 0x516   : > { %1313 = vadd.xlane.f32.xlu0 %v1312_v54 }
 0x518   : > { %v1629_v55 = vpop.f32.mrf.mxu2 }
 0x51f   : > { %v4255_v58 = vpop.f32.mrf.mxu3 }
 0x520   : > { %v1519_v60 = vpack.c.bf16 %v4255_v58, %v4242_v39  ;;  %v4259_v50 = vpop.f32.mrf.mxu2 }
 0x521   : > { %v1798_v11 = vsel %vm611_vm2, %v4259_v50, -inf }
 0x527   : > { %v1514_v1 = vpop.f32.mrf.mxu3 }
 0x528   : > { %v1675_v2 = vpop.f32.mrf.mxu2  ;;  %v602_v1 = vld [vmem:[%s4305_s25] sm:$0xf] }
 0x52a   : > { %1432 = vrot.lane.b32.xlu0 %v3926_v51, %s3762_s18 }
 0x52f   : > { %v4263_v6 = vpop.f32.mrf.mxu3 }
 0x530   : > { %v4265_v8 = vpop.f32.mrf.mxu2  ;;  %v1795_v9 = vsel %vm611_vm2, %v4263_v6, -inf }
 0x531   : > { %1796 = vmax.xlane.f32.xlu2 %v1795_v9  ;;  %v1577_v9 = vsel %vm900_vm3, %v602_v1, 0 }
 0x532   : > { %1951 = vrot.lane.b32.xlu0 %v3920_v46, %s3765_s21 }
 0x537   : > { %v1652_v10 = vpop.f32.mrf.mxu3 }
 0x538   : > { %v1721_v57 = vpop.f32.mrf.mxu2 }
 0x539   : > { %1799 = vmax.xlane.f32.xlu1 %v1798_v11 }
 0x53a   : > { %1993 = vrot.lane.b32.xlu0 %v3932_v56, %s3765_s21 }
 0x53f   : > { %v4275_v12 = vpop.f32.mrf.mxu3 }
 0x540   : > { %v4277_v13 = vpop.f32.mrf.mxu2  ;;  %v1801_v14 = vsel %vm611_vm2, %v4275_v12, -inf }
 0x541   : > { %1802 = vmax.xlane.f32.xlu2 %v1801_v14  ;;  %v1810_v15 = vsel %vm611_vm2, %v4277_v13, -inf }
 0x542   : > { %2014 = vrot.lane.b32.xlu0 %v3936_v61, %s3765_s21  ;;  %1811 = vmax.xlane.f32.xlu1 %v1810_v15 }
 0x547   : > { %v1698_v16 = vpop.f32.mrf.mxu3 }
 0x548   : > { %v1767_v17 = vpop.f32.mrf.mxu2 }
 0x54c   : > { %v1302_v42 = vpop.xlane.xlu2 %1301 }
 0x54d   : > { %3604 = vrcp.f32 %v1302_v42 }
 0x54f   : > { %v4285_v19 = vpop.f32.mrf.mxu3 }
 0x550   : > { %v1807_v43 = vsel %vm611_vm2, %v4285_v19, -inf }
 0x553   : > { %v3605_v20 = vpop.eup %3604 }
 0x554   : > { %v1332_v47 = vmul.f32 %v3605_v20, %v4216_v18  ;;  %v1349_v40 = vpop.permute.xlu2 %1348 }
 0x555   : > { %v1354_v22 = vsel %vm900_vm3, %v1349_v40, 0 }
 0x556   : > { %v1340_v23 = vpack.c.bf16 %v1332_v47, %v1332_v47  ;;  %1363 = vmatpush.bf16.msra.mxu0 %v1354_v22 }
 0x557   : > { %v1744_v24 = vpop.f32.mrf.mxu3 }
 0x559   : > { %v1305_v25 = vpop.xlane.xlu1 %1304  ;;  %3380 = vmatmul.msk.bf16.vlgmr.msra.gmra.mxu0 %vm611_vm2, %v1340_v23 }
 0x55a   : > { %3606 = vrcp.f32 %v1305_v25 }
 0x55b   : > { %2137 = vrot.lane.b32.xlu1 %v3946_v7, %s3766_s22 }
 0x55c   : > { %v1931_v30 = vpop.permute.xlu2 %1930 }
 0x55d   : > { %v1936_v32 = vsel %vm900_vm3, %v1931_v30, 0 }
 0x55e   : > { %1945 = vmatpush.bf16.msra.mxu2 %v1936_v32 }
 0x55f   : > { %v4293_v18 = vpop.f32.mrf.mxu3 }
 0x560   : > { %v3607_v0 = vpop.eup %3606  ;;  %v1813_v44 = vsel %vm611_vm2, %v4293_v18, -inf }
 0x561   : > { %v1333_v48 = vmul.f32 %v3607_v0, %v4226_v29  ;;  %1814 = vmax.xlane.f32.xlu2 %v1813_v44  ;;  %v1317_v54 = vpop.xlane.xlu1 %1316 }
 0x562   : > { %3608 = vrcp.f32 %v1317_v54  ;;  %v603_v54 = vld [vmem:[%s4305_s25 + $0x4] sm:$0xf] }
 0x563   : > { %v1341_v45 = vpack.c.bf16 %v1333_v48, %v1333_v48 }
 0x565   : > { %3381 = vmatmul.msk.bf16.vlgmr.msra.gmra.mxu1 %vm611_vm2, %v1341_v45 }
 0x567   : > { %v1790_v33 = vpop.f32.mrf.mxu3 }
 0x568   : > { %v3609_v55 = vpop.eup %3608 }
 0x569   : > { %v1337_v29 = vmul.f32 %v3609_v55, %v4230_v34  ;;  %v1064_v34 = vpack.c.bf16 %v4140_v49, %v4055_v21  ;;  %v1533_v55 = vsel %vm900_vm3, %v603_v54, 0 }
 0x56b   : > { %v1345_v57 = vpack.c.bf16 %v1337_v29, %v1337_v29 }
 0x56c   : > { %1808 = vmax.xlane.f32.xlu0 %v1807_v43 }
 0x579   : > { %2035 = vrot.lane.b32.xlu2 %v3942_v5, %s3765_s21  ;;  %v1454_v2 = vpop.permute.xlu1 %1453 }
 0x57a   : > { %v1459_v10 = vsel %vm900_vm3, %v1454_v2, 0 }
 0x57b   : > { %1468 = vmatpush.bf16.msrb.mxu1 %v1459_v10 }
 0x57e   : > { %3385 = vmatmul.msk.bf16.vlgmr.msrb.gmra.mxu1 %vm611_vm2, %v1345_v57 }
 0x57f   : > { %1586 = vmatpush.bf16.msra.mxu1 %v1577_v9 }
 0x580   : > { %2114 = vrot.lane.b32.xlu0 %v3912_v37, %s3766_s22 }
 0x581   : > { %v1910_v11 = vpop.permute.xlu1 %1909 }
 0x582   : > { %v1915_v14 = vsel %vm900_vm3, %v1910_v11, 0 }
 0x583   : > { %1924 = vmatpush.bf16.msrb.mxu1 %v1915_v14 }
 0x588   : > { %2112 = vrot.lane.b32.xlu0 %v3912_v37, %s3767_s26 }
 0x589   : > { %v1314_v15 = vpop.xlane.xlu0 %1313 }
 0x58a   : > { %3610 = vrcp.f32 %v1314_v15 }
 0x58e   : > { %3392 = vmatmul.msk.bf16.vlgmr.msra.gmra.mxu1 %vm611_vm2, %v1064_v34 }
 0x590   : > { %2135 = vrot.lane.b32.xlu0 %v3946_v7, %s3767_s26  ;;  %v3611_v16 = vpop.eup %3610 }
 0x591   : > { %v1336_v17 = vmul.f32 %v3611_v16, %v4251_v53 }
 0x593   : > { %v1344_v21 = vpack.c.bf16 %v1336_v17, %v1336_v17 }
 0x59c   : > { %v1433_v42 = vpop.permute.xlu0 %1432 }
 0x59d   : > { %v1438_v20 = vsel %vm900_vm3, %v1433_v42, 0  ;;  %v1792_v42 = vsel %vm611_vm2, %v4249_v52, -inf }
 0x59e   : > { %3393 = vmatmul.msk.bf16.gmra.mxu1 %vm611_vm2, %v1065_v28  ;;  %1447 = vmatpush.bf16.msrb.mxu0 %v1438_v20 }
 0x5a1   : > { %3384 = vmatmul.msk.bf16.vlgmr.msrb.gmra.mxu0 %vm611_vm2, %v1344_v21 }
 0x5a2   : > { %1542 = vmatpush.bf16.msra.mxu0 %v1533_v55 }
 0x5a4   : > { %v1797_v49 = vpop.xlane.xlu2 %1796  ;;  %v1952_v47 = vpop.permute.xlu0 %1951 }
 0x5a5   : > { %v1817_v40 = vsub.f32 %v4263_v6, %v1797_v49  ;;  %v1957_v22 = vsel %vm900_vm3, %v1952_v47, 0 }
 0x5a6   : > { %1966 = vmatpush.bf16.msra.mxu3 %v1957_v22 }
 0x5a7   : > { %v1826_v53 = vmul.f32 1.442695, %v1817_v40 }
 0x5a9   : > { %3612 = vpow2.f32 %v1826_v53 }
 0x5ac   : > { %v1800_v23 = vpop.xlane.xlu1 %1799  ;;  %v1994_v24 = vpop.permute.xlu0 %1993 }
 0x5ad   : > { %v1818_v25 = vsub.f32 %v4259_v50, %v1800_v23  ;;  %v1999_v26 = vsel %vm900_vm3, %v1994_v24, 0 }
 0x5ae   : > { %3394 = vmatmul.msk.bf16.gmra.mxu1 %vm611_vm2, %v1066_v63 }
 0x5af   : > { %v4339_v27 = vpop.eup %3612  ;;  %v1828_v28 = vmul.f32 1.442695, %v1818_v25  ;;  %2008 = vmatpush.bf16.msra.mxu1 %v1999_v26 }
 0x5b0   : > { %v1843_v6 = vsel %vm611_vm2, %v4339_v27, 0.0 }
 0x5b1   : > { %3614 = vpow2.f32 %v1828_v28  ;;  %1844 = vadd.xlane.f32.xlu1 %v1843_v6 }
 0x5b4   : > { %v1803_v30 = vpop.xlane.xlu2 %1802  ;;  %v2015_v32 = vpop.permute.xlu0 %2014 }
 0x5b5   : > { %v1819_v50 = vsub.f32 %v4275_v12, %v1803_v30  ;;  %v2020_v0 = vsel %vm900_vm3, %v2015_v32, 0  ;;  %v1812_v44 = vpop.xlane.xlu1 %1811 }
 0x5b6   : > { %v1822_v59 = vsub.f32 %v4277_v13, %v1812_v44  ;;  %2029 = vmatpush.bf16.msrb.mxu2 %v2020_v0 }
 0x5b7   : > { %v4346_v62 = vpop.eup %3614  ;;  %v1830_v63 = vmul.f32 1.442695, %v1819_v50 }
 0x5b8   : > { %v1836_v48 = vmul.f32 1.442695, %v1822_v59  ;;  %v1846_v45 = vsel %vm611_vm2, %v4346_v62, 0.0 }
 0x5b9   : > { %3616 = vpow2.f32 %v1830_v63  ;;  %1847 = vadd.xlane.f32.xlu2 %v1846_v45  ;;  %v1804_v63 = vsel %vm611_vm2, %v4265_v8, -inf }
 0x5ba   : > { %3618 = vpow2.f32 %v1836_v48 }
 0x5be   : > { %3395 = vmatmul.msk.bf16.gmra.mxu1 %vm611_vm2, %v1067_v38 }
 0x5bf   : > { %v4354_v12 = vpop.eup %3616 }
 0x5c0   : > { %v4356_v33 = vpop.eup %3618  ;;  %v1849_v13 = vsel %vm611_vm2, %v4354_v12, 0.0 }
 0x5c1   : > { %1850 = vadd.xlane.f32.xlu1 %v1849_v13  ;;  %v1858_v43 = vsel %vm611_vm2, %v4356_v33, 0.0 }
 0x5c2   : > { %1859 = vadd.xlane.f32.xlu2 %v1858_v43 }
 0x5cd   : > { %v2138_v4 = vpop.permute.xlu1 %2137 }
 0x5ce   : > { %v2143_v32 = vsel %vm611_vm2, %v2138_v4, 0 }
 0x5d4   : > { %v1815_v1 = vpop.xlane.xlu2 %1814 }
 0x5d6   : > { %v1365_v31 = vpop.f32.mrf.mxu0 }
 0x5da   : > { %2158 = vrot.lane.b32.xlu1 %v3916_v41, %s3767_s26  ;;  %2160 = vrot.lane.b32.xlu2 %v3916_v41, %s3766_s22 }
 0x5dc   : > { %v2036_v36 = vpop.permute.xlu2 %2035 }
 0x5dd   : > { %v2041_v38 = vsel %vm900_vm3, %v2036_v36, 0 }
 0x5de   : > { %2050 = vmatpush.bf16.msrb.mxu3 %v2041_v38  ;;  %v1367_v29 = vpop.f32.mrf.mxu0 }
 0x5df   : > { %v1809_v2 = vpop.xlane.xlu0 %1808 }
 0x5e0   : > { %v1821_v9 = vsub.f32 %v4285_v19, %v1809_v2  ;;  %v1823_v19 = vsub.f32 %v4293_v18, %v1815_v1 }
 0x5e2   : > { %v1834_v10 = vmul.f32 1.442695, %v1821_v9  ;;  %2206 = vrot.lane.b32.xlu1 %v3926_v51, %s3766_s22  ;;  %v1386_v57 = vpop.f32.mrf.mxu1  ;;  %v1838_v17 = vmul.f32 1.442695, %v1823_v19 }
 0x5e3   : > { %v1516_v11 = vpack.c.bf16 %v1386_v57, %v1365_v31 }
 0x5e4   : > { %3620 = vpow2.f32 %v1834_v10 }
 0x5e5   : > { %3388 = vmatmul.msk.bf16.vlgmr.msra.gmra.mxu0 %vm611_vm2, %v1516_v11  ;;  %3622 = vpow2.f32 %v1838_v17 }
 0x5ea   : > { %v4373_v14 = vpop.eup %3620  ;;  %v1388_v34 = vpop.f32.mrf.mxu1 }
 0x5eb   : > { %v1855_v15 = vsel %vm611_vm2, %v4373_v14, 0.0  ;;  %v4386_v21 = vpop.eup %3622 }
 0x5ec   : > { %1856 = vadd.xlane.f32.xlu0 %v1855_v15  ;;  %v1861_v3 = vsel %vm611_vm2, %v4386_v21, 0.0 }
 0x5f2   : > { %v2115_v23 = vpop.permute.xlu0 %2114 }
 0x5f3   : > { %v2120_v25 = vsel %vm611_vm2, %v2115_v23, 0 }
 0x5f5   : > { %3389 = vmatmul.msk.bf16.gmra.mxu0 %vm611_vm2, %v1517_v35 }
 0x5fa   : > { %v2113_v45 = vpop.permute.xlu0 %2112 }
 0x5fb   : > { %v1470_v16 = vpop.f32.mrf.mxu1 }
 0x600   : > { %2183 = vrot.lane.b32.xlu0 %v3920_v46, %s3766_s22 }
 0x603   : > { %v1472_v20 = vpop.f32.mrf.mxu1  ;;  %1793 = vmax.xlane.f32.xlu2 %v1792_v42 }
 0x608   : > { %2181 = vrot.lane.b32.xlu0 %v3920_v46, %s3767_s26 }
 0x60b   : > { %v4432_v43 = vpop.f32.mrf.mxu1 }
 0x60c   : > { %1862 = vadd.xlane.f32.xlu1 %v1861_v3 }
 0x610   : > { %2229 = vrot.lane.b32.xlu0 %v3932_v56, %s3766_s22 }
 0x613   : > { %v4435_v31 = vpop.f32.mrf.mxu1 }
 0x618   : > { %2227 = vrot.lane.b32.xlu0 %v3932_v56, %s3767_s26 }
 0x61b   : > { %v4438_v29 = vpop.f32.mrf.mxu1 }
 0x61e   : > { %v1449_v35 = vpop.f32.mrf.mxu0 }
 0x61f   : > { %v1518_v18 = vpack.c.bf16 %v1470_v16, %v1449_v35 }
 0x620   : > { %2252 = vrot.lane.b32.xlu0 %v3936_v61, %s3766_s22 }
 0x621   : > { %3390 = vmatmul.msk.bf16.gmra.mxu0 %vm611_vm2, %v1518_v18 }
 0x623   : > { %v4443_v11 = vpop.f32.mrf.mxu1 }
 0x624   : > { %v1845_v49 = vpop.xlane.xlu1 %1844 }
 0x625   : > { %3624 = vrcp.f32 %v1845_v49  ;;  %2204 = vrot.lane.b32.xlu1 %v3926_v51, %s3767_s26 }
 0x626   : > { %v1451_v47 = vpop.f32.mrf.mxu0 }
 0x62b   : > { %v3625_v40 = vpop.eup %3624  ;;  %v4449_v17 = vpop.f32.mrf.mxu1 }
 0x62c   : > { %v1873_v22 = vmul.f32 %v3625_v40, %v4339_v27  ;;  %v1848_v53 = vpop.xlane.xlu2 %1847 }
 0x62d   : > { %3626 = vrcp.f32 %v1848_v53  ;;  %2275 = vrot.lane.b32.xlu1 %v3942_v5, %s3766_s22 }
 0x62e   : > { %v1881_v24 = vpack.c.bf16 %v1873_v22, %v1873_v22 }
 0x630   : > { %3405 = vmatmul.msk.bf16.vlgmr.msrb.gmra.mxu1 %vm611_vm2, %v1881_v24 }
 0x631   : > { %2129 = vmatpush.bf16.xpose.msrb.mxu1 %v2120_v25  ;;  %3391 = vmatmul.msk.bf16.gmra.mxu0 %vm611_vm2, %v1519_v60 }
 0x633   : > { %v3627_v26 = vpop.eup %3626  ;;  %v4455_v4 = vpop.f32.mrf.mxu1 }
 0x634   : > { %v1874_v27 = vmul.f32 %v3627_v26, %v4346_v62  ;;  %v1851_v28 = vpop.xlane.xlu1 %1850 }
 0x635   : > { %3628 = vrcp.f32 %v1851_v28  ;;  %2273 = vrot.lane.b32.xlu1 %v3942_v5, %s3767_s26  ;;  %v1860_v6 = vpop.xlane.xlu2 %1859 }
 0x636   : > { %v1882_v30 = vpack.c.bf16 %v1874_v27, %v1874_v27  ;;  %3630 = vrcp.f32 %v1860_v6 }
 0x638   : > { %3406 = vmatmul.msk.bf16.vlgmr.msra.gmra.mxu2 %vm611_vm2, %v1882_v30 }
 0x639   : > { %2152 = vmatpush.bf16.xpose.msra.mxu2 %v2143_v32 }
 0x63b   : > { %v3629_v50 = vpop.eup %3628  ;;  %v4459_v47 = vpop.f32.mrf.mxu1 }
 0x63c   : > { %v1875_v39 = vmul.f32 %v3629_v50, %v4354_v12  ;;  %v3631_v44 = vpop.eup %3630 }
 0x63d   : > { %2250 = vrot.lane.b32.xlu1 %v3936_v61, %s3767_s26  ;;  %v2161_v58 = vpop.permute.xlu2 %2160  ;;  %v1878_v59 = vmul.f32 %v3631_v44, %v4356_v33  ;;  %v2136_v33 = vpop.permute.xlu0 %2135  ;;  %s2639_s26 = scalar_lea.vmem %s5049_s7, %s3740_s29 }
 0x63e   : > { %v1883_v60 = vpack.c.bf16 %v1875_v39, %v1875_v39  ;;  %v2166_v0 = vsel %vm611_vm2, %v2161_v58, 0 }
 0x63f   : > { %v1886_v62 = vpack.c.bf16 %v1878_v59, %v1878_v59 }
 0x640   : > { %3407 = vmatmul.msk.bf16.vlgmr.msra.gmra.mxu3 %vm611_vm2, %v1883_v60 }
 0x641   : > { %2175 = vmatpush.bf16.xpose.msra.mxu3 %v2166_v0 }
 0x643   : > { %v4463_v22 = vpop.f32.mrf.mxu1 }
 0x645   : > { %1888 = vrot.lane.b32.xlu1 %v3912_v37, %s3765_s21 }
 0x648   : > { %3410 = vmatmul.msk.bf16.vlgmr.msrb.gmra.mxu2 %vm611_vm2, %v1886_v62 }
 0x64a   : > { %1805 = vmax.xlane.f32.xlu0 %v1804_v63 }
 0x64c   : > { %v2159_v48 = vpop.permute.xlu1 %2158 }
 0x64d   : > { %1972 = vrot.lane.b32.xlu1 %v3926_v51, %s3765_s21 }
 0x654   : > { %v2207_v12 = vpop.permute.xlu1 %2206 }
 0x655   : > { %v2212_v13 = vsel %vm611_vm2, %v2207_v12, 0 }
 0x656   : > { %2221 = vmatpush.bf16.xpose.msrb.mxu2 %v2212_v13 }
 0x658   : > { %3417 = vmatmul.msk.bf16.vlgmr.msra.gmra.mxu2 %vm611_vm2, %v2136_v33 }
 0x65e   : > { %2392 = vrot.lane.b32.xlu0 %v3912_v37, %s3768_s27 }
 0x65f   : > { %v1857_v54 = vpop.xlane.xlu0 %1856 }
 0x660   : > { %3632 = vrcp.f32 %v1857_v54 }
 0x666   : > { %v3633_v55 = vpop.eup %3632 }
 0x667   : > { %v1877_v1 = vmul.f32 %v3633_v55, %v4373_v14 }
 0x669   : > { %v1885_v36 = vpack.c.bf16 %v1877_v1, %v1877_v1 }
 0x66b   : > { %3409 = vmatmul.msk.bf16.vlgmr.msra.gmra.mxu1 %vm611_vm2, %v1885_v36 }
 0x672   : > { %v2184_v38 = vpop.permute.xlu0 %2183 }
 0x673   : > { %v2189_v2 = vsel %vm611_vm2, %v2184_v38, 0 }
 0x674   : > { %2198 = vmatpush.bf16.xpose.msra.mxu1 %v2189_v2 }
 0x676   : > { %v1794_v9 = vpop.xlane.xlu2 %1793 }
 0x677   : > { %v1816_v37 = vsub.f32 %v4249_v52, %v1794_v9 }
 0x679   : > { %v1824_v10 = vmul.f32 1.442695, %v1816_v37 }
 0x67a   : > { %v2182_v57 = vpop.permute.xlu0 %2181 }
 0x67b   : > { %3634 = vpow2.f32 %v1824_v10  ;;  %3416 = vmatmul.msk.bf16.vlgmr.msrb.gmra.mxu1 %vm611_vm2, %v2113_v45 }
 0x67f   : > { %v1863_v14 = vpop.xlane.xlu1 %1862 }
 0x680   : > { %3636 = vrcp.f32 %v1863_v14 }
 0x681   : > { %v4445_v34 = vpop.eup %3634 }
 0x682   : > { %v2230_v15 = vpop.permute.xlu0 %2229  ;;  %v1840_v19 = vsel %vm611_vm2, %v4445_v34, 0.0 }
 0x683   : > { %1841 = vadd.xlane.f32.xlu2 %v1840_v19  ;;  %v2235_v3 = vsel %vm611_vm2, %v2230_v15, 0 }
 0x686   : > { %v3637_v16 = vpop.eup %3636 }
 0x687   : > { %v1879_v52 = vmul.f32 %v3637_v16, %v4386_v21 }
 0x689   : > { %v1887_v42 = vpack.c.bf16 %v1879_v52, %v1879_v52 }
 0x68a   : > { %v2228_v20 = vpop.permute.xlu0 %2227 }
 0x68b   : > { %3411 = vmatmul.msk.bf16.vlgmr.msrb.gmra.mxu3 %vm611_vm2, %v1887_v42  ;;  %3419 = vmatmul.msk.bf16.vlgmr.msra.gmra.mxu1 %vm611_vm2, %v2182_v57 }
 0x68c   : > { %2244 = vmatpush.bf16.xpose.msrb.mxu3 %v2235_v3 }
 0x692   : > { %v2253_v35 = vpop.permute.xlu0 %2252 }
 0x693   : > { %v2258_v18 = vsel %vm611_vm2, %v2253_v35, 0 }
 0x694   : > { %2267 = vmatpush.bf16.xpose.msrb.mxu1 %v2258_v18 }
 0x697   : > { %v2205_v49 = vpop.permute.xlu1 %2204 }
 0x698   : > { %3420 = vmatmul.msk.bf16.vlgmr.msrb.gmra.mxu2 %vm611_vm2, %v2205_v49 }
 0x69b   : > { %3418 = vmatmul.msk.bf16.vlgmr.msra.gmra.mxu3 %vm611_vm2, %v2159_v48 }
 0x69f   : > { %v2276_v21 = vpop.permute.xlu1 %2275 }
 0x6a0   : > { %v2281_v40 = vsel %vm611_vm2, %v2276_v21, 0 }
 0x6a1   : > { %2290 = vmatpush.bf16.xpose.msra.mxu2 %v2281_v40 }
 0x6a7   : > { %v2274_v53 = vpop.permute.xlu1 %2273 }
 0x6a8   : > { %3423 = vmatmul.msk.bf16.vlgmr.msra.gmra.mxu2 %vm611_vm2, %v2274_v53  ;;  %v4522_v53 = vpop.f32.mrf.mxu0 }
 0x6ab   : > { %3421 = vmatmul.msk.bf16.vlgmr.msrb.gmra.mxu3 %vm611_vm2, %v2228_v20 }
 0x6ad   : > { %v4467_v23 = vpop.f32.mrf.mxu1 }
 0x6af   : > { %v2251_v24 = vpop.permute.xlu1 %2250 }
 0x6b0   : > { %3422 = vmatmul.msk.bf16.vlgmr.msrb.gmra.mxu1 %vm611_vm2, %v2251_v24 }
 0x6b5   : > { %v1928_v25 = vpop.f32.mrf.mxu1 }
 0x6b7   : > { %v1889_v26 = vpop.permute.xlu1 %1888 }
 0x6b8   : > { %v1894_v27 = vsel %vm900_vm3, %v1889_v26, 0 }
 0x6b9   : > { %1903 = vmatpush.bf16.msrb.mxu0 %v1894_v27 }
 0x6bb   : > { %v4471_v28 = vpop.f32.mrf.mxu2 }
 0x6bd   : > { %v1806_v6 = vpop.xlane.xlu0 %1805 }
 0x6be   : > { %v1820_v30 = vsub.f32 %v4265_v8, %v1806_v6  ;;  %v4526_v6 = vpop.f32.mrf.mxu0 }
 0x6bf   : > { %v1973_v32 = vpop.permute.xlu1 %1972 }
 0x6c0   : > { %v1832_v50 = vmul.f32 1.442695, %v1820_v30  ;;  %v1978_v39 = vsel %vm900_vm3, %v1973_v32, 0 }
 0x6c1   : > { %1987 = vmatpush.bf16.msra.mxu0 %v1978_v39 }
 0x6c2   : > { %3638 = vpow2.f32 %v1832_v50 }
 0x6c3   : > { %v1949_v58 = vpop.f32.mrf.mxu2  ;;  %v4475_v60 = vpop.f32.mrf.mxu3 }
 0x6c4   : > { %v2057_v0 = vpack.c.bf16 %v4475_v60, %v4471_v28 }
 0x6c6   : > { %v4528_v39 = vpop.f32.mrf.mxu0 }
 0x6c8   : > { %v3639_v44 = vpop.eup %3638 }
 0x6c9   : > { %v1852_v59 = vsel %vm611_vm2, %v3639_v44, 0.0 }
 0x6ca   : > { %1853 = vadd.xlane.f32.xlu2 %v1852_v59 }
 0x6cb   : > { %v1970_v62 = vpop.f32.mrf.mxu3  ;;  %v4480_v63 = vpop.f32.mrf.mxu2 }
 0x6cc   : > { %v604_v62 = vld [vmem:[%s4305_s25 + $0x8] sm:$0xf] }
 0x6d0   : > { %v2393_v8 = vpop.permute.xlu0 %2392 }
 0x6d1   : > { %v2398_v48 = vsel %vm900_vm3, %v2393_v8, 0  ;;  %v4532_v8 = vpop.f32.mrf.mxu0 }
 0x6d2   : > { %2407 = vmatpush.bf16.msra.mxu3 %v2398_v48 }
 0x6d3   : > { %v2033_v45 = vpop.f32.mrf.mxu2 }
 0x6d4   : > { %v2073_v45 = vsel %vm900_vm3, %v604_v62, 0 }
 0x6db   : > { %v2154_v12 = vpop.f32.mrf.mxu2 }
 0x6dc   : > { %v2299_v13 = vsel %vm611_vm2, %v2154_v12, -inf }
 0x6dd   : > { %2300 = vmax.xlane.f32.xlu1 %v2299_v13 }
 0x6e3   : > { %v2156_v33 = vpop.f32.mrf.mxu2 }
 0x6e4   : > { %v4535_v33 = vpop.f32.mrf.mxu0 }
 0x6e8   : > { %v4484_v54 = vpop.f32.mrf.mxu1 }
 0x6f0   : > { %v2012_v55 = vpop.f32.mrf.mxu1 }
 0x6f6   : > { %2455 = vrot.lane.b32.xlu1 %v3920_v46, %s3768_s27  ;;  %v1842_v1 = vpop.xlane.xlu2 %1841 }
 0x6f7   : > { %3640 = vrcp.f32 %v1842_v1  ;;  %v4541_v1 = vpop.f32.mrf.mxu0 }
 0x6f8   : > { %v4488_v36 = vpop.f32.mrf.mxu1 }
 0x6f9   : > { %v2296_v38 = vsel %vm611_vm2, %v4488_v36, -inf }
 0x6fa   : > { %2297 = vmax.xlane.f32.xlu2 %v2296_v38 }
 0x6fd   : > { %v3641_v2 = vpop.eup %3640 }
 0x6fe   : > { %v1872_v9 = vmul.f32 %v3641_v2, %v4445_v34  ;;  %2476 = vrot.lane.b32.xlu1 %v3926_v51, %s3768_s27 }
 0x700   : > { %v1880_v37 = vpack.c.bf16 %v1872_v9, %v1872_v9  ;;  %v2133_v10 = vpop.f32.mrf.mxu1 }
 0x702   : > { %3404 = vmatmul.msk.bf16.vlgmr.msrb.gmra.mxu0 %vm611_vm2, %v1880_v37 }
 0x703   : > { %2082 = vmatpush.bf16.msrb.mxu0 %v2073_v45 }
 0x708   : > { %v4496_v57 = vpop.f32.mrf.mxu1 }
 0x709   : > { %v2305_v46 = vsel %vm611_vm2, %v4496_v57, -inf }
 0x70a   : > { %2306 = vmax.xlane.f32.xlu2 %v2305_v46 }
 0x70e   : > { %v4500_v14 = vpop.f32.mrf.mxu3 }
 0x70f   : > { %v2059_v15 = vpack.c.bf16 %v4500_v14, %v4480_v63  ;;  %v1589_v14 = vadd.f32 %v4432_v43, %v4522_v53 }
 0x710   : > { %v2202_v19 = vpop.f32.mrf.mxu1 }
 0x716   : > { %v2054_v34 = vpop.f32.mrf.mxu3 }
 0x71b   : > { %v4504_v16 = vpop.f32.mrf.mxu2 }
 0x71c   : > { %v2308_v51 = vsel %vm611_vm2, %v4504_v16, -inf }
 0x71d   : > { %2309 = vmax.xlane.f32.xlu0 %v2308_v51 }
 0x71e   : > { %v4508_v52 = vpop.f32.mrf.mxu3 }
 0x71f   : > { %v2302_v42 = vsel %vm611_vm2, %v4508_v52, -inf }
 0x720   : > { %2303 = vmax.xlane.f32.xlu2 %v2302_v42 }
 0x723   : > { %v2225_v20 = vpop.f32.mrf.mxu2 }
 0x726   : > { %v2179_v3 = vpop.f32.mrf.mxu3 }
 0x72b   : > { %v4512_v35 = vpop.f32.mrf.mxu2 }
 0x72c   : > { %v2317_v27 = vsel %vm611_vm2, %v4512_v35, -inf }
 0x72d   : > { %v4514_v18 = vpop.f32.mrf.mxu1 }
 0x72e   : > { %v4516_v49 = vpop.f32.mrf.mxu3  ;;  %v2314_v21 = vsel %vm611_vm2, %v4514_v18, -inf }
 0x72f   : > { %2315 = vmax.xlane.f32.xlu0 %v2314_v21  ;;  %v2311_v40 = vsel %vm611_vm2, %v4516_v49, -inf }
 0x730   : > { %2312 = vmax.xlane.f32.xlu2 %v2311_v40 }
 0x733   : > { %v2294_v24 = vpop.f32.mrf.mxu2 }
 0x735   : > { %v2271_v25 = vpop.f32.mrf.mxu1 }
 0x736   : > { %v2248_v26 = vpop.f32.mrf.mxu3 }
 0x738   : > { %2318 = vmax.xlane.f32.xlu2 %v2317_v27 }
 0x73d   : > { %v1854_v30 = vpop.xlane.xlu2 %1853 }
 0x73e   : > { %3642 = vrcp.f32 %v1854_v30 }
 0x744   : > { %v3643_v32 = vpop.eup %3642 }
 0x745   : > { %v1876_v50 = vmul.f32 %v3643_v32, %v3639_v44 }
 0x747   : > { %v1884_v58 = vpack.c.bf16 %v1876_v50, %v1876_v50 }
 0x749   : > { %3408 = vmatmul.msk.bf16.vlgmr.msra.gmra.mxu0 %vm611_vm2, %v1884_v58 }
 0x750   : > { %v2301_v59 = vpop.xlane.xlu1 %2300 }
 0x751   : > { %v2321_v48 = vsub.f32 %v2154_v12, %v2301_v59  ;;  %v4544_v12 = vpop.f32.mrf.mxu0 }
 0x753   : > { %v2330_v13 = vmul.f32 1.442695, %v2321_v48 }
 0x755   : > { %3644 = vpow2.f32 %v2330_v13 }
 0x759   : > { %v4550_v34 = vpop.f32.mrf.mxu0 }
 0x75b   : > { %v4537_v55 = vpop.eup %3644 }
 0x75c   : > { %v2347_v44 = vsel %vm611_vm2, %v4537_v55, 0.0 }
 0x75d   : > { %2348 = vadd.xlane.f32.xlu2 %v2347_v44 }
 0x768   : > { %v2456_v38 = vpop.permute.xlu1 %2455 }
 0x769   : > { %v2461_v2 = vsel %vm900_vm3, %v2456_v38, 0 }
 0x76a   : > { %2470 = vmatpush.bf16.msrb.mxu3 %v2461_v2 }
 0x76d   : > { %v2298_v9 = vpop.xlane.xlu2 %2297 }
 0x76e   : > { %v2320_v37 = vsub.f32 %v4488_v36, %v2298_v9 }
 0x770   : > { %v2328_v10 = vmul.f32 1.442695, %v2320_v37  ;;  %v2477_v46 = vpop.permute.xlu1 %2476 }
 0x771   : > { %v2482_v19 = vsel %vm900_vm3, %v2477_v46, 0 }
 0x772   : > { %3646 = vpow2.f32 %v2328_v10  ;;  %2491 = vmatpush.bf16.msra.mxu0 %v2482_v19 }
 0x775   : > { %2413 = vrot.lane.b32.xlu2 %v3946_v7, %s3768_s27 }
 0x778   : > { %v4552_v51 = vpop.eup %3646 }
 0x779   : > { %v2344_v42 = vsel %vm611_vm2, %v4552_v51, 0.0 }
 0x77a   : > { %2345 = vadd.xlane.f32.xlu0 %v2344_v42 }
 0x77d   : > { %v2307_v20 = vpop.xlane.xlu2 %2306 }
 0x77e   : > { %v2323_v36 = vsub.f32 %v4496_v57, %v2307_v20 }
 0x77f   : > { %v1905_v3 = vpop.f32.mrf.mxu0 }
 0x780   : > { %v2334_v21 = vmul.f32 1.442695, %v2323_v36  ;;  %v2056_v40 = vpack.c.bf16 %v4467_v23, %v1905_v3 }
 0x782   : > { %3648 = vpow2.f32 %v2334_v21  ;;  %3412 = vmatmul.msk.bf16.vlgmr.msrb.gmra.mxu0 %vm611_vm2, %v2056_v40 }
 0x787   : > { %v1907_v24 = vpop.f32.mrf.mxu0 }
 0x788   : > { %v4559_v7 = vpop.eup %3648 }
 0x789   : > { %v2353_v25 = vsel %vm611_vm2, %v4559_v7, 0.0 }
 0x78a   : > { %2354 = vadd.xlane.f32.xlu1 %v2353_v25 }
 0x78e   : > { %2434 = vrot.lane.b32.xlu0 %v3916_v41, %s3768_s27 }
 0x790   : > { %v2310_v32 = vpop.xlane.xlu0 %2309 }
 0x791   : > { %v2324_v58 = vsub.f32 %v4504_v16, %v2310_v32 }
 0x792   : > { %3413 = vmatmul.msk.bf16.gmra.mxu0 %vm611_vm2, %v2057_v0 }
 0x793   : > { %v2304_v57 = vpop.xlane.xlu2 %2303  ;;  %v2336_v60 = vmul.f32 1.442695, %v2324_v58 }
 0x794   : > { %v2322_v23 = vsub.f32 %v4508_v52, %v2304_v57 }
 0x796   : > { %v2332_v26 = vmul.f32 1.442695, %v2322_v23  ;;  %v1594_v23 = vadd.f32 %v4438_v29, %v4528_v39 }
 0x798   : > { %3650 = vpow2.f32 %v2332_v26 }
 0x79e   : > { %v4570_v27 = vpop.eup %3650 }
 0x79f   : > { %v2350_v30 = vsel %vm611_vm2, %v4570_v27, 0.0 }
 0x7a0   : > { %2351 = vadd.xlane.f32.xlu1 %v2350_v30 }
 0x7a2   : > { %v2316_v38 = vpop.xlane.xlu0 %2315 }
 0x7a3   : > { %v2313_v50 = vpop.xlane.xlu2 %2312  ;;  %v2326_v37 = vsub.f32 %v4514_v18, %v2316_v38 }
 0x7a4   : > { %v2325_v41 = vsub.f32 %v4516_v49, %v2313_v50 }
 0x7a6   : > { %v2338_v28 = vmul.f32 1.442695, %v2325_v41 }
 0x7a8   : > { %3652 = vpow2.f32 %v2338_v28 }
 0x7a9   : > { %3654 = vpow2.f32 %v2336_v60 }
 0x7ab   : > { %v2319_v0 = vpop.xlane.xlu2 %2318 }
 0x7ac   : > { %v2327_v52 = vsub.f32 %v4512_v35, %v2319_v0 }
 0x7ae   : > { %v4576_v59 = vpop.eup %3652  ;;  %v2342_v48 = vmul.f32 1.442695, %v2327_v52 }
 0x7af   : > { %v2359_v62 = vsel %vm611_vm2, %v4576_v59, 0.0  ;;  %v4581_v45 = vpop.eup %3654 }
 0x7b0   : > { %2360 = vadd.xlane.f32.xlu2 %v2359_v62  ;;  %3656 = vpow2.f32 %v2342_v48  ;;  %v2356_v16 = vsel %vm611_vm2, %v4581_v45, 0.0 }
 0x7b6   : > { %v4587_v49 = vpop.eup %3656 }
 0x7b7   : > { %v2365_v35 = vsel %vm611_vm2, %v4587_v49, 0.0 }
 0x7b8   : > { %2357 = vadd.xlane.f32.xlu0 %v2356_v16 }
 0x7b9   : > { %2497 = vrot.lane.b32.xlu1 %v3932_v56, %s3768_s27  ;;  %v2340_v56 = vmul.f32 1.442695, %v2326_v37 }
 0x7c0   : > { %2366 = vadd.xlane.f32.xlu0 %v2365_v35 }
 0x7c6   : > { %v1989_v13 = vpop.f32.mrf.mxu0 }
 0x7c7   : > { %v2058_v44 = vpack.c.bf16 %v4484_v54, %v1989_v13  ;;  %v1599_v13 = vadd.f32 %v4449_v17, %v4535_v33 }
 0x7c8   : > { %2518 = vrot.lane.b32.xlu2 %v3936_v61, %s3768_s27 }
 0x7c9   : > { %3414 = vmatmul.msk.bf16.gmra.mxu0 %vm611_vm2, %v2058_v44 }
 0x7ce   : > { %v1991_v2 = vpop.f32.mrf.mxu0 }
 0x7d0   : > { %v2349_v9 = vpop.xlane.xlu2 %2348 }
 0x7d1   : > { %3658 = vrcp.f32 %v2349_v9 }
 0x7d2   : > { %3660 = vpow2.f32 %v2340_v56 }
 0x7d4   : > { %2539 = vrot.lane.b32.xlu0 %v3942_v5, %s3768_s27 }
 0x7d7   : > { %v3659_v10 = vpop.eup %3658 }
 0x7d8   : > { %v2377_v46 = vmul.f32 %v3659_v10, %v4537_v55  ;;  %v2414_v19 = vpop.permute.xlu2 %2413  ;;  %v4605_v18 = vpop.eup %3660  ;;  %v1604_v10 = vadd.f32 %v4459_v47, %v4544_v12 }
 0x7d9   : > { %v2419_v54 = vsel %vm900_vm3, %v2414_v19, 0  ;;  %3415 = vmatmul.msk.bf16.gmra.mxu0 %vm611_vm2, %v2059_v15  ;;  %v2362_v5 = vsel %vm611_vm2, %v4605_v18, 0.0  ;;  %v605_v19 = vld [vmem:[%s4305_s25 + $0xc] sm:$0xf]  ;;  %s2856_s25 = scalar_lea.vmem %s5051_s9, %s3740_s29 }
 0x7da   : > { %v2385_v61 = vpack.c.bf16 %v2377_v46, %v2377_v46  ;;  %2428 = vmatpush.bf16.msra.mxu1 %v2419_v54 }
 0x7dd   : > { %3425 = vmatmul.msk.bf16.vlgmr.msra.gmra.mxu1 %vm611_vm2, %v2385_v61  ;;  %v2577_v61 = vsel %vm900_vm3, %v605_v19, 0  ;;  %v1601_v19 = vadd.f32 %v4455_v4, %v4541_v1  ;;  %v3769_v4 = vmov 32.0  }
 0x7de   : > { %2586 = vmatpush.bf16.msrb.mxu0 %v2577_v61 }
 0x7e3   : > { %2363 = vadd.xlane.f32.xlu1 %v2362_v5 }
 0x7ed   : > { %v2346_v55 = vpop.xlane.xlu0 %2345 }
 0x7ee   : > { %3662 = vrcp.f32 %v2346_v55 }
 0x7f4   : > { %v3663_v42 = vpop.eup %3662 }
 0x7f5   : > { %v2376_v20 = vmul.f32 %v3663_v42, %v4552_v51 }
 0x7f7   : > { %v2384_v36 = vpack.c.bf16 %v2376_v20, %v2376_v20 }
 0x7f9   : > { %3424 = vmatmul.msk.bf16.vlgmr.msra.gmra.mxu3 %vm611_vm2, %v2384_v36 }
 0x7fd   : > { %v2355_v63 = vpop.xlane.xlu1 %2354 }
 0x7fe   : > { %3664 = vrcp.f32 %v2355_v63 }
 0x7ff   : > { %v2084_v15 = vpop.f32.mrf.mxu0 }
 0x800   : > { %v4613_v3 = vadd.f32 %v2084_v15, %v1589_v14  ;;  %v2435_v21 = vpop.permute.xlu0 %2434 }
 0x801   : > { %v2440_v40 = vsel %vm900_vm3, %v2435_v21, 0 }
 0x802   : > { %2449 = vmatpush.bf16.msrb.mxu2 %v2440_v40 }
 0x804   : > { %v3665_v24 = vpop.eup %3664 }
 0x805   : > { %v2379_v25 = vmul.f32 %v3665_v24, %v4559_v7 }
 0x807   : > { %v2387_v57 = vpack.c.bf16 %v2379_v25, %v2379_v25  ;;  %v4617_v51 = vpop.f32.mrf.mxu0 }
 0x809   : > { %3427 = vmatmul.msk.bf16.vlgmr.msrb.gmra.mxu3 %vm611_vm2, %v2387_v57 }
 0x80f   : > { %v2089_v43 = vpop.f32.mrf.mxu0 }
 0x810   : > { %v4622_v53 = vadd.f32 %v2089_v43, %v1594_v23 }
 0x813   : > { %v2352_v26 = vpop.xlane.xlu1 %2351 }
 0x814   : > { %3666 = vrcp.f32 %v2352_v26 }
 0x817   : > { %v4632_v16 = vpop.f32.mrf.mxu0 }
 0x81a   : > { %v3667_v30 = vpop.eup %3666 }
 0x81b   : > { %v2378_v32 = vmul.f32 %v3667_v30, %v4570_v27 }
 0x81d   : > { %v2386_v50 = vpack.c.bf16 %v2378_v32, %v2378_v32 }
 0x81f   : > { %3426 = vmatmul.msk.bf16.vlgmr.msrb.gmra.mxu2 %vm611_vm2, %v2386_v50 }
 0x823   : > { %v2361_v7 = vpop.xlane.xlu2 %2360 }
 0x824   : > { %3668 = vrcp.f32 %v2361_v7  ;;  %v4661_v7 = vld [vmem:[%s2616_s20] ss:$0 sm:$0xff] }
 0x82a   : > { %v3669_v41 = vpop.eup %3668 }
 0x82b   : > { %v2381_v58 = vmul.f32 %v3669_v41, %v4576_v59  ;;  %v2498_v28 = vpop.permute.xlu1 %2497  ;;  %v2519_v60 = vpop.permute.xlu2 %2518 }
 0x82c   : > { %v2503_v29 = vsel %vm900_vm3, %v2498_v28, 0  ;;  %v2524_v39 = vsel %vm900_vm3, %v2519_v60, 0  ;;  %v2358_v0 = vpop.xlane.xlu0 %2357  ;;  %v1591_v60 = vadd.f32 %v4435_v31, %v4526_v6 }
 0x82d   : > { %v2389_v52 = vpack.c.bf16 %v2381_v58, %v2381_v58  ;;  %3670 = vrcp.f32 %v2358_v0  ;;  %2512 = vmatpush.bf16.msrb.mxu1 %v2503_v29  ;;  %2533 = vmatpush.bf16.msra.mxu2 %v2524_v39  ;;  %v3710_v29 = vld [vmem:[#allocation2] sm:$0xff] }
 0x82e   : > { %v2105_v0 = vadd.f32 %v4617_v51, %v1591_v60 }
 0x830   : > { %3429 = vmatmul.msk.bf16.vlgmr.msrb.gmra.mxu1 %vm611_vm2, %v2389_v52 }
 0x833   : > { %v3671_v27 = vpop.eup %3670 }
 0x834   : > { %v2380_v62 = vmul.f32 %v3671_v27, %v4581_v45  ;;  %v2367_v59 = vpop.xlane.xlu0 %2366 }
 0x835   : > { %3672 = vrcp.f32 %v2367_v59  ;;  %v3711_v59 = vld [vmem:[#allocation2 + $0x8] sm:$0xff] }
 0x836   : > { %v2388_v48 = vpack.c.bf16 %v2380_v62, %v2380_v62 }
 0x838   : > { %3428 = vmatmul.msk.bf16.vlgmr.msra.gmra.mxu0 %vm611_vm2, %v2388_v48 }
 0x83b   : > { %v3673_v35 = vpop.eup %3672 }
 0x83c   : > { %v2383_v44 = vmul.f32 %v3673_v35, %v4587_v49 }
 0x83e   : > { %v2391_v37 = vpack.c.bf16 %v2383_v44, %v2383_v44  ;;  %v3712_v44 = vld [vmem:[#allocation2 + $0x10] sm:$0xff] }
 0x846   : > { %v2094_v38 = vpop.f32.mrf.mxu0  ;;  %v2540_v2 = vpop.permute.xlu0 %2539 }
 0x847   : > { %v4637_v9 = vadd.f32 %v2094_v38, %v1599_v13  ;;  %v2545_v45 = vsel %vm900_vm3, %v2540_v2, 0  ;;  %v1596_v13 = vadd.f32 %v4443_v11, %v4532_v8 }
 0x848   : > { %2554 = vmatpush.bf16.msra.mxu3 %v2545_v45 }
 0x849   : > { %v2107_v2 = vadd.f32 %v4632_v16, %v1596_v13 }
 0x84b   : > { %3431 = vmatmul.msk.bf16.vlgmr.msra.gmra.mxu3 %vm611_vm2, %v2391_v37 }
 0x84e   : > { %v4641_v56 = vpop.f32.mrf.mxu0 }
 0x856   : > { %v2364_v17 = vpop.xlane.xlu1 %2363  ;;  %v2099_v33 = vpop.f32.mrf.mxu0 }
 0x857   : > { %3674 = vrcp.f32 %v2364_v17  ;;  %v4645_v49 = vadd.f32 %v2099_v33, %v1604_v10  ;;  %v3713_v33 = vld [vmem:[#allocation2 + $0x18] sm:$0xff] }
 0x858   : > { %3676 = vrcp.f32 %v3769_v4 }
 0x85a   : > { %v2430_v46 = vpop.f32.mrf.mxu1 }
 0x85d   : > { %v3675_v54 = vpop.eup %3674 }
 0x85e   : > { %v2382_v5 = vmul.f32 %v3675_v54, %v4605_v18  ;;  %v4657_v21 = vpop.f32.mrf.mxu0  ;;  %v3714_v54 = vld [vmem:[#allocation2 + $0x20] sm:$0xff]  ;;  %v3677_v1 = vpop.eup %3676 }
 0x85f   : > { %vm2670_vm4 = vweird.f32 %v3677_v1 }
 0x860   : > { %v2390_v55 = vpack.c.bf16 %v2382_v5, %v2382_v5  ;;  %v2109_v5 = vadd.f32 %v4641_v56, %v1601_v19  ;;  %v2666_v56 = vmul.f32 32.0, %v3677_v1 }
 0x862   : > { %v2432_v42 = vpop.f32.mrf.mxu1  ;;  %3430 = vmatmul.msk.bf16.vlgmr.msra.gmra.mxu2 %vm611_vm2, %v2390_v55 }
 0x87c   : > { %v2409_v20 = vpop.f32.mrf.mxu3 }
 0x87d   : > { %v2560_v47 = vpack.c.bf16 %v2430_v46, %v2409_v20 }
 0x87f   : > { %3432 = vmatmul.msk.bf16.vlgmr.msrb.gmra.mxu0 %vm611_vm2, %v2560_v47  ;;  %v3715_v47 = vld [vmem:[#allocation2 + $0x28] sm:$0xff] }
 0x884   : > { %v2411_v12 = vpop.f32.mrf.mxu3 }
 0x88c   : > { %v2472_v36 = vpop.f32.mrf.mxu3 }
 0x894   : > { %v2474_v63 = vpop.f32.mrf.mxu3 }
 0x8a2   : > { %v2451_v14 = vpop.f32.mrf.mxu2 }
 0x8a3   : > { %v2561_v15 = vpack.c.bf16 %v2472_v36, %v2451_v14 }
 0x8a5   : > { %3433 = vmatmul.msk.bf16.gmra.mxu0 %vm611_vm2, %v2561_v15 }
 0x8aa   : > { %v2453_v18 = vpop.f32.mrf.mxu2 }
 0x8ab   : > { %v2667_v18 = vsub.f32 1.0, %v2666_v56 }
 0x8ad   : > { %v2514_v40 = vpop.f32.mrf.mxu1 }
 0x8b5   : > { %v2493_v24 = vpop.f32.mrf.mxu0  ;;  %v2516_v25 = vpop.f32.mrf.mxu1 }
 0x8b6   : > { %v2562_v57 = vpack.c.bf16 %v2514_v40, %v2493_v24  ;;  %v3716_v40 = vld [vmem:[#allocation2 + $0x30] sm:$0xff] }
 0x8b8   : > { %3434 = vmatmul.msk.bf16.gmra.mxu0 %vm611_vm2, %v2562_v57  ;;  %v2668_v57 = vmul.f32 %v3677_v1, %v2667_v18 }
 0x8bd   : > { %v2495_v23 = vpop.f32.mrf.mxu0 }
 0x8be   : > { %v2669_v23 = vadd.f32 %v3677_v1, %v2668_v57 }
 0x8ce   : > { %v2556_v43 = vpop.f32.mrf.mxu3 }
 0x8d6   : > { %v2558_v26 = vpop.f32.mrf.mxu3 }
 0x8e5   : > { %v2535_v30 = vpop.f32.mrf.mxu2 }
 0x8e6   : > { %v2563_v32 = vpack.c.bf16 %v2556_v43, %v2535_v30  ;;  %v1606_v43 = vadd.f32 %v4463_v22, %v4550_v34 }
 0x8e8   : > { %3435 = vmatmul.msk.bf16.gmra.mxu0 %vm611_vm2, %v2563_v32  ;;  %v2111_v32 = vadd.f32 %v4657_v21, %v1606_v43  ;;  %v3717_v21 = vld [vmem:[#allocation2 + $0x38] sm:$0xff] }
 0x8ed   : > { %v2537_v50 = vpop.f32.mrf.mxu2 }
 0x8fc   : > { %v2588_v41 = vpop.f32.mrf.mxu0 }
 0x8fd   : > { %v2608_v58 = vadd.f32 %v2588_v41, %v4613_v3 }
 0x8ff   : > { %v2621_v28 = vadd.f32 %v4661_v7, %v2608_v58 }
 0x901   : > { %v4667_v39 = vadd.f32 %v3710_v29, %v2621_v28 }
 0x903   : > { %v2641_v52 = vsel %vm550_vm1, %v4667_v39, 0.0 }
 0x904   : > { %2642 = vadd.xlane.f32.xlu2 %v2641_v52  ;;  %v2590_v27 = vpop.f32.mrf.mxu0 }
 0x905   : > { %v2609_v62 = vadd.f32 %v2590_v27, %v2105_v0 }
 0x907   : > { %v2622_v48 = vadd.f32 %v4661_v7, %v2609_v62 }
 0x909   : > { %v4673_v3 = vadd.f32 %v3711_v59, %v2622_v48 }
 0x90b   : > { %v2644_v35 = vsel %vm550_vm1, %v4673_v3, 0.0 }
 0x90c   : > { %2645 = vadd.xlane.f32.xlu0 %v2644_v35 }
 0x922   : > { %v2593_v31 = vpop.f32.mrf.mxu0 }
 0x923   : > { %v2610_v6 = vadd.f32 %v2593_v31, %v4622_v53 }
 0x925   : > { %v2623_v51 = vadd.f32 %v4661_v7, %v2610_v6 }
 0x927   : > { %v4681_v38 = vadd.f32 %v3712_v44, %v2623_v51 }
 0x929   : > { %v2647_v45 = vsel %vm550_vm1, %v4681_v38, 0.0 }
 0x92a   : > { %2648 = vadd.xlane.f32.xlu1 %v2647_v45  ;;  %v2595_v37 = vpop.f32.mrf.mxu0 }
 0x92b   : > { %v2611_v10 = vadd.f32 %v2595_v37, %v2107_v2 }
 0x92d   : > { %v2624_v17 = vadd.f32 %v4661_v7, %v2611_v10 }
 0x92f   : > { %v4687_v53 = vadd.f32 %v3713_v33, %v2624_v17 }
 0x931   : > { %v2650_v46 = vsel %vm550_vm1, %v4687_v53, 0.0 }
 0x932   : > { %2651 = vadd.xlane.f32.xlu1 %v2650_v46 }
 0x935   : > { %v2598_v11 = vpop.f32.mrf.mxu0 }
 0x936   : > { %v2612_v8 = vadd.f32 %v2598_v11, %v4637_v9 }
 0x938   : > { %v2625_v16 = vadd.f32 %v4661_v7, %v2612_v8 }
 0x93a   : > { %v4695_v61 = vadd.f32 %v3714_v54, %v2625_v16 }
 0x93c   : > { %v2653_v55 = vsel %vm550_vm1, %v4695_v61, 0.0 }
 0x93d   : > { %2654 = vadd.xlane.f32.xlu1 %v2653_v55  ;;  %v2600_v42 = vpop.f32.mrf.mxu0  ;;  %v3480_v55 = vld [vmem:[%s2851_s19 + $0x8] sm:$0xff] }
 0x93e   : > { %v2613_v20 = vadd.f32 %v2600_v42, %v2109_v5  ;;  %2891 = vmatpush.bf16.msra.mxu1 %v3480_v55 }
 0x940   : > { %v2626_v9 = vadd.f32 %v4661_v7, %v2613_v20 }
 0x942   : > { %v2634_v12 = vadd.f32 %v3715_v47, %v2626_v9  ;;  %v3479_v9 = vld [vmem:[%s2851_s19] sm:$0xff] }
 0x943   : > { %2892 = vmatpush.bf16.msra.mxu1 %v3479_v9 }
 0x944   : > { %v2656_v36 = vsel %vm550_vm1, %v2634_v12, 0.0 }
 0x945   : > { %2657 = vadd.xlane.f32.xlu1 %v2656_v36 }
 0x965   : > { %v2603_v63 = vpop.f32.mrf.mxu0 }
 0x966   : > { %v2614_v14 = vadd.f32 %v2603_v63, %v4645_v49  ;;  %v4713_v49 = vsel %vm2670_vm4, %v3677_v1, %v2669_v23 }
 0x968   : > { %v2627_v15 = vadd.f32 %v4661_v7, %v2614_v14 }
 0x96a   : > { %v2635_v24 = vadd.f32 %v3716_v40, %v2627_v15 }
 0x96c   : > { %v2659_v25 = vsel %vm550_vm1, %v2635_v24, 0.0 }
 0x96d   : > { %2660 = vadd.xlane.f32.xlu0 %v2659_v25  ;;  %v2605_v26 = vpop.f32.mrf.mxu0 }
 0x96e   : > { %v2615_v41 = vadd.f32 %v2605_v26, %v2111_v32 }
 0x970   : > { %v2628_v60 = vadd.f32 %v4661_v7, %v2615_v41  ;;  %v4784_v41 = vld [vmem:[%s2637_s23] ss:$0 sm:$0xff]  ;;  %s2937_s23 = scalar_lea.vmem %s5053_s11, %s3740_s29 }
 0x972   : > { %v2636_v52 = vadd.f32 %v3717_v21, %v2628_v60 }
 0x974   : > { %v2662_v27 = vsel %vm550_vm1, %v2636_v52, 0.0 }
 0x977   : > { %v2643_v30 = vpop.xlane.xlu2 %2642 }
 0x978   : > { %v2672_v50 = vmul.f32 %v4713_v49, %v2643_v30 }
 0x97a   : > { %v4720_v58 = vsub.f32 %v4667_v39, %v2672_v50 }
 0x97c   : > { %v2688_v28 = vmul.f32 %v4720_v58, %v4720_v58 }
 0x97e   : > { %v2696_v29 = vsel %vm550_vm1, %v2688_v28, 0.0 }
 0x97f   : > { %2697 = vadd.xlane.f32.xlu2 %v2696_v29  ;;  %v2646_v0 = vpop.xlane.xlu0 %2645 }
 0x980   : > { %v2673_v22 = vmul.f32 %v4713_v49, %v2646_v0  ;;  %v4792_v0 = vld [vmem:[%s2639_s26] ss:$0 sm:$0xff]  ;;  %s3481_s26 = sshll.u32 %s3740_s29, 5 }
 0x981   : > { %s2928_s19 = scalar_lea.vmem %s5052_s10, %s3481_s26  ;;  %s3016_s26 = scalar_lea.vmem %s5054_s12, %s3740_s29 }
 0x982   : > { %v4728_v34 = vsub.f32 %v4673_v3, %v2673_v22 }
 0x984   : > { %v2689_v39 = vmul.f32 %v4728_v34, %v4728_v34 }
 0x986   : > { %v2699_v62 = vsel %vm550_vm1, %v2689_v39, 0.0 }
 0x987   : > { %2663 = vadd.xlane.f32.xlu2 %v2662_v27  ;;  %2700 = vadd.xlane.f32.xlu1 %v2699_v62 }
 0x99d   : > { %v2649_v7 = vpop.xlane.xlu1 %2648 }
 0x99e   : > { %v2674_v48 = vmul.f32 %v4713_v49, %v2649_v7 }
 0x9a0   : > { %v4736_v59 = vsub.f32 %v4681_v38, %v2674_v48 }
 0x9a2   : > { %v2690_v3 = vmul.f32 %v4736_v59, %v4736_v59 }
 0x9a4   : > { %v2702_v35 = vsel %vm550_vm1, %v2690_v3, 0.0 }
 0x9a5   : > { %v2652_v31 = vpop.xlane.xlu1 %2651  ;;  %2703 = vadd.xlane.f32.xlu1 %v2702_v35 }
 0x9a6   : > { %v2675_v6 = vmul.f32 %v4713_v49, %v2652_v31 }
 0x9a8   : > { %v4743_v51 = vsub.f32 %v4687_v53, %v2675_v6 }
 0x9aa   : > { %v2691_v13 = vmul.f32 %v4743_v51, %v4743_v51 }
 0x9ac   : > { %v2705_v44 = vsel %vm550_vm1, %v2691_v13, 0.0 }
 0x9ad   : > { %2706 = vadd.xlane.f32.xlu0 %v2705_v44 }
 0x9b0   : > { %v2655_v38 = vpop.xlane.xlu1 %2654 }
 0x9b1   : > { %v2676_v2 = vmul.f32 %v4713_v49, %v2655_v38 }
 0x9b3   : > { %v4750_v45 = vsub.f32 %v4695_v61, %v2676_v2 }
 0x9b5   : > { %v2692_v37 = vmul.f32 %v4750_v45, %v4750_v45 }
 0x9b7   : > { %v2708_v10 = vsel %vm550_vm1, %v2692_v37, 0.0 }
 0x9b8   : > { %v2658_v17 = vpop.xlane.xlu1 %2657  ;;  %2709 = vadd.xlane.f32.xlu2 %v2708_v10 }
 0x9b9   : > { %v2677_v33 = vmul.f32 %v4713_v49, %v2658_v17 }
 0x9bb   : > { %v4756_v53 = vsub.f32 %v2634_v12, %v2677_v33 }
 0x9bd   : > { %v2693_v46 = vmul.f32 %v4756_v53, %v4756_v53 }
 0x9bf   : > { %v2711_v11 = vsel %vm550_vm1, %v2693_v46, 0.0 }
 0x9c0   : > { %2712 = vadd.xlane.f32.xlu1 %v2711_v11 }
 0x9e0   : > { %v2661_v8 = vpop.xlane.xlu0 %2660 }
 0x9e1   : > { %v2678_v16 = vmul.f32 %v4713_v49, %v2661_v8 }
 0x9e3   : > { %v4762_v19 = vsub.f32 %v2635_v24, %v2678_v16 }
 0x9e5   : > { %v2694_v54 = vmul.f32 %v4762_v19, %v4762_v19 }
 0x9e7   : > { %v2714_v61 = vsel %vm550_vm1, %v2694_v54, 0.0 }
 0x9e8   : > { %2715 = vadd.xlane.f32.xlu0 %v2714_v61 }
 0x9f2   : > { %v2698_v5 = vpop.xlane.xlu2 %2697 }
 0x9f3   : > { %v2720_v42 = vmul.f32 %v2698_v5, %v4713_v49 }
 0x9f5   : > { %v2728_v20 = vadd.f32 1e-05, %v2720_v42 }
 0x9f7   : > { %3678 = vrsqrt.f32 %v2728_v20  ;;  %vm2742_vm6 = vweird.f32 %v2728_v20 }
 0x9fa   : > { %v2664_v47 = vpop.xlane.xlu2 %2663  ;;  %v2701_v12 = vpop.xlane.xlu1 %2700 }
 0x9fb   : > { %v2679_v36 = vmul.f32 %v4713_v49, %v2664_v47  ;;  %v2721_v4 = vmul.f32 %v2701_v12, %v4713_v49 }
 0x9fd   : > { %v3679_v1 = vpop.eup %3678  ;;  %v4774_v63 = vsub.f32 %v2636_v52, %v2679_v36  ;;  %v2729_v56 = vadd.f32 1e-05, %v2721_v4 }
 0x9fe   : > { %v2737_v14 = vmul.f32 %v3679_v1, %v2728_v20  ;;  %vm2743_vm5 = vweird.f32 %v3679_v1 }
 0x9ff   : > { %3680 = vrsqrt.f32 %v2729_v56  ;;  %v2695_v15 = vmul.f32 %v4774_v63, %v4774_v63  ;;  %vm2744_vm7 = vmor %vm2742_vm6, %vm2743_vm5  ;;  %vm2752_vm9 = vweird.f32 %v2729_v56 }
 0xa00   : > { %v2738_v18 = vmul.f32 %v3679_v1, %v2737_v14 }
 0xa01   : > { %v2717_v40 = vsel %vm550_vm1, %v2695_v15, 0.0 }
 0xa02   : > { %v2739_v24 = vmul.f32 0.5, %v2738_v18  ;;  %2718 = vadd.xlane.f32.xlu2 %v2717_v40 }
 0xa04   : > { %v2740_v25 = vsub.f32 1.5, %v2739_v24 }
 0xa05   : > { %v3681_v57 = vpop.eup %3680 }
 0xa06   : > { %v2741_v23 = vmul.f32 %v3679_v1, %v2740_v25  ;;  %v2747_v43 = vmul.f32 %v3681_v57, %v2729_v56  ;;  %vm2753_vm8 = vweird.f32 %v3681_v57 }
 0xa07   : > { %vm2754_vm10 = vmor %vm2752_vm9, %vm2753_vm8 }
 0xa08   : > { %v2748_v26 = vmul.f32 %v3681_v57, %v2747_v43  ;;  %v2745_v30 = vsel %vm2744_vm7, %v3679_v1, %v2741_v23 }
 0xa09   : > { %v2816_v28 = vmul.f32 %v2745_v30, %v4720_v58 }
 0xa0a   : > { %v2749_v32 = vmul.f32 0.5, %v2748_v26 }
 0xa0b   : > { %v2827_v22 = vmul.f32 %v4784_v41, %v2816_v28 }
 0xa0c   : > { %v2750_v50 = vsub.f32 1.5, %v2749_v32 }
 0xa0d   : > { %v4802_v58 = vadd.f32 %v4792_v0, %v2827_v22 }
 0xa0e   : > { %v2751_v60 = vmul.f32 %v3681_v57, %v2750_v50 }
 0xa10   : > { %v2755_v29 = vsel %vm2754_vm10, %v3681_v57, %v2751_v60 }
 0xa11   : > { %v2817_v21 = vmul.f32 %v2755_v29, %v4728_v34 }
 0xa13   : > { %v2828_v52 = vmul.f32 %v4784_v41, %v2817_v21 }
 0xa15   : > { %v4805_v39 = vadd.f32 %v4792_v0, %v2828_v52 }
 0xa17   : > { %v2846_v27 = vpack.c.bf16 %v4805_v39, %v4802_v58 }
 0xa18   : > { %v2704_v62 = vpop.xlane.xlu1 %2703 }
 0xa19   : > { %v2722_v7 = vmul.f32 %v2704_v62, %v4713_v49  ;;  %3445 = vmatmul.msk.bf16.vlgmr.msra.gmra.mxu1 %vm550_vm1, %v2846_v27 }
 0xa1b   : > { %v2730_v34 = vadd.f32 1e-05, %v2722_v7 }
 0xa1d   : > { %3682 = vrsqrt.f32 %v2730_v34  ;;  %vm2762_vm12 = vweird.f32 %v2730_v34 }
 0xa20   : > { %v2707_v48 = vpop.xlane.xlu0 %2706 }
 0xa21   : > { %v2723_v3 = vmul.f32 %v2707_v48, %v4713_v49 }
 0xa23   : > { %v3683_v35 = vpop.eup %3682  ;;  %v2731_v31 = vadd.f32 1e-05, %v2723_v3 }
 0xa24   : > { %v2757_v6 = vmul.f32 %v3683_v35, %v2730_v34  ;;  %vm2763_vm11 = vweird.f32 %v3683_v35 }
 0xa25   : > { %3684 = vrsqrt.f32 %v2731_v31  ;;  %vm2764_vm13 = vmor %vm2762_vm12, %vm2763_vm11  ;;  %vm2772_vm15 = vweird.f32 %v2731_v31 }
 0xa26   : > { %v2758_v13 = vmul.f32 %v3683_v35, %v2757_v6 }
 0xa28   : > { %v2759_v44 = vmul.f32 0.5, %v2758_v13  ;;  %v3484_v13 = vld [vmem:[%s2928_s19 + $0x10] sm:$0xff] }
 0xa2a   : > { %v2760_v38 = vsub.f32 1.5, %v2759_v44 }
 0xa2b   : > { %v3685_v2 = vpop.eup %3684  ;;  %v2710_v37 = vpop.xlane.xlu2 %2709 }
 0xa2c   : > { %v2761_v10 = vmul.f32 %v3683_v35, %v2760_v38  ;;  %v2767_v17 = vmul.f32 %v3685_v2, %v2731_v31  ;;  %v2724_v33 = vmul.f32 %v2710_v37, %v4713_v49  ;;  %vm2773_vm14 = vweird.f32 %v3685_v2  ;;  %v3483_v38 = vld [vmem:[%s2928_s19 + $0x8] sm:$0xff] }
 0xa2d   : > { %vm2774_vm0 = vmor %vm2772_vm15, %vm2773_vm14  ;;  %vm2966_vm14 = vcmask 523264  }
 0xa2e   : > { %v2768_v46 = vmul.f32 %v3685_v2, %v2767_v17  ;;  %v2732_v11 = vadd.f32 1e-05, %v2724_v33  ;;  %v2765_v8 = vsel %vm2764_vm13, %v3683_v35, %v2761_v10  ;;  %v3485_v35 = vld [vmem:[%s2928_s19 + $0x18] sm:$0xff]  ;;  %v3482_v17 = vld [vmem:[%s2928_s19] sm:$0xff]  ;;  %s3018_s19 = scalar_lea.vmem %s5055_s13, %s3740_s29 }
 0xa2f   : > { %v2818_v61 = vmul.f32 %v2765_v8, %v4736_v59  ;;  %2983 = vmatpush.bf16.msrb.mxu2 %v3485_v35 }
 0xa30   : > { %v2769_v16 = vmul.f32 0.5, %v2768_v46  ;;  %3686 = vrsqrt.f32 %v2732_v11  ;;  %vm2782_vm3 = vweird.f32 %v2732_v11 }
 0xa31   : > { %v2829_v4 = vmul.f32 %v4784_v41, %v2818_v61 }
 0xa32   : > { %v2770_v54 = vsub.f32 1.5, %v2769_v16 }
 0xa33   : > { %v2713_v5 = vpop.xlane.xlu1 %2712  ;;  %v4819_v59 = vadd.f32 %v4792_v0, %v2829_v4  ;;  %2984 = vmatpush.bf16.msrb.mxu2 %v3484_v13 }
 0xa34   : > { %v2771_v55 = vmul.f32 %v3685_v2, %v2770_v54  ;;  %v2725_v42 = vmul.f32 %v2713_v5, %v4713_v49 }
 0xa36   : > { %v3687_v20 = vpop.eup %3686  ;;  %v2775_v9 = vsel %vm2774_vm0, %v3685_v2, %v2771_v55  ;;  %v2733_v47 = vadd.f32 1e-05, %v2725_v42 }
 0xa37   : > { %v2819_v12 = vmul.f32 %v2775_v9, %v4743_v51  ;;  %v2777_v36 = vmul.f32 %v3687_v20, %v2732_v11  ;;  %vm2783_vm2 = vweird.f32 %v3687_v20  ;;  %2985 = vmatpush.bf16.msrb.mxu2 %v3483_v38 }
 0xa38   : > { %3688 = vrsqrt.f32 %v2733_v47  ;;  %vm2784_vm4 = vmor %vm2782_vm3, %vm2783_vm2  ;;  %vm2792_vm6 = vweird.f32 %v2733_v47 }
 0xa39   : > { %v2778_v1 = vmul.f32 %v3687_v20, %v2777_v36  ;;  %v2830_v56 = vmul.f32 %v4784_v41, %v2819_v12 }
 0xa3b   : > { %v2779_v14 = vmul.f32 0.5, %v2778_v1  ;;  %v4822_v15 = vadd.f32 %v4792_v0, %v2830_v56  ;;  %2986 = vmatpush.bf16.msrb.mxu2 %v3482_v17 }
 0xa3d   : > { %v2780_v18 = vsub.f32 1.5, %v2779_v14  ;;  %v2847_v40 = vpack.c.bf16 %v4822_v15, %v4819_v59 }
 0xa3e   : > { %v3689_v24 = vpop.eup %3688 }
 0xa3f   : > { %v2781_v51 = vmul.f32 %v3687_v20, %v2780_v18  ;;  %v2787_v25 = vmul.f32 %v3689_v24, %v2733_v47  ;;  %3446 = vmatmul.msk.bf16.gmra.mxu1 %vm550_vm1, %v2847_v40  ;;  %vm2793_vm5 = vweird.f32 %v3689_v24 }
 0xa40   : > { %vm2794_vm7 = vmor %vm2792_vm6, %vm2793_vm5 }
 0xa41   : > { %v2788_v57 = vmul.f32 %v3689_v24, %v2787_v25  ;;  %v2785_v23 = vsel %vm2784_vm4, %v3687_v20, %v2781_v51 }
 0xa42   : > { %v2820_v30 = vmul.f32 %v2785_v23, %v4750_v45 }
 0xa43   : > { %v2789_v43 = vmul.f32 0.5, %v2788_v57 }
 0xa44   : > { %v2831_v60 = vmul.f32 %v4784_v41, %v2820_v30 }
 0xa45   : > { %v2790_v26 = vsub.f32 1.5, %v2789_v43 }
 0xa46   : > { %v4832_v22 = vadd.f32 %v4792_v0, %v2831_v60 }
 0xa47   : > { %v2791_v32 = vmul.f32 %v3689_v24, %v2790_v26 }
 0xa49   : > { %v2795_v50 = vsel %vm2794_vm7, %v3689_v24, %v2791_v32 }
 0xa4a   : > { %v2821_v28 = vmul.f32 %v2795_v50, %v4756_v53 }
 0xa4c   : > { %v2832_v29 = vmul.f32 %v4784_v41, %v2821_v28 }
 0xa4e   : > { %v4835_v21 = vadd.f32 %v4792_v0, %v2832_v29 }
 0xa50   : > { %v2848_v45 = vpack.c.bf16 %v4835_v21, %v4832_v22 }
 0xa52   : > { %3447 = vmatmul.msk.bf16.gmra.mxu1 %vm550_vm1, %v2848_v45 }
 0xa5b   : > { %v2716_v52 = vpop.xlane.xlu0 %2715 }
 0xa5c   : > { %v2726_v27 = vmul.f32 %v2716_v52, %v4713_v49 }
 0xa5e   : > { %v2734_v62 = vadd.f32 1e-05, %v2726_v27 }
 0xa60   : > { %3690 = vrsqrt.f32 %v2734_v62  ;;  %vm2802_vm9 = vweird.f32 %v2734_v62 }
 0xa66   : > { %v3691_v53 = vpop.eup %3690 }
 0xa67   : > { %v2797_v7 = vmul.f32 %v3691_v53, %v2734_v62  ;;  %vm2803_vm8 = vweird.f32 %v3691_v53 }
 0xa68   : > { %vm2804_vm10 = vmor %vm2802_vm9, %vm2803_vm8 }
 0xa69   : > { %v2798_v34 = vmul.f32 %v3691_v53, %v2797_v7 }
 0xa6b   : > { %v2799_v6 = vmul.f32 0.5, %v2798_v34 }
 0xa6d   : > { %v2800_v44 = vsub.f32 1.5, %v2799_v6 }
 0xa6f   : > { %v2801_v37 = vmul.f32 %v3691_v53, %v2800_v44 }
 0xa71   : > { %v2805_v46 = vsel %vm2804_vm10, %v3691_v53, %v2801_v37  ;;  %v3545_v53 = vld [vmem:[%s2937_s23] ss:$0 sm:$0xff] }
 0xa72   : > { %v2822_v16 = vmul.f32 %v2805_v46, %v4762_v19 }
 0xa74   : > { %v2833_v55 = vmul.f32 %v4784_v41, %v2822_v16 }
 0xa75   : > { %v2719_v48 = vpop.xlane.xlu2 %2718 }
 0xa76   : > { %v2727_v3 = vmul.f32 %v2719_v48, %v4713_v49  ;;  %v4851_v20 = vadd.f32 %v4792_v0, %v2833_v55 }
 0xa78   : > { %v2735_v31 = vadd.f32 1e-05, %v2727_v3 }
 0xa7a   : > { %3692 = vrsqrt.f32 %v2735_v31  ;;  %vm2812_vm12 = vweird.f32 %v2735_v31 }
 0xa80   : > { %v3693_v2 = vpop.eup %3692 }
 0xa81   : > { %v2807_v10 = vmul.f32 %v3693_v2, %v2735_v31  ;;  %vm2813_vm11 = vweird.f32 %v3693_v2 }
 0xa82   : > { %vm2814_vm13 = vmor %vm2812_vm12, %vm2813_vm11 }
 0xa83   : > { %v2808_v33 = vmul.f32 %v3693_v2, %v2807_v10 }
 0xa85   : > { %v2809_v11 = vmul.f32 0.5, %v2808_v33 }
 0xa87   : > { %v2810_v8 = vsub.f32 1.5, %v2809_v11 }
 0xa89   : > { %v2811_v54 = vmul.f32 %v3693_v2, %v2810_v8 }
 0xa8b   : > { %v2815_v61 = vsel %vm2814_vm13, %v3693_v2, %v2811_v54 }
 0xa8c   : > { %v2823_v5 = vmul.f32 %v2815_v61, %v4774_v63  ;;  %v3544_v63 = vld [vmem:[%s2856_s25] ss:$0 sm:$0xff] }
 0xa8e   : > { %v2834_v42 = vmul.f32 %v4784_v41, %v2823_v5 }
 0xa90   : > { %v4854_v9 = vadd.f32 %v4792_v0, %v2834_v42 }
 0xa92   : > { %v2849_v19 = vpack.c.bf16 %v4854_v9, %v4851_v20 }
 0xa94   : > { %3448 = vmatmul.msk.bf16.gmra.mxu1 %vm550_vm1, %v2849_v19 }
 0xa96   : > { %v2894_v47 = vpop.f32.mrf.mxu1 }
 0xa97   : > { %v2895_v12 = vadd.f32 %v3544_v63, %v2894_v47 }
 0xa99   : > { %v2914_v0 = vmax.f32 %v2895_v12, 0.0 }
 0xa9e   : > { %v2896_v36 = vpop.f32.mrf.mxu1 }
 0xa9f   : > { %v2897_v41 = vadd.f32 %v3544_v63, %v2896_v36 }
 0xaa1   : > { %v2915_v4 = vmax.f32 %v2897_v41, 0.0 }
 0xaa3   : > { %v2922_v1 = vpack.c.bf16 %v2915_v4, %v2914_v0 }
 0xaa5   : > { %3467 = vmatmul.msk.bf16.vlgmr.msrb.gmra.mxu2 %vm2966_vm14, %v2922_v1 }
 0xabc   : > { %v2899_v56 = vpop.f32.mrf.mxu1 }
 0xabd   : > { %v2900_v14 = vadd.f32 %v3544_v63, %v2899_v56 }
 0xabf   : > { %v2916_v24 = vmax.f32 %v2900_v14, 0.0 }
 0xac4   : > { %v2901_v18 = vpop.f32.mrf.mxu1 }
 0xac5   : > { %v2902_v40 = vadd.f32 %v3544_v63, %v2901_v18 }
 0xac7   : > { %v2917_v51 = vmax.f32 %v2902_v40, 0.0 }
 0xac9   : > { %v2923_v25 = vpack.c.bf16 %v2917_v51, %v2916_v24 }
 0xacb   : > { %3468 = vmatmul.msk.bf16.gmra.mxu2 %vm2966_vm14, %v2923_v25 }
 0xacf   : > { %v2904_v57 = vpop.f32.mrf.mxu1 }
 0xad0   : > { %v2905_v23 = vadd.f32 %v3544_v63, %v2904_v57 }
 0xad2   : > { %v2918_v30 = vmax.f32 %v2905_v23, 0.0 }
 0xad7   : > { %v2906_v43 = vpop.f32.mrf.mxu1 }
 0xad8   : > { %v2907_v26 = vadd.f32 %v3544_v63, %v2906_v43 }
 0xada   : > { %v2919_v32 = vmax.f32 %v2907_v26, 0.0 }
 0xadc   : > { %v2924_v50 = vpack.c.bf16 %v2919_v32, %v2918_v30 }
 0xade   : > { %3469 = vmatmul.msk.bf16.gmra.mxu2 %vm2966_vm14, %v2924_v50 }
 0xb11   : > { %v2909_v28 = vpop.f32.mrf.mxu1 }
 0xb12   : > { %v2910_v60 = vadd.f32 %v3544_v63, %v2909_v28 }
 0xb14   : > { %v2920_v52 = vmax.f32 %v2910_v60, 0.0 }
 0xb19   : > { %v2911_v29 = vpop.f32.mrf.mxu1 }
 0xb1a   : > { %v2912_v45 = vadd.f32 %v3544_v63, %v2911_v29 }
 0xb1c   : > { %v2921_v27 = vmax.f32 %v2912_v45, 0.0 }
 0xb1e   : > { %v2925_v62 = vpack.c.bf16 %v2921_v27, %v2920_v52 }
 0xb20   : > { %3470 = vmatmul.msk.bf16.gmra.mxu2 %vm2966_vm14, %v2925_v62 }
 0xb28   : > { %v2988_v7 = vpop.f32.mrf.mxu2 }
 0xb29   : > { %v2989_v34 = vadd.f32 %v3545_v53, %v2988_v7 }
 0xb2b   : > { %v3008_v48 = vadd.f32 %v2989_v34, %v4802_v58 }
 0xb2d   : > { %v3020_v3 = vsel %vm550_vm1, %v3008_v48, 0.0 }
 0xb2e   : > { %3021 = vadd.xlane.f32.xlu1 %v3020_v3 }
 0xb30   : > { %v2990_v35 = vpop.f32.mrf.mxu2 }
 0xb31   : > { %v2991_v31 = vadd.f32 %v3545_v53, %v2990_v35 }
 0xb33   : > { %v3009_v6 = vadd.f32 %v2991_v31, %v4805_v39 }
 0xb35   : > { %v3023_v13 = vsel %vm550_vm1, %v3009_v6, 0.0 }
 0xb36   : > { %3024 = vadd.xlane.f32.xlu0 %v3023_v13 }
 0xb4e   : > { %v2993_v44 = vpop.f32.mrf.mxu2 }
 0xb4f   : > { %v2994_v38 = vadd.f32 %v3545_v53, %v2993_v44 }
 0xb51   : > { %v3010_v2 = vadd.f32 %v2994_v38, %v4819_v59 }
 0xb53   : > { %v3026_v37 = vsel %vm550_vm1, %v3010_v2, 0.0 }
 0xb54   : > { %3027 = vadd.xlane.f32.xlu2 %v3026_v37 }
 0xb56   : > { %v2995_v58 = vpop.f32.mrf.mxu2 }
 0xb57   : > { %v2996_v10 = vadd.f32 %v3545_v53, %v2995_v58 }
 0xb59   : > { %v3011_v17 = vadd.f32 %v2996_v10, %v4822_v15 }
 0xb5b   : > { %v3029_v33 = vsel %vm550_vm1, %v3011_v17, 0.0 }
 0xb5c   : > { %3030 = vadd.xlane.f32.xlu1 %v3029_v33 }
 0xb61   : > { %v2998_v39 = vpop.f32.mrf.mxu2 }
 0xb62   : > { %v2999_v46 = vadd.f32 %v3545_v53, %v2998_v39 }
 0xb64   : > { %v3012_v11 = vadd.f32 %v2999_v46, %v4832_v22 }
 0xb66   : > { %v3032_v8 = vsel %vm550_vm1, %v3012_v11, 0.0 }
 0xb67   : > { %3033 = vadd.xlane.f32.xlu0 %v3032_v8 }
 0xb69   : > { %v3000_v16 = vpop.f32.mrf.mxu2 }
 0xb6a   : > { %v3001_v59 = vadd.f32 %v3545_v53, %v3000_v16 }
 0xb6c   : > { %v3013_v15 = vadd.f32 %v3001_v59, %v4835_v21 }
 0xb6e   : > { %v3035_v54 = vsel %vm550_vm1, %v3013_v15, 0.0 }
 0xb6f   : > { %3036 = vadd.xlane.f32.xlu2 %v3035_v54  ;;  %v4951_v54 = vld [vmem:[%s3016_s26] ss:$0 sm:$0xff] }
 0xba1   : > { %v3022_v61 = vpop.xlane.xlu1 %3021 }
 0xba2   : > { %v3044_v22 = vmul.f32 %v3022_v61, %v4713_v49 }
 0xba3   : > { %v3003_v5 = vpop.f32.mrf.mxu2 }
 0xba4   : > { %v4893_v55 = vsub.f32 %v3008_v48, %v3044_v22  ;;  %v3004_v42 = vadd.f32 %v3545_v53, %v3003_v5  ;;  %v4958_v5 = vld [vmem:[%s3018_s19] ss:$0 sm:$0xff] }
 0xba6   : > { %v3014_v19 = vadd.f32 %v3004_v42, %v4851_v20  ;;  %v3060_v47 = vmul.f32 %v4893_v55, %v4893_v55 }
 0xba8   : > { %v3068_v63 = vsel %vm550_vm1, %v3060_v47, 0.0  ;;  %v3038_v12 = vsel %vm550_vm1, %v3014_v19, 0.0 }
 0xba9   : > { %3069 = vadd.xlane.f32.xlu2 %v3068_v63  ;;  %3039 = vadd.xlane.f32.xlu1 %v3038_v12  ;;  %v3025_v21 = vpop.xlane.xlu0 %3024 }
 0xbaa   : > { %v3045_v36 = vmul.f32 %v3025_v21, %v4713_v49 }
 0xbab   : > { %v3005_v41 = vpop.f32.mrf.mxu2 }
 0xbac   : > { %v4901_v0 = vsub.f32 %v3009_v6, %v3045_v36  ;;  %v3006_v4 = vadd.f32 %v3545_v53, %v3005_v41 }
 0xbae   : > { %v3015_v1 = vadd.f32 %v3006_v4, %v4854_v9  ;;  %v3061_v20 = vmul.f32 %v4901_v0, %v4901_v0 }
 0xbb0   : > { %v3041_v56 = vsel %vm550_vm1, %v3015_v1, 0.0  ;;  %v3071_v14 = vsel %vm550_vm1, %v3061_v20, 0.0 }
 0xbb1   : > { %3042 = vadd.xlane.f32.xlu0 %v3041_v56  ;;  %3072 = vadd.xlane.f32.xlu1 %v3071_v14 }
 0xbc7   : > { %v3028_v18 = vpop.xlane.xlu2 %3027 }
 0xbc8   : > { %v3046_v40 = vmul.f32 %v3028_v18, %v4713_v49 }
 0xbca   : > { %v4909_v24 = vsub.f32 %v3010_v2, %v3046_v40 }
 0xbcc   : > { %v3062_v51 = vmul.f32 %v4909_v24, %v4909_v24 }
 0xbce   : > { %v3074_v25 = vsel %vm550_vm1, %v3062_v51, 0.0 }
 0xbcf   : > { %v3031_v9 = vpop.xlane.xlu1 %3030  ;;  %3075 = vadd.xlane.f32.xlu0 %v3074_v25 }
 0xbd0   : > { %v3047_v57 = vmul.f32 %v3031_v9, %v4713_v49 }
 0xbd2   : > { %v4915_v23 = vsub.f32 %v3011_v17, %v3047_v57 }
 0xbd4   : > { %v3063_v43 = vmul.f32 %v4915_v23, %v4915_v23 }
 0xbd6   : > { %v3077_v26 = vsel %vm550_vm1, %v3063_v43, 0.0 }
 0xbd7   : > { %3078 = vadd.xlane.f32.xlu2 %v3077_v26 }
 0xbda   : > { %v3034_v30 = vpop.xlane.xlu0 %3033 }
 0xbdb   : > { %v3048_v32 = vmul.f32 %v3034_v30, %v4713_v49 }
 0xbdd   : > { %v4921_v50 = vsub.f32 %v3012_v11, %v3048_v32 }
 0xbdf   : > { %v3064_v28 = vmul.f32 %v4921_v50, %v4921_v50 }
 0xbe1   : > { %v3080_v60 = vsel %vm550_vm1, %v3064_v28, 0.0 }
 0xbe2   : > { %v3037_v29 = vpop.xlane.xlu2 %3036  ;;  %3081 = vadd.xlane.f32.xlu1 %v3080_v60 }
 0xbe3   : > { %v3049_v45 = vmul.f32 %v3037_v29, %v4713_v49 }
 0xbe5   : > { %v4927_v52 = vsub.f32 %v3013_v15, %v3049_v45 }
 0xbe7   : > { %v3065_v27 = vmul.f32 %v4927_v52, %v4927_v52 }
 0xbe9   : > { %v3083_v62 = vsel %vm550_vm1, %v3065_v27, 0.0 }
 0xbea   : > { %3084 = vadd.xlane.f32.xlu0 %v3083_v62 }
 0xc1c   : > { %v3070_v53 = vpop.xlane.xlu2 %3069  ;;  %v3040_v7 = vpop.xlane.xlu1 %3039 }
 0xc1d   : > { %v3092_v34 = vmul.f32 %v3070_v53, %v4713_v49  ;;  %v3050_v48 = vmul.f32 %v3040_v7, %v4713_v49 }
 0xc1f   : > { %v3100_v3 = vadd.f32 1e-05, %v3092_v34  ;;  %v4934_v35 = vsub.f32 %v3014_v19, %v3050_v48 }
 0xc21   : > { %3694 = vrsqrt.f32 %v3100_v3  ;;  %v3066_v31 = vmul.f32 %v4934_v35, %v4934_v35  ;;  %vm3114_vm0 = vweird.f32 %v3100_v3 }
 0xc23   : > { %v3086_v6 = vsel %vm550_vm1, %v3066_v31, 0.0 }
 0xc24   : > { %3087 = vadd.xlane.f32.xlu2 %v3086_v6  ;;  %v3073_v13 = vpop.xlane.xlu1 %3072  ;;  %v3043_v44 = vpop.xlane.xlu0 %3042 }
 0xc25   : > { %v3093_v38 = vmul.f32 %v3073_v13, %v4713_v49  ;;  %v3051_v2 = vmul.f32 %v3043_v44, %v4713_v49 }
 0xc27   : > { %v3695_v37 = vpop.eup %3694  ;;  %v3101_v58 = vadd.f32 1e-05, %v3093_v38  ;;  %v4941_v10 = vsub.f32 %v3015_v1, %v3051_v2 }
 0xc28   : > { %v3109_v17 = vmul.f32 %v3695_v37, %v3100_v3  ;;  %vm3115_vm15 = vweird.f32 %v3695_v37 }
 0xc29   : > { %3696 = vrsqrt.f32 %v3101_v58  ;;  %v3067_v33 = vmul.f32 %v4941_v10, %v4941_v10  ;;  %vm3116_vm2 = vmor %vm3114_vm0, %vm3115_vm15  ;;  %vm3124_vm4 = vweird.f32 %v3101_v58 }
 0xc2a   : > { %v3110_v39 = vmul.f32 %v3695_v37, %v3109_v17 }
 0xc2b   : > { %v3089_v46 = vsel %vm550_vm1, %v3067_v33, 0.0 }
 0xc2c   : > { %v3111_v11 = vmul.f32 0.5, %v3110_v39  ;;  %3090 = vadd.xlane.f32.xlu1 %v3089_v46 }
 0xc2e   : > { %v3112_v8 = vsub.f32 1.5, %v3111_v11 }
 0xc2f   : > { %v3697_v16 = vpop.eup %3696 }
 0xc30   : > { %v3113_v59 = vmul.f32 %v3695_v37, %v3112_v8  ;;  %v3119_v15 = vmul.f32 %v3697_v16, %v3101_v58  ;;  %vm3125_vm3 = vweird.f32 %v3697_v16 }
 0xc31   : > { %vm3126_vm5 = vmor %vm3124_vm4, %vm3125_vm3 }
 0xc32   : > { %v3117_v61 = vsel %vm3116_vm2, %v3695_v37, %v3113_v59  ;;  %v3120_v22 = vmul.f32 %v3697_v16, %v3119_v15 }
 0xc33   : > { %v3188_v42 = vmul.f32 %v3117_v61, %v4893_v55 }
 0xc34   : > { %v3121_v19 = vmul.f32 0.5, %v3120_v22 }
 0xc35   : > { %v3199_v47 = vmul.f32 %v4951_v54, %v3188_v42 }
 0xc36   : > { %v3122_v63 = vsub.f32 1.5, %v3121_v19 }
 0xc37   : > { %v4963_v12 = vadd.f32 %v4958_v5, %v3199_v47 }
 0xc38   : > { %v3123_v21 = vmul.f32 %v3697_v16, %v3122_v63 }
 0xc39   : > { %3218 = vst.msk [vmem:[#allocation2] sm:$0xff] %vm550_vm1, %v4963_v12 }
 0xc3a   : > { %v3127_v36 = vsel %vm3126_vm5, %v3697_v16, %v3123_v21 }
 0xc3b   : > { %v3189_v41 = vmul.f32 %v3127_v36, %v4901_v0 }
 0xc3d   : > { %v3200_v4 = vmul.f32 %v4951_v54, %v3189_v41 }
 0xc3f   : > { %v4970_v55 = vadd.f32 %v4958_v5, %v3200_v4 }
 0xc41   : > { %3219 = vst.msk [vmem:[#allocation2 + $0x8] sm:$0xff] %vm550_vm1, %v4970_v55 }
 0xc42   : > { %v3076_v1 = vpop.xlane.xlu0 %3075 }
 0xc43   : > { %v3094_v20 = vmul.f32 %v3076_v1, %v4713_v49 }
 0xc45   : > { %v3102_v56 = vadd.f32 1e-05, %v3094_v20 }
 0xc47   : > { %3698 = vrsqrt.f32 %v3102_v56  ;;  %vm3134_vm7 = vweird.f32 %v3102_v56 }
 0xc4a   : > { %v3079_v14 = vpop.xlane.xlu2 %3078 }
 0xc4b   : > { %v3095_v18 = vmul.f32 %v3079_v14, %v4713_v49 }
 0xc4d   : > { %v3699_v40 = vpop.eup %3698  ;;  %v3103_v51 = vadd.f32 1e-05, %v3095_v18 }
 0xc4e   : > { %v3129_v25 = vmul.f32 %v3699_v40, %v3102_v56  ;;  %vm3135_vm6 = vweird.f32 %v3699_v40 }
 0xc4f   : > { %3700 = vrsqrt.f32 %v3103_v51  ;;  %vm3136_vm8 = vmor %vm3134_vm7, %vm3135_vm6  ;;  %vm3144_vm10 = vweird.f32 %v3103_v51 }
 0xc50   : > { %v3130_v0 = vmul.f32 %v3699_v40, %v3129_v25 }
 0xc52   : > { %v3131_v9 = vmul.f32 0.5, %v3130_v0 }
 0xc54   : > { %v3132_v57 = vsub.f32 1.5, %v3131_v9 }
 0xc55   : > { %v3701_v43 = vpop.eup %3700  ;;  %v3082_v26 = vpop.xlane.xlu1 %3081 }
 0xc56   : > { %v3133_v30 = vmul.f32 %v3699_v40, %v3132_v57  ;;  %v3139_v32 = vmul.f32 %v3701_v43, %v3103_v51  ;;  %v3096_v28 = vmul.f32 %v3082_v26, %v4713_v49  ;;  %vm3145_vm9 = vweird.f32 %v3701_v43 }
 0xc57   : > { %vm3146_vm11 = vmor %vm3144_vm10, %vm3145_vm9 }
 0xc58   : > { %v3137_v60 = vsel %vm3136_vm8, %v3699_v40, %v3133_v30  ;;  %v3140_v29 = vmul.f32 %v3701_v43, %v3139_v32  ;;  %v3104_v45 = vadd.f32 1e-05, %v3096_v28 }
 0xc59   : > { %v3190_v27 = vmul.f32 %v3137_v60, %v4909_v24 }
 0xc5a   : > { %v3141_v62 = vmul.f32 0.5, %v3140_v29  ;;  %3702 = vrsqrt.f32 %v3104_v45  ;;  %vm3154_vm13 = vweird.f32 %v3104_v45 }
 0xc5b   : > { %v3201_v53 = vmul.f32 %v4951_v54, %v3190_v27 }
 0xc5c   : > { %v3142_v7 = vsub.f32 1.5, %v3141_v62 }
 0xc5d   : > { %v4980_v34 = vadd.f32 %v4958_v5, %v3201_v53  ;;  %v3085_v48 = vpop.xlane.xlu0 %3084 }
 0xc5e   : > { %v3143_v3 = vmul.f32 %v3701_v43, %v3142_v7  ;;  %v3097_v31 = vmul.f32 %v3085_v48, %v4713_v49 }
 0xc5f   : > { %3220 = vst.msk [vmem:[#allocation2 + $0x10] sm:$0xff] %vm550_vm1, %v4980_v34 }
 0xc60   : > { %v3703_v6 = vpop.eup %3702  ;;  %v3147_v24 = vsel %vm3146_vm11, %v3701_v43, %v3143_v3  ;;  %v3105_v13 = vadd.f32 1e-05, %v3097_v31 }
 0xc61   : > { %v3191_v44 = vmul.f32 %v3147_v24, %v4915_v23  ;;  %v3149_v38 = vmul.f32 %v3703_v6, %v3104_v45  ;;  %vm3155_vm12 = vweird.f32 %v3703_v6 }
 0xc62   : > { %3704 = vrsqrt.f32 %v3105_v13  ;;  %vm3156_vm14 = vmor %vm3154_vm13, %vm3155_vm12  ;;  %vm3164_vm0 = vweird.f32 %v3105_v13 }
 0xc63   : > { %v3202_v2 = vmul.f32 %v4951_v54, %v3191_v44  ;;  %v3150_v37 = vmul.f32 %v3703_v6, %v3149_v38 }
 0xc65   : > { %v4988_v58 = vadd.f32 %v4958_v5, %v3202_v2  ;;  %v3151_v17 = vmul.f32 0.5, %v3150_v37 }
 0xc67   : > { %3221 = vst.msk [vmem:[#allocation2 + $0x18] sm:$0xff] %vm550_vm1, %v4988_v58  ;;  %v3152_v33 = vsub.f32 1.5, %v3151_v17 }
 0xc68   : > { %v3705_v39 = vpop.eup %3704 }
 0xc69   : > { %v3153_v46 = vmul.f32 %v3703_v6, %v3152_v33  ;;  %v3159_v11 = vmul.f32 %v3705_v39, %v3105_v13  ;;  %vm3165_vm15 = vweird.f32 %v3705_v39 }
 0xc6a   : > { %vm3166_vm2 = vmor %vm3164_vm0, %vm3165_vm15 }
 0xc6b   : > { %v3157_v23 = vsel %vm3156_vm14, %v3703_v6, %v3153_v46  ;;  %v3160_v8 = vmul.f32 %v3705_v39, %v3159_v11 }
 0xc6c   : > { %v3192_v16 = vmul.f32 %v3157_v23, %v4921_v50 }
 0xc6d   : > { %v3161_v59 = vmul.f32 0.5, %v3160_v8 }
 0xc6e   : > { %v3203_v15 = vmul.f32 %v4951_v54, %v3192_v16 }
 0xc6f   : > { %v3162_v61 = vsub.f32 1.5, %v3161_v59 }
 0xc70   : > { %v3214_v22 = vadd.f32 %v4958_v5, %v3203_v15 }
 0xc71   : > { %v3163_v42 = vmul.f32 %v3705_v39, %v3162_v61 }
 0xc72   : > { %3222 = vst.msk [vmem:[#allocation2 + $0x20] sm:$0xff] %vm550_vm1, %v3214_v22 }
 0xc73   : > { %v3167_v19 = vsel %vm3166_vm2, %v3705_v39, %v3163_v42 }
 0xc74   : > { %v3193_v47 = vmul.f32 %v3167_v19, %v4927_v52 }
 0xc76   : > { %v3204_v63 = vmul.f32 %v4951_v54, %v3193_v47 }
 0xc78   : > { %v3215_v21 = vadd.f32 %v4958_v5, %v3204_v63 }
 0xc7a   : > { %3223 = vst.msk [vmem:[#allocation2 + $0x28] sm:$0xff] %vm550_vm1, %v3215_v21 }
 0xc97   : > { %v3088_v50 = vpop.xlane.xlu2 %3087 }
 0xc98   : > { %v3098_v36 = vmul.f32 %v3088_v50, %v4713_v49 }
 0xc9a   : > { %v3106_v41 = vadd.f32 1e-05, %v3098_v36 }
 0xc9c   : > { %3706 = vrsqrt.f32 %v3106_v41  ;;  %vm3174_vm4 = vweird.f32 %v3106_v41 }
 0xc9f   : > { %v3091_v4 = vpop.xlane.xlu1 %3090 }
 0xca0   : > { %v3099_v1 = vmul.f32 %v3091_v4, %v4713_v49 }
 0xca2   : > { %v3707_v20 = vpop.eup %3706  ;;  %v3107_v56 = vadd.f32 1e-05, %v3099_v1 }
 0xca3   : > { %v3169_v14 = vmul.f32 %v3707_v20, %v3106_v41  ;;  %vm3175_vm3 = vweird.f32 %v3707_v20 }
 0xca4   : > { %3708 = vrsqrt.f32 %v3107_v56  ;;  %vm3176_vm5 = vmor %vm3174_vm4, %vm3175_vm3  ;;  %vm3184_vm7 = vweird.f32 %v3107_v56 }
 0xca5   : > { %v3170_v18 = vmul.f32 %v3707_v20, %v3169_v14 }
 0xca7   : > { %v3171_v52 = vmul.f32 0.5, %v3170_v18 }
 0xca9   : > { %v3172_v40 = vsub.f32 1.5, %v3171_v52 }
 0xcaa   : > { %v3709_v51 = vpop.eup %3708 }
 0xcab   : > { %v3173_v25 = vmul.f32 %v3707_v20, %v3172_v40  ;;  %v3179_v0 = vmul.f32 %v3709_v51, %v3107_v56  ;;  %vm3185_vm6 = vweird.f32 %v3709_v51 }
 0xcac   : > { %vm3186_vm8 = vmor %vm3184_vm7, %vm3185_vm6 }
 0xcad   : > { %v3177_v9 = vsel %vm3176_vm5, %v3707_v20, %v3173_v25  ;;  %v3180_v57 = vmul.f32 %v3709_v51, %v3179_v0 }
 0xcae   : > { %v3194_v43 = vmul.f32 %v3177_v9, %v4934_v35 }
 0xcaf   : > { %v3181_v26 = vmul.f32 0.5, %v3180_v57 }
 0xcb0   : > { %v3205_v49 = vmul.f32 %v4951_v54, %v3194_v43 }
 0xcb1   : > { %v3182_v30 = vsub.f32 1.5, %v3181_v26 }
 0xcb2   : > { %v3216_v32 = vadd.f32 %v4958_v5, %v3205_v49 }
 0xcb3   : > { %v3183_v28 = vmul.f32 %v3709_v51, %v3182_v30 }
 0xcb4   : > { %3224 = vst.msk [vmem:[#allocation2 + $0x30] sm:$0xff] %vm550_vm1, %v3216_v32 }
 0xcb5   : > { %v3187_v60 = vsel %vm3186_vm8, %v3709_v51, %v3183_v28 }
 0xcb6   : > { %v3195_v29 = vmul.f32 %v3187_v60, %v4941_v10 }
 0xcb8   : > { %v3206_v45 = vmul.f32 %v4951_v54, %v3195_v29  ;;  %3229 = sbr.rel (%p3471_p7) target bundleno = 3271 (0xcc7), region = 84 }
 0xcba   : > { %v3217_v27 = vadd.f32 %v4958_v5, %v3206_v45 }
 0xcbc   : > { %3225 = vst.msk [vmem:[#allocation2 + $0x38] sm:$0xff] %vm550_vm1, %v3217_v27 }
 0xcbd   : > { %v3230_v35 = vpack.c.bf16 %v4963_v12, %v4963_v12  ;;  %vm3238_vm9 = vcmask 257024   ;;  %v3231_v10 = vpack.c.bf16 %v4970_v55, %v4970_v55  ;;  %v3232_v54 = vpack.c.bf16 %v4980_v34, %v4980_v34 }
 0xcbe   : > { %v3233_v5 = vpack.c.bf16 %v4988_v58, %v4988_v58  ;;  %v3234_v62 = vpack.c.bf16 %v3214_v22, %v3214_v22  ;;  %v3235_v53 = vpack.c.bf16 %v3215_v21, %v3215_v21  ;;  %v3236_v7 = vpack.c.bf16 %v3216_v32, %v3216_v32 }
 0xcbf   : > { %3239 = vst.msk [vmem:[%s3883_s28] sm:$0xf] %vm3238_vm9, %v3230_v35  ;;  %v3237_v48 = vpack.c.bf16 %v3217_v27, %v3217_v27 }
 0xcc0   : > { %3240 = vst.msk [vmem:[%s3883_s28 + $0x4] sm:$0xf] %vm3238_vm9, %v3231_v10 }
 0xcc1   : > { %3241 = vst.msk [vmem:[%s3883_s28 + $0x8] sm:$0xf] %vm3238_vm9, %v3232_v54 }
 0xcc2   : > { %3242 = vst.msk [vmem:[%s3883_s28 + $0xc] sm:$0xf] %vm3238_vm9, %v3233_v5 }
 0xcc3   : > { %3243 = vst.msk [vmem:[%s3883_s28 + $0x10] sm:$0xf] %vm3238_vm9, %v3234_v62 }
 0xcc4   : > { %3244 = vst.msk [vmem:[%s3883_s28 + $0x14] sm:$0xf] %vm3238_vm9, %v3235_v53 }
 0xcc5   : > { %3245 = vst.msk [vmem:[%s3883_s28 + $0x18] sm:$0xf] %vm3238_vm9, %v3236_v7 }
 0xcc6   : > { %3246 = vst.msk [vmem:[%s3883_s28 + $0x1c] sm:$0xf] %vm3238_vm9, %v3237_v48 }
 0xcc7 PF: > { %s24_s17 = sadd.s32 1, %s3756_s17   ;;  %s5059_s23 = sld [smem:[#allocation3_spill]] }
 0xcc8   : > { %p21_p8 = scmp.ge.s32.totalorder %s24_s17, 6   ;;  %s5060_s24 = sld [smem:[#allocation4_spill]] }
 0xcc9   : > { %s5061_s29 = smov %s3748_s15  ;;  %s5062_s30 = smov %s3752_s16 }
 0xcca   :  { %23 = sbr.rel (!%p21_p8) target bundleno = 3 (0x3), region = 126 }
 0xccd   : > { %s5063_s15 = smov %s5059_s23 }
 0xcce   : > { %s5064_s16 = smov %s5060_s24 }

</bundles_post_ra>
